<compile_context>
chip_gen: v6e
topology: v6e:2x2x1
jax: 0.10.0
libtpu: 0.0.40
codegen_flags: <defaults>
</compile_context>

<pallas_src>
import functools
import math

import numpy as np
import jax
import jax.numpy as jnp
from jax.experimental import pallas as pl
from jax.experimental.pallas import tpu as pltpu

_EPS = 1e-5


# ----------------------------------------------------------------------------
# small helpers
# ----------------------------------------------------------------------------
def _round_up(x, m):
    return ((x + m - 1) // m) * m


@functools.lru_cache(maxsize=None)
def _vmem_capacity_bytes():
    try:
        return int(pltpu.get_tpu_info().vmem_capacity_bytes)
    except Exception:
        return 64 * 1024 * 1024          # conservative (v7x-sized) fallback


def _vmem_limit_bytes():
    # ~40 MiB on a 64 MiB part (v7x), ~80 MiB on 128 MiB parts (v5e/v6e).
    return int(min(0.625 * _vmem_capacity_bytes(), 100 * 1024 * 1024))


@functools.lru_cache(maxsize=None)
def _single_buffer_ok():
    """Probe (outside any jit) whether pipeline_mode=pl.Buffered(1) is supported."""
    try:
        spec = pl.BlockSpec((8, 128), lambda i: (0, 0),
                            pipeline_mode=pl.Buffered(buffer_count=1))

        def _k(x_ref, o_ref):
            o_ref[...] = x_ref[...] + 1.0

        out = pl.pallas_call(
            _k,
            out_shape=jax.ShapeDtypeStruct((8, 128), jnp.float32),
            grid=(2,),
            in_specs=[spec],
            out_specs=pl.BlockSpec((8, 128), lambda i: (0, 0)),
        )(jnp.zeros((8, 128), jnp.float32))
        jax.block_until_ready(out)
        return True
    except Exception:
        return False


def _invariant_spec(block_shape, index_map):
    """BlockSpec for grid-invariant operands (weights/biases): single-buffer when supported."""
    if _single_buffer_ok():
        return pl.BlockSpec(block_shape, index_map,
                            pipeline_mode=pl.Buffered(buffer_count=1))
    return pl.BlockSpec(block_shape, index_map)


# ----------------------------------------------------------------------------
# plain-JAX layout helpers (identical semantics to the torch module)
# ----------------------------------------------------------------------------
def get_window_size(x_size, window_size, shift_size=None):
    use_window_size = list(window_size)
    use_shift_size = list(shift_size) if shift_size is not None else None
    for i in range(len(x_size)):
        if x_size[i] <= window_size[i]:
            use_window_size[i] = x_size[i]
            if shift_size is not None:
                use_shift_size[i] = 0
    if shift_size is None:
        return tuple(use_window_size)
    return tuple(use_window_size), tuple(use_shift_size)


def window_partition(x, window_size):
    b, d, h, w, c = x.shape
    x = x.reshape(b, d // window_size[0], window_size[0],
                  h // window_size[1], window_size[1],
                  w // window_size[2], window_size[2], c)
    return jnp.transpose(x, (0, 1, 3, 5, 2, 4, 6, 7)).reshape(
        -1, window_size[0] * window_size[1] * window_size[2], c)


def window_reverse(windows, window_size, dims):
    b, d, h, w = dims
    x = windows.reshape(b, d // window_size[0], h // window_size[1], w // window_size[2],
                        window_size[0], window_size[1], window_size[2], -1)
    return jnp.transpose(x, (0, 1, 4, 2, 5, 3, 6, 7)).reshape(b, d, h, w, -1)


def compute_mask(dims, window_size, shift_size):
    """Shift mask for shifted windows. NOTE: mirrors the original Swin code; mixed zero /
    non-zero shift_size components would produce the same (degenerate) mask as PyTorch."""
    d, h, w = dims
    img_mask = np.zeros((1, d, h, w, 1), dtype=np.float32)
    cnt = 0
    for ds_ in (slice(0, -window_size[0]), slice(-window_size[0], -shift_size[0]),
                slice(-shift_size[0], None)):
        for hs_ in (slice(0, -window_size[1]), slice(-window_size[1], -shift_size[1]),
                    slice(-shift_size[1], None)):
            for ws_ in (slice(0, -window_size[2]), slice(-window_size[2], -shift_size[2]),
                        slice(-shift_size[2], None)):
                img_mask[:, ds_, hs_, ws_, :] = cnt
                cnt += 1
    mask_windows = window_partition(jnp.asarray(img_mask), window_size)[..., 0]   # (nW, N)
    attn_mask = mask_windows[:, None, :] - mask_windows[:, :, None]
    return jnp.where(attn_mask != 0, -100.0, 0.0).astype(jnp.float32)


def _relative_position_index(window_size):
    ws = window_size
    coords = np.stack(np.meshgrid(np.arange(ws[0]), np.arange(ws[1]), np.arange(ws[2]),
                                  indexing="ij"))
    coords_flatten = coords.reshape(3, -1)
    rel = coords_flatten[:, :, None] - coords_flatten[:, None, :]
    rel = rel.transpose(1, 2, 0).astype(np.int64)
    rel[:, :, 0] += ws[0] - 1
    rel[:, :, 1] += ws[1] - 1
    rel[:, :, 2] += ws[2] - 1
    rel[:, :, 0] *= (2 * ws[1] - 1) * (2 * ws[2] - 1)
    rel[:, :, 1] *= (2 * ws[2] - 1)
    return rel.sum(-1)                              # (N, N)


@functools.lru_cache(maxsize=None)
def _partition_permutations(dims, window_size, shift_size):
    """Fuse cyclic shift + window_partition into ONE flat gather (and its inverse for
    window_reverse + shift-back), removing the roll/partition/reverse HBM round trips."""
    d, h, w = dims
    idx = np.arange(d * h * w, dtype=np.int32).reshape(d, h, w)
    if any(s > 0 for s in shift_size):
        idx = np.roll(idx, shift=(-shift_size[0], -shift_size[1], -shift_size[2]),
                      axis=(0, 1, 2))
    idx = idx.reshape(d // window_size[0], window_size[0],
                      h // window_size[1], window_size[1],
                      w // window_size[2], window_size[2])
    perm = idx.transpose(0, 2, 4, 1, 3, 5).reshape(-1).astype(np.int32)
    inv = np.argsort(perm).astype(np.int32)
    return perm, inv


def _gelu_tanh(x):
    return 0.5 * x * (1.0 + jnp.tanh(0.7978845608028654 * (x + 0.044715 * x * x * x)))


# ----------------------------------------------------------------------------
# Pallas kernel 1: norm1 + fused-QKV window attention + fused proj + first residual
# ----------------------------------------------------------------------------
def _window_attn_kernel(*refs, num_heads, head_dim, scale, eps, has_mask):
    if has_mask:
        (x_ref, mask_ref, bias_ref, g1_ref, be1_ref,
         wqkv_ref, bqkv_ref, wp_ref, bp_ref, o_ref) = refs
    else:
        (x_ref, bias_ref, g1_ref, be1_ref,
         wqkv_ref, bqkv_ref, wp_ref, bp_ref, o_ref) = refs
        mask_ref = None

    x_raw = x_ref[0]                                      # (tw, N, C) compute dtype
    cdt = x_raw.dtype
    xw = x_raw.astype(jnp.float32)
    tw, n_tok, c = xw.shape

    # LayerNorm (norm1), f32 — per-token so it commutes with the shift/partition gather.
    mu = jnp.mean(xw, axis=-1, keepdims=True)
    var = jnp.mean(jnp.square(xw - mu), axis=-1, keepdims=True)
    xn = (xw - mu) * jax.lax.rsqrt(var + eps) * g1_ref[...] + be1_ref[...]

    m_rows = tw * n_tok
    x2 = xn.reshape(m_rows, c).astype(cdt)

    # One lane-dense fused QKV projection: (M, C) @ (C, 3C), f32 accumulation.
    qkv = jnp.dot(x2, wqkv_ref[...], preferred_element_type=jnp.float32) + bqkv_ref[...]

    head_outs = []
    for h in range(num_heads):                            # static unroll over heads
        q = (qkv[:, h * head_dim:(h + 1) * head_dim] * scale).astype(cdt)
        k = qkv[:, c + h * head_dim: c + (h + 1) * head_dim].astype(cdt)
        v = qkv[:, 2 * c + h * head_dim: 2 * c + (h + 1) * head_dim].astype(cdt)
        qw = q.reshape(tw, n_tok, head_dim)
        kw = k.reshape(tw, n_tok, head_dim)
        vw = v.reshape(tw, n_tok, head_dim)

        s = jnp.einsum("wid,wjd->wij", qw, kw, preferred_element_type=jnp.float32)
        s = s + bias_ref[h][None]
        if has_mask:
            s = s + mask_ref[...]
        s = s - jnp.max(s, axis=-1, keepdims=True)
        p = jnp.exp(s)
        p = p * pl.reciprocal(jnp.sum(p, axis=-1, keepdims=True), approx=True)

        oh = jnp.einsum("wij,wjd->wid", p.astype(cdt), vw,
                        preferred_element_type=jnp.float32)
        head_outs.append(oh.reshape(m_rows, head_dim))

    # One (M, C) @ (C, C) output projection (K = C, not head_dim).
    o_cat = jnp.concatenate(head_outs, axis=-1).astype(cdt)
    out = jnp.dot(o_cat, wp_ref[...], preferred_element_type=jnp.float32) + bp_ref[...]
    out = out + xw.reshape(m_rows, c)                     # fused first residual: x + attn
    o_ref[0] = out.reshape(tw, n_tok, c).astype(o_ref.dtype)


def _pick_window_tile(n_win, n_tok, c, itemsize):
    budget = max(4 << 20, _vmem_capacity_bytes() // 8)
    best = 1
    for tw in range(1, n_win + 1):
        if n_win % tw:
            continue
        scores = 3 * tw * n_tok * n_tok * 4               # scores / probs / mask (f32)
        acts = 4 * tw * n_tok * c * itemsize              # x in + out, double-buffered
        qkv = tw * n_tok * 3 * c * 4                      # fused qkv (f32)
        if scores + acts + qkv <= budget:
            best = tw
    return best


def _window_attention_pallas(x_win, mask, rel_bias, kp, *, num_heads,
                             window_tile=None, eps=_EPS):
    b, n_win, n_tok, c = x_win.shape
    hd = c // num_heads
    scale = float(hd) ** -0.5
    has_mask = mask is not None
    itemsize = jnp.dtype(x_win.dtype).itemsize

    if window_tile is None:
        window_tile = _pick_window_tile(n_win, n_tok, c, itemsize)
    tw = max(1, min(int(window_tile), n_win))
    while n_win % tw:
        tw -= 1
    grid = (b, n_win // tw)

    kern = functools.partial(_window_attn_kernel, num_heads=num_heads, head_dim=hd,
                             scale=scale, eps=eps, has_mask=has_mask)

    const2 = lambda i, j: (0, 0)
    const3 = lambda i, j: (0, 0, 0)

    in_specs = [pl.BlockSpec((1, tw, n_tok, c), lambda i, j: (i, j, 0, 0))]
    inputs = [x_win]
    if has_mask:
        in_specs.append(pl.BlockSpec((tw, n_tok, n_tok), lambda i, j: (j, 0, 0)))
        inputs.append(mask.astype(jnp.float32))
    in_specs += [
        _invariant_spec((num_heads, n_tok, n_tok), const3),   # relative-position bias
        _invariant_spec((1, c), const2),                      # norm1 gamma
        _invariant_spec((1, c), const2),                      # norm1 beta
        _invariant_spec((c, 3 * c), const2),                  # fused QKV weight (pre-transposed)
        _invariant_spec((1, 3 * c), const2),                  # fused QKV bias
        _invariant_spec((c, c), const2),                      # proj weight (pre-transposed)
        _invariant_spec((1, c), const2),                      # proj bias
    ]
    inputs += [rel_bias, kp["g1"], kp["be1"], kp["wqkv"], kp["bqkv"],
               kp["wproj"], kp["bproj"]]

    flops = int(2 * b * n_win * n_tok * c * 3 * c
                + 4 * b * n_win * num_heads * n_tok * n_tok * hd
                + 2 * b * n_win * n_tok * c * c)
    transcendentals = int(b * n_win * num_heads * n_tok * n_tok)
    bytes_accessed = int(itemsize * 2 * b * n_win * n_tok * c
                         + 4 * ((n_win * n_tok * n_tok) if has_mask else 0)
                         + 4 * num_heads * n_tok * n_tok
                         + itemsize * 4 * c * c + 4 * 8 * c)

    return pl.pallas_call(
        kern,
        out_shape=jax.ShapeDtypeStruct((b, n_win, n_tok, c), x_win.dtype),
        grid_spec=pltpu.PrefetchScalarGridSpec(
            num_scalar_prefetch=0, grid=grid,
            in_specs=in_specs,
            out_specs=pl.BlockSpec((1, tw, n_tok, c), lambda i, j: (i, j, 0, 0))),
        compiler_params=pltpu.CompilerParams(
            dimension_semantics=("parallel", "parallel"),
            vmem_limit_bytes=_vmem_limit_bytes()),
        cost_estimate=pl.CostEstimate(flops=flops, transcendentals=transcendentals,
                                      bytes_accessed=bytes_accessed),
    )(*inputs)


# ----------------------------------------------------------------------------
# Pallas kernel 2: norm2 + MLP + residual (x1 already contains the first residual)
# ----------------------------------------------------------------------------
def _mlp_kernel(x1_ref, g2_ref, be2_ref, w1_ref, b1_ref, w2_ref, b2_ref, o_ref, *, eps):
    x1 = x1_ref[...]
    cdt = x1.dtype
    x1f = x1.astype(jnp.float32)
    mu = jnp.mean(x1f, axis=-1, keepdims=True)
    var = jnp.mean(jnp.square(x1f - mu), axis=-1, keepdims=True)
    xn = (x1f - mu) * jax.lax.rsqrt(var + eps) * g2_ref[...] + be2_ref[...]
    h = jnp.dot(xn.astype(cdt), w1_ref[...], preferred_element_type=jnp.float32) + b1_ref[...]
    h = _gelu_tanh(h)
    y = jnp.dot(h.astype(cdt), w2_ref[...], preferred_element_type=jnp.float32) + b2_ref[...]
    o_ref[...] = (x1f + y).astype(o_ref.dtype)


def _mlp_residual_pallas(x1_2d, kp, *, tm=None, eps=_EPS):
    n_rows, c = x1_2d.shape
    hidden = kp["w1"].shape[1]
    itemsize = jnp.dtype(x1_2d.dtype).itemsize

    if tm is None:
        tm = 1024 if _vmem_capacity_bytes() >= (96 << 20) else 512
        while tm > 128 and tm * hidden * 4 > (16 << 20):
            tm //= 2
    tm = int(min(int(tm), _round_up(n_rows, 8)))
    tm = max(8, (tm // 8) * 8)
    grid_n = pl.cdiv(n_rows, tm)                    # partial last block handled by Pallas masking

    flops = int(4 * n_rows * c * hidden + 12 * n_rows * c)
    transcendentals = int(n_rows * hidden)
    bytes_accessed = int(itemsize * (2 * n_rows * c + 2 * c * hidden) + 4 * (hidden + 3 * c))

    const2 = lambda i: (0, 0)
    return pl.pallas_call(
        functools.partial(_mlp_kernel, eps=eps),
        out_shape=jax.ShapeDtypeStruct((n_rows, c), x1_2d.dtype),
        grid_spec=pltpu.PrefetchScalarGridSpec(
            num_scalar_prefetch=0, grid=(grid_n,),
            in_specs=[
                pl.BlockSpec((tm, c), lambda i: (i, 0)),       # x1 tile (single activation stream)
                _invariant_spec((1, c), const2),               # norm2 gamma
                _invariant_spec((1, c), const2),               # norm2 beta
                _invariant_spec((c, hidden), const2),          # fc1 weight (pre-transposed)
                _invariant_spec((1, hidden), const2),          # fc1 bias
                _invariant_spec((hidden, c), const2),          # fc2 weight (pre-transposed)
                _invariant_spec((1, c), const2),               # fc2 bias
            ],
            out_specs=pl.BlockSpec((tm, c), lambda i: (i, 0))),
        compiler_params=pltpu.CompilerParams(
            dimension_semantics=("parallel",),
            vmem_limit_bytes=_vmem_limit_bytes()),
        cost_estimate=pl.CostEstimate(flops=flops, transcendentals=transcendentals,
                                      bytes_accessed=bytes_accessed),
    )(x1_2d, kp["g2"], kp["be2"], kp["w1"], kp["b1"], kp["w2"], kp["b2"])


# ----------------------------------------------------------------------------
# parameters (torch layouts) and one-time kernel-layout preparation
# ----------------------------------------------------------------------------
def init_params(key, dim, num_heads, window_size, mlp_ratio=4.0):
    ks = jax.random.split(key, 12)
    hidden = int(dim * mlp_ratio)
    num_rel = (2 * window_size[0] - 1) * (2 * window_size[1] - 1) * (2 * window_size[2] - 1)

    def lin_w(k, out_f, in_f):
        bound = 1.0 / math.sqrt(in_f)
        return jax.random.uniform(k, (out_f, in_f), minval=-bound, maxval=bound,
                                  dtype=jnp.float32)

    return {
        "norm1_g": 1.0 + 0.1 * jax.random.normal(ks[0], (dim,), jnp.float32),
        "norm1_b": 0.05 * jax.random.normal(ks[1], (dim,), jnp.float32),
        "qkv_w": lin_w(ks[2], 3 * dim, dim),
        "qkv_b": 0.05 * jax.random.normal(ks[3], (3 * dim,), jnp.float32),
        "proj_w": lin_w(ks[4], dim, dim),
        "proj_b": 0.05 * jax.random.normal(ks[5], (dim,), jnp.float32),
        "rel_table": 0.02 * jax.random.normal(ks[6], (num_rel, num_heads), jnp.float32),
        "norm2_g": 1.0 + 0.1 * jax.random.normal(ks[7], (dim,), jnp.float32),
        "norm2_b": 0.05 * jax.random.normal(ks[8], (dim,), jnp.float32),
        "fc1_w": lin_w(ks[9], hidden, dim),
        "fc1_b": 0.05 * jax.random.normal(ks[10], (hidden,), jnp.float32),
        "fc2_w": lin_w(ks[11], dim, hidden),
        "fc2_b": jnp.zeros((dim,), jnp.float32),
    }


def prepare_kernel_params(p, dim, num_heads, window_size, compute_dtype=jnp.bfloat16):
    """One-time model-state prep: pre-transpose the matmul weights (no per-call weight.T,
    no per-head splits), pre-gather the relative-position bias, and cast matmul weights to
    the compute dtype (bf16: native MXU dtype, halves HBM/VMEM)."""
    _single_buffer_ok()   # warm the single-buffering capability probe outside any jit trace
    cdt = compute_dtype
    f32 = jnp.float32
    n_full = window_size[0] * window_size[1] * window_size[2]
    idx = _relative_position_index(window_size).reshape(-1)
    rel_bias = jnp.transpose(p["rel_table"][idx].reshape(n_full, n_full, num_heads),
                             (2, 0, 1)).astype(f32)                         # (nH, N, N)
    return {
        "g1": p["norm1_g"][None, :].astype(f32), "be1": p["norm1_b"][None, :].astype(f32),
        "wqkv": p["qkv_w"].T.astype(cdt),                                    # (C, 3C) fused
        "bqkv": p["qkv_b"][None, :].astype(f32),
        "wproj": p["proj_w"].T.astype(cdt),                                  # (C, C)
        "bproj": p["proj_b"][None, :].astype(f32),
        "rel_bias": rel_bias,
        "g2": p["norm2_g"][None, :].astype(f32), "be2": p["norm2_b"][None, :].astype(f32),
        "w1": p["fc1_w"].T.astype(cdt), "b1": p["fc1_b"][None, :].astype(f32),
        "w2": p["fc2_w"].T.astype(cdt), "b2": p["fc2_b"][None, :].astype(f32),
    }


# ----------------------------------------------------------------------------
# SwinTransformerBlock forward (Pallas) and pure-JAX reference
# ----------------------------------------------------------------------------
def swin_block_forward(x, mask_matrix, kp, *, window_size, shift_size, num_heads,
                       window_tile=None, mlp_row_tile=None, eps=_EPS):
    b, d, h, w, c = x.shape
    ws, ss = get_window_size((d, h, w), window_size, shift_size)
    n = ws[0] * ws[1] * ws[2]
    n_win = (d // ws[0]) * (h // ws[1]) * (w // ws[2])
    cdt = kp["wqkv"].dtype

    use_mask = any(i > 0 for i in ss)
    if use_mask and mask_matrix is None:
        raise ValueError("shifted block requires mask_matrix")

    # single gather = cyclic shift + window_partition (and its inverse for the way back)
    perm, inv_perm = _partition_permutations((d, h, w), tuple(ws), tuple(ss))

    x_flat = x.astype(cdt).reshape(b, d * h * w, c)
    x_win = jnp.take(x_flat, perm, axis=1).reshape(b, n_win, n, c)

    rel_bias = kp["rel_bias"][:, :n, :n]
    mask = mask_matrix if use_mask else None

    # kernel 1: x1 (= x + attn(norm1(x))) still in window layout
    x1_win = _window_attention_pallas(x_win, mask, rel_bias, kp, num_heads=num_heads,
                                      window_tile=window_tile, eps=eps)
    x1_flat = jnp.take(x1_win.reshape(b, n_win * n, c), inv_perm, axis=1)   # reverse + unshift

    # kernel 2: x1 + mlp(norm2(x1))
    out2d = _mlp_residual_pallas(x1_flat.reshape(b * d * h * w, c), kp,
                                 tm=mlp_row_tile, eps=eps)
    return out2d.reshape(b, d, h, w, c)


def _layer_norm_ref(x, g, b, eps=_EPS):
    mu = jnp.mean(x, axis=-1, keepdims=True)
    var = jnp.mean(jnp.square(x - mu), axis=-1, keepdims=True)
    return (x - mu) * jax.lax.rsqrt(var + eps) * g + b


def swin_block_reference(x, mask_matrix, p, *, window_size, shift_size, num_heads,
                         compute_dtype=jnp.float32, eps=_EPS):
    """Pure-JAX reference. With compute_dtype=f32 it is a ground-truth (HIGHEST-precision)
    reference of the torch module; with bf16 it mirrors the kernels' bf16-operand /
    f32-accumulation numerics so the comparison can be tight."""
    cdt = compute_dtype
    f32 = jnp.float32
    prec = jax.lax.Precision.HIGHEST if cdt == jnp.float32 else jax.lax.Precision.DEFAULT

    def mm(a, bb):
        return jnp.dot(a.astype(cdt), bb.astype(cdt), preferred_element_type=f32,
                       precision=prec)

    b, d, h, w, c = x.shape
    ws, ss = get_window_size((d, h, w), window_size, shift_size)
    x = x.astype(cdt).astype(f32)
    shortcut = x
    xn = _layer_norm_ref(x, p["norm1_g"], p["norm1_b"], eps)
    if any(i > 0 for i in ss):
        shifted = jnp.roll(xn, shift=(-ss[0], -ss[1], -ss[2]), axis=(1, 2, 3))
        attn_mask = mask_matrix
    else:
        shifted = xn
        attn_mask = None

    xw = window_partition(shifted, ws)
    bnw, n, _ = xw.shape
    hd = c // num_heads
    scale = hd ** -0.5

    qkv = mm(xw, p["qkv_w"].T) + p["qkv_b"]
    qkv = jnp.transpose(qkv.reshape(bnw, n, 3, num_heads, hd), (2, 0, 3, 1, 4))
    q, k, v = qkv[0] * scale, qkv[1], qkv[2]
    attn = jnp.einsum("bhid,bhjd->bhij", q.astype(cdt), k.astype(cdt),
                      preferred_element_type=f32, precision=prec)
    idx = _relative_position_index(window_size)[:n, :n].reshape(-1)
    bias = jnp.transpose(p["rel_table"][idx].reshape(n, n, num_heads), (2, 0, 1))
    attn = attn + bias[None]
    if attn_mask is not None:
        nw = attn_mask.shape[0]
        attn = attn.reshape(bnw // nw, nw, num_heads, n, n) + attn_mask[None, :, None]
        attn = attn.reshape(bnw, num_heads, n, n)
    attn = jax.nn.softmax(attn, axis=-1)
    o = jnp.einsum("bhij,bhjd->bhid", attn.astype(cdt), v.astype(cdt),
                   preferred_element_type=f32, precision=prec)
    o = jnp.transpose(o, (0, 2, 1, 3)).reshape(bnw, n, c)
    o = mm(o, p["proj_w"].T) + p["proj_b"]

    shifted_out = window_reverse(o, ws, (b, d, h, w))
    if any(i > 0 for i in ss):
        attn_out = jnp.roll(shifted_out, shift=(ss[0], ss[1], ss[2]), axis=(1, 2, 3))
    else:
        attn_out = shifted_out

    x1 = shortcut + attn_out
    x1 = x1.astype(cdt).astype(f32)        # mirrors the inter-kernel activation storage dtype
    xn2 = _layer_norm_ref(x1, p["norm2_g"], p["norm2_b"], eps)
    hmid = _gelu_tanh(mm(xn2, p["fc1_w"].T) + p["fc1_b"])
    y = mm(hmid, p["fc2_w"].T) + p["fc2_b"]
    return (x1 + y).astype(cdt)


# ----------------------------------------------------------------------------
if __name__ == "__main__":
    B, C = 2, 32
    D = H = W = 8
    NUM_HEADS = 4
    WINDOW_SIZE = (4, 4, 4)
    COMPUTE_DTYPE = jnp.bfloat16      # bf16 activations/weights, f32 accumulation (review item)

    key = jax.random.PRNGKey(0)
    kx, kparam = jax.random.split(key)
    x = jax.random.normal(kx, (B, D, H, W, C), dtype=jnp.float32)
    params = init_params(kparam, C, NUM_HEADS, WINDOW_SIZE)
    kernel_params = prepare_kernel_params(params, C, NUM_HEADS, WINDOW_SIZE,
                                          compute_dtype=COMPUTE_DTYPE)

    ok = True
    # exercise both the shifted (masked) and non-shifted (mask-free) specializations
    for shift in ((2, 2, 2), (0, 0, 0)):
        ws, ss = get_window_size((D, H, W), WINDOW_SIZE, shift)
        mask_matrix = compute_mask((D, H, W), ws, ss) if any(i > 0 for i in ss) else None

        # small tiles chosen explicitly so the (batch, window) and row grids have >1 step
        fwd = jax.jit(functools.partial(
            swin_block_forward, window_size=WINDOW_SIZE, shift_size=shift,
            num_heads=NUM_HEADS, window_tile=4, mlp_row_tile=256))
        out = jax.block_until_ready(fwd(x, mask_matrix, kernel_params))
        assert out.shape == (B, D, H, W, C), out.shape

        # tight check vs a reference mirroring the kernels' mixed-precision numerics
        ref_mirror = swin_block_reference(x, mask_matrix, params, window_size=WINDOW_SIZE,
                                          shift_size=shift, num_heads=NUM_HEADS,
                                          compute_dtype=COMPUTE_DTYPE)
        ok = ok and bool(jnp.allclose(out.astype(jnp.float32),
                                      ref_mirror.astype(jnp.float32),
                                      atol=2e-2, rtol=2e-2))

        # loose sanity check vs the full-precision f32 module semantics
        ref_f32 = swin_block_reference(x, mask_matrix, params, window_size=WINDOW_SIZE,
                                       shift_size=shift, num_heads=NUM_HEADS,
                                       compute_dtype=jnp.float32)
        ok = ok and bool(jnp.allclose(out.astype(jnp.float32), ref_f32,
                                      atol=0.25, rtol=0.05))

    assert ok, "mismatch vs reference"
    print("KERNEL_OK")
</pallas_src>

<mosaic_0001>
module attributes {stable_mosaic.version = 11 : i64} {
  func.func @_k(%arg0: i32, %arg1: memref<8x128xf32, #tpu.memory_space<vmem>>, %arg2: memref<8x128xf32, #tpu.memory_space<vmem>>) attributes {dimension_semantics = [#tpu.dimension_semantics<arbitrary>], iteration_bounds = array<i64: 2>, scalar_prefetch = 0 : i64, scratch_operands = 0 : i64, tpu.core_type = #tpu.core_type<tc>, window_params = [{pipeline_mode = #tpu.pipeline_mode<synchronous>, transform_indices = @transform_0, window_bounds = array<i64: 8, 128>}, {pipeline_mode = #tpu.pipeline_mode<synchronous>, transform_indices = @transform_1, window_bounds = array<i64: 8, 128>}]} {
    %c0 = arith.constant 0 : index
    %c0_0 = arith.constant 0 : index
    %0 = vector.load %arg1[%c0, %c0_0] : memref<8x128xf32, #tpu.memory_space<vmem>>, vector<8x128xf32>
    %cst = arith.constant 1.000000e+00 : f32
    %1 = vector.broadcast %cst : f32 to vector<8x128xf32>
    %2 = arith.addf %0, %1 : vector<8x128xf32>
    %c0_1 = arith.constant 0 : index
    %c0_2 = arith.constant 0 : index
    %3 = vector.load %arg2[%c0_1, %c0_2] : memref<8x128xf32, #tpu.memory_space<vmem>>, vector<8x128xf32>
    tpu.vector_store %arg2[%c0_1, %c0_2], %2 {strides = array<i32>} : memref<8x128xf32, #tpu.memory_space<vmem>>, vector<8x128xf32>,
    return
  }
  func.func @transform_0(%arg0: i32) -> (i32, i32) {
    %c0_i32 = arith.constant 0 : i32
    %c0_i32_0 = arith.constant 0 : i32
    %c0_i32_1 = arith.constant 0 : i32
    return %c0_i32, %c0_i32_0 : i32, i32
  }
  func.func @transform_1(%arg0: i32) -> (i32, i32) {
    %c0_i32 = arith.constant 0 : i32
    %c0_i32_0 = arith.constant 0 : i32
    %c0_i32_1 = arith.constant 0 : i32
    return %c0_i32, %c0_i32_0 : i32, i32
  }
}

module attributes {stable_mosaic.version = 11 : i64} {
  func.func @_window_attn_kernel(%arg0: i32, %arg1: i32, %arg2: memref<1x4x64x32xbf16, #tpu.memory_space<vmem>>, %arg3: memref<4x64x64xf32, #tpu.memory_space<vmem>>, %arg4: memref<4x64x64xf32, #tpu.memory_space<vmem>>, %arg5: memref<1x32xf32, #tpu.memory_space<vmem>>, %arg6: memref<1x32xf32, #tpu.memory_space<vmem>>, %arg7: memref<32x96xbf16, #tpu.memory_space<vmem>>, %arg8: memref<1x96xf32, #tpu.memory_space<vmem>>, %arg9: memref<32x32xbf16, #tpu.memory_space<vmem>>, %arg10: memref<1x32xf32, #tpu.memory_space<vmem>>, %arg11: memref<1x4x64x32xbf16, #tpu.memory_space<vmem>>) attributes {dimension_semantics = [#tpu.dimension_semantics<parallel>, #tpu.dimension_semantics<parallel>], iteration_bounds = array<i64: 2, 2>, scalar_prefetch = 0 : i64, scratch_operands = 0 : i64, tpu.core_type = #tpu.core_type<tc>, window_params = [{transform_indices = @transform_0, window_bounds = array<i64: 1, 4, 64, 32>}, {transform_indices = @transform_1, window_bounds = array<i64: 4, 64, 64>}, {pipeline_mode = #tpu.pipeline_mode<synchronous>, transform_indices = @transform_2, window_bounds = array<i64: 4, 64, 64>}, {pipeline_mode = #tpu.pipeline_mode<synchronous>, transform_indices = @transform_3, window_bounds = array<i64: 1, 32>}, {pipeline_mode = #tpu.pipeline_mode<synchronous>, transform_indices = @transform_4, window_bounds = array<i64: 1, 32>}, {pipeline_mode = #tpu.pipeline_mode<synchronous>, transform_indices = @transform_5, window_bounds = array<i64: 32, 96>}, {pipeline_mode = #tpu.pipeline_mode<synchronous>, transform_indices = @transform_6, window_bounds = array<i64: 1, 96>}, {pipeline_mode = #tpu.pipeline_mode<synchronous>, transform_indices = @transform_7, window_bounds = array<i64: 32, 32>}, {pipeline_mode = #tpu.pipeline_mode<synchronous>, transform_indices = @transform_8, window_bounds = array<i64: 1, 32>}, {transform_indices = @transform_9, window_bounds = array<i64: 1, 4, 64, 32>}]} {
    %c0 = arith.constant 0 : index
    %c0_0 = arith.constant 0 : index
    %c0_1 = arith.constant 0 : index
    %c0_2 = arith.constant 0 : index
    %0 = vector.load %arg2[%c0, %c0_0, %c0_1, %c0_2] : memref<1x4x64x32xbf16, #tpu.memory_space<vmem>>, vector<1x4x64x32xbf16>
    %1 = vector.shape_cast %0 : vector<1x4x64x32xbf16> to vector<4x64x32xbf16>
    %2 = arith.extf %1 : vector<4x64x32xbf16> to vector<4x64x32xf32>
    %cst = arith.constant dense<0.000000e+00> : vector<4x64xf32>
    %3 = vector.multi_reduction <add>, %2, %cst [2] : vector<4x64x32xf32> to vector<4x64xf32>
    %4 = vector.shape_cast %3 : vector<4x64xf32> to vector<4x64x1xf32>
    %cst_3 = arith.constant 3.200000e+01 : f32
    %5 = vector.broadcast %cst_3 : f32 to vector<4x64x1xf32>
    %6 = arith.divf %4, %5 : vector<4x64x1xf32>
    %7 = vector.broadcast %6 : vector<4x64x1xf32> to vector<4x64x32xf32>
    %8 = arith.subf %2, %7 : vector<4x64x32xf32>
    %9 = arith.mulf %8, %8 : vector<4x64x32xf32>
    %cst_4 = arith.constant dense<0.000000e+00> : vector<4x64xf32>
    %10 = vector.multi_reduction <add>, %9, %cst_4 [2] : vector<4x64x32xf32> to vector<4x64xf32>
    %11 = vector.shape_cast %10 : vector<4x64xf32> to vector<4x64x1xf32>
    %cst_5 = arith.constant 3.200000e+01 : f32
    %12 = vector.broadcast %cst_5 : f32 to vector<4x64x1xf32>
    %13 = arith.divf %11, %12 : vector<4x64x1xf32>
    %14 = vector.broadcast %6 : vector<4x64x1xf32> to vector<4x64x32xf32>
    %15 = arith.subf %2, %14 : vector<4x64x32xf32>
    %cst_6 = arith.constant 9.99999974E-6 : f32
    %16 = vector.broadcast %cst_6 : f32 to vector<4x64x1xf32>
    %17 = arith.addf %13, %16 : vector<4x64x1xf32>
    %18 = math.rsqrt %17 : vector<4x64x1xf32>
    %19 = vector.broadcast %18 : vector<4x64x1xf32> to vector<4x64x32xf32>
    %20 = arith.mulf %15, %19 : vector<4x64x32xf32>
    %c0_7 = arith.constant 0 : index
    %c0_8 = arith.constant 0 : index
    %21 = vector.load %arg5[%c0_7, %c0_8] : memref<1x32xf32, #tpu.memory_space<vmem>>, vector<1x32xf32>
    %22 = vector.shape_cast %21 : vector<1x32xf32> to vector<1x1x32xf32>
    %23 = vector.broadcast %22 : vector<1x1x32xf32> to vector<4x64x32xf32>
    %24 = arith.mulf %20, %23 : vector<4x64x32xf32>
    %c0_9 = arith.constant 0 : index
    %c0_10 = arith.constant 0 : index
    %25 = vector.load %arg6[%c0_9, %c0_10] : memref<1x32xf32, #tpu.memory_space<vmem>>, vector<1x32xf32>
    %26 = vector.shape_cast %25 : vector<1x32xf32> to vector<1x1x32xf32>
    %27 = vector.broadcast %26 : vector<1x1x32xf32> to vector<4x64x32xf32>
    %28 = arith.addf %24, %27 : vector<4x64x32xf32>
    %29 = vector.shape_cast %28 : vector<4x64x32xf32> to vector<256x32xf32>
    %30 = arith.truncf %29 : vector<256x32xf32> to vector<256x32xbf16>
    %c0_11 = arith.constant 0 : index
    %c0_12 = arith.constant 0 : index
    %31 = vector.load %arg7[%c0_11, %c0_12] : memref<32x96xbf16, #tpu.memory_space<vmem>>, vector<32x96xbf16>
    %cst_13 = arith.constant dense<0.000000e+00> : vector<256x96xf32>
    %32 = tpu.matmul %30, %31, %cst_13 {dimension_numbers = #tpu.dot_dimension_numbers<[1], [0], [0], [1], [0, 0, 1, 1], [], []>} : vector<256x32xbf16>, vector<32x96xbf16>, vector<256x96xf32> -> vector<256x96xf32>
    %c0_14 = arith.constant 0 : index
    %c0_15 = arith.constant 0 : index
    %33 = vector.load %arg8[%c0_14, %c0_15] : memref<1x96xf32, #tpu.memory_space<vmem>>, vector<1x96xf32>
    %34 = vector.broadcast %33 : vector<1x96xf32> to vector<256x96xf32>
    %35 = arith.addf %32, %34 : vector<256x96xf32>
    %36 = vector.extract_strided_slice %35 {offsets = [0, 0], sizes = [256, 8], strides = [1, 1]} : vector<256x96xf32> to vector<256x8xf32>
    %cst_16 = arith.constant 0.353553385 : f32
    %37 = vector.broadcast %cst_16 : f32 to vector<256x8xf32>
    %38 = arith.mulf %36, %37 : vector<256x8xf32>
    %39 = arith.truncf %38 : vector<256x8xf32> to vector<256x8xbf16>
    %40 = vector.extract_strided_slice %35 {offsets = [0, 32], sizes = [256, 8], strides = [1, 1]} : vector<256x96xf32> to vector<256x8xf32>
    %41 = arith.truncf %40 : vector<256x8xf32> to vector<256x8xbf16>
    %42 = vector.extract_strided_slice %35 {offsets = [0, 64], sizes = [256, 8], strides = [1, 1]} : vector<256x96xf32> to vector<256x8xf32>
    %43 = arith.truncf %42 : vector<256x8xf32> to vector<256x8xbf16>
    %44 = vector.shape_cast %39 : vector<256x8xbf16> to vector<4x64x8xbf16>
    %45 = vector.shape_cast %41 : vector<256x8xbf16> to vector<4x64x8xbf16>
    %46 = vector.shape_cast %43 : vector<256x8xbf16> to vector<4x64x8xbf16>
    "tpu.trace_start"() <{level = 10 : i32, message = "wid,wjd->wij"}> : () -> ()
    %cst_17 = arith.constant dense<0.000000e+00> : vector<4x64x64xf32>
    %47 = tpu.matmul %44, %45, %cst_17 {dimension_numbers = #tpu.dot_dimension_numbers<[2], [2], [1], [1], [0, 0, 0, 1, 1, 1], [0], [0]>} : vector<4x64x8xbf16>, vector<4x64x8xbf16>, vector<4x64x64xf32> -> vector<4x64x64xf32>
    "tpu.trace_stop"() : () -> ()
    %c0_18 = arith.constant 0 : index
    %c0_19 = arith.constant 0 : index
    %c0_20 = arith.constant 0 : index
    %48 = vector.load %arg4[%c0_18, %c0_19, %c0_20] : memref<4x64x64xf32, #tpu.memory_space<vmem>>, vector<1x64x64xf32>
    %49 = vector.shape_cast %48 : vector<1x64x64xf32> to vector<64x64xf32>
    %50 = vector.shape_cast %49 : vector<64x64xf32> to vector<1x64x64xf32>
    %51 = vector.broadcast %50 : vector<1x64x64xf32> to vector<4x64x64xf32>
    %52 = arith.addf %47, %51 : vector<4x64x64xf32>
    %c0_21 = arith.constant 0 : index
    %c0_22 = arith.constant 0 : index
    %c0_23 = arith.constant 0 : index
    %53 = vector.load %arg3[%c0_21, %c0_22, %c0_23] : memref<4x64x64xf32, #tpu.memory_space<vmem>>, vector<4x64x64xf32>
    %54 = arith.addf %52, %53 : vector<4x64x64xf32>
    %cst_24 = arith.constant dense<0xFF800000> : vector<4x64xf32>
    %55 = vector.multi_reduction <maximumf>, %54, %cst_24 [2] : vector<4x64x64xf32> to vector<4x64xf32>
    %56 = vector.shape_cast %55 : vector<4x64xf32> to vector<4x64x1xf32>
    %57 = vector.broadcast %56 : vector<4x64x1xf32> to vector<4x64x64xf32>
    %58 = arith.subf %54, %57 : vector<4x64x64xf32>
    %59 = math.exp %58 : vector<4x64x64xf32>
    %cst_25 = arith.constant dense<0.000000e+00> : vector<4x64xf32>
    %60 = vector.multi_reduction <add>, %59, %cst_25 [2] : vector<4x64x64xf32> to vector<4x64xf32>
    %61 = vector.shape_cast %60 : vector<4x64xf32> to vector<4x64x1xf32>
    %62 = tpu.reciprocal %61 {approx = true} : vector<4x64x1xf32> -> vector<4x64x1xf32>
    %63 = vector.broadcast %62 : vector<4x64x1xf32> to vector<4x64x64xf32>
    %64 = arith.mulf %59, %63 : vector<4x64x64xf32>
    %65 = arith.truncf %64 : vector<4x64x64xf32> to vector<4x64x64xbf16>
    "tpu.trace_start"() <{level = 10 : i32, message = "wij,wjd->wid"}> : () -> ()
    %cst_26 = arith.constant dense<0.000000e+00> : vector<4x64x8xf32>
    %66 = tpu.matmul %65, %46, %cst_26 {dimension_numbers = #tpu.dot_dimension_numbers<[2], [1], [1], [2], [0, 0, 0, 1, 1, 2], [0], [0]>} : vector<4x64x64xbf16>, vector<4x64x8xbf16>, vector<4x64x8xf32> -> vector<4x64x8xf32>
    "tpu.trace_stop"() : () -> ()
    %67 = vector.shape_cast %66 : vector<4x64x8xf32> to vector<256x8xf32>
    %68 = vector.extract_strided_slice %35 {offsets = [0, 8], sizes = [256, 8], strides = [1, 1]} : vector<256x96xf32> to vector<256x8xf32>
    %cst_27 = arith.constant 0.353553385 : f32
    %69 = vector.broadcast %cst_27 : f32 to vector<256x8xf32>
    %70 = arith.mulf %68, %69 : vector<256x8xf32>
    %71 = arith.truncf %70 : vector<256x8xf32> to vector<256x8xbf16>
    %72 = vector.extract_strided_slice %35 {offsets = [0, 40], sizes = [256, 8], strides = [1, 1]} : vector<256x96xf32> to vector<256x8xf32>
    %73 = arith.truncf %72 : vector<256x8xf32> to vector<256x8xbf16>
    %74 = vector.extract_strided_slice %35 {offsets = [0, 72], sizes = [256, 8], strides = [1, 1]} : vector<256x96xf32> to vector<256x8xf32>
    %75 = arith.truncf %74 : vector<256x8xf32> to vector<256x8xbf16>
    %76 = vector.shape_cast %71 : vector<256x8xbf16> to vector<4x64x8xbf16>
    %77 = vector.shape_cast %73 : vector<256x8xbf16> to vector<4x64x8xbf16>
    %78 = vector.shape_cast %75 : vector<256x8xbf16> to vector<4x64x8xbf16>
    "tpu.trace_start"() <{level = 10 : i32, message = "wid,wjd->wij"}> : () -> ()
    %cst_28 = arith.constant dense<0.000000e+00> : vector<4x64x64xf32>
    %79 = tpu.matmul %76, %77, %cst_28 {dimension_numbers = #tpu.dot_dimension_numbers<[2], [2], [1], [1], [0, 0, 0, 1, 1, 1], [0], [0]>} : vector<4x64x8xbf16>, vector<4x64x8xbf16>, vector<4x64x64xf32> -> vector<4x64x64xf32>
    "tpu.trace_stop"() : () -> ()
    %c1 = arith.constant 1 : index
    %c0_29 = arith.constant 0 : index
    %c0_30 = arith.constant 0 : index
    %80 = vector.load %arg4[%c1, %c0_29, %c0_30] : memref<4x64x64xf32, #tpu.memory_space<vmem>>, vector<1x64x64xf32>
    %81 = vector.shape_cast %80 : vector<1x64x64xf32> to vector<64x64xf32>
    %82 = vector.shape_cast %81 : vector<64x64xf32> to vector<1x64x64xf32>
    %83 = vector.broadcast %82 : vector<1x64x64xf32> to vector<4x64x64xf32>
    %84 = arith.addf %79, %83 : vector<4x64x64xf32>
    %c0_31 = arith.constant 0 : index
    %c0_32 = arith.constant 0 : index
    %c0_33 = arith.constant 0 : index
    %85 = vector.load %arg3[%c0_31, %c0_32, %c0_33] : memref<4x64x64xf32, #tpu.memory_space<vmem>>, vector<4x64x64xf32>
    %86 = arith.addf %84, %85 : vector<4x64x64xf32>
    %cst_34 = arith.constant dense<0xFF800000> : vector<4x64xf32>
    %87 = vector.multi_reduction <maximumf>, %86, %cst_34 [2] : vector<4x64x64xf32> to vector<4x64xf32>
    %88 = vector.shape_cast %87 : vector<4x64xf32> to vector<4x64x1xf32>
    %89 = vector.broadcast %88 : vector<4x64x1xf32> to vector<4x64x64xf32>
    %90 = arith.subf %86, %89 : vector<4x64x64xf32>
    %91 = math.exp %90 : vector<4x64x64xf32>
    %cst_35 = arith.constant dense<0.000000e+00> : vector<4x64xf32>
    %92 = vector.multi_reduction <add>, %91, %cst_35 [2] : vector<4x64x64xf32> to vector<4x64xf32>
    %93 = vector.shape_cast %92 : vector<4x64xf32> to vector<4x64x1xf32>
    %94 = tpu.reciprocal %93 {approx = true} : vector<4x64x1xf32> -> vector<4x64x1xf32>
    %95 = vector.broadcast %94 : vector<4x64x1xf32> to vector<4x64x64xf32>
    %96 = arith.mulf %91, %95 : vector<4x64x64xf32>
    %97 = arith.truncf %96 : vector<4x64x64xf32> to vector<4x64x64xbf16>
    "tpu.trace_start"() <{level = 10 : i32, message = "wij,wjd->wid"}> : () -> ()
    %cst_36 = arith.constant dense<0.000000e+00> : vector<4x64x8xf32>
    %98 = tpu.matmul %97, %78, %cst_36 {dimension_numbers = #tpu.dot_dimension_numbers<[2], [1], [1], [2], [0, 0, 0, 1, 1, 2], [0], [0]>} : vector<4x64x64xbf16>, vector<4x64x8xbf16>, vector<4x64x8xf32> -> vector<4x64x8xf32>
    "tpu.trace_stop"() : () -> ()
    %99 = vector.shape_cast %98 : vector<4x64x8xf32> to vector<256x8xf32>
    %100 = vector.extract_strided_slice %35 {offsets = [0, 16], sizes = [256, 8], strides = [1, 1]} : vector<256x96xf32> to vector<256x8xf32>
    %cst_37 = arith.constant 0.353553385 : f32
    %101 = vector.broadcast %cst_37 : f32 to vector<256x8xf32>
    %102 = arith.mulf %100, %101 : vector<256x8xf32>
    %103 = arith.truncf %102 : vector<256x8xf32> to vector<256x8xbf16>
    %104 = vector.extract_strided_slice %35 {offsets = [0, 48], sizes = [256, 8], strides = [1, 1]} : vector<256x96xf32> to vector<256x8xf32>
    %105 = arith.truncf %104 : vector<256x8xf32> to vector<256x8xbf16>
    %106 = vector.extract_strided_slice %35 {offsets = [0, 80], sizes = [256, 8], strides = [1, 1]} : vector<256x96xf32> to vector<256x8xf32>
    %107 = arith.truncf %106 : vector<256x8xf32> to vector<256x8xbf16>
    %108 = vector.shape_cast %103 : vector<256x8xbf16> to vector<4x64x8xbf16>
    %109 = vector.shape_cast %105 : vector<256x8xbf16> to vector<4x64x8xbf16>
    %110 = vector.shape_cast %107 : vector<256x8xbf16> to vector<4x64x8xbf16>
    "tpu.trace_start"() <{level = 10 : i32, message = "wid,wjd->wij"}> : () -> ()
    %cst_38 = arith.constant dense<0.000000e+00> : vector<4x64x64xf32>
    %111 = tpu.matmul %108, %109, %cst_38 {dimension_numbers = #tpu.dot_dimension_numbers<[2], [2], [1], [1], [0, 0, 0, 1, 1, 1], [0], [0]>} : vector<4x64x8xbf16>, vector<4x64x8xbf16>, vector<4x64x64xf32> -> vector<4x64x64xf32>
    "tpu.trace_stop"() : () -> ()
    %c2 = arith.constant 2 : index
    %c0_39 = arith.constant 0 : index
    %c0_40 = arith.constant 0 : index
    %112 = vector.load %arg4[%c2, %c0_39, %c0_40] : memref<4x64x64xf32, #tpu.memory_space<vmem>>, vector<1x64x64xf32>
    %113 = vector.shape_cast %112 : vector<1x64x64xf32> to vector<64x64xf32>
    %114 = vector.shape_cast %113 : vector<64x64xf32> to vector<1x64x64xf32>
    %115 = vector.broadcast %114 : vector<1x64x64xf32> to vector<4x64x64xf32>
    %116 = arith.addf %111, %115 : vector<4x64x64xf32>
    %c0_41 = arith.constant 0 : index
    %c0_42 = arith.constant 0 : index
    %c0_43 = arith.constant 0 : index
    %117 = vector.load %arg3[%c0_41, %c0_42, %c0_43] : memref<4x64x64xf32, #tpu.memory_space<vmem>>, vector<4x64x64xf32>
    %118 = arith.addf %116, %117 : vector<4x64x64xf32>
    %cst_44 = arith.constant dense<0xFF800000> : vector<4x64xf32>
    %119 = vector.multi_reduction <maximumf>, %118, %cst_44 [2] : vector<4x64x64xf32> to vector<4x64xf32>
    %120 = vector.shape_cast %119 : vector<4x64xf32> to vector<4x64x1xf32>
    %121 = vector.broadcast %120 : vector<4x64x1xf32> to vector<4x64x64xf32>
    %122 = arith.subf %118, %121 : vector<4x64x64xf32>
    %123 = math.exp %122 : vector<4x64x64xf32>
    %cst_45 = arith.constant dense<0.000000e+00> : vector<4x64xf32>
    %124 = vector.multi_reduction <add>, %123, %cst_45 [2] : vector<4x64x64xf32> to vector<4x64xf32>
    %125 = vector.shape_cast %124 : vector<4x64xf32> to vector<4x64x1xf32>
    %126 = tpu.reciprocal %125 {approx = true} : vector<4x64x1xf32> -> vector<4x64x1xf32>
    %127 = vector.broadcast %126 : vector<4x64x1xf32> to vector<4x64x64xf32>
    %128 = arith.mulf %123, %127 : vector<4x64x64xf32>
    %129 = arith.truncf %128 : vector<4x64x64xf32> to vector<4x64x64xbf16>
    "tpu.trace_start"() <{level = 10 : i32, message = "wij,wjd->wid"}> : () -> ()
    %cst_46 = arith.constant dense<0.000000e+00> : vector<4x64x8xf32>
    %130 = tpu.matmul %129, %110, %cst_46 {dimension_numbers = #tpu.dot_dimension_numbers<[2], [1], [1], [2], [0, 0, 0, 1, 1, 2], [0], [0]>} : vector<4x64x64xbf16>, vector<4x64x8xbf16>, vector<4x64x8xf32> -> vector<4x64x8xf32>
    "tpu.trace_stop"() : () -> ()
    %131 = vector.shape_cast %130 : vector<4x64x8xf32> to vector<256x8xf32>
    %132 = vector.extract_strided_slice %35 {offsets = [0, 24], sizes = [256, 8], strides = [1, 1]} : vector<256x96xf32> to vector<256x8xf32>
    %cst_47 = arith.constant 0.353553385 : f32
    %133 = vector.broadcast %cst_47 : f32 to vector<256x8xf32>
    %134 = arith.mulf %132, %133 : vector<256x8xf32>
    %135 = arith.truncf %134 : vector<256x8xf32> to vector<256x8xbf16>
    %136 = vector.extract_strided_slice %35 {offsets = [0, 56], sizes = [256, 8], strides = [1, 1]} : vector<256x96xf32> to vector<256x8xf32>
    %137 = arith.truncf %136 : vector<256x8xf32> to vector<256x8xbf16>
    %138 = vector.extract_strided_slice %35 {offsets = [0, 88], sizes = [256, 8], strides = [1, 1]} : vector<256x96xf32> to vector<256x8xf32>
    %139 = arith.truncf %138 : vector<256x8xf32> to vector<256x8xbf16>
    %140 = vector.shape_cast %135 : vector<256x8xbf16> to vector<4x64x8xbf16>
    %141 = vector.shape_cast %137 : vector<256x8xbf16> to vector<4x64x8xbf16>
    %142 = vector.shape_cast %139 : vector<256x8xbf16> to vector<4x64x8xbf16>
    "tpu.trace_start"() <{level = 10 : i32, message = "wid,wjd->wij"}> : () -> ()
    %cst_48 = arith.constant dense<0.000000e+00> : vector<4x64x64xf32>
    %143 = tpu.matmul %140, %141, %cst_48 {dimension_numbers = #tpu.dot_dimension_numbers<[2], [2], [1], [1], [0, 0, 0, 1, 1, 1], [0], [0]>} : vector<4x64x8xbf16>, vector<4x64x8xbf16>, vector<4x64x64xf32> -> vector<4x64x64xf32>
    "tpu.trace_stop"() : () -> ()
    %c3 = arith.constant 3 : index
    %c0_49 = arith.constant 0 : index
    %c0_50 = arith.constant 0 : index
    %144 = vector.load %arg4[%c3, %c0_49, %c0_50] : memref<4x64x64xf32, #tpu.memory_space<vmem>>, vector<1x64x64xf32>
    %145 = vector.shape_cast %144 : vector<1x64x64xf32> to vector<64x64xf32>
    %146 = vector.shape_cast %145 : vector<64x64xf32> to vector<1x64x64xf32>
    %147 = vector.broadcast %146 : vector<1x64x64xf32> to vector<4x64x64xf32>
    %148 = arith.addf %143, %147 : vector<4x64x64xf32>
    %c0_51 = arith.constant 0 : index
    %c0_52 = arith.constant 0 : index
    %c0_53 = arith.constant 0 : index
    %149 = vector.load %arg3[%c0_51, %c0_52, %c0_53] : memref<4x64x64xf32, #tpu.memory_space<vmem>>, vector<4x64x64xf32>
    %150 = arith.addf %148, %149 : vector<4x64x64xf32>
    %cst_54 = arith.constant dense<0xFF800000> : vector<4x64xf32>
    %151 = vector.multi_reduction <maximumf>, %150, %cst_54 [2] : vector<4x64x64xf32> to vector<4x64xf32>
    %152 = vector.shape_cast %151 : vector<4x64xf32> to vector<4x64x1xf32>
    %153 = vector.broadcast %152 : vector<4x64x1xf32> to vector<4x64x64xf32>
    %154 = arith.subf %150, %153 : vector<4x64x64xf32>
    %155 = math.exp %154 : vector<4x64x64xf32>
    %cst_55 = arith.constant dense<0.000000e+00> : vector<4x64xf32>
    %156 = vector.multi_reduction <add>, %155, %cst_55 [2] : vector<4x64x64xf32> to vector<4x64xf32>
    %157 = vector.shape_cast %156 : vector<4x64xf32> to vector<4x64x1xf32>
    %158 = tpu.reciprocal %157 {approx = true} : vector<4x64x1xf32> -> vector<4x64x1xf32>
    %159 = vector.broadcast %158 : vector<4x64x1xf32> to vector<4x64x64xf32>
    %160 = arith.mulf %155, %159 : vector<4x64x64xf32>
    %161 = arith.truncf %160 : vector<4x64x64xf32> to vector<4x64x64xbf16>
    "tpu.trace_start"() <{level = 10 : i32, message = "wij,wjd->wid"}> : () -> ()
    %cst_56 = arith.constant dense<0.000000e+00> : vector<4x64x8xf32>
    %162 = tpu.matmul %161, %142, %cst_56 {dimension_numbers = #tpu.dot_dimension_numbers<[2], [1], [1], [2], [0, 0, 0, 1, 1, 2], [0], [0]>} : vector<4x64x64xbf16>, vector<4x64x8xbf16>, vector<4x64x8xf32> -> vector<4x64x8xf32>
    "tpu.trace_stop"() : () -> ()
    %163 = vector.shape_cast %162 : vector<4x64x8xf32> to vector<256x8xf32>
    %164 = tpu.concatenate %67, %99, %131, %163 in 1 : vector<256x8xf32>, vector<256x8xf32>, vector<256x8xf32>, vector<256x8xf32> -> vector<256x32xf32>
    %165 = arith.truncf %164 : vector<256x32xf32> to vector<256x32xbf16>
    %c0_57 = arith.constant 0 : index
    %c0_58 = arith.constant 0 : index
    %166 = vector.load %arg9[%c0_57, %c0_58] : memref<32x32xbf16, #tpu.memory_space<vmem>>, vector<32x32xbf16>
    %cst_59 = arith.constant dense<0.000000e+00> : vector<256x32xf32>
    %167 = tpu.matmul %165, %166, %cst_59 {dimension_numbers = #tpu.dot_dimension_numbers<[1], [0], [0], [1], [0, 0, 1, 1], [], []>} : vector<256x32xbf16>, vector<32x32xbf16>, vector<256x32xf32> -> vector<256x32xf32>
    %c0_60 = arith.constant 0 : index
    %c0_61 = arith.constant 0 : index
    %168 = vector.load %arg10[%c0_60, %c0_61] : memref<1x32xf32, #tpu.memory_space<vmem>>, vector<1x32xf32>
    %169 = vector.broadcast %168 : vector<1x32xf32> to vector<256x32xf32>
    %170 = arith.addf %167, %169 : vector<256x32xf32>
    %171 = vector.shape_cast %2 : vector<4x64x32xf32> to vector<256x32xf32>
    %172 = arith.addf %170, %171 : vector<256x32xf32>
    %173 = vector.shape_cast %172 : vector<256x32xf32> to vector<4x64x32xf32>
    %174 = arith.truncf %173 : vector<4x64x32xf32> to vector<4x64x32xbf16>
    %c0_62 = arith.constant 0 : index
    %c0_63 = arith.constant 0 : index
    %c0_64 = arith.constant 0 : index
    %c0_65 = arith.constant 0 : index
    %175 = vector.load %arg11[%c0_62, %c0_63, %c0_64, %c0_65] : memref<1x4x64x32xbf16, #tpu.memory_space<vmem>>, vector<1x4x64x32xbf16>
    %176 = vector.shape_cast %175 : vector<1x4x64x32xbf16> to vector<4x64x32xbf16>
    %177 = vector.shape_cast %174 : vector<4x64x32xbf16> to vector<1x4x64x32xbf16>
    tpu.vector_store %arg11[%c0_62, %c0_63, %c0_64, %c0_65], %177 {strides = array<i32>} : memref<1x4x64x32xbf16, #tpu.memory_space<vmem>>, vector<1x4x64x32xbf16>,
    return
  }
  func.func @transform_0(%arg0: i32, %arg1: i32) -> (i32, i32, i32, i32) {
    %c0_i32 = arith.constant 0 : i32
    %c0_i32_0 = arith.constant 0 : i32
    %c0_i32_1 = arith.constant 0 : i32
    return %arg0, %arg1, %c0_i32, %c0_i32_0 : i32, i32, i32, i32
  }
  func.func @transform_1(%arg0: i32, %arg1: i32) -> (i32, i32, i32) {
    %c0_i32 = arith.constant 0 : i32
    %c0_i32_0 = arith.constant 0 : i32
    %c0_i32_1 = arith.constant 0 : i32
    return %arg1, %c0_i32, %c0_i32_0 : i32, i32, i32
  }
  func.func @transform_2(%arg0: i32, %arg1: i32) -> (i32, i32, i32) {
    %c0_i32 = arith.constant 0 : i32
    %c0_i32_0 = arith.constant 0 : i32
    %c0_i32_1 = arith.constant 0 : i32
    %c0_i32_2 = arith.constant 0 : i32
    return %c0_i32, %c0_i32_0, %c0_i32_1 : i32, i32, i32
  }
  func.func @transform_3(%arg0: i32, %arg1: i32) -> (i32, i32) {
    %c0_i32 = arith.constant 0 : i32
    %c0_i32_0 = arith.constant 0 : i32
    %c0_i32_1 = arith.constant 0 : i32
    return %c0_i32, %c0_i32_0 : i32, i32
  }
  func.func @transform_4(%arg0: i32, %arg1: i32) -> (i32, i32) {
    %c0_i32 = arith.constant 0 : i32
    %c0_i32_0 = arith.constant 0 : i32
    %c0_i32_1 = arith.constant 0 : i32
    return %c0_i32, %c0_i32_0 : i32, i32
  }
  func.func @transform_5(%arg0: i32, %arg1: i32) -> (i32, i32) {
    %c0_i32 = arith.constant 0 : i32
    %c0_i32_0 = arith.constant 0 : i32
    %c0_i32_1 = arith.constant 0 : i32
    return %c0_i32, %c0_i32_0 : i32, i32
  }
  func.func @transform_6(%arg0: i32, %arg1: i32) -> (i32, i32) {
    %c0_i32 = arith.constant 0 : i32
    %c0_i32_0 = arith.constant 0 : i32
    %c0_i32_1 = arith.constant 0 : i32
    return %c0_i32, %c0_i32_0 : i32, i32
  }
  func.func @transform_7(%arg0: i32, %arg1: i32) -> (i32, i32) {
    %c0_i32 = arith.constant 0 : i32
    %c0_i32_0 = arith.constant 0 : i32
    %c0_i32_1 = arith.constant 0 : i32
    return %c0_i32, %c0_i32_0 : i32, i32
  }
  func.func @transform_8(%arg0: i32, %arg1: i32) -> (i32, i32) {
    %c0_i32 = arith.constant 0 : i32
    %c0_i32_0 = arith.constant 0 : i32
    %c0_i32_1 = arith.constant 0 : i32
    return %c0_i32, %c0_i32_0 : i32, i32
  }
  func.func @transform_9(%arg0: i32, %arg1: i32) -> (i32, i32, i32, i32) {
    %c0_i32 = arith.constant 0 : i32
    %c0_i32_0 = arith.constant 0 : i32
    %c0_i32_1 = arith.constant 0 : i32
    return %arg0, %arg1, %c0_i32, %c0_i32_0 : i32, i32, i32, i32
  }
}

module attributes {stable_mosaic.version = 11 : i64} {
  func.func @_mlp_kernel(%arg0: i32, %arg1: memref<256x32xbf16, #tpu.memory_space<vmem>>, %arg2: memref<1x32xf32, #tpu.memory_space<vmem>>, %arg3: memref<1x32xf32, #tpu.memory_space<vmem>>, %arg4: memref<32x128xbf16, #tpu.memory_space<vmem>>, %arg5: memref<1x128xf32, #tpu.memory_space<vmem>>, %arg6: memref<128x32xbf16, #tpu.memory_space<vmem>>, %arg7: memref<1x32xf32, #tpu.memory_space<vmem>>, %arg8: memref<256x32xbf16, #tpu.memory_space<vmem>>) attributes {dimension_semantics = [#tpu.dimension_semantics<parallel>], iteration_bounds = array<i64: 4>, scalar_prefetch = 0 : i64, scratch_operands = 0 : i64, tpu.core_type = #tpu.core_type<tc>, window_params = [{transform_indices = @transform_0, window_bounds = array<i64: 256, 32>}, {pipeline_mode = #tpu.pipeline_mode<synchronous>, transform_indices = @transform_1, window_bounds = array<i64: 1, 32>}, {pipeline_mode = #tpu.pipeline_mode<synchronous>, transform_indices = @transform_2, window_bounds = array<i64: 1, 32>}, {pipeline_mode = #tpu.pipeline_mode<synchronous>, transform_indices = @transform_3, window_bounds = array<i64: 32, 128>}, {pipeline_mode = #tpu.pipeline_mode<synchronous>, transform_indices = @transform_4, window_bounds = array<i64: 1, 128>}, {pipeline_mode = #tpu.pipeline_mode<synchronous>, transform_indices = @transform_5, window_bounds = array<i64: 128, 32>}, {pipeline_mode = #tpu.pipeline_mode<synchronous>, transform_indices = @transform_6, window_bounds = array<i64: 1, 32>}, {transform_indices = @transform_7, window_bounds = array<i64: 256, 32>}]} {
    %c0 = arith.constant 0 : index
    %c0_0 = arith.constant 0 : index
    %0 = vector.load %arg1[%c0, %c0_0] : memref<256x32xbf16, #tpu.memory_space<vmem>>, vector<256x32xbf16>
    %1 = arith.extf %0 : vector<256x32xbf16> to vector<256x32xf32>
    %cst = arith.constant dense<0.000000e+00> : vector<256xf32>
    %2 = vector.multi_reduction <add>, %1, %cst [1] : vector<256x32xf32> to vector<256xf32>
    %3 = vector.shape_cast %2 : vector<256xf32> to vector<256x1xf32>
    %cst_1 = arith.constant 3.200000e+01 : f32
    %4 = vector.broadcast %cst_1 : f32 to vector<256x1xf32>
    %5 = arith.divf %3, %4 : vector<256x1xf32>
    %6 = vector.broadcast %5 : vector<256x1xf32> to vector<256x32xf32>
    %7 = arith.subf %1, %6 : vector<256x32xf32>
    %8 = arith.mulf %7, %7 : vector<256x32xf32>
    %cst_2 = arith.constant dense<0.000000e+00> : vector<256xf32>
    %9 = vector.multi_reduction <add>, %8, %cst_2 [1] : vector<256x32xf32> to vector<256xf32>
    %10 = vector.shape_cast %9 : vector<256xf32> to vector<256x1xf32>
    %cst_3 = arith.constant 3.200000e+01 : f32
    %11 = vector.broadcast %cst_3 : f32 to vector<256x1xf32>
    %12 = arith.divf %10, %11 : vector<256x1xf32>
    %13 = vector.broadcast %5 : vector<256x1xf32> to vector<256x32xf32>
    %14 = arith.subf %1, %13 : vector<256x32xf32>
    %cst_4 = arith.constant 9.99999974E-6 : f32
    %15 = vector.broadcast %cst_4 : f32 to vector<256x1xf32>
    %16 = arith.addf %12, %15 : vector<256x1xf32>
    %17 = math.rsqrt %16 : vector<256x1xf32>
    %18 = vector.broadcast %17 : vector<256x1xf32> to vector<256x32xf32>
    %19 = arith.mulf %14, %18 : vector<256x32xf32>
    %c0_5 = arith.constant 0 : index
    %c0_6 = arith.constant 0 : index
    %20 = vector.load %arg2[%c0_5, %c0_6] : memref<1x32xf32, #tpu.memory_space<vmem>>, vector<1x32xf32>
    %21 = vector.broadcast %20 : vector<1x32xf32> to vector<256x32xf32>
    %22 = arith.mulf %19, %21 : vector<256x32xf32>
    %c0_7 = arith.constant 0 : index
    %c0_8 = arith.constant 0 : index
    %23 = vector.load %arg3[%c0_7, %c0_8] : memref<1x32xf32, #tpu.memory_space<vmem>>, vector<1x32xf32>
    %24 = vector.broadcast %23 : vector<1x32xf32> to vector<256x32xf32>
    %25 = arith.addf %22, %24 : vector<256x32xf32>
    %26 = arith.truncf %25 : vector<256x32xf32> to vector<256x32xbf16>
    %c0_9 = arith.constant 0 : index
    %c0_10 = arith.constant 0 : index
    %27 = vector.load %arg4[%c0_9, %c0_10] : memref<32x128xbf16, #tpu.memory_space<vmem>>, vector<32x128xbf16>
    %cst_11 = arith.constant dense<0.000000e+00> : vector<256x128xf32>
    %28 = tpu.matmul %26, %27, %cst_11 {dimension_numbers = #tpu.dot_dimension_numbers<[1], [0], [0], [1], [0, 0, 1, 1], [], []>} : vector<256x32xbf16>, vector<32x128xbf16>, vector<256x128xf32> -> vector<256x128xf32>
    %c0_12 = arith.constant 0 : index
    %c0_13 = arith.constant 0 : index
    %29 = vector.load %arg5[%c0_12, %c0_13] : memref<1x128xf32, #tpu.memory_space<vmem>>, vector<1x128xf32>
    %30 = vector.broadcast %29 : vector<1x128xf32> to vector<256x128xf32>
    %31 = arith.addf %28, %30 : vector<256x128xf32>
    %cst_14 = arith.constant 5.000000e-01 : f32
    %32 = vector.broadcast %cst_14 : f32 to vector<256x128xf32>
    %33 = arith.mulf %32, %31 : vector<256x128xf32>
    %cst_15 = arith.constant 4.471500e-02 : f32
    %34 = vector.broadcast %cst_15 : f32 to vector<256x128xf32>
    %35 = arith.mulf %34, %31 : vector<256x128xf32>
    %36 = arith.mulf %35, %31 : vector<256x128xf32>
    %37 = arith.mulf %36, %31 : vector<256x128xf32>
    %38 = arith.addf %31, %37 : vector<256x128xf32>
    %cst_16 = arith.constant 0.797884583 : f32
    %39 = vector.broadcast %cst_16 : f32 to vector<256x128xf32>
    %40 = arith.mulf %39, %38 : vector<256x128xf32>
    %41 = math.tanh %40 : vector<256x128xf32>
    %cst_17 = arith.constant 1.000000e+00 : f32
    %42 = vector.broadcast %cst_17 : f32 to vector<256x128xf32>
    %43 = arith.addf %42, %41 : vector<256x128xf32>
    %44 = arith.mulf %33, %43 : vector<256x128xf32>
    %45 = arith.truncf %44 : vector<256x128xf32> to vector<256x128xbf16>
    %c0_18 = arith.constant 0 : index
    %c0_19 = arith.constant 0 : index
    %46 = vector.load %arg6[%c0_18, %c0_19] : memref<128x32xbf16, #tpu.memory_space<vmem>>, vector<128x32xbf16>
    %cst_20 = arith.constant dense<0.000000e+00> : vector<256x32xf32>
    %47 = tpu.matmul %45, %46, %cst_20 {dimension_numbers = #tpu.dot_dimension_numbers<[1], [0], [0], [1], [0, 0, 1, 1], [], []>} : vector<256x128xbf16>, vector<128x32xbf16>, vector<256x32xf32> -> vector<256x32xf32>
    %c0_21 = arith.constant 0 : index
    %c0_22 = arith.constant 0 : index
    %48 = vector.load %arg7[%c0_21, %c0_22] : memref<1x32xf32, #tpu.memory_space<vmem>>, vector<1x32xf32>
    %49 = vector.broadcast %48 : vector<1x32xf32> to vector<256x32xf32>
    %50 = arith.addf %47, %49 : vector<256x32xf32>
    %51 = arith.addf %1, %50 : vector<256x32xf32>
    %52 = arith.truncf %51 : vector<256x32xf32> to vector<256x32xbf16>
    %c0_23 = arith.constant 0 : index
    %c0_24 = arith.constant 0 : index
    %53 = vector.load %arg8[%c0_23, %c0_24] : memref<256x32xbf16, #tpu.memory_space<vmem>>, vector<256x32xbf16>
    tpu.vector_store %arg8[%c0_23, %c0_24], %52 {strides = array<i32>} : memref<256x32xbf16, #tpu.memory_space<vmem>>, vector<256x32xbf16>,
    return
  }
  func.func @transform_0(%arg0: i32) -> (i32, i32) {
    %c0_i32 = arith.constant 0 : i32
    %c0_i32_0 = arith.constant 0 : i32
    return %arg0, %c0_i32 : i32, i32
  }
  func.func @transform_1(%arg0: i32) -> (i32, i32) {
    %c0_i32 = arith.constant 0 : i32
    %c0_i32_0 = arith.constant 0 : i32
    %c0_i32_1 = arith.constant 0 : i32
    return %c0_i32, %c0_i32_0 : i32, i32
  }
  func.func @transform_2(%arg0: i32) -> (i32, i32) {
    %c0_i32 = arith.constant 0 : i32
    %c0_i32_0 = arith.constant 0 : i32
    %c0_i32_1 = arith.constant 0 : i32
    return %c0_i32, %c0_i32_0 : i32, i32
  }
  func.func @transform_3(%arg0: i32) -> (i32, i32) {
    %c0_i32 = arith.constant 0 : i32
    %c0_i32_0 = arith.constant 0 : i32
    %c0_i32_1 = arith.constant 0 : i32
    return %c0_i32, %c0_i32_0 : i32, i32
  }
  func.func @transform_4(%arg0: i32) -> (i32, i32) {
    %c0_i32 = arith.constant 0 : i32
    %c0_i32_0 = arith.constant 0 : i32
    %c0_i32_1 = arith.constant 0 : i32
    return %c0_i32, %c0_i32_0 : i32, i32
  }
  func.func @transform_5(%arg0: i32) -> (i32, i32) {
    %c0_i32 = arith.constant 0 : i32
    %c0_i32_0 = arith.constant 0 : i32
    %c0_i32_1 = arith.constant 0 : i32
    return %c0_i32, %c0_i32_0 : i32, i32
  }
  func.func @transform_6(%arg0: i32) -> (i32, i32) {
    %c0_i32 = arith.constant 0 : i32
    %c0_i32_0 = arith.constant 0 : i32
    %c0_i32_1 = arith.constant 0 : i32
    return %c0_i32, %c0_i32_0 : i32, i32
  }
  func.func @transform_7(%arg0: i32) -> (i32, i32) {
    %c0_i32 = arith.constant 0 : i32
    %c0_i32_0 = arith.constant 0 : i32
    return %arg0, %c0_i32 : i32, i32
  }
}

</mosaic_0001>

<bundles_post_ra>
// kernel: tpu_custom_call.1
= control target key start
LH: loop header
LB: loop body
LE: loop exit
PB: predicated region body
PF: predicated region fallthrough
CT: control target
= control target key end

     0   :  { %6 = vsyncpa [#allocation3], 0  ;;  %s305_s0 = inlined_call_operand.hbm [shape: f32[8,128], index: 0, kind: input, shape index: {}]   ;;  %s306_s1 = inlined_call_operand.hbm [shape: f32[8,128], index: 1, kind: output, shape index: {}]  }
   0x1   :  { %7 = vsyncpa [#allocation4], 0  ;;  %s258_s6 = smov 0  }
   0x2 LB: > { %s145_s7 = sadd.s32 4294967295, %s244_s6   ;;  %p146_p0 = scmp.ge.s32.totalorder %s244_s6, 1  ;;  %s244_s6 = sphi %s258_s6, %s13_s6  }
   0x3   : > { %p60_p1 = scmp.lt.s32.totalorder %s244_s6, 3  ;;  %p270_p3 = scmp.eq.s32.totalorder %s145_s7, 0 }
   0x4   : > { %s246_s10 = smov [#allocation2]  }
   0x5   : > { %p266_p2 = pnand %p146_p0, %p60_p1  ;;  %s73_s11 = sshll.u32 %s246_s10, 4  ;;  %s74_s11 = int_to_ptr.vmem [resolvable:$true] %s73_s11 }
   0x6   : > { %s191_s12 = scalar_lea.vmem %s74_s11, 128  ;;  %p199_p10 = scmp.lt.s32.totalorder %s74_s11, %s74_s11 }
   0x7   : > { %p162_p4 = pneg %p266_p2  ;;  %p192_p7 = scmp.ne.s32.totalorder %s74_s11, %s191_s12 }
   0x8   : > { %p200_p11 = scmp.lt.s32.totalorder %s191_s12, %s191_s12 }
   0x9   : > { %p163_p5 = pnand %p270_p3, %p162_p4 }
   0xa   : > { %p201_p12 = por %p200_p11, %p199_p10 }
   0xb   : > { %p182_p6 = pneg %p163_p5 }
   0xd   : > { %p194_p8 = pnand %p192_p7, %p182_p6 }
   0xf   : > { %p195_p9 = pneg %p194_p8 }
  0x11   : > { %p202_p13 = pnand %p201_p12, %p195_p9 }
  0x13   : > { %205 = shalt.err (!%p202_p13)
}
  0x14   : > { %165 = dma.hbm_to_vmem [thread:$0]  (!%p163_p5), %s305_s0, 128, %s74_s11, [#allocation3]  }
  0x15   : > { %86 = sbr.rel (%p266_p2) target bundleno = 42 (0x2a), region = 24 }
  0x1a   : > { %235 = dma.done.wait (%p270_p3), [#allocation3], 128  }
  0x1b   : > { %237 = vsyncadd (%p270_p3), [#allocation3], 4294967168  ;;  %s247_s15 = smov [#allocation5]   ;;  %v96_v0 = vld [vmem:[#allocation2] sm:$0xff]  ;;  %p287_p0 = scmp.eq.s32.totalorder %s145_s7, 1 }
  0x1c   : > { %s106_s16 = sshll.u32 %s247_s15, 4  ;;  %v97_v1 = vadd.f32 1.0, %v96_v0  ;;  %s107_s16 = int_to_ptr.vmem [resolvable:$true] %s106_s16 }
  0x1d   : > { %s206_s18 = scalar_lea.vmem %s107_s16, 128  ;;  %p213_p5 = scmp.lt.s32.totalorder %s107_s16, %s107_s16 }
  0x1e   : > { %98 = vst [vmem:[#allocation5] sm:$0xff] %v97_v1  ;;  %p207_p1 = scmp.ne.s32.totalorder %s107_s16, %s206_s18  ;;  %p214_p6 = scmp.lt.s32.totalorder %s206_s18, %s206_s18 }
  0x20   : > { %p208_p2 = pnand %p207_p1, %p287_p0  ;;  %p215_p7 = por %p214_p6, %p213_p5 }
  0x22   : > { %p209_p4 = pneg %p208_p2 }
  0x24   : > { %p216_p3 = pnand %p215_p7, %p209_p4 }
  0x26   : > { %219 = shalt.err (!%p216_p3)
}
  0x27   : > { %159 = dma.vmem_to_hbm [thread:$0]  (%p287_p0), %s107_s16, 128, %s306_s1, [#allocation4]  }
  0x28   : > { %239 = dma.done.wait (%p287_p0), [#allocation4], 128  }
  0x29   : > { %241 = vsyncadd (%p287_p0), [#allocation4], 4294967168 }
  0x2a PF: > { %s13_s6 = sadd.s32 1, %s244_s6  }
  0x2b   : > { %p10_p8 = scmp.ge.s32.totalorder %s13_s6, 4  }
  0x2d   :  { %12 = sbr.rel (!%p10_p8) target bundleno = 2 (0x2), region = 53 }
  0x32   :  { %119 = vsyncpa [#allocation3], 1 }
  0x33   :  { %121 = vsyncpa [#allocation3 + $0x1], 1 }
  0x34   :  { %122 = vsyncpa [#allocation4], 1 }
  0x35   :  { %124 = vsyncpa [#allocation4 + $0x1], 1 }

// kernel: swin_block_forward.3
= control target key start
LH: loop header
LB: loop body
LE: loop exit
PB: predicated region body
PF: predicated region fallthrough
CT: control target
= control target key end

     0   :  { %12 = vsyncpa [#allocation3], 0  ;;  %s3543_s0 = inlined_call_operand.vmem [shape: bf16[1024,32], index: 0, kind: input, shape index: {}]   ;;  %s3544_s1 = inlined_call_operand.vmem [shape: f32[1,32], index: 1, kind: input, shape index: {}]   ;;  %s3545_s2 = inlined_call_operand.vmem [shape: f32[1,32], index: 2, kind: input, shape index: {}]   ;;  %s3546_s3 = inlined_call_operand.vmem [shape: bf16[32,128], index: 3, kind: input, shape index: {}]   ;;  %s3547_s4 = inlined_call_operand.vmem [shape: f32[1,128], index: 4, kind: input, shape index: {}]   ;;  %s3548_s5 = inlined_call_operand.vmem [shape: bf16[128,32], index: 5, kind: input, shape index: {}]   ;;  %s3549_s6 = inlined_call_operand.vmem [shape: f32[1,32], index: 6, kind: input, shape index: {}]   ;;  %s3550_s7 = inlined_call_operand.hbm [shape: bf16[1024,32], index: 7, kind: output, shape index: {}]  }
   0x1   :  { %14 = vsyncpa [#allocation3 + $0x1], 0  ;;  %s2506_s24 = smov 0   ;;  %s2508_s25 = smov 0  }
   0x2   :  { %s2510_s26 = smov 0   ;;  %s2512_s27 = smov 0  }
   0x3 LB: > { %s2527_s28 = sadd.s32 4294967295, %s2461_s27   ;;  %s1894_s29 = sadd.s32 4294967294, %s2461_s27   ;;  %s2461_s27 = sphi %s2512_s27, %s3616_s27   ;;  %s2457_s26 = sphi %s2510_s26, %s3615_s26   ;;  %s2453_s25 = sphi %s2508_s25, %s3614_s25   ;;  %s2449_s24 = sphi %s2506_s24, %s3613_s24  }
   0x4   : > { %s2531_s30 = sadd.s32 1, %s2461_s27   ;;  %s179_s8 = sadd.s32 1, %s2457_s26 }
   0x5   : > { %s176_s9 = ssub.s32 %s2461_s27, %s2531_s30  ;;  %p189_p0 = scmp.ne.s32.totalorder %s2457_s26, %s2453_s25 }
   0x6   : > { %p177_p1 = scmp.eq.s32.totalorder %s176_s9, 0  ;;  %p190_p2 = scmp.eq.s32.totalorder %s2527_s28, 3 }
   0x7   : > { %p195_p3 = scmp.ne.s32.totalorder %s2453_s25, %s2449_s24  ;;  %p196_p4 = scmp.eq.s32.totalorder %s1894_s29, 3 }
   0x8   : > { %s2542_s10 = scalar_select %p177_p1, %s2457_s26, %s179_s8  }
   0x9   : > { %p2544_p5 = por %p190_p2, %p189_p0  ;;  %p2548_p6 = por %p196_p4, %p195_p3 }
   0xa   : > { %p1897_p7 = scmp.ge.s32.totalorder %s2461_s27, 1  ;;  %p241_p8 = scmp.lt.s32.totalorder %s2461_s27, 5 }
   0xc   : > { %p242_p9 = pnand %p1897_p7, %p241_p8 }
   0xe   : > { %245 = sbr.rel (%p242_p9) target bundleno = 868 (0x364), region = 48 }
  0x13   : > { %s1899_s13 = sshll.u32 %s2527_s28, 5  ;;  %vm345_vm0 = vcmask 261120   ;;  %s270_s16 = sand.u32 1, %s2453_s25   ;;  %vm1785_vm1 = vcmask 257024  }
  0x14   : > { %p274_p10 = scmp.lt.s32.totalorder %s1899_s13, 127  ;;  %s1898_s19 = sshll.u32 %s270_s16, 7 }
  0x15   : > { %s3367_s20 = scalar_lea.vmem [#allocation2], %s1898_s19  ;;  %s2000_s21 = sshll.u32 %s2527_s28, 11 }
  0x16   : > { %s3618_s13 = smov (!%p274_p10, %s1899_s13), 127  ;;  %s1832_s22 = sshll.u32 %s3367_s20, 4  ;;  %s3495_s22 = int_to_ptr.vmem [resolvable:$true] %s1832_s22 }
  0x17   : > { %s1900_s14 = sshll.u32 %s3618_s13, 2  ;;  %s3493_s8 = scalar_lea.hbm %s3550_s7, %s2000_s21 }
  0x18   : > { %s2558_s17 = scalar_lea.vmem %s3543_s0, %s1900_s14  ;;  %s3503_s28 = scalar_lea.sflag [#allocation3], %s270_s16 }
  0x19   : > { %v2002_v0 = vld [vmem:[%s2558_s17] sm:$0xff]   ;;  %v2065_v1 = vld [vmem:[%s2558_s17 + $0x8] sm:$0xff]   ;;  %v2066_v6 = vld [vmem:[%s2558_s17 + $0x10] sm:$0xff]   ;;  %s2401_s9 = scalar_lea.vmem %s3495_s22, 2048  ;;  %s2463_s13 = smov [#allocation2]  }
  0x1a   : > { %v2562_v2 = vunpack.c.l.bf16 %v2002_v0  ;;  %v2564_v3 = vunpack.c.l.bf16 %v2065_v1  ;;  %v2566_v4 = vunpack.c.h.bf16 %v2002_v0  ;;  %v2568_v5 = vunpack.c.h.bf16 %v2065_v1  ;;  %v2067_v13 = vld [vmem:[%s2558_s17 + $0x18] sm:$0xff]   ;;  %v2068_v18 = vld [vmem:[%s2558_s17 + $0x20] sm:$0xff]   ;;  %v2069_v23 = vld [vmem:[%s2558_s17 + $0x28] sm:$0xff]   ;;  %p2402_p11 = scmp.ne.s32.totalorder %s3495_s22, %s2401_s9  ;;  %s2405_s14 = sshll.u32 %s2463_s13, 4  ;;  %s2406_s14 = int_to_ptr.vmem [resolvable:$false] %s2405_s14 }
  0x1b   : > { %v2579_v11 = vunpack.c.l.bf16 %v2066_v6  ;;  %v2581_v12 = vunpack.c.h.bf16 %v2066_v6  ;;  %v2588_v16 = vunpack.c.l.bf16 %v2067_v13  ;;  %v2590_v17 = vunpack.c.h.bf16 %v2067_v13  ;;  %v2070_v28 = vld [vmem:[%s2558_s17 + $0x30] sm:$0xff]   ;;  %v2071_v33 = vld [vmem:[%s2558_s17 + $0x38] sm:$0xff]   ;;  %v2072_v38 = vld [vmem:[%s2558_s17 + $0x40] sm:$0xff]   ;;  %s2407_s15 = scalar_lea.vmem %s2406_s14, 4096  ;;  %p2408_p0 = scmp.lt.s32.totalorder %s3495_s22, %s2406_s14 }
  0x1c   : > { %v346_v7 = vsel %vm345_vm0, %v2562_v2, 0.0  ;;  %v352_v8 = vsel %vm345_vm0, %v2564_v3, 0.0  ;;  %v349_v9 = vsel %vm345_vm0, %v2566_v4, 0.0  ;;  %v355_v10 = vsel %vm345_vm0, %v2568_v5, 0.0  ;;  %v2073_v43 = vld [vmem:[%s2558_s17 + $0x48] sm:$0xff]   ;;  %v2074_v48 = vld [vmem:[%s2558_s17 + $0x50] sm:$0xff]   ;;  %p2403_p12 = pnand %p2402_p11, %p2544_p5  ;;  %p2409_p1 = scmp.lt.s32.totalorder %s2407_s15, %s2401_s9 }
  0x1d   : > { %347 = vadd.xlane.f32.xlu0 %v346_v7  ;;  %353 = vadd.xlane.f32.xlu1 %v352_v8  ;;  %v358_v14 = vsel %vm345_vm0, %v2579_v11, 0.0  ;;  %v361_v15 = vsel %vm345_vm0, %v2581_v12, 0.0  ;;  %v364_v19 = vsel %vm345_vm0, %v2588_v16, 0.0  ;;  %v367_v20 = vsel %vm345_vm0, %v2590_v17, 0.0  ;;  %v2075_v53 = vld [vmem:[%s2558_s17 + $0x58] sm:$0xff]   ;;  %v2076_v58 = vld [vmem:[%s2558_s17 + $0x60] sm:$0xff]  }
  0x1e   : > { %v2597_v21 = vunpack.c.l.bf16 %v2068_v18  ;;  %v2599_v22 = vunpack.c.h.bf16 %v2068_v18  ;;  %v2606_v26 = vunpack.c.l.bf16 %v2069_v23  ;;  %v2608_v27 = vunpack.c.h.bf16 %v2069_v23  ;;  %v2077_v63 = vld [vmem:[%s2558_s17 + $0x68] sm:$0xff]   ;;  %v2078_v8 = vld [vmem:[%s2558_s17 + $0x70] sm:$0xff]   ;;  %p2404_p13 = pneg %p2403_p12  ;;  %p2410_p2 = por %p2409_p1, %p2408_p0 }
  0x1f   : > { %v2615_v31 = vunpack.c.l.bf16 %v2070_v28  ;;  %v2617_v32 = vunpack.c.h.bf16 %v2070_v28  ;;  %v2624_v36 = vunpack.c.l.bf16 %v2071_v33  ;;  %v2626_v37 = vunpack.c.h.bf16 %v2071_v33 }
  0x20   : > { %v370_v24 = vsel %vm345_vm0, %v2597_v21, 0.0  ;;  %v373_v25 = vsel %vm345_vm0, %v2599_v22, 0.0  ;;  %v376_v29 = vsel %vm345_vm0, %v2606_v26, 0.0  ;;  %v379_v30 = vsel %vm345_vm0, %v2608_v27, 0.0  ;;  %p2411_p3 = pnand %p2410_p2, %p2404_p13 }
  0x21   : > { %350 = vadd.xlane.f32.xlu0 %v349_v9  ;;  %356 = vadd.xlane.f32.xlu1 %v355_v10  ;;  %3573 = vst [vmem:[#allocation5_spill] sm:$0xff] %v2615_v31  ;;  %3574 = vst [vmem:[#allocation6_spill] sm:$0xff] %v2617_v32  ;;  %v382_v34 = vsel %vm345_vm0, %v2615_v31, 0.0  ;;  %v385_v35 = vsel %vm345_vm0, %v2617_v32, 0.0  ;;  %v388_v39 = vsel %vm345_vm0, %v2624_v36, 0.0  ;;  %v391_v40 = vsel %vm345_vm0, %v2626_v37, 0.0 }
  0x22   : > { %3575 = vst [vmem:[#allocation7_spill] sm:$0xff] %v2624_v36  ;;  %3576 = vst [vmem:[#allocation8_spill] sm:$0xff] %v2626_v37  ;;  %v2633_v41 = vunpack.c.l.bf16 %v2072_v38  ;;  %v2635_v42 = vunpack.c.h.bf16 %v2072_v38  ;;  %v2642_v46 = vunpack.c.l.bf16 %v2073_v43  ;;  %v2644_v47 = vunpack.c.h.bf16 %v2073_v43 }
  0x23   : > { %v2651_v51 = vunpack.c.l.bf16 %v2074_v48  ;;  %v2653_v52 = vunpack.c.h.bf16 %v2074_v48  ;;  %v2660_v56 = vunpack.c.l.bf16 %v2075_v53  ;;  %v2662_v57 = vunpack.c.h.bf16 %v2075_v53 }
  0x24   : > { %3577 = vst [vmem:[#allocation9_spill] sm:$0xff] %v2633_v41  ;;  %3578 = vst [vmem:[#allocation10_spill] sm:$0xff] %v2635_v42  ;;  %v394_v44 = vsel %vm345_vm0, %v2633_v41, 0.0  ;;  %v397_v45 = vsel %vm345_vm0, %v2635_v42, 0.0  ;;  %v400_v49 = vsel %vm345_vm0, %v2642_v46, 0.0  ;;  %v403_v50 = vsel %vm345_vm0, %v2644_v47, 0.0 }
  0x25   : > { %359 = vadd.xlane.f32.xlu0 %v358_v14  ;;  %362 = vadd.xlane.f32.xlu1 %v361_v15  ;;  %3579 = vst [vmem:[#allocation11_spill] sm:$0xff] %v2642_v46  ;;  %3580 = vst [vmem:[#allocation12_spill] sm:$0xff] %v2644_v47  ;;  %v406_v54 = vsel %vm345_vm0, %v2651_v51, 0.0  ;;  %v409_v55 = vsel %vm345_vm0, %v2653_v52, 0.0  ;;  %v412_v59 = vsel %vm345_vm0, %v2660_v56, 0.0  ;;  %v415_v60 = vsel %vm345_vm0, %v2662_v57, 0.0 }
  0x26   : > { %3581 = vst [vmem:[#allocation13_spill] sm:$0xff] %v2651_v51  ;;  %3582 = vst [vmem:[#allocation14_spill] sm:$0xff] %v2653_v52  ;;  %v2669_v61 = vunpack.c.l.bf16 %v2076_v58  ;;  %v2671_v62 = vunpack.c.h.bf16 %v2076_v58  ;;  %v2678_v6 = vunpack.c.l.bf16 %v2077_v63  ;;  %v2680_v7 = vunpack.c.h.bf16 %v2077_v63  ;;  %v2079_v15 = vld [vmem:[%s2558_s17 + $0x78] sm:$0xff]  }
  0x27   : > { %3583 = vst [vmem:[#allocation15_spill] sm:$0xff] %v2660_v56  ;;  %3584 = vst [vmem:[#allocation16_spill] sm:$0xff] %v2662_v57  ;;  %v2687_v13 = vunpack.c.l.bf16 %v2078_v8  ;;  %v2689_v14 = vunpack.c.h.bf16 %v2078_v8  ;;  %v2698_v23 = vunpack.c.h.bf16 %v2079_v15 }
  0x28   : > { %3585 = vst [vmem:[#allocation17_spill] sm:$0xff] %v2669_v61  ;;  %3586 = vst [vmem:[#allocation18_spill] sm:$0xff] %v2671_v62  ;;  %v418_v0 = vsel %vm345_vm0, %v2669_v61, 0.0  ;;  %v421_v1 = vsel %vm345_vm0, %v2671_v62, 0.0  ;;  %v424_v9 = vsel %vm345_vm0, %v2678_v6, 0.0  ;;  %v427_v10 = vsel %vm345_vm0, %v2680_v7, 0.0 }
  0x29   : > { %365 = vadd.xlane.f32.xlu0 %v364_v19  ;;  %368 = vadd.xlane.f32.xlu1 %v367_v20  ;;  %3587 = vst [vmem:[#allocation19_spill] sm:$0xff] %v2678_v6  ;;  %3588 = vst [vmem:[#allocation20_spill] sm:$0xff] %v2680_v7  ;;  %v430_v18 = vsel %vm345_vm0, %v2687_v13, 0.0  ;;  %v433_v19 = vsel %vm345_vm0, %v2689_v14, 0.0  ;;  %v2696_v20 = vunpack.c.l.bf16 %v2079_v15 }
  0x2a   : > { %3589 = vst [vmem:[#allocation21_spill] sm:$0xff] %v2687_v13  ;;  %3590 = vst [vmem:[#allocation22_spill] sm:$0xff] %v2689_v14 }
  0x2b   : > { %3591 = vst [vmem:[#allocation23_spill] sm:$0xff] %v2696_v20  ;;  %3592 = vst [vmem:[#allocation24_spill] sm:$0xff] %v2698_v23 }
  0x2d   : > { %371 = vadd.xlane.f32.xlu0 %v370_v24  ;;  %374 = vadd.xlane.f32.xlu1 %v373_v25  ;;  %v436_v24 = vsel %vm345_vm0, %v2696_v20, 0.0  ;;  %v439_v25 = vsel %vm345_vm0, %v2698_v23, 0.0 }
  0x31   : > { %377 = vadd.xlane.f32.xlu0 %v376_v29  ;;  %380 = vadd.xlane.f32.xlu1 %v379_v30 }
  0x35   : > { %383 = vadd.xlane.f32.xlu0 %v382_v34  ;;  %386 = vadd.xlane.f32.xlu1 %v385_v35 }
  0x39   : > { %389 = vadd.xlane.f32.xlu0 %v388_v39  ;;  %392 = vadd.xlane.f32.xlu1 %v391_v40 }
  0x3d   : > { %395 = vadd.xlane.f32.xlu0 %v394_v44  ;;  %398 = vadd.xlane.f32.xlu1 %v397_v45 }
  0x41   : > { %401 = vadd.xlane.f32.xlu0 %v400_v49  ;;  %404 = vadd.xlane.f32.xlu1 %v403_v50 }
  0x45   : > { %407 = vadd.xlane.f32.xlu0 %v406_v54  ;;  %410 = vadd.xlane.f32.xlu1 %v409_v55 }
  0x49   : > { %413 = vadd.xlane.f32.xlu0 %v412_v59  ;;  %416 = vadd.xlane.f32.xlu1 %v415_v60 }
  0x4d   : > { %419 = vadd.xlane.f32.xlu0 %v418_v0  ;;  %422 = vadd.xlane.f32.xlu1 %v421_v1 }
  0x51   : > { %425 = vadd.xlane.f32.xlu0 %v424_v9  ;;  %428 = vadd.xlane.f32.xlu1 %v427_v10 }
  0x55   : > { %431 = vadd.xlane.f32.xlu0 %v430_v18  ;;  %434 = vadd.xlane.f32.xlu1 %v433_v19 }
  0x59   : > { %437 = vadd.xlane.f32.xlu0 %v436_v24  ;;  %440 = vadd.xlane.f32.xlu1 %v439_v25 }
  0xa6   : > { %v348_v28 = vpop.xlane.xlu0 %347  ;;  %v354_v29 = vpop.xlane.xlu1 %353 }
  0xa7   : > { %v443_v30 = vmul.f32 0.03125, %v348_v28  ;;  %v445_v33 = vmul.f32 0.03125, %v354_v29 }
  0xa9   : > { %v2705_v34 = vsub.f32 %v2562_v2, %v443_v30  ;;  %v2708_v35 = vsub.f32 %v2564_v3, %v445_v33 }
  0xaa   : > { %v351_v38 = vpop.xlane.xlu0 %350  ;;  %v357_v39 = vpop.xlane.xlu1 %356 }
  0xab   : > { %v444_v40 = vmul.f32 0.03125, %v351_v38  ;;  %v446_v43 = vmul.f32 0.03125, %v357_v39  ;;  %v507_v44 = vmul.f32 %v2705_v34, %v2705_v34  ;;  %v509_v45 = vmul.f32 %v2708_v35, %v2708_v35 }
  0xad   : > { %v2715_v48 = vsub.f32 %v2566_v4, %v444_v40  ;;  %v2718_v49 = vsub.f32 %v2568_v5, %v446_v43  ;;  %v539_v50 = vsel %vm345_vm0, %v507_v44, 0.0  ;;  %v545_v55 = vsel %vm345_vm0, %v509_v45, 0.0 }
  0xae   : > { %540 = vadd.xlane.f32.xlu0 %v539_v50  ;;  %v360_v53 = vpop.xlane.xlu0 %359  ;;  %v363_v54 = vpop.xlane.xlu1 %362 }
  0xaf   : > { %v447_v58 = vmul.f32 0.03125, %v360_v53  ;;  %v448_v59 = vmul.f32 0.03125, %v363_v54  ;;  %v508_v60 = vmul.f32 %v2715_v48, %v2715_v48  ;;  %v510_v63 = vmul.f32 %v2718_v49, %v2718_v49 }
  0xb1   : > { %v2727_v0 = vsub.f32 %v2579_v11, %v447_v58  ;;  %v2730_v1 = vsub.f32 %v2581_v12, %v448_v59  ;;  %v542_v8 = vsel %vm345_vm0, %v508_v60, 0.0  ;;  %v548_v15 = vsel %vm345_vm0, %v510_v63, 0.0 }
  0xb2   : > { %546 = vadd.xlane.f32.xlu0 %v545_v55  ;;  %543 = vadd.xlane.f32.xlu1 %v542_v8  ;;  %v366_v9 = vpop.xlane.xlu0 %365  ;;  %v369_v10 = vpop.xlane.xlu1 %368 }
  0xb3   : > { %v449_v18 = vmul.f32 0.03125, %v366_v9  ;;  %v450_v19 = vmul.f32 0.03125, %v369_v10  ;;  %v511_v24 = vmul.f32 %v2727_v0, %v2727_v0  ;;  %v512_v25 = vmul.f32 %v2730_v1, %v2730_v1 }
  0xb5   : > { %v2739_v28 = vsub.f32 %v2588_v16, %v449_v18  ;;  %v2742_v29 = vsub.f32 %v2590_v17, %v450_v19  ;;  %v551_v30 = vsel %vm345_vm0, %v511_v24, 0.0  ;;  %v554_v39 = vsel %vm345_vm0, %v512_v25, 0.0 }
  0xb6   : > { %549 = vadd.xlane.f32.xlu1 %v548_v15  ;;  %552 = vadd.xlane.f32.xlu0 %v551_v30  ;;  %v372_v33 = vpop.xlane.xlu0 %371  ;;  %v375_v38 = vpop.xlane.xlu1 %374 }
  0xb7   : > { %v451_v40 = vmul.f32 0.03125, %v372_v33  ;;  %v452_v43 = vmul.f32 0.03125, %v375_v38  ;;  %v513_v44 = vmul.f32 %v2739_v28, %v2739_v28  ;;  %v514_v45 = vmul.f32 %v2742_v29, %v2742_v29 }
  0xb9   : > { %v2751_v50 = vsub.f32 %v2597_v21, %v451_v40  ;;  %v2754_v53 = vsub.f32 %v2599_v22, %v452_v43  ;;  %v557_v54 = vsel %vm345_vm0, %v513_v44, 0.0  ;;  %v560_v59 = vsel %vm345_vm0, %v514_v45, 0.0 }
  0xba   : > { %555 = vadd.xlane.f32.xlu1 %v554_v39  ;;  %558 = vadd.xlane.f32.xlu0 %v557_v54  ;;  %v378_v55 = vpop.xlane.xlu0 %377  ;;  %v381_v58 = vpop.xlane.xlu1 %380 }
  0xbb   : > { %v453_v60 = vmul.f32 0.03125, %v378_v55  ;;  %v454_v63 = vmul.f32 0.03125, %v381_v58  ;;  %v515_v8 = vmul.f32 %v2751_v50, %v2751_v50  ;;  %v516_v9 = vmul.f32 %v2754_v53, %v2754_v53 }
  0xbd   : > { %v2763_v10 = vsub.f32 %v2606_v26, %v453_v60  ;;  %v2766_v15 = vsub.f32 %v2608_v27, %v454_v63  ;;  %v563_v18 = vsel %vm345_vm0, %v515_v8, 0.0  ;;  %v566_v25 = vsel %vm345_vm0, %v516_v9, 0.0 }
  0xbe   : > { %561 = vadd.xlane.f32.xlu1 %v560_v59  ;;  %564 = vadd.xlane.f32.xlu0 %v563_v18  ;;  %v384_v19 = vpop.xlane.xlu0 %383  ;;  %v387_v24 = vpop.xlane.xlu1 %386 }
  0xbf   : > { %v455_v30 = vmul.f32 0.03125, %v384_v19  ;;  %v456_v33 = vmul.f32 0.03125, %v387_v24  ;;  %v517_v38 = vmul.f32 %v2763_v10, %v2763_v10  ;;  %v518_v39 = vmul.f32 %v2766_v15, %v2766_v15 }
  0xc1   : > { %v2775_v40 = vsub.f32 %v2615_v31, %v455_v30  ;;  %v2778_v43 = vsub.f32 %v2617_v32, %v456_v33  ;;  %v569_v44 = vsel %vm345_vm0, %v517_v38, 0.0  ;;  %v572_v55 = vsel %vm345_vm0, %v518_v39, 0.0 }
  0xc2   : > { %567 = vadd.xlane.f32.xlu1 %v566_v25  ;;  %570 = vadd.xlane.f32.xlu0 %v569_v44  ;;  %v390_v45 = vpop.xlane.xlu0 %389  ;;  %v393_v54 = vpop.xlane.xlu1 %392 }
  0xc3   : > { %v457_v58 = vmul.f32 0.03125, %v390_v45  ;;  %v458_v59 = vmul.f32 0.03125, %v393_v54  ;;  %v519_v60 = vmul.f32 %v2775_v40, %v2775_v40  ;;  %v520_v63 = vmul.f32 %v2778_v43, %v2778_v43 }
  0xc5   : > { %v2787_v8 = vsub.f32 %v2624_v36, %v457_v58  ;;  %v2790_v9 = vsub.f32 %v2626_v37, %v458_v59  ;;  %v575_v18 = vsel %vm345_vm0, %v519_v60, 0.0  ;;  %v578_v25 = vsel %vm345_vm0, %v520_v63, 0.0 }
  0xc6   : > { %573 = vadd.xlane.f32.xlu1 %v572_v55  ;;  %576 = vadd.xlane.f32.xlu0 %v575_v18  ;;  %v396_v19 = vpop.xlane.xlu0 %395  ;;  %v399_v24 = vpop.xlane.xlu1 %398 }
  0xc7   : > { %v459_v30 = vmul.f32 0.03125, %v396_v19  ;;  %v460_v33 = vmul.f32 0.03125, %v399_v24  ;;  %v521_v38 = vmul.f32 %v2787_v8, %v2787_v8  ;;  %v522_v39 = vmul.f32 %v2790_v9, %v2790_v9 }
  0xc9   : > { %v2799_v44 = vsub.f32 %v2633_v41, %v459_v30  ;;  %v2802_v45 = vsub.f32 %v2635_v42, %v460_v33  ;;  %v581_v54 = vsel %vm345_vm0, %v521_v38, 0.0  ;;  %v584_v59 = vsel %vm345_vm0, %v522_v39, 0.0 }
  0xca   : > { %579 = vadd.xlane.f32.xlu1 %v578_v25  ;;  %582 = vadd.xlane.f32.xlu0 %v581_v54  ;;  %v402_v55 = vpop.xlane.xlu0 %401  ;;  %v405_v58 = vpop.xlane.xlu1 %404 }
  0xcb   : > { %v461_v60 = vmul.f32 0.03125, %v402_v55  ;;  %v462_v63 = vmul.f32 0.03125, %v405_v58  ;;  %v523_v18 = vmul.f32 %v2799_v44, %v2799_v44  ;;  %v524_v19 = vmul.f32 %v2802_v45, %v2802_v45 }
  0xcd   : > { %v2811_v24 = vsub.f32 %v2642_v46, %v461_v60  ;;  %v2814_v30 = vsub.f32 %v2644_v47, %v462_v63  ;;  %v587_v25 = vsel %vm345_vm0, %v523_v18, 0.0  ;;  %v590_v39 = vsel %vm345_vm0, %v524_v19, 0.0  ;;  %v2263_v18 = vld [vmem:[%s3546_s3 + $0x8] sm:$0xff]  }
  0xce   : > { %585 = vadd.xlane.f32.xlu1 %v584_v59  ;;  %588 = vadd.xlane.f32.xlu0 %v587_v25  ;;  %v408_v33 = vpop.xlane.xlu0 %407  ;;  %v411_v38 = vpop.xlane.xlu1 %410 }
  0xcf   : > { %v463_v54 = vmul.f32 0.03125, %v408_v33  ;;  %v464_v55 = vmul.f32 0.03125, %v411_v38  ;;  %v525_v58 = vmul.f32 %v2811_v24, %v2811_v24  ;;  %v526_v60 = vmul.f32 %v2814_v30, %v2814_v30  ;;  %2122 = vmatprep.subr.bf16.mxu0 %v2263_v18 }
  0xd0   : > { %2123 = vmatpush3.bf16.msra.mxu0 %v2263_v18 }
  0xd1   : > { %v2823_v42 = vsub.f32 %v2651_v51, %v463_v54  ;;  %v2826_v63 = vsub.f32 %v2653_v52, %v464_v55  ;;  %v593_v59 = vsel %vm345_vm0, %v525_v58, 0.0  ;;  %v596_v33 = vsel %vm345_vm0, %v526_v60, 0.0  ;;  %v2264_v60 = vld [vmem:[%s3546_s3] sm:$0xff]  }
  0xd2   : > { %591 = vadd.xlane.f32.xlu1 %v590_v39  ;;  %594 = vadd.xlane.f32.xlu0 %v593_v59  ;;  %v414_v19 = vpop.xlane.xlu0 %413  ;;  %v417_v25 = vpop.xlane.xlu1 %416 }
  0xd3   : > { %v465_v38 = vmul.f32 0.03125, %v414_v19  ;;  %v466_v47 = vmul.f32 0.03125, %v417_v25  ;;  %v527_v54 = vmul.f32 %v2823_v42, %v2823_v42  ;;  %v528_v55 = vmul.f32 %v2826_v63, %v2826_v63  ;;  %2124 = vmatprep.subr.bf16.mxu0 %v2264_v60 }
  0xd4   : > { %2125 = vmatpush3.bf16.msra.mxu0 %v2264_v60 }
  0xd5   : > { %v2838_v58 = vsub.f32 %v2660_v56, %v465_v38  ;;  %v2841_v39 = vsub.f32 %v2662_v57, %v466_v47  ;;  %v599_v59 = vsel %vm345_vm0, %v527_v54, 0.0  ;;  %v602_v52 = vsel %vm345_vm0, %v528_v55, 0.0 }
  0xd6   : > { %597 = vadd.xlane.f32.xlu1 %v596_v33  ;;  %600 = vadd.xlane.f32.xlu0 %v599_v59  ;;  %v420_v19 = vpop.xlane.xlu0 %419  ;;  %v423_v25 = vpop.xlane.xlu1 %422 }
  0xd7   : > { %v467_v51 = vmul.f32 0.03125, %v420_v19  ;;  %v468_v18 = vmul.f32 0.03125, %v423_v25  ;;  %v529_v38 = vmul.f32 %v2838_v58, %v2838_v58  ;;  %v530_v47 = vmul.f32 %v2841_v39, %v2841_v39 }
  0xd9   : > { %v2853_v54 = vsub.f32 %v2669_v61, %v467_v51  ;;  %v2856_v33 = vsub.f32 %v2671_v62, %v468_v18  ;;  %v605_v59 = vsel %vm345_vm0, %v529_v38, 0.0  ;;  %v608_v25 = vsel %vm345_vm0, %v530_v47, 0.0 }
  0xda   : > { %603 = vadd.xlane.f32.xlu1 %v602_v52  ;;  %606 = vadd.xlane.f32.xlu0 %v605_v59  ;;  %v426_v55 = vpop.xlane.xlu0 %425  ;;  %v429_v19 = vpop.xlane.xlu1 %428 }
  0xdb   : > { %v469_v57 = vmul.f32 0.03125, %v426_v55  ;;  %v470_v56 = vmul.f32 0.03125, %v429_v19  ;;  %v531_v41 = vmul.f32 %v2853_v54, %v2853_v54  ;;  %v532_v51 = vmul.f32 %v2856_v33, %v2856_v33 }
  0xdd   : > { %v2865_v60 = vsub.f32 %v2678_v6, %v469_v57  ;;  %v2868_v18 = vsub.f32 %v2680_v7, %v470_v56  ;;  %v611_v52 = vsel %vm345_vm0, %v531_v41, 0.0  ;;  %v614_v59 = vsel %vm345_vm0, %v532_v51, 0.0 }
  0xde   : > { %609 = vadd.xlane.f32.xlu1 %v608_v25  ;;  %612 = vadd.xlane.f32.xlu0 %v611_v52  ;;  %v432_v38 = vpop.xlane.xlu0 %431  ;;  %v435_v47 = vpop.xlane.xlu1 %434 }
  0xdf   : > { %v471_v55 = vmul.f32 0.03125, %v432_v38  ;;  %v472_v19 = vmul.f32 0.03125, %v435_v47  ;;  %v533_v62 = vmul.f32 %v2865_v60, %v2865_v60  ;;  %v534_v57 = vmul.f32 %v2868_v18, %v2868_v18 }
  0xe1   : > { %v2877_v61 = vsub.f32 %v2687_v13, %v471_v55  ;;  %v2880_v56 = vsub.f32 %v2689_v14, %v472_v19  ;;  %v617_v41 = vsel %vm345_vm0, %v533_v62, 0.0  ;;  %v620_v52 = vsel %vm345_vm0, %v534_v57, 0.0 }
  0xe2   : > { %615 = vadd.xlane.f32.xlu1 %v614_v59  ;;  %618 = vadd.xlane.f32.xlu0 %v617_v41  ;;  %v438_v25 = vpop.xlane.xlu0 %437  ;;  %v441_v51 = vpop.xlane.xlu1 %440 }
  0xe3   : > { %v473_v38 = vmul.f32 0.03125, %v438_v25  ;;  %v474_v47 = vmul.f32 0.03125, %v441_v51  ;;  %v535_v7 = vmul.f32 %v2877_v61, %v2877_v61  ;;  %v536_v55 = vmul.f32 %v2880_v56, %v2880_v56 }
  0xe5   : > { %v2889_v13 = vsub.f32 %v2696_v20, %v473_v38  ;;  %v2892_v19 = vsub.f32 %v2698_v23, %v474_v47  ;;  %v623_v62 = vsel %vm345_vm0, %v535_v7, 0.0  ;;  %v626_v59 = vsel %vm345_vm0, %v536_v55, 0.0 }
  0xe6   : > { %621 = vadd.xlane.f32.xlu1 %v620_v52  ;;  %624 = vadd.xlane.f32.xlu0 %v623_v62 }
  0xe7   : > { %v537_v57 = vmul.f32 %v2889_v13, %v2889_v13  ;;  %v538_v41 = vmul.f32 %v2892_v19, %v2892_v19 }
  0xe9   : > { %v629_v25 = vsel %vm345_vm0, %v537_v57, 0.0  ;;  %v632_v51 = vsel %vm345_vm0, %v538_v41, 0.0 }
  0xea   : > { %627 = vadd.xlane.f32.xlu1 %v626_v59  ;;  %630 = vadd.xlane.f32.xlu0 %v629_v25 }
  0xee   : > { %633 = vadd.xlane.f32.xlu1 %v632_v51 }
 0x137   : > { %v541_v38 = vpop.xlane.xlu0 %540 }
 0x138   : > { %v635_v47 = vmul.f32 0.03125, %v541_v38 }
 0x13a   : > { %v667_v7 = vadd.f32 1e-05, %v635_v47 }
 0x13b   : > { %v544_v52 = vpop.xlane.xlu1 %543  ;;  %v547_v62 = vpop.xlane.xlu0 %546 }
 0x13c   : > { %2273 = vrsqrt.f32 %v667_v7  ;;  %v636_v55 = vmul.f32 0.03125, %v544_v52  ;;  %v637_v14 = vmul.f32 0.03125, %v547_v62 }
 0x13e   : > { %v668_v23 = vadd.f32 1e-05, %v636_v55  ;;  %v669_v20 = vadd.f32 1e-05, %v637_v14 }
 0x13f   : > { %v550_v6 = vpop.xlane.xlu1 %549  ;;  %v553_v46 = vpop.xlane.xlu0 %552 }
 0x140   : > { %2275 = vrsqrt.f32 %v668_v23  ;;  %v638_v32 = vmul.f32 0.03125, %v550_v6  ;;  %v639_v57 = vmul.f32 0.03125, %v553_v46 }
 0x141   : > { %2277 = vrsqrt.f32 %v669_v20  ;;  %v2906_v20 = vld [vmem:[%s3544_s1] ss:$0 sm:$0xff] }
 0x142   : > { %v670_v59 = vadd.f32 1e-05, %v638_v32  ;;  %v671_v25 = vadd.f32 1e-05, %v639_v57 }
 0x143   : > { %v556_v41 = vpop.xlane.xlu1 %555  ;;  %v559_v51 = vpop.xlane.xlu0 %558 }
 0x144   : > { %2279 = vrsqrt.f32 %v670_v59  ;;  %v640_v38 = vmul.f32 0.03125, %v556_v41  ;;  %v641_v47 = vmul.f32 0.03125, %v559_v51 }
 0x145   : > { %2281 = vrsqrt.f32 %v671_v25 }
 0x146   : > { %v672_v37 = vadd.f32 1e-05, %v640_v38  ;;  %v673_v7 = vadd.f32 1e-05, %v641_v47 }
 0x147   : > { %v562_v52 = vpop.xlane.xlu1 %561  ;;  %v565_v62 = vpop.xlane.xlu0 %564 }
 0x148   : > { %2283 = vrsqrt.f32 %v672_v37  ;;  %v642_v14 = vmul.f32 0.03125, %v562_v52  ;;  %v643_v55 = vmul.f32 0.03125, %v565_v62 }
 0x149   : > { %v2274_v31 = vpop.eup %2273  ;;  %2285 = vrsqrt.f32 %v673_v7 }
 0x14a   : > { %v674_v6 = vadd.f32 1e-05, %v642_v14  ;;  %v675_v46 = vadd.f32 1e-05, %v643_v55  ;;  %v731_v32 = vmul.f32 %v2274_v31, %v2705_v34  ;;  %v2913_v31 = vld [vmem:[%s3545_s2] ss:$0 sm:$0xff] }
 0x14b   : > { %v568_v23 = vpop.xlane.xlu1 %567  ;;  %v571_v57 = vpop.xlane.xlu0 %570 }
 0x14c   : > { %2287 = vrsqrt.f32 %v674_v6  ;;  %v644_v59 = vmul.f32 0.03125, %v568_v23  ;;  %v645_v25 = vmul.f32 0.03125, %v571_v57  ;;  %v770_v37 = vmul.f32 %v2906_v20, %v731_v32 }
 0x14d   : > { %v2276_v41 = vpop.eup %2275  ;;  %2289 = vrsqrt.f32 %v675_v46 }
 0x14e   : > { %v2278_v51 = vpop.eup %2277  ;;  %v676_v38 = vadd.f32 1e-05, %v644_v59  ;;  %v677_v47 = vadd.f32 1e-05, %v645_v25  ;;  %v732_v7 = vmul.f32 %v2276_v41, %v2715_v48  ;;  %v809_v32 = vadd.f32 %v2913_v31, %v770_v37 }
 0x14f   : > { %v574_v34 = vpop.xlane.xlu1 %573  ;;  %v577_v52 = vpop.xlane.xlu0 %576  ;;  %v733_v62 = vmul.f32 %v2278_v51, %v2708_v35 }
 0x150   : > { %2291 = vrsqrt.f32 %v676_v38  ;;  %v646_v14 = vmul.f32 0.03125, %v574_v34  ;;  %v647_v55 = vmul.f32 0.03125, %v577_v52  ;;  %v771_v6 = vmul.f32 %v2906_v20, %v732_v7 }
 0x151   : > { %v2280_v46 = vpop.eup %2279  ;;  %2293 = vrsqrt.f32 %v677_v47  ;;  %v772_v35 = vmul.f32 %v2906_v20, %v733_v62 }
 0x152   : > { %v2282_v23 = vpop.eup %2281  ;;  %v678_v48 = vadd.f32 1e-05, %v646_v14  ;;  %v679_v57 = vadd.f32 1e-05, %v647_v55  ;;  %v810_v59 = vadd.f32 %v2913_v31, %v771_v6  ;;  %v734_v25 = vmul.f32 %v2280_v46, %v2718_v49 }
 0x153   : > { %v580_v41 = vpop.xlane.xlu1 %579  ;;  %v583_v36 = vpop.xlane.xlu0 %582  ;;  %v735_v51 = vmul.f32 %v2282_v23, %v2727_v0  ;;  %v811_v0 = vadd.f32 %v2913_v31, %v772_v35 }
 0x154   : > { %2295 = vrsqrt.f32 %v678_v48  ;;  %v648_v38 = vmul.f32 0.03125, %v580_v41  ;;  %v649_v7 = vmul.f32 0.03125, %v583_v36  ;;  %v841_v34 = vpack.c.bf16 %v810_v59, %v809_v32 }
 0x155   : > { %v2284_v47 = vpop.eup %2283  ;;  %2297 = vrsqrt.f32 %v679_v57  ;;  %v773_v37 = vmul.f32 %v2906_v20, %v734_v25  ;;  %v774_v52 = vmul.f32 %v2906_v20, %v735_v51 }
 0x156   : > { %v2286_v14 = vpop.eup %2285  ;;  %v680_v55 = vadd.f32 1e-05, %v648_v38  ;;  %v681_v6 = vadd.f32 1e-05, %v649_v7  ;;  %2126 = vmatprep.mubr.msk.bf16.mxu0 %vm345_vm0, %v841_v34  ;;  %v736_v49 = vmul.f32 %v2284_v47, %v2730_v1 }
 0x157   : > { %v586_v62 = vpop.xlane.xlu1 %585  ;;  %v589_v46 = vpop.xlane.xlu0 %588  ;;  %v812_v36 = vadd.f32 %v2913_v31, %v773_v37  ;;  %v737_v32 = vmul.f32 %v2286_v14, %v2739_v28  ;;  %v813_v41 = vadd.f32 %v2913_v31, %v774_v52 }
 0x158   : > { %2299 = vrsqrt.f32 %v680_v55  ;;  %v650_v23 = vmul.f32 0.03125, %v586_v62  ;;  %v651_v48 = vmul.f32 0.03125, %v589_v46  ;;  %v775_v57 = vmul.f32 %v2906_v20, %v736_v49 }
 0x159   : > { %v2288_v59 = vpop.eup %2287  ;;  %2301 = vrsqrt.f32 %v681_v6  ;;  %v842_v25 = vpack.c.bf16 %v812_v36, %v811_v0  ;;  %v776_v47 = vmul.f32 %v2906_v20, %v737_v32 }
 0x15a   : > { %v2290_v51 = vpop.eup %2289  ;;  %v682_v1 = vadd.f32 1e-05, %v650_v23  ;;  %v683_v38 = vadd.f32 1e-05, %v651_v48  ;;  %v814_v7 = vadd.f32 %v2913_v31, %v775_v57  ;;  %v738_v35 = vmul.f32 %v2288_v59, %v2742_v29 }
 0x15b   : > { %2127 = vmatmul.mubr.msk.bf16.vlgmr.msra.gmra.mxu0 %vm345_vm0, %v842_v25  ;;  %v592_v28 = vpop.xlane.xlu1 %591  ;;  %v595_v34 = vpop.xlane.xlu0 %594  ;;  %v739_v37 = vmul.f32 %v2290_v51, %v2751_v50  ;;  %v815_v50 = vadd.f32 %v2913_v31, %v776_v47 }
 0x15c   : > { %2303 = vrsqrt.f32 %v682_v1  ;;  %v652_v14 = vmul.f32 0.03125, %v592_v28  ;;  %v653_v55 = vmul.f32 0.03125, %v595_v34  ;;  %v843_v6 = vpack.c.bf16 %v814_v7, %v813_v41 }
 0x15d   : > { %v2292_v52 = vpop.eup %2291  ;;  %2305 = vrsqrt.f32 %v683_v38  ;;  %v777_v49 = vmul.f32 %v2906_v20, %v738_v35  ;;  %v778_v62 = vmul.f32 %v2906_v20, %v739_v37 }
 0x15e   : > { %v2294_v46 = vpop.eup %2293  ;;  %v684_v29 = vadd.f32 1e-05, %v652_v14  ;;  %v685_v0 = vadd.f32 1e-05, %v653_v55  ;;  %2130 = vmatprep.mubr.msk.bf16.mxu0 %vm345_vm0, %v843_v6  ;;  %v740_v36 = vmul.f32 %v2292_v52, %v2754_v53 }
 0x15f   : > { %v598_v32 = vpop.xlane.xlu1 %597  ;;  %v601_v23 = vpop.xlane.xlu0 %600  ;;  %v816_v48 = vadd.f32 %v2913_v31, %v777_v49  ;;  %v741_v57 = vmul.f32 %v2294_v46, %v2763_v10  ;;  %v817_v38 = vadd.f32 %v2913_v31, %v778_v62 }
 0x160   : > { %2307 = vrsqrt.f32 %v684_v29  ;;  %v654_v59 = vmul.f32 0.03125, %v598_v32  ;;  %v655_v25 = vmul.f32 0.03125, %v601_v23  ;;  %v779_v41 = vmul.f32 %v2906_v20, %v740_v36 }
 0x161   : > { %v2296_v51 = vpop.eup %2295  ;;  %2309 = vrsqrt.f32 %v685_v0  ;;  %v844_v1 = vpack.c.bf16 %v816_v48, %v815_v50  ;;  %v780_v37 = vmul.f32 %v2906_v20, %v741_v57 }
 0x162   : > { %v2298_v7 = vpop.eup %2297  ;;  %v686_v53 = vadd.f32 1e-05, %v654_v59  ;;  %v687_v35 = vadd.f32 1e-05, %v655_v25  ;;  %v818_v28 = vadd.f32 %v2913_v31, %v779_v41  ;;  %v742_v34 = vmul.f32 %v2296_v51, %v2766_v15 }
 0x163   : > { %2131 = vmatmul.mubr.msk.bf16.gmra.mxu0 %vm345_vm0, %v844_v1  ;;  %v604_v10 = vpop.xlane.xlu1 %603  ;;  %v607_v47 = vpop.xlane.xlu0 %606  ;;  %v743_v14 = vmul.f32 %v2298_v7, %v2775_v40  ;;  %v819_v40 = vadd.f32 %v2913_v31, %v780_v37 }
 0x164   : > { %2311 = vrsqrt.f32 %v686_v53  ;;  %v656_v55 = vmul.f32 0.03125, %v604_v10  ;;  %v657_v6 = vmul.f32 0.03125, %v607_v47  ;;  %v845_v52 = vpack.c.bf16 %v818_v28, %v817_v38 }
 0x165   : > { %v2300_v49 = vpop.eup %2299  ;;  %2313 = vrsqrt.f32 %v687_v35  ;;  %v781_v62 = vmul.f32 %v2906_v20, %v742_v34  ;;  %v782_v46 = vmul.f32 %v2906_v20, %v743_v14 }
 0x166   : > { %v2302_v29 = vpop.eup %2301  ;;  %v688_v15 = vadd.f32 1e-05, %v656_v55  ;;  %v689_v0 = vadd.f32 1e-05, %v657_v6  ;;  %2134 = vmatprep.mubr.msk.bf16.mxu0 %vm345_vm0, %v845_v52  ;;  %v744_v36 = vmul.f32 %v2300_v49, %v2778_v43 }
 0x167   : > { %v610_v32 = vpop.xlane.xlu1 %609  ;;  %v613_v23 = vpop.xlane.xlu0 %612  ;;  %v820_v50 = vadd.f32 %v2913_v31, %v781_v62  ;;  %v745_v48 = vmul.f32 %v2302_v29, %v2787_v8  ;;  %v821_v1 = vadd.f32 %v2913_v31, %v782_v46 }
 0x168   : > { %2315 = vrsqrt.f32 %v688_v15  ;;  %v658_v57 = vmul.f32 0.03125, %v610_v32  ;;  %v659_v59 = vmul.f32 0.03125, %v613_v23  ;;  %v783_v25 = vmul.f32 %v2906_v20, %v744_v36 }
 0x169   : > { %v2304_v41 = vpop.eup %2303  ;;  %2317 = vrsqrt.f32 %v689_v0  ;;  %v846_v51 = vpack.c.bf16 %v820_v50, %v819_v40  ;;  %v784_v34 = vmul.f32 %v2906_v20, %v745_v48 }
 0x16a   : > { %v2306_v38 = vpop.eup %2305  ;;  %v690_v43 = vadd.f32 1e-05, %v658_v57  ;;  %v691_v7 = vadd.f32 1e-05, %v659_v59  ;;  %v822_v53 = vadd.f32 %v2913_v31, %v783_v25  ;;  %v746_v35 = vmul.f32 %v2304_v41, %v2790_v9 }
 0x16b   : > { %2135 = vmatmul.mubr.msk.bf16.gmra.mxu0 %vm345_vm0, %v846_v51  ;;  %v616_v8 = vpop.xlane.xlu1 %615  ;;  %v619_v28 = vpop.xlane.xlu0 %618  ;;  %v747_v10 = vmul.f32 %v2306_v38, %v2799_v44  ;;  %v823_v44 = vadd.f32 %v2913_v31, %v784_v34 }
 0x16c   : > { %2319 = vrsqrt.f32 %v690_v43  ;;  %v660_v47 = vmul.f32 0.03125, %v616_v8  ;;  %v661_v37 = vmul.f32 0.03125, %v619_v28  ;;  %v847_v14 = vpack.c.bf16 %v822_v53, %v821_v1 }
 0x16d   : > { %v2308_v55 = vpop.eup %2307  ;;  %2321 = vrsqrt.f32 %v691_v7  ;;  %v785_v6 = vmul.f32 %v2906_v20, %v746_v35  ;;  %v786_v52 = vmul.f32 %v2906_v20, %v747_v10 }
 0x16e   : > { %v2310_v49 = vpop.eup %2309  ;;  %v692_v9 = vadd.f32 1e-05, %v660_v47  ;;  %v693_v62 = vadd.f32 1e-05, %v661_v37  ;;  %2138 = vmatprep.mubr.msk.bf16.mxu0 %vm345_vm0, %v847_v14  ;;  %v748_v46 = vmul.f32 %v2308_v55, %v2802_v45 }
 0x16f   : > { %v622_v29 = vpop.xlane.xlu1 %621  ;;  %v625_v15 = vpop.xlane.xlu0 %624  ;;  %v824_v0 = vadd.f32 %v2913_v31, %v785_v6  ;;  %v749_v36 = vmul.f32 %v2310_v49, %v2811_v24  ;;  %v825_v57 = vadd.f32 %v2913_v31, %v786_v52 }
 0x170   : > { %2323 = vrsqrt.f32 %v692_v9  ;;  %v662_v32 = vmul.f32 0.03125, %v622_v29  ;;  %v663_v23 = vmul.f32 0.03125, %v625_v15  ;;  %v787_v40 = vmul.f32 %v2906_v20, %v748_v46 }
 0x171   : > { %v2312_v50 = vpop.eup %2311  ;;  %2325 = vrsqrt.f32 %v693_v62  ;;  %v848_v48 = vpack.c.bf16 %v824_v0, %v823_v44  ;;  %v788_v38 = vmul.f32 %v2906_v20, %v749_v36 }
 0x172   : > { %v2314_v59 = vpop.eup %2313  ;;  %v694_v45 = vadd.f32 1e-05, %v662_v32  ;;  %v695_v25 = vadd.f32 1e-05, %v663_v23  ;;  %v826_v41 = vadd.f32 %v2913_v31, %v787_v40  ;;  %v750_v51 = vmul.f32 %v2312_v50, %v2814_v30 }
 0x173   : > { %2139 = vmatmul.mubr.msk.bf16.gmra.mxu0 %vm345_vm0, %v848_v48  ;;  %v628_v24 = vpop.xlane.xlu1 %627  ;;  %v631_v1 = vpop.xlane.xlu0 %630  ;;  %v751_v43 = vmul.f32 %v2314_v59, %v2823_v42  ;;  %v827_v42 = vadd.f32 %v2913_v31, %v788_v38 }
 0x174   : > { %2327 = vrsqrt.f32 %v694_v45  ;;  %v664_v7 = vmul.f32 0.03125, %v628_v24  ;;  %v665_v53 = vmul.f32 0.03125, %v631_v1  ;;  %v849_v35 = vpack.c.bf16 %v826_v41, %v825_v57 }
 0x175   : > { %v2316_v8 = vpop.eup %2315  ;;  %2329 = vrsqrt.f32 %v695_v25  ;;  %v789_v28 = vmul.f32 %v2906_v20, %v750_v51  ;;  %v790_v34 = vmul.f32 %v2906_v20, %v751_v43 }
 0x176   : > { %v2318_v10 = vpop.eup %2317  ;;  %v696_v30 = vadd.f32 1e-05, %v664_v7  ;;  %v697_v47 = vadd.f32 1e-05, %v665_v53  ;;  %2142 = vmatprep.mubr.msk.bf16.mxu0 %vm345_vm0, %v849_v35  ;;  %v752_v37 = vmul.f32 %v2316_v8, %v2826_v63 }
 0x177   : > { %v634_v14 = vpop.xlane.xlu1 %633  ;;  %v828_v55 = vadd.f32 %v2913_v31, %v789_v28  ;;  %v753_v6 = vmul.f32 %v2318_v10, %v2838_v58  ;;  %v829_v46 = vadd.f32 %v2913_v31, %v790_v34 }
 0x178   : > { %2331 = vrsqrt.f32 %v696_v30  ;;  %v666_v52 = vmul.f32 0.03125, %v634_v14  ;;  %v791_v49 = vmul.f32 %v2906_v20, %v752_v37 }
 0x179   : > { %v2320_v9 = vpop.eup %2319  ;;  %2333 = vrsqrt.f32 %v697_v47  ;;  %v850_v62 = vpack.c.bf16 %v828_v55, %v827_v42  ;;  %v792_v0 = vmul.f32 %v2906_v20, %v753_v6 }
 0x17a   : > { %v2322_v29 = vpop.eup %2321  ;;  %v698_v15 = vadd.f32 1e-05, %v666_v52  ;;  %v830_v63 = vadd.f32 %v2913_v31, %v791_v49  ;;  %v754_v44 = vmul.f32 %v2320_v9, %v2841_v39  ;;  %v2268_v49 = vld [vmem:[%s3548_s5 + $0x20] sm:$0xff]   ;;  %v2269_v9 = vld [vmem:[%s3548_s5 + $0x18] sm:$0xff]  }
 0x17b   : > { %2143 = vmatmul.mubr.msk.bf16.gmra.mxu0 %vm345_vm0, %v850_v62  ;;  %v755_v58 = vmul.f32 %v2322_v29, %v2853_v54  ;;  %v831_v50 = vadd.f32 %v2913_v31, %v792_v0  ;;  %v2270_v62 = vld [vmem:[%s3548_s5 + $0x10] sm:$0xff]   ;;  %v2272_v29 = vld [vmem:[%s3548_s5] sm:$0xff]  }
 0x17c   : > { %2335 = vrsqrt.f32 %v698_v15  ;;  %v851_v36 = vpack.c.bf16 %v830_v63, %v829_v46  ;;  %v793_v32 = vmul.f32 %v2906_v20, %v754_v44  ;;  %v2271_v46 = vld [vmem:[%s3548_s5 + $0x8] sm:$0xff]   ;;  %v3051_v15 = vld [vmem:[%s3547_s4] ss:$0 sm:$0xff] }
 0x17d   : > { %v2324_v23 = vpop.eup %2323  ;;  %v794_v57 = vmul.f32 %v2906_v20, %v755_v58 }
 0x17e   : > { %v2326_v40 = vpop.eup %2325  ;;  %2146 = vmatprep.mubr.msk.bf16.mxu0 %vm345_vm0, %v851_v36  ;;  %v832_v48 = vadd.f32 %v2913_v31, %v793_v32  ;;  %v756_v39 = vmul.f32 %v2324_v23, %v2856_v33 }
 0x17f   : > { %v757_v59 = vmul.f32 %v2326_v40, %v2865_v60  ;;  %v833_v51 = vadd.f32 %v2913_v31, %v794_v57 }
 0x180   : > { %v852_v45 = vpack.c.bf16 %v832_v48, %v831_v50  ;;  %v795_v54 = vmul.f32 %v2906_v20, %v756_v39 }
 0x181   : > { %v2328_v25 = vpop.eup %2327  ;;  %v796_v38 = vmul.f32 %v2906_v20, %v757_v59 }
 0x182   : > { %v2330_v41 = vpop.eup %2329  ;;  %v834_v24 = vadd.f32 %v2913_v31, %v795_v54  ;;  %v758_v1 = vmul.f32 %v2328_v25, %v2868_v18 }
 0x183   : > { %2147 = vmatmul.mubr.msk.bf16.gmra.mxu0 %vm345_vm0, %v852_v45  ;;  %v759_v33 = vmul.f32 %v2330_v41, %v2877_v61  ;;  %v835_v35 = vadd.f32 %v2913_v31, %v796_v38 }
 0x184   : > { %v853_v43 = vpack.c.bf16 %v834_v24, %v833_v51  ;;  %v797_v60 = vmul.f32 %v2906_v20, %v758_v1 }
 0x185   : > { %v2332_v7 = vpop.eup %2331  ;;  %v798_v18 = vmul.f32 %v2906_v20, %v759_v33 }
 0x186   : > { %v2334_v53 = vpop.eup %2333  ;;  %2150 = vmatprep.mubr.msk.bf16.mxu0 %vm345_vm0, %v853_v43  ;;  %v836_v8 = vadd.f32 %v2913_v31, %v797_v60  ;;  %v760_v28 = vmul.f32 %v2332_v7, %v2880_v56 }
 0x187   : > { %v761_v34 = vmul.f32 %v2334_v53, %v2889_v13  ;;  %v837_v47 = vadd.f32 %v2913_v31, %v798_v18 }
 0x188   : > { %v854_v10 = vpack.c.bf16 %v836_v8, %v835_v35  ;;  %v799_v61 = vmul.f32 %v2906_v20, %v760_v28 }
 0x189   : > { %v2336_v30 = vpop.eup %2335  ;;  %v800_v42 = vmul.f32 %v2906_v20, %v761_v34 }
 0x18a   : > { %v838_v37 = vadd.f32 %v2913_v31, %v799_v61  ;;  %v762_v14 = vmul.f32 %v2336_v30, %v2892_v19  ;;  %v2265_v19 = vld [vmem:[%s3548_s5 + $0x38] sm:$0xff]  }
 0x18b   : > { %2151 = vmatmul.mubr.msk.bf16.gmra.mxu0 %vm345_vm0, %v854_v10  ;;  %v839_v13 = vadd.f32 %v2913_v31, %v800_v42  ;;  %2158 = vmatprep.subr.bf16.mxu0 %v2265_v19 }
 0x18c   : > { %v855_v55 = vpack.c.bf16 %v838_v37, %v837_v47  ;;  %v801_v56 = vmul.f32 %v2906_v20, %v762_v14  ;;  %2206 = vmatprep.subr.bf16.mxu1 %v2265_v19  ;;  %2159 = vmatpush3.bf16.msra.mxu0 %v2265_v19  ;;  %v2266_v20 = vld [vmem:[%s3548_s5 + $0x30] sm:$0xff]  }
 0x18d   : > { %2214 = vmatpush3.bf16.msra.mxu1 %v2265_v19  ;;  %2160 = vmatprep.subr.bf16.mxu0 %v2266_v20 }
 0x18e   : > { %2154 = vmatprep.mubr.msk.bf16.mxu0 %vm345_vm0, %v855_v55  ;;  %v840_v6 = vadd.f32 %v2913_v31, %v801_v56  ;;  %2207 = vmatprep.subr.bf16.mxu1 %v2266_v20  ;;  %v2267_v31 = vld [vmem:[%s3548_s5 + $0x28] sm:$0xff]  }
 0x190   : > { %v856_v52 = vpack.c.bf16 %v840_v6, %v839_v13  ;;  %2161 = vmatpush3.bf16.msra.mxu0 %v2266_v20 }
 0x191   : > { %2215 = vmatpush3.bf16.msra.mxu1 %v2266_v20  ;;  %2162 = vmatprep.subr.bf16.mxu0 %v2267_v31 }
 0x192   : > { %2208 = vmatprep.subr.bf16.mxu1 %v2267_v31 }
 0x193   : > { %2155 = vmatmul.mubr.msk.bf16.gmra.mxu0 %vm345_vm0, %v856_v52 }
 0x194   : > { %2163 = vmatpush3.bf16.msra.mxu0 %v2267_v31 }
 0x195   : > { %2216 = vmatpush3.bf16.msra.mxu1 %v2267_v31  ;;  %2164 = vmatprep.subr.bf16.mxu0 %v2268_v49 }
 0x196   : > { %2209 = vmatprep.subr.bf16.mxu1 %v2268_v49 }
 0x198   : > { %2165 = vmatpush3.bf16.msra.mxu0 %v2268_v49 }
 0x199   : > { %2217 = vmatpush3.bf16.msra.mxu1 %v2268_v49  ;;  %2166 = vmatprep.subr.bf16.mxu0 %v2269_v9 }
 0x19a   : > { %2210 = vmatprep.subr.bf16.mxu1 %v2269_v9 }
 0x19c   : > { %2167 = vmatpush3.bf16.msra.mxu0 %v2269_v9 }
 0x19d   : > { %2218 = vmatpush3.bf16.msra.mxu1 %v2269_v9  ;;  %2168 = vmatprep.subr.bf16.mxu0 %v2270_v62 }
 0x19e   : > { %2211 = vmatprep.subr.bf16.mxu1 %v2270_v62 }
 0x1a0   : > { %2169 = vmatpush3.bf16.msra.mxu0 %v2270_v62 }
 0x1a1   : > { %2219 = vmatpush3.bf16.msra.mxu1 %v2270_v62  ;;  %2170 = vmatprep.subr.bf16.mxu0 %v2271_v46 }
 0x1a2   : > { %2212 = vmatprep.subr.bf16.mxu1 %v2271_v46 }
 0x1a4   : > { %2171 = vmatpush3.bf16.msra.mxu0 %v2271_v46 }
 0x1a5   : > { %2220 = vmatpush3.bf16.msra.mxu1 %v2271_v46  ;;  %2172 = vmatprep.subr.bf16.mxu0 %v2272_v29 }
 0x1a6   : > { %2213 = vmatprep.subr.bf16.mxu1 %v2272_v29 }
 0x1a8   : > { %2173 = vmatpush3.bf16.msra.mxu0 %v2272_v29 }
 0x1a9   : > { %2221 = vmatpush3.bf16.msra.mxu1 %v2272_v29 }
 0x21b   : > { %v2128_v63 = vpop.f32.mrf.mxu0 }
 0x21c   : > { %v3054_v44 = vadd.f32 %v2128_v63, %v3051_v15 }
 0x21d   : > { %v962_v0 = vpop.f32.mrf.mxu0 }
 0x21e   : > { %v1123_v58 = vmul.f32 0.044715, %v3054_v44  ;;  %v3058_v36 = vadd.f32 %v3051_v15, %v962_v0 }
 0x21f   : > { %v2129_v32 = vpop.f32.mrf.mxu0 }
 0x220   : > { %v1155_v23 = vmul.f32 %v1123_v58, %v3054_v44  ;;  %v1121_v40 = vmul.f32 0.044715, %v3058_v36  ;;  %v3063_v50 = vadd.f32 %v2129_v32, %v3051_v15 }
 0x221   : > { %v965_v48 = vpop.f32.mrf.mxu0 }
 0x222   : > { %v1187_v39 = vmul.f32 %v1155_v23, %v3054_v44  ;;  %v1153_v57 = vmul.f32 %v1121_v40, %v3058_v36  ;;  %v1124_v59 = vmul.f32 0.044715, %v3063_v50  ;;  %v3069_v45 = vadd.f32 %v3051_v15, %v965_v48 }
 0x223   : > { %v2132_v54 = vpop.f32.mrf.mxu0 }
 0x224   : > { %v1219_v25 = vadd.f32 %v1187_v39, %v3054_v44  ;;  %v1185_v41 = vmul.f32 %v1153_v57, %v3058_v36  ;;  %v1156_v51 = vmul.f32 %v1124_v59, %v3063_v50  ;;  %v3075_v24 = vadd.f32 %v2132_v54, %v3051_v15 }
 0x225   : > { %v1122_v1 = vmul.f32 0.044715, %v3069_v45  ;;  %v978_v38 = vpop.f32.mrf.mxu0 }
 0x226   : > { %v1251_v33 = vmul.f32 0.7978846, %v1219_v25  ;;  %v1188_v43 = vmul.f32 %v1156_v51, %v3063_v50  ;;  %v1127_v60 = vmul.f32 0.044715, %v3075_v24  ;;  %v3081_v7 = vadd.f32 %v3051_v15, %v978_v38 }
 0x227   : > { %v1154_v53 = vmul.f32 %v1122_v1, %v3069_v45  ;;  %v2133_v35 = vpop.f32.mrf.mxu0  ;;  %v1217_v8 = vadd.f32 %v1185_v41, %v3058_v36 }
 0x228   : > { %v1220_v28 = vadd.f32 %v1188_v43, %v3063_v50  ;;  %v1159_v18 = vmul.f32 %v1127_v60, %v3075_v24  ;;  %v1125_v34 = vmul.f32 0.044715, %v3081_v7  ;;  %2337 = vtanh.f32 %v1251_v33 }
 0x229   : > { %v1186_v10 = vmul.f32 %v1154_v53, %v3069_v45  ;;  %v3090_v61 = vadd.f32 %v2133_v35, %v3051_v15  ;;  %v981_v30 = vpop.f32.mrf.mxu0  ;;  %v1249_v47 = vmul.f32 0.7978846, %v1217_v8 }
 0x22a   : > { %v1252_v37 = vmul.f32 0.7978846, %v1220_v28  ;;  %v1191_v14 = vmul.f32 %v1159_v18, %v3075_v24  ;;  %v3094_v42 = vadd.f32 %v3051_v15, %v981_v30  ;;  %v1157_v55 = vmul.f32 %v1125_v34, %v3081_v7 }
 0x22b   : > { %v1128_v56 = vmul.f32 0.044715, %v3090_v61  ;;  %v2136_v13 = vpop.f32.mrf.mxu0  ;;  %v1218_v6 = vadd.f32 %v1186_v10, %v3069_v45  ;;  %2339 = vtanh.f32 %v1249_v47  ;;  %v1091_v28 = vmul.f32 0.5, %v3054_v44 }
 0x22c   : > { %2341 = vtanh.f32 %v1252_v37  ;;  %v1126_v52 = vmul.f32 0.044715, %v3094_v42  ;;  %v3101_v19 = vadd.f32 %v2136_v13, %v3051_v15  ;;  %v1189_v9 = vmul.f32 %v1157_v55, %v3081_v7 }
 0x22d   : > { %v1160_v20 = vmul.f32 %v1128_v56, %v3090_v61  ;;  %v994_v31 = vpop.f32.mrf.mxu0  ;;  %v1250_v49 = vmul.f32 0.7978846, %v1218_v6  ;;  %v1223_v62 = vadd.f32 %v1191_v14, %v3075_v24  ;;  %v1089_v34 = vmul.f32 0.5, %v3058_v36 }
 0x22e   : > { %v1131_v46 = vmul.f32 0.044715, %v3101_v19  ;;  %v3108_v29 = vadd.f32 %v3051_v15, %v994_v31  ;;  %v1158_v63 = vmul.f32 %v1126_v52, %v3094_v42  ;;  %v1221_v32 = vadd.f32 %v1189_v9, %v3081_v7 }
 0x22f   : > { %v1192_v0 = vmul.f32 %v1160_v20, %v3090_v61  ;;  %v2137_v58 = vpop.f32.mrf.mxu0  ;;  %2343 = vtanh.f32 %v1250_v49  ;;  %v1255_v23 = vmul.f32 0.7978846, %v1223_v62  ;;  %v1092_v47 = vmul.f32 0.5, %v3063_v50 }
 0x230   : > { %v1163_v40 = vmul.f32 %v1131_v46, %v3101_v19  ;;  %v1129_v48 = vmul.f32 0.044715, %v3108_v29  ;;  %v3116_v39 = vadd.f32 %v2137_v58, %v3051_v15  ;;  %v1190_v57 = vmul.f32 %v1158_v63, %v3094_v42 }
 0x231   : > { %v997_v59 = vpop.f32.mrf.mxu0  ;;  %v1253_v54 = vmul.f32 0.7978846, %v1221_v32  ;;  %v1224_v25 = vadd.f32 %v1192_v0, %v3090_v61  ;;  %2345 = vtanh.f32 %v1255_v23  ;;  %v1090_v44 = vmul.f32 0.5, %v3069_v45 }
 0x232   : > { %v1161_v41 = vmul.f32 %v1129_v48, %v3108_v29  ;;  %v1132_v51 = vmul.f32 0.044715, %v3116_v39  ;;  %v3123_v1 = vadd.f32 %v3051_v15, %v997_v59  ;;  %v1222_v33 = vadd.f32 %v1190_v57, %v3094_v42 }
 0x233   : > { %v2140_v38 = vpop.f32.mrf.mxu0  ;;  %2347 = vtanh.f32 %v1253_v54  ;;  %v1256_v43 = vmul.f32 0.7978846, %v1224_v25  ;;  %v1195_v60 = vmul.f32 %v1163_v40, %v3101_v19  ;;  %v3145_v50 = vmul.f32 0.5, %v3081_v7 }
 0x234   : > { %v1193_v53 = vmul.f32 %v1161_v41, %v3108_v29  ;;  %v1164_v35 = vmul.f32 %v1132_v51, %v3116_v39  ;;  %v1130_v8 = vmul.f32 0.044715, %v3123_v1  ;;  %v1254_v10 = vmul.f32 0.7978846, %v1222_v33 }
 0x235   : > { %v1010_v18 = vpop.f32.mrf.mxu0  ;;  %2349 = vtanh.f32 %v1256_v43  ;;  %v2338_v30 = vpop.eup %2337  ;;  %v3135_v14 = vadd.f32 %v2140_v38, %v3051_v15  ;;  %v3148_v20 = vmul.f32 0.5, %v3075_v24  ;;  %v1227_v31 = vadd.f32 %v1195_v60, %v3101_v19 }
 0x236   : > { %v1162_v37 = vmul.f32 %v1130_v8, %v3123_v1  ;;  %v3138_v55 = vadd.f32 %v3051_v15, %v1010_v18  ;;  %v1196_v56 = vmul.f32 %v1164_v35, %v3116_v39  ;;  %2351 = vtanh.f32 %v1254_v10 }
 0x237   : > { %v2141_v13 = vpop.f32.mrf.mxu0  ;;  %v1225_v36 = vadd.f32 %v1193_v53, %v3108_v29  ;;  %v3156_v46 = vmul.f32 0.5, %v3090_v61  ;;  %v1135_v0 = vmul.f32 0.044715, %v3135_v14  ;;  %v3163_v58 = vmul.f32 0.5, %v3094_v42 }
 0x238   : > { %v2340_v6 = vpop.eup %2339  ;;  %v1194_v52 = vmul.f32 %v1162_v37, %v3123_v1  ;;  %v1133_v9 = vmul.f32 0.044715, %v3138_v55  ;;  %v3153_v62 = vadd.f32 %v2141_v13, %v3051_v15  ;;  %v1228_v48 = vadd.f32 %v1196_v56, %v3116_v39 }
 0x239   : > { %v2342_v49 = vpop.eup %2341  ;;  %v1013_v45 = vpop.f32.mrf.mxu0  ;;  %v1257_v63 = vmul.f32 0.7978846, %v1225_v36  ;;  %v1313_v24 = vadd.f32 1.0, %v2340_v6  ;;  %v1315_v59 = vadd.f32 1.0, %v2338_v30  ;;  %v3169_v54 = vmul.f32 0.5, %v3101_v19 }
 0x23a   : > { %v3160_v7 = vadd.f32 %v3051_v15, %v1013_v45  ;;  %v1316_v23 = vadd.f32 1.0, %v2342_v49  ;;  %v1226_v40 = vadd.f32 %v1194_v52, %v3123_v1  ;;  %v1259_v25 = vmul.f32 0.7978846, %v1227_v31 }
 0x23b   : > { %v2144_v32 = vpop.f32.mrf.mxu0  ;;  %2353 = vtanh.f32 %v1257_v63  ;;  %v1165_v41 = vmul.f32 %v1133_v9, %v3138_v55  ;;  %v1136_v42 = vmul.f32 0.044715, %v3153_v62  ;;  %v1345_v60 = vmul.f32 %v1313_v24, %v1089_v34 }
 0x23c   : > { %v2344_v57 = vpop.eup %2343  ;;  %v1134_v61 = vmul.f32 0.044715, %v3160_v7  ;;  %v1258_v33 = vmul.f32 0.7978846, %v1226_v40  ;;  %v3174_v43 = vadd.f32 %v2144_v32, %v3051_v15  ;;  %v1348_v53 = vmul.f32 %v1316_v23, %v1092_v47 }
 0x23d   : > { %v1026_v51 = vpop.f32.mrf.mxu0  ;;  %v1314_v38 = vadd.f32 1.0, %v2344_v57  ;;  %v3177_v35 = vmul.f32 0.5, %v3108_v29  ;;  %v1260_v30 = vmul.f32 0.7978846, %v1228_v48  ;;  %v1167_v56 = vmul.f32 %v1135_v0, %v3135_v14 }
 0x23e   : > { %v2346_v8 = vpop.eup %2345  ;;  %v1166_v19 = vmul.f32 %v1134_v61, %v3160_v7  ;;  %2355 = vtanh.f32 %v1258_v33  ;;  %v3182_v13 = vadd.f32 %v3051_v15, %v1026_v51  ;;  %v1347_v34 = vmul.f32 %v1315_v59, %v1091_v28 }
 0x23f   : > { %v2145_v18 = vpop.f32.mrf.mxu0  ;;  %v1346_v10 = vmul.f32 %v1314_v38, %v1090_v44  ;;  %v1197_v29 = vmul.f32 %v1165_v41, %v3138_v55  ;;  %v1168_v47 = vmul.f32 %v1136_v42, %v3153_v62  ;;  %2357 = vtanh.f32 %v1259_v25 }
 0x240   : > { %v2348_v37 = vpop.eup %2347  ;;  %v3185_v36 = vadd.f32 %v2145_v18, %v3051_v15  ;;  %v1139_v31 = vmul.f32 0.044715, %v3174_v43  ;;  %v1378_v9 = vpack.c.bf16 %v1348_v53, %v1347_v34  ;;  %v1319_v45 = vadd.f32 1.0, %v2346_v8 }
 0x241   : > { %v1029_v6 = vpop.f32.mrf.mxu0  ;;  %v1377_v52 = vpack.c.bf16 %v1346_v10, %v1345_v60  ;;  %v1198_v63 = vmul.f32 %v1166_v19, %v3160_v7  ;;  %v1317_v28 = vadd.f32 1.0, %v2348_v37  ;;  %2359 = vtanh.f32 %v1260_v30 }
 0x242   : > { %v2350_v44 = vpop.eup %2349  ;;  %v3191_v49 = vadd.f32 %v3051_v15, %v1029_v6  ;;  %v1137_v23 = vmul.f32 0.044715, %v3182_v13  ;;  %v1140_v40 = vmul.f32 0.044715, %v3185_v36  ;;  %v3200_v57 = vmul.f32 0.5, %v3116_v39 }
 0x243   : > { %2174 = vmatprep.mubr.bf16.mxu0 %v1377_v52  ;;  %v2148_v0 = vpop.f32.mrf.mxu0  ;;  %v1320_v24 = vadd.f32 1.0, %v2350_v44  ;;  %v2352_v32 = vpop.eup %2351  ;;  %v1199_v61 = vmul.f32 %v1167_v56, %v3135_v14  ;;  %v1229_v42 = vadd.f32 %v1197_v29, %v3138_v55  ;;  %v1200_v51 = vmul.f32 %v1168_v47, %v3153_v62 }
 0x244   : > { %v3197_v48 = vadd.f32 %v2148_v0, %v3051_v15  ;;  %2175 = vmatmul.mubr.bf16.vlgmr.msra.gmra.mxu0 %v1378_v9  ;;  %v1138_v59 = vmul.f32 0.044715, %v3191_v49  ;;  %v1318_v41 = vadd.f32 1.0, %v2352_v32  ;;  %v1171_v38 = vmul.f32 %v1139_v31, %v3174_v43 }
 0x245   : > { %v1042_v25 = vpop.f32.mrf.mxu0  ;;  %v1351_v33 = vmul.f32 %v1319_v45, %v3148_v20  ;;  %v1352_v60 = vmul.f32 %v1320_v24, %v3156_v46  ;;  %v1349_v39 = vmul.f32 %v1317_v28, %v3145_v50  ;;  %v1230_v19 = vadd.f32 %v1198_v63, %v3160_v7 }
 0x246   : > { %v1350_v8 = vmul.f32 %v1318_v41, %v3163_v58  ;;  %v1261_v18 = vmul.f32 0.7978846, %v1229_v42  ;;  %v1169_v30 = vmul.f32 %v1137_v23, %v3182_v13  ;;  %v1172_v37 = vmul.f32 %v1140_v40, %v3185_v36 }
 0x247   : > { %v2149_v53 = vpop.f32.mrf.mxu0  ;;  %v1143_v56 = vmul.f32 0.044715, %v3197_v48  ;;  %v3216_v34 = vadd.f32 %v3051_v15, %v1042_v25  ;;  %v1170_v20 = vmul.f32 %v1138_v59, %v3191_v49  ;;  %v1262_v50 = vmul.f32 0.7978846, %v1230_v19 }
 0x248   : > { %v2354_v10 = vpop.eup %2353  ;;  %v1379_v29 = vpack.c.bf16 %v1350_v8, %v1349_v39  ;;  %2361 = vtanh.f32 %v1261_v18  ;;  %v3220_v58 = vadd.f32 %v2149_v53, %v3051_v15  ;;  %v1380_v6 = vpack.c.bf16 %v1352_v60, %v1351_v33 }
 0x249   : > { %v1045_v46 = vpop.f32.mrf.mxu0  ;;  %v1321_v52 = vadd.f32 1.0, %v2354_v10  ;;  %v3226_v44 = vmul.f32 %v1171_v38, %v3174_v43  ;;  %v1098_v9 = vmul.f32 0.5, %v3123_v1  ;;  %v3230_v45 = vmul.f32 0.5, %v3138_v55 }
 0x24a   : > { %v3223_v47 = vadd.f32 %v3051_v15, %v1045_v46  ;;  %2178 = vmatprep.mubr.bf16.mxu1 %v1379_v29  ;;  %2363 = vtanh.f32 %v1262_v50  ;;  %v1201_v0 = vmul.f32 %v1169_v30, %v3182_v13  ;;  %v1175_v28 = vmul.f32 %v1143_v56, %v3197_v48 }
 0x24b   : > { %v2152_v31 = vpop.f32.mrf.mxu0  ;;  %v2356_v63 = vpop.eup %2355  ;;  %v1141_v24 = vmul.f32 0.044715, %v3216_v34  ;;  %2179 = vmatmul.mubr.bf16.vlgmr.msra.gmra.mxu1 %v1380_v6  ;;  %v3236_v32 = vmul.f32 0.5, %v3160_v7  ;;  %v3239_v23 = vmul.f32 %v1172_v37, %v3185_v36  ;;  %v1231_v55 = vadd.f32 %v1199_v61, %v3135_v14 }
 0x24c   : > { %v1322_v1 = vadd.f32 1.0, %v2356_v63  ;;  %v1232_v59 = vadd.f32 %v1200_v51, %v3153_v62  ;;  %v2358_v25 = vpop.eup %2357  ;;  %v1202_v41 = vmul.f32 %v1170_v20, %v3191_v49  ;;  %v1144_v42 = vmul.f32 0.044715, %v3220_v58 }
 0x24d   : > { %v1058_v40 = vpop.f32.mrf.mxu0  ;;  %v1142_v38 = vmul.f32 0.044715, %v3223_v47  ;;  %v1353_v33 = vmul.f32 %v1321_v52, %v3177_v35  ;;  %v1323_v53 = vadd.f32 1.0, %v2358_v25  ;;  %v1263_v39 = vmul.f32 0.7978846, %v1231_v55 }
 0x24e   : > { %v1354_v60 = vmul.f32 %v1322_v1, %v1098_v9  ;;  %v1264_v8 = vmul.f32 0.7978846, %v1232_v59  ;;  %v2360_v19 = vpop.eup %2359  ;;  %v3248_v18 = vmul.f32 %v1175_v28, %v3197_v48  ;;  %v1173_v61 = vmul.f32 %v1141_v24, %v3216_v34 }
 0x24f   : > { %v2153_v7 = vpop.f32.mrf.mxu0  ;;  %v3252_v51 = vadd.f32 %v2152_v31, %v3051_v15  ;;  %v3255_v10 = vmul.f32 0.5, %v3135_v14  ;;  %v3258_v30 = vadd.f32 %v3051_v15, %v1058_v40  ;;  %v1324_v56 = vadd.f32 1.0, %v2360_v19 }
 0x250   : > { %v1381_v37 = vpack.c.bf16 %v1354_v60, %v1353_v33  ;;  %2365 = vtanh.f32 %v1263_v39  ;;  %v1176_v20 = vmul.f32 %v1144_v42, %v3220_v58  ;;  %v1174_v46 = vmul.f32 %v1142_v38, %v3223_v47 }
 0x251   : > { %v1061_v35 = vpop.f32.mrf.mxu0  ;;  %v3263_v29 = vadd.f32 %v2153_v7, %v3051_v15  ;;  %v1355_v6 = vmul.f32 %v1323_v53, %v3169_v54  ;;  %v1356_v52 = vmul.f32 %v1324_v56, %v3200_v57  ;;  %2367 = vtanh.f32 %v1264_v8 }
 0x252   : > { %v3266_v50 = vadd.f32 %v3051_v15, %v1061_v35  ;;  %2182 = vmatprep.mubr.bf16.mxu1 %v1381_v37  ;;  %v1233_v31 = vadd.f32 %v1201_v0, %v3182_v13  ;;  %v1205_v9 = vmul.f32 %v1173_v61, %v3216_v34  ;;  %v1147_v63 = vmul.f32 0.044715, %v3252_v51 }
 0x253   : > { %v2156_v14 = vpop.f32.mrf.mxu0  ;;  %v3274_v28 = vmul.f32 0.5, %v3153_v62  ;;  %v3277_v24 = vmul.f32 0.5, %v3182_v13  ;;  %v1145_v40 = vmul.f32 0.044715, %v3258_v30  ;;  %v1382_v1 = vpack.c.bf16 %v1356_v52, %v1355_v6 }
 0x254   : > { %v1234_v54 = vadd.f32 %v1202_v41, %v3191_v49  ;;  %v1265_v57 = vmul.f32 0.7978846, %v1233_v31  ;;  %v1208_v0 = vmul.f32 %v1176_v20, %v3220_v58  ;;  %v1148_v25 = vmul.f32 0.044715, %v3263_v29 }
 0x255   : > { %v1074_v55 = vpop.f32.mrf.mxu0  ;;  %v2362_v59 = vpop.eup %2361  ;;  %v1146_v42 = vmul.f32 0.044715, %v3266_v50  ;;  %v1206_v13 = vmul.f32 %v1174_v46, %v3223_v47  ;;  %2183 = vmatmul.mubr.bf16.gmra.mxu1 %v1382_v1  ;;  %v1179_v41 = vmul.f32 %v1147_v63, %v3252_v51  ;;  %v3290_v53 = vadd.f32 %v2156_v14, %v3051_v15 }
 0x256   : > { %v3285_v62 = vadd.f32 %v3051_v15, %v1074_v55  ;;  %v1325_v33 = vadd.f32 1.0, %v2362_v59  ;;  %v1266_v7 = vmul.f32 0.7978846, %v1234_v54  ;;  %2369 = vtanh.f32 %v1265_v57 }
 0x257   : > { %v2157_v38 = vpop.f32.mrf.mxu0  ;;  %v2364_v60 = vpop.eup %2363  ;;  %v1177_v19 = vmul.f32 %v1145_v40, %v3258_v30  ;;  %v1235_v37 = vadd.f32 %v3226_v44, %v3174_v43  ;;  %v1180_v56 = vmul.f32 %v1148_v25, %v3263_v29  ;;  %v1178_v20 = vmul.f32 %v1146_v42, %v3266_v50 }
 0x258   : > { %v1149_v39 = vmul.f32 0.044715, %v3285_v62  ;;  %v3294_v8 = vadd.f32 %v2157_v38, %v3051_v15  ;;  %v1326_v35 = vadd.f32 1.0, %v2364_v60  ;;  %2371 = vtanh.f32 %v1266_v7 }
 0x259   : > { %v1077_v61 = vpop.f32.mrf.mxu0  ;;  %v1357_v6 = vmul.f32 %v1325_v33, %v3230_v45  ;;  %v1236_v31 = vadd.f32 %v3239_v23, %v3185_v36  ;;  %v1267_v63 = vmul.f32 0.7978846, %v1235_v37  ;;  %v1211_v40 = vmul.f32 %v1179_v41, %v3252_v51 }
 0x25a   : > { %v1152_v46 = vmul.f32 0.044715, %v3294_v8  ;;  %v3303_v14 = vadd.f32 %v3051_v15, %v1077_v61  ;;  %v1358_v52 = vmul.f32 %v1326_v35, %v3236_v32  ;;  %v1151_v44 = vmul.f32 0.044715, %v3290_v53 }
 0x25b   : > { %v1181_v1 = vmul.f32 %v1149_v39, %v3285_v62  ;;  %v1268_v57 = vmul.f32 0.7978846, %v1236_v31  ;;  %2373 = vtanh.f32 %v1267_v63  ;;  %v1237_v15 = vadd.f32 %v1205_v9, %v3216_v34 }
 0x25c   : > { %v1150_v55 = vmul.f32 0.044715, %v3303_v14  ;;  %v1383_v54 = vpack.c.bf16 %v1358_v52, %v1357_v6  ;;  %v1209_v32 = vmul.f32 %v1177_v19, %v3258_v30  ;;  %v1212_v59 = vmul.f32 %v1180_v56, %v3263_v29 }
 0x25d   : > { %v2366_v45 = vpop.eup %2365  ;;  %v1184_v23 = vmul.f32 %v1152_v46, %v3294_v8  ;;  %v1238_v25 = vadd.f32 %v1206_v13, %v3223_v47  ;;  %v1210_v42 = vmul.f32 %v1178_v20, %v3266_v50  ;;  %2375 = vtanh.f32 %v1268_v57 }
 0x25e   : > { %2186 = vmatprep.mubr.bf16.mxu1 %v1383_v54  ;;  %v1327_v38 = vadd.f32 1.0, %v2366_v45  ;;  %v1269_v33 = vmul.f32 0.7978846, %v1237_v15  ;;  %v2368_v7 = vpop.eup %2367  ;;  %v1182_v60 = vmul.f32 %v1150_v55, %v3303_v14  ;;  %v1239_v9 = vadd.f32 %v3248_v18, %v3197_v48 }
 0x25f   : > { %v1270_v41 = vmul.f32 0.7978846, %v1238_v25  ;;  %v1240_v39 = vadd.f32 %v1208_v0, %v3220_v58  ;;  %v1183_v19 = vmul.f32 %v1151_v44, %v3290_v53  ;;  %v1213_v61 = vmul.f32 %v1181_v1, %v3285_v62 }
 0x260   : > { %v1328_v13 = vadd.f32 1.0, %v2368_v7  ;;  %2377 = vtanh.f32 %v1269_v33  ;;  %v1216_v35 = vmul.f32 %v1184_v23, %v3294_v8  ;;  %v1271_v37 = vmul.f32 0.7978846, %v1239_v9 }
 0x261   : > { %2379 = vtanh.f32 %v1270_v41  ;;  %v1272_v56 = vmul.f32 0.7978846, %v1240_v39  ;;  %v1359_v20 = vmul.f32 %v1327_v38, %v3255_v10  ;;  %v1241_v6 = vadd.f32 %v1209_v32, %v3258_v30 }
 0x262   : > { %v1360_v46 = vmul.f32 %v1328_v13, %v3274_v28  ;;  %v1242_v18 = vadd.f32 %v1210_v42, %v3266_v50  ;;  %v1214_v52 = vmul.f32 %v1182_v60, %v3303_v14  ;;  %2381 = vtanh.f32 %v1271_v37 }
 0x263   : > { %v2370_v0 = vpop.eup %2369  ;;  %v1243_v31 = vadd.f32 %v1211_v40, %v3252_v51  ;;  %v1244_v63 = vadd.f32 %v1212_v59, %v3263_v29  ;;  %2383 = vtanh.f32 %v1272_v56  ;;  %v1273_v55 = vmul.f32 0.7978846, %v1241_v6 }
 0x264   : > { %v1384_v44 = vpack.c.bf16 %v1360_v46, %v1359_v20  ;;  %v1329_v1 = vadd.f32 1.0, %v2370_v0  ;;  %v1274_v10 = vmul.f32 0.7978846, %v1242_v18  ;;  %v1245_v15 = vadd.f32 %v1213_v61, %v3285_v62 }
 0x265   : > { %v2372_v54 = vpop.eup %2371  ;;  %v1275_v57 = vmul.f32 0.7978846, %v1243_v31  ;;  %v1276_v28 = vmul.f32 0.7978846, %v1244_v63  ;;  %v1215_v45 = vmul.f32 %v1183_v19, %v3290_v53  ;;  %v1106_v32 = vmul.f32 0.5, %v3191_v49 }
 0x266   : > { %2187 = vmatmul.mubr.bf16.gmra.mxu1 %v1384_v44  ;;  %v1330_v23 = vadd.f32 1.0, %v2372_v54  ;;  %2385 = vtanh.f32 %v1273_v55  ;;  %v1246_v40 = vadd.f32 %v1214_v52, %v3303_v14  ;;  %v1277_v59 = vmul.f32 0.7978846, %v1245_v15 }
 0x267   : > { %2387 = vtanh.f32 %v1274_v10  ;;  %v1361_v25 = vmul.f32 %v1329_v1, %v3277_v24  ;;  %v1248_v7 = vadd.f32 %v1216_v35, %v3294_v8  ;;  %v1247_v49 = vadd.f32 %v1215_v45, %v3290_v53 }
 0x268   : > { %v1362_v42 = vmul.f32 %v1330_v23, %v1106_v32  ;;  %2389 = vtanh.f32 %v1275_v57  ;;  %v2374_v38 = vpop.eup %2373  ;;  %v1278_v33 = vmul.f32 0.7978846, %v1246_v40  ;;  %v1107_v39 = vmul.f32 0.5, %v3174_v43 }
 0x269   : > { %2391 = vtanh.f32 %v1276_v28  ;;  %v1331_v41 = vadd.f32 1.0, %v2374_v38  ;;  %v1108_v19 = vmul.f32 0.5, %v3185_v36  ;;  %v1280_v61 = vmul.f32 0.7978846, %v1248_v7 }
 0x26a   : > { %v1385_v60 = vpack.c.bf16 %v1362_v42, %v1361_v25  ;;  %2393 = vtanh.f32 %v1277_v59  ;;  %v2376_v9 = vpop.eup %2375  ;;  %v1279_v35 = vmul.f32 0.7978846, %v1247_v49  ;;  %v1109_v6 = vmul.f32 0.5, %v3216_v34 }
 0x26b   : > { %2395 = vtanh.f32 %v1278_v33  ;;  %v1332_v24 = vadd.f32 1.0, %v2376_v9  ;;  %v1363_v56 = vmul.f32 %v1331_v41, %v1107_v39  ;;  %v1110_v18 = vmul.f32 0.5, %v3223_v47 }
 0x26c   : > { %2190 = vmatprep.mubr.bf16.mxu1 %v1385_v60  ;;  %2397 = vtanh.f32 %v1280_v61  ;;  %v1112_v36 = vmul.f32 0.5, %v3220_v58  ;;  %v1111_v34 = vmul.f32 0.5, %v3197_v48  ;;  %v1113_v45 = vmul.f32 0.5, %v3258_v30 }
 0x26d   : > { %v2378_v13 = vpop.eup %2377  ;;  %v1364_v20 = vmul.f32 %v1332_v24, %v1108_v19  ;;  %2399 = vtanh.f32 %v1279_v35  ;;  %v1114_v32 = vmul.f32 0.5, %v3266_v50  ;;  %v1118_v48 = vmul.f32 0.5, %v3303_v14 }
 0x26e   : > { %v2380_v37 = vpop.eup %2379  ;;  %v1333_v46 = vadd.f32 1.0, %v2378_v13  ;;  %v1116_v9 = vmul.f32 0.5, %v3263_v29  ;;  %v1117_v50 = vmul.f32 0.5, %v3285_v62  ;;  %v1115_v19 = vmul.f32 0.5, %v3252_v51 }
 0x26f   : > { %v1334_v0 = vadd.f32 1.0, %v2380_v37  ;;  %v2382_v52 = vpop.eup %2381  ;;  %v1386_v31 = vpack.c.bf16 %v1364_v20, %v1363_v56  ;;  %v1120_v29 = vmul.f32 0.5, %v3294_v8  ;;  %v1119_v62 = vmul.f32 0.5, %v3290_v53 }
 0x270   : > { %v2384_v63 = vpop.eup %2383  ;;  %v1365_v43 = vmul.f32 %v1333_v46, %v1109_v6  ;;  %v1335_v1 = vadd.f32 1.0, %v2382_v52 }
 0x271   : > { %v1366_v44 = vmul.f32 %v1334_v0, %v1110_v18  ;;  %2191 = vmatmul.mubr.bf16.gmra.mxu1 %v1386_v31  ;;  %v1336_v55 = vadd.f32 1.0, %v2384_v63  ;;  %v3358_v0 = vld [vmem:[%s3549_s6] ss:$0 sm:$0xff] }
 0x272   : > { %v1367_v59 = vmul.f32 %v1335_v1, %v1111_v34 }
 0x273   : > { %v2386_v54 = vpop.eup %2385  ;;  %v1387_v10 = vpack.c.bf16 %v1366_v44, %v1365_v43  ;;  %v1368_v28 = vmul.f32 %v1336_v55, %v1112_v36 }
 0x274   : > { %v2388_v57 = vpop.eup %2387  ;;  %v1337_v47 = vadd.f32 1.0, %v2386_v54 }
 0x275   : > { %v2390_v15 = vpop.eup %2389  ;;  %2194 = vmatprep.mubr.bf16.mxu1 %v1387_v10  ;;  %v1338_v23 = vadd.f32 1.0, %v2388_v57  ;;  %v1388_v33 = vpack.c.bf16 %v1368_v28, %v1367_v59 }
 0x276   : > { %v2392_v40 = vpop.eup %2391  ;;  %v1369_v25 = vmul.f32 %v1337_v47, %v1113_v45  ;;  %v1339_v30 = vadd.f32 1.0, %v2390_v15 }
 0x277   : > { %v2394_v58 = vpop.eup %2393  ;;  %v1370_v42 = vmul.f32 %v1338_v23, %v1114_v32  ;;  %v1340_v7 = vadd.f32 1.0, %v2392_v40 }
 0x278   : > { %v2396_v38 = vpop.eup %2395  ;;  %v1341_v41 = vadd.f32 1.0, %v2394_v58  ;;  %v1371_v37 = vmul.f32 %v1339_v30, %v1115_v19 }
 0x279   : > { %v1389_v60 = vpack.c.bf16 %v1370_v42, %v1369_v25  ;;  %v1342_v49 = vadd.f32 1.0, %v2396_v38  ;;  %2195 = vmatmul.mubr.bf16.gmra.mxu1 %v1388_v33  ;;  %v1372_v24 = vmul.f32 %v1340_v7, %v1116_v9  ;;  %v2398_v61 = vpop.eup %2397 }
 0x27a   : > { %v1373_v13 = vmul.f32 %v1341_v41, %v1117_v50  ;;  %v2400_v56 = vpop.eup %2399  ;;  %v1344_v46 = vadd.f32 1.0, %v2398_v61 }
 0x27b   : > { %2198 = vmatprep.mubr.bf16.mxu1 %v1389_v60  ;;  %v1374_v39 = vmul.f32 %v1342_v49, %v1118_v48  ;;  %v1390_v20 = vpack.c.bf16 %v1372_v24, %v1371_v37  ;;  %v1343_v35 = vadd.f32 1.0, %v2400_v56 }
 0x27c   : > { %v1376_v6 = vmul.f32 %v1344_v46, %v1120_v29  ;;  %v3594_v29 = vld [vmem:[#allocation5_spill] sm:$0xff] }
 0x27d   : > { %v1391_v14 = vpack.c.bf16 %v1374_v39, %v1373_v13  ;;  %v1375_v18 = vmul.f32 %v1343_v35, %v1119_v62 }
 0x27f   : > { %v1392_v51 = vpack.c.bf16 %v1376_v6, %v1375_v18  ;;  %v3595_v18 = vld [vmem:[#allocation8_spill] sm:$0xff] }
 0x281   : > { %2199 = vmatmul.mubr.bf16.gmra.mxu1 %v1390_v20 }
 0x282   : > { %2202 = vmatprep.mubr.bf16.mxu1 %v1391_v14 }
 0x289   : > { %2203 = vmatmul.mubr.bf16.gmra.mxu1 %v1392_v51 }
 0x304   : > { %v2176_v52 = vpop.f32.mrf.mxu0 }
 0x305   : > { %v1507_v31 = vadd.f32 %v2176_v52, %v3358_v0 }
 0x306   : > { %v1498_v8 = vpop.f32.mrf.mxu0 }
 0x307   : > { %v1627_v63 = vadd.f32 %v2564_v3, %v1507_v31  ;;  %v1499_v53 = vadd.f32 %v3358_v0, %v1498_v8  ;;  %v3596_v8 = vld [vmem:[#allocation6_spill] sm:$0xff] }
 0x308   : > { %v2177_v43 = vpop.f32.mrf.mxu0 }
 0x309   : > { %v1970_v44 = vpack.c.bf16 %v1627_v63, %v1627_v63  ;;  %v1625_v36 = vadd.f32 %v2562_v2, %v1499_v53  ;;  %v1510_v1 = vadd.f32 %v2177_v43, %v3358_v0 }
 0x30a   : > { %v1501_v55 = vpop.f32.mrf.mxu0 }
 0x30b   : > { %1788 = vst.msk [vmem:[%s3367_s20 + $0x8] sm:$0xf] %vm1785_vm1, %v1970_v44  ;;  %v1968_v54 = vpack.c.bf16 %v1625_v36, %v1625_v36  ;;  %v1628_v3 = vadd.f32 %v2568_v5, %v1510_v1  ;;  %v1502_v10 = vadd.f32 %v3358_v0, %v1501_v55  ;;  %v2180_v57 = vpop.f32.mrf.mxu1  ;;  %v3597_v1 = vld [vmem:[#allocation11_spill] sm:$0xff] }
 0x30c   : > { %v1523_v28 = vadd.f32 %v2180_v57, %v3358_v0  ;;  %v3598_v57 = vld [vmem:[#allocation9_spill] sm:$0xff] }
 0x30d   : > { %1786 = vst.msk [vmem:[%s3367_s20] sm:$0xf] %vm1785_vm1, %v1968_v54  ;;  %v1971_v2 = vpack.c.bf16 %v1628_v3, %v1628_v3  ;;  %v1626_v34 = vadd.f32 %v2566_v4, %v1502_v10  ;;  %v1514_v47 = vpop.f32.mrf.mxu1 }
 0x30e   : > { %v1631_v45 = vadd.f32 %v2588_v16, %v1523_v28  ;;  %v1515_v5 = vadd.f32 %v3358_v0, %v1514_v47 }
 0x30f   : > { %1789 = vst.msk [vmem:[%s3367_s20 + $0xc] sm:$0xf] %vm1785_vm1, %v1971_v2  ;;  %v1969_v15 = vpack.c.bf16 %v1626_v34, %v1626_v34  ;;  %v2181_v32 = vpop.f32.mrf.mxu1 }
 0x310   : > { %v1974_v23 = vpack.c.bf16 %v1631_v45, %v1631_v45  ;;  %v1629_v40 = vadd.f32 %v2579_v11, %v1515_v5  ;;  %v1526_v4 = vadd.f32 %v2181_v32, %v3358_v0 }
 0x311   : > { %1787 = vst.msk [vmem:[%s3367_s20 + $0x4] sm:$0xf] %vm1785_vm1, %v1969_v15  ;;  %v1517_v59 = vpop.f32.mrf.mxu1  ;;  %v3599_v15 = vld [vmem:[#allocation12_spill] sm:$0xff] }
 0x312   : > { %1792 = vst.msk [vmem:[%s3367_s20 + $0x18] sm:$0xf] %vm1785_vm1, %v1974_v23  ;;  %v1972_v58 = vpack.c.bf16 %v1629_v40, %v1629_v40  ;;  %v1632_v25 = vadd.f32 %v2590_v17, %v1526_v4  ;;  %v1518_v42 = vadd.f32 %v3358_v0, %v1517_v59  ;;  %v3600_v40 = vld [vmem:[#allocation10_spill] sm:$0xff] }
 0x314   : > { %1790 = vst.msk [vmem:[%s3367_s20 + $0x10] sm:$0xf] %vm1785_vm1, %v1972_v58  ;;  %v1975_v16 = vpack.c.bf16 %v1632_v25, %v1632_v25  ;;  %v1630_v38 = vadd.f32 %v2581_v12, %v1518_v42  ;;  %v3601_v42 = vld [vmem:[#allocation15_spill] sm:$0xff] }
 0x315   : > { %v2184_v11 = vpop.f32.mrf.mxu1 }
 0x316   : > { %1793 = vst.msk [vmem:[%s3367_s20 + $0x1c] sm:$0xf] %vm1785_vm1, %v1975_v16  ;;  %v1973_v33 = vpack.c.bf16 %v1630_v38, %v1630_v38  ;;  %v1539_v7 = vadd.f32 %v2184_v11, %v3358_v0 }
 0x317   : > { %v1530_v60 = vpop.f32.mrf.mxu1 }
 0x318   : > { %1791 = vst.msk [vmem:[%s3367_s20 + $0x14] sm:$0xf] %vm1785_vm1, %v1973_v33  ;;  %v1635_v17 = vadd.f32 %v2606_v26, %v1539_v7  ;;  %v1531_v48 = vadd.f32 %v3358_v0, %v1530_v60  ;;  %v3602_v7 = vld [vmem:[#allocation13_spill] sm:$0xff] }
 0x319   : > { %v2185_v41 = vpop.f32.mrf.mxu1 }
 0x31a   : > { %v1978_v49 = vpack.c.bf16 %v1635_v17, %v1635_v17  ;;  %v1633_v12 = vadd.f32 %v2597_v21, %v1531_v48  ;;  %v1542_v9 = vadd.f32 %v2185_v41, %v3358_v0 }
 0x31b   : > { %v1533_v30 = vpop.f32.mrf.mxu1 }
 0x31c   : > { %1796 = vst.msk [vmem:[%s3367_s20 + $0x28] sm:$0xf] %vm1785_vm1, %v1978_v49  ;;  %v1976_v50 = vpack.c.bf16 %v1633_v12, %v1633_v12  ;;  %v1636_v39 = vadd.f32 %v2608_v27, %v1542_v9  ;;  %v1534_v19 = vadd.f32 %v3358_v0, %v1533_v30  ;;  %v3593_v27 = vld [vmem:[#allocation7_spill] sm:$0xff]  ;;  %v3603_v49 = vld [vmem:[#allocation16_spill] sm:$0xff] }
 0x31e   : > { %1794 = vst.msk [vmem:[%s3367_s20 + $0x20] sm:$0xf] %vm1785_vm1, %v1976_v50  ;;  %v1979_v26 = vpack.c.bf16 %v1636_v39, %v1636_v39  ;;  %v1634_v24 = vadd.f32 %v2599_v22, %v1534_v19  ;;  %v3604_v39 = vld [vmem:[#allocation14_spill] sm:$0xff] }
 0x320   : > { %1797 = vst.msk [vmem:[%s3367_s20 + $0x2c] sm:$0xf] %vm1785_vm1, %v1979_v26  ;;  %v1977_v61 = vpack.c.bf16 %v1634_v24, %v1634_v24 }
 0x322   : > { %1795 = vst.msk [vmem:[%s3367_s20 + $0x24] sm:$0xf] %vm1785_vm1, %v1977_v61 }
 0x326   : > { %v2188_v21 = vpop.f32.mrf.mxu1 }
 0x327   : > { %v1555_v13 = vadd.f32 %v2188_v21, %v3358_v0  ;;  %v3605_v21 = vld [vmem:[#allocation19_spill] sm:$0xff] }
 0x328   : > { %v1546_v37 = vpop.f32.mrf.mxu1 }
 0x329   : > { %v1639_v56 = vadd.f32 %v3593_v27, %v1555_v13  ;;  %v1547_v14 = vadd.f32 %v3358_v0, %v1546_v37 }
 0x32a   : > { %v2189_v20 = vpop.f32.mrf.mxu1 }
 0x32b   : > { %v1982_v46 = vpack.c.bf16 %v1639_v56, %v1639_v56  ;;  %v1637_v22 = vadd.f32 %v3594_v29, %v1547_v14  ;;  %v1558_v35 = vadd.f32 %v2189_v20, %v3358_v0  ;;  %v3606_v14 = vld [vmem:[#allocation17_spill] sm:$0xff] }
 0x32c   : > { %v1549_v62 = vpop.f32.mrf.mxu1 }
 0x32d   : > { %1800 = vst.msk [vmem:[%s3367_s20 + $0x38] sm:$0xf] %vm1785_vm1, %v1982_v46  ;;  %v1980_v6 = vpack.c.bf16 %v1637_v22, %v1637_v22  ;;  %v1640_v51 = vadd.f32 %v3595_v18, %v1558_v35  ;;  %v1550_v52 = vadd.f32 %v3358_v0, %v1549_v62  ;;  %v3607_v35 = vld [vmem:[#allocation20_spill] sm:$0xff] }
 0x32f   : > { %1798 = vst.msk [vmem:[%s3367_s20 + $0x30] sm:$0xf] %vm1785_vm1, %v1980_v6  ;;  %v1983_v31 = vpack.c.bf16 %v1640_v51, %v1640_v51  ;;  %v1638_v63 = vadd.f32 %v3596_v8, %v1550_v52  ;;  %v3608_v52 = vld [vmem:[#allocation18_spill] sm:$0xff] }
 0x331   : > { %1801 = vst.msk [vmem:[%s3367_s20 + $0x3c] sm:$0xf] %vm1785_vm1, %v1983_v31  ;;  %v1981_v53 = vpack.c.bf16 %v1638_v63, %v1638_v63  ;;  %v2192_v43 = vpop.f32.mrf.mxu1 }
 0x332   : > { %v1571_v44 = vadd.f32 %v2192_v43, %v3358_v0  ;;  %v3609_v43 = vld [vmem:[#allocation23_spill] sm:$0xff] }
 0x333   : > { %1799 = vst.msk [vmem:[%s3367_s20 + $0x34] sm:$0xf] %vm1785_vm1, %v1981_v53  ;;  %v1562_v36 = vpop.f32.mrf.mxu1 }
 0x334   : > { %v1643_v55 = vadd.f32 %v3597_v1, %v1571_v44  ;;  %v1563_v54 = vadd.f32 %v3358_v0, %v1562_v36 }
 0x335   : > { %v2193_v3 = vpop.f32.mrf.mxu1 }
 0x336   : > { %v1986_v10 = vpack.c.bf16 %v1643_v55, %v1643_v55  ;;  %v1641_v2 = vadd.f32 %v3598_v57, %v1563_v54  ;;  %v1574_v34 = vadd.f32 %v2193_v3, %v3358_v0  ;;  %v3610_v54 = vld [vmem:[#allocation21_spill] sm:$0xff] }
 0x337   : > { %v1565_v28 = vpop.f32.mrf.mxu1 }
 0x338   : > { %1804 = vst.msk [vmem:[%s3367_s20 + $0x48] sm:$0xf] %vm1785_vm1, %v1986_v10  ;;  %v1984_v47 = vpack.c.bf16 %v1641_v2, %v1641_v2  ;;  %v1644_v45 = vadd.f32 %v3599_v15, %v1574_v34  ;;  %v1566_v5 = vadd.f32 %v3358_v0, %v1565_v28  ;;  %v3611_v34 = vld [vmem:[#allocation24_spill] sm:$0xff] }
 0x339   : > { %v2196_v32 = vpop.f32.mrf.mxu1 }
 0x33a   : > { %1802 = vst.msk [vmem:[%s3367_s20 + $0x40] sm:$0xf] %vm1785_vm1, %v1984_v47  ;;  %v1987_v23 = vpack.c.bf16 %v1644_v45, %v1644_v45  ;;  %v1642_v4 = vadd.f32 %v3600_v40, %v1566_v5  ;;  %v1587_v59 = vadd.f32 %v2196_v32, %v3358_v0  ;;  %v3612_v45 = vld [vmem:[#allocation22_spill] sm:$0xff] }
 0x33b   : > { %v1578_v58 = vpop.f32.mrf.mxu1 }
 0x33c   : > { %1805 = vst.msk [vmem:[%s3367_s20 + $0x4c] sm:$0xf] %vm1785_vm1, %v1987_v23  ;;  %v1985_v25 = vpack.c.bf16 %v1642_v4, %v1642_v4  ;;  %v1647_v16 = vadd.f32 %v3601_v42, %v1587_v59  ;;  %v1579_v38 = vadd.f32 %v3358_v0, %v1578_v58 }
 0x33d   : > { %v2197_v33 = vpop.f32.mrf.mxu1 }
 0x33e   : > { %1803 = vst.msk [vmem:[%s3367_s20 + $0x44] sm:$0xf] %vm1785_vm1, %v1985_v25  ;;  %v1990_v11 = vpack.c.bf16 %v1647_v16, %v1647_v16  ;;  %v1645_v60 = vadd.f32 %v3602_v7, %v1579_v38  ;;  %v1590_v17 = vadd.f32 %v2197_v33, %v3358_v0 }
 0x33f   : > { %v1581_v48 = vpop.f32.mrf.mxu1 }
 0x340   : > { %1808 = vst.msk [vmem:[%s3367_s20 + $0x58] sm:$0xf] %vm1785_vm1, %v1990_v11  ;;  %v1988_v41 = vpack.c.bf16 %v1645_v60, %v1645_v60  ;;  %v1648_v12 = vadd.f32 %v3603_v49, %v1590_v17  ;;  %v1582_v9 = vadd.f32 %v3358_v0, %v1581_v48 }
 0x341   : > { %v2200_v30 = vpop.f32.mrf.mxu1 }
 0x342   : > { %1806 = vst.msk [vmem:[%s3367_s20 + $0x50] sm:$0xf] %vm1785_vm1, %v1988_v41  ;;  %v1991_v50 = vpack.c.bf16 %v1648_v12, %v1648_v12  ;;  %v1646_v19 = vadd.f32 %v3604_v39, %v1582_v9  ;;  %v1603_v26 = vadd.f32 %v2200_v30, %v3358_v0 }
 0x343   : > { %v1594_v24 = vpop.f32.mrf.mxu1 }
 0x344   : > { %1809 = vst.msk [vmem:[%s3367_s20 + $0x5c] sm:$0xf] %vm1785_vm1, %v1991_v50  ;;  %v1989_v61 = vpack.c.bf16 %v1646_v19, %v1646_v19  ;;  %v1651_v13 = vadd.f32 %v3605_v21, %v1603_v26  ;;  %v1595_v37 = vadd.f32 %v3358_v0, %v1594_v24 }
 0x345   : > { %v2201_v27 = vpop.f32.mrf.mxu1 }
 0x346   : > { %1807 = vst.msk [vmem:[%s3367_s20 + $0x54] sm:$0xf] %vm1785_vm1, %v1989_v61  ;;  %v1994_v56 = vpack.c.bf16 %v1651_v13, %v1651_v13  ;;  %v1649_v20 = vadd.f32 %v3606_v14, %v1595_v37  ;;  %v1606_v46 = vadd.f32 %v2201_v27, %v3358_v0 }
 0x347   : > { %v1597_v29 = vpop.f32.mrf.mxu1 }
 0x348   : > { %1812 = vst.msk [vmem:[%s3367_s20 + $0x68] sm:$0xf] %vm1785_vm1, %v1994_v56  ;;  %v1992_v22 = vpack.c.bf16 %v1649_v20, %v1649_v20  ;;  %v1652_v62 = vadd.f32 %v3607_v35, %v1606_v46  ;;  %v1598_v6 = vadd.f32 %v3358_v0, %v1597_v29 }
 0x349   : > { %v2204_v18 = vpop.f32.mrf.mxu1 }
 0x34a   : > { %1810 = vst.msk [vmem:[%s3367_s20 + $0x60] sm:$0xf] %vm1785_vm1, %v1992_v22  ;;  %v1995_v51 = vpack.c.bf16 %v1652_v62, %v1652_v62  ;;  %v1650_v31 = vadd.f32 %v3608_v52, %v1598_v6  ;;  %v1619_v8 = vadd.f32 %v2204_v18, %v3358_v0 }
 0x34b   : > { %v1610_v63 = vpop.f32.mrf.mxu1 }
 0x34c   : > { %1813 = vst.msk [vmem:[%s3367_s20 + $0x6c] sm:$0xf] %vm1785_vm1, %v1995_v51  ;;  %v1993_v53 = vpack.c.bf16 %v1650_v31, %v1650_v31  ;;  %v1655_v44 = vadd.f32 %v3609_v43, %v1619_v8  ;;  %v1611_v36 = vadd.f32 %v3358_v0, %v1610_v63 }
 0x34d   : > { %v2205_v1 = vpop.f32.mrf.mxu1 }
 0x34e   : > { %1811 = vst.msk [vmem:[%s3367_s20 + $0x64] sm:$0xf] %vm1785_vm1, %v1993_v53  ;;  %v1998_v55 = vpack.c.bf16 %v1655_v44, %v1655_v44  ;;  %v1653_v3 = vadd.f32 %v3610_v54, %v1611_v36  ;;  %v1622_v10 = vadd.f32 %v2205_v1, %v3358_v0 }
 0x34f   : > { %v1613_v57 = vpop.f32.mrf.mxu1 }
 0x350   : > { %1816 = vst.msk [vmem:[%s3367_s20 + $0x78] sm:$0xf] %vm1785_vm1, %v1998_v55  ;;  %v1996_v2 = vpack.c.bf16 %v1653_v3, %v1653_v3  ;;  %v1656_v28 = vadd.f32 %v3611_v34, %v1622_v10  ;;  %v1614_v47 = vadd.f32 %v3358_v0, %v1613_v57 }
 0x352   : > { %1814 = vst.msk [vmem:[%s3367_s20 + $0x70] sm:$0xf] %vm1785_vm1, %v1996_v2  ;;  %v1999_v15 = vpack.c.bf16 %v1656_v28, %v1656_v28  ;;  %v1654_v5 = vadd.f32 %v3612_v45, %v1614_v47 }
 0x354   : > { %1817 = vst.msk [vmem:[%s3367_s20 + $0x7c] sm:$0xf] %vm1785_vm1, %v1999_v15  ;;  %v1997_v0 = vpack.c.bf16 %v1654_v5, %v1654_v5 }
 0x356   : > { %1815 = vst.msk [vmem:[%s3367_s20 + $0x74] sm:$0xf] %vm1785_vm1, %v1997_v0 }
 0x357   : > { %2414 = shalt.err (!%p2411_p3)
}
 0x358   : > { %s2415_s16 = scalar_lea.hbm %s3493_s8, 2048  ;;  %s2419_s19 = scalar_lea.hbm %s3550_s7, 8192 }
 0x359   : > { %p2416_p4 = scmp.ne.s32.totalorder %s3493_s8, %s2415_s16  ;;  %p2420_p9 = scmp.lt.s32.totalorder %s3493_s8, %s3550_s7 }
 0x35a   : > { %p2421_p10 = scmp.lt.s32.totalorder %s2419_s19, %s2415_s16 }
 0x35b   : > { %p2417_p7 = pnand %p2416_p4, %p2544_p5 }
 0x35c   : > { %p2422_p11 = por %p2421_p10, %p2420_p9 }
 0x35d   : > { %p2418_p8 = pneg %p2417_p7 }
 0x35f   : > { %p2423_p12 = pnand %p2422_p11, %p2418_p8 }
 0x361   : > { %2426 = shalt.err (!%p2423_p12)
}
 0x362   : > { %s2464_s23 = smov 64   ;;  %s2465_s29 = smov 4  }
 0x363   : > { %2222 = dma.vmem_to_hbm [thread:$0]  (%p2544_p5), %s3495_s22, 2048, %s3493_s8, %s3503_s28, %s2464_s23, %s2464_s23, %s2465_s29  }
 0x364 PF: > { %p2228_p13 = scmp.ge.s32.totalorder %s2461_s27, 2  ;;  %s1847_s9 = sand.u32 1, %s2449_s24  }
 0x365   : > { %s1848_s13 = scalar_lea.sflag [#allocation3], %s1847_s9 }
 0x366   : > { %p2225_p0 = pnand %p2228_p13, %p2548_p6 }
 0x368   : > { %p2226_p1 = pneg %p2225_p0 }
 0x36a   : > { %2444 = dma.done.wait (%p2226_p1), %s1848_s13, 2048  }
 0x36b   : > { %2446 = vsyncadd (%p2226_p1), %s1848_s13, 4294965248  ;;  %p17_p2 = scmp.ge.s32.totalorder %s2531_s30, 6   ;;  %s3613_s24 = smov %s2453_s25 }
 0x36c   : > { %s3614_s25 = smov %s2457_s26  ;;  %s3615_s26 = smov %s2542_s10 }
 0x36d   : > { %s3616_s27 = smov %s2531_s30  ;;  %19 = sbr.rel (!%p17_p2) target bundleno = 3 (0x3), region = 83 }
 0x372   :  { %1853 = vsyncpa [#allocation3], 1 }
 0x373   :  { %1855 = vsyncpa [#allocation3 + $0x1], 1 }

// kernel: swin_block_forward.2
= control target key start
LH: loop header
LB: loop body
LE: loop exit
PB: predicated region body
PF: predicated region fallthrough
CT: control target
= control target key end

     0   :  { %s9450_s30 = smov 0   ;;  %s9452_s10 = smov 0   ;;  %s13402_s0 = inlined_call_operand.vmem [shape: bf16[2,8,64,32], index: 0, kind: input, shape index: {}]   ;;  %s13403_s1 = inlined_call_operand.vmem [shape: f32[8,64,64], index: 1, kind: input, shape index: {}]   ;;  %s13404_s2 = inlined_call_operand.vmem [shape: f32[4,64,64], index: 2, kind: input, shape index: {}]   ;;  %s13405_s3 = inlined_call_operand.vmem [shape: f32[1,32], index: 3, kind: input, shape index: {}]   ;;  %s13406_s4 = inlined_call_operand.vmem [shape: f32[1,32], index: 4, kind: input, shape index: {}]   ;;  %s13407_s5 = inlined_call_operand.vmem [shape: bf16[32,96], index: 5, kind: input, shape index: {}]   ;;  %s13408_s6 = inlined_call_operand.vmem [shape: f32[1,96], index: 6, kind: input, shape index: {}]   ;;  %s13409_s7 = inlined_call_operand.vmem [shape: bf16[32,32], index: 7, kind: input, shape index: {}]   ;;  %s13410_s8 = inlined_call_operand.vmem [shape: f32[1,32], index: 8, kind: input, shape index: {}]   ;;  %s13411_s9 = inlined_call_operand.vmem [shape: bf16[2,8,64,32], index: 9, kind: output, shape index: {}]  }
   0x1   :  { %s9454_s11 = smov 0   ;;  %s9456_s12 = smov 0  }
   0x2   :  { %s9458_s13 = smov 0  }
   0x3 LB: > { %s28_s14 = sadd.s32 1, %s9376_s11  ;;  %s31_s15 = sadd.s32 1, %s9380_s12  ;;  %s9384_s13 = sphi %s9458_s13, %s19_s13   ;;  %s9380_s12 = sphi %s9456_s12, %s14008_s12   ;;  %s9376_s11 = sphi %s9454_s11, %s14007_s11   ;;  %s9372_s10 = sphi %s9452_s10, %s14006_s10   ;;  %s9368_s30 = sphi %s9450_s30, %s14005_s30  }
   0x4   : > { %p29_p0 = scmp.ge.s32.totalorder %s28_s14, 2  ;;  %p7182_p1 = scmp.ge.s32.totalorder %s9384_s13, 1 }
   0x5   : > { %p321_p2 = scmp.lt.s32.totalorder %s9384_s13, 5 }
   0x6   : > { %s14010_s14 = smov (%p29_p0, %s28_s14), 0  ;;  %s14012_s15 = smov (!%p29_p0, %s31_s15), %s9380_s12 }
   0x7   : > { %p322_p3 = pnand %p7182_p1, %p321_p2  ;;  %p33_p4 = scmp.ge.s32.totalorder %s14012_s15, 2 }
   0x9   : > { %s14014_s15 = smov (%p33_p4, %s14012_s15), 0  ;;  %325 = sbr.rel (%p322_p3) target bundleno = 3743 (0xe9f), region = 56 }
   0xe   : > { %s7183_s16 = sshll.u32 %s9368_s30, 2  ;;  %p374_p5 = scmp.lt.s32.totalorder %s9372_s10, 1  ;;  %vm467_vm0 = vcmask 261120   ;;  %vm1295_vm1 = vcmask 64512   ;;  %vm1752_vm2 = vcmask 523264   ;;  %vm6560_vm3 = vcmask 130048  }
   0xf   : > { %p376_p6 = scmp.lt.s32.totalorder %s7183_s16, 7  ;;  %s9386_s21 = smov 96   ;;  %vm6593_vm4 = vcmask 195584   ;;  %vm7034_vm5 = vcmask 257024  }
  0x10   : > { %s14016_s10 = smov (!%p374_p5, %s9372_s10), 1  ;;  %s9387_s22 = smov 64  }
  0x11   : > { %s14018_s16 = smov (!%p376_p6, %s7183_s16), 7  ;;  %s7185_s17 = sshll.u32 %s14016_s10, 6 }
  0x12   : > { %s7184_s18 = sshll.u32 %s14018_s16, 3  ;;  %s9389_s24 = smov 120  }
  0x13   : > { %s9483_s19 = sadd.s32 %s7185_s17, %s7184_s18  ;;  %s7420_s25 = sshll.u32 %s14018_s16, 6 }
  0x14   : > { %s7186_s20 = sshll.u32 %s9483_s19, 2  ;;  %s10215_s28 = scalar_lea.vmem %s13403_s1, %s7420_s25 }
  0x15   : > { %s9491_s23 = scalar_lea.vmem %s13402_s0, %s7186_s20  ;;  %s9390_s18 = smov 56  }
  0x16   : > { %v7454_v0 = vld [vmem:[%s9491_s23] sm:$0xff]   ;;  %v7517_v1 = vld [vmem:[%s9491_s23 + $0x8] sm:$0xff]   ;;  %v7518_v6 = vld [vmem:[%s9491_s23 + $0x10] sm:$0xff]   ;;  %s9393_s29 = smov 48   ;;  %s9398_s26 = smov 16  }
  0x17   : > { %v9495_v2 = vunpack.c.l.bf16 %v7454_v0  ;;  %v9497_v3 = vunpack.c.l.bf16 %v7517_v1  ;;  %v9499_v4 = vunpack.c.h.bf16 %v7454_v0  ;;  %v9501_v5 = vunpack.c.h.bf16 %v7517_v1  ;;  %v7519_v13 = vld [vmem:[%s9491_s23 + $0x18] sm:$0xff]   ;;  %v7520_v18 = vld [vmem:[%s9491_s23 + $0x20] sm:$0xff]   ;;  %v7521_v23 = vld [vmem:[%s9491_s23 + $0x28] sm:$0xff]   ;;  %s9399_s10 = smov 24  }
  0x18   : > { %v9512_v11 = vunpack.c.l.bf16 %v7518_v6  ;;  %v9514_v12 = vunpack.c.h.bf16 %v7518_v6  ;;  %v9521_v16 = vunpack.c.l.bf16 %v7519_v13  ;;  %v9523_v17 = vunpack.c.h.bf16 %v7519_v13  ;;  %v7522_v28 = vld [vmem:[%s9491_s23 + $0x30] sm:$0xff]   ;;  %v7523_v33 = vld [vmem:[%s9491_s23 + $0x38] sm:$0xff]   ;;  %v7524_v38 = vld [vmem:[%s9491_s23 + $0x40] sm:$0xff]  }
  0x19   : > { %13589 = vst [vmem:[#allocation2_spill] sm:$0xff] %v9495_v2  ;;  %13590 = vst [vmem:[#allocation3_spill] sm:$0xff] %v9497_v3  ;;  %v468_v7 = vsel %vm467_vm0, %v9495_v2, 0.0  ;;  %v474_v8 = vsel %vm467_vm0, %v9497_v3, 0.0  ;;  %v471_v9 = vsel %vm467_vm0, %v9499_v4, 0.0  ;;  %v477_v10 = vsel %vm467_vm0, %v9501_v5, 0.0 }
  0x1a   : > { %13591 = vst [vmem:[#allocation4_spill] sm:$0xff] %v9499_v4  ;;  %13592 = vst [vmem:[#allocation5_spill] sm:$0xff] %v9501_v5  ;;  %469 = vadd.xlane.f32.xlu0 %v468_v7  ;;  %475 = vadd.xlane.f32.xlu1 %v474_v8  ;;  %v480_v14 = vsel %vm467_vm0, %v9512_v11, 0.0  ;;  %v483_v15 = vsel %vm467_vm0, %v9514_v12, 0.0  ;;  %v486_v19 = vsel %vm467_vm0, %v9521_v16, 0.0  ;;  %v489_v20 = vsel %vm467_vm0, %v9523_v17, 0.0 }
  0x1b   : > { %13593 = vst [vmem:[#allocation6_spill] sm:$0xff] %v9512_v11  ;;  %13594 = vst [vmem:[#allocation7_spill] sm:$0xff] %v9514_v12  ;;  %v9530_v21 = vunpack.c.l.bf16 %v7520_v18  ;;  %v9532_v22 = vunpack.c.h.bf16 %v7520_v18  ;;  %v9539_v26 = vunpack.c.l.bf16 %v7521_v23  ;;  %v9541_v27 = vunpack.c.h.bf16 %v7521_v23  ;;  %v7525_v43 = vld [vmem:[%s9491_s23 + $0x48] sm:$0xff]   ;;  %v7526_v48 = vld [vmem:[%s9491_s23 + $0x50] sm:$0xff]  }
  0x1c   : > { %13595 = vst [vmem:[#allocation8_spill] sm:$0xff] %v9521_v16  ;;  %13596 = vst [vmem:[#allocation9_spill] sm:$0xff] %v9523_v17  ;;  %v9548_v31 = vunpack.c.l.bf16 %v7522_v28  ;;  %v9550_v32 = vunpack.c.h.bf16 %v7522_v28  ;;  %v9557_v36 = vunpack.c.l.bf16 %v7523_v33  ;;  %v9559_v37 = vunpack.c.h.bf16 %v7523_v33  ;;  %v7527_v53 = vld [vmem:[%s9491_s23 + $0x58] sm:$0xff]   ;;  %v7528_v58 = vld [vmem:[%s9491_s23 + $0x60] sm:$0xff]  }
  0x1d   : > { %13597 = vst [vmem:[#allocation10_spill] sm:$0xff] %v9530_v21  ;;  %13598 = vst [vmem:[#allocation11_spill] sm:$0xff] %v9532_v22  ;;  %v492_v24 = vsel %vm467_vm0, %v9530_v21, 0.0  ;;  %v495_v25 = vsel %vm467_vm0, %v9532_v22, 0.0  ;;  %v498_v29 = vsel %vm467_vm0, %v9539_v26, 0.0  ;;  %v501_v30 = vsel %vm467_vm0, %v9541_v27, 0.0 }
  0x1e   : > { %472 = vadd.xlane.f32.xlu0 %v471_v9  ;;  %478 = vadd.xlane.f32.xlu1 %v477_v10  ;;  %13599 = vst [vmem:[#allocation12_spill] sm:$0xff] %v9539_v26  ;;  %13600 = vst [vmem:[#allocation13_spill] sm:$0xff] %v9541_v27  ;;  %v504_v34 = vsel %vm467_vm0, %v9548_v31, 0.0  ;;  %v507_v35 = vsel %vm467_vm0, %v9550_v32, 0.0  ;;  %v510_v39 = vsel %vm467_vm0, %v9557_v36, 0.0  ;;  %v513_v40 = vsel %vm467_vm0, %v9559_v37, 0.0 }
  0x1f   : > { %13601 = vst [vmem:[#allocation14_spill] sm:$0xff] %v9548_v31  ;;  %13602 = vst [vmem:[#allocation15_spill] sm:$0xff] %v9550_v32  ;;  %v9566_v41 = vunpack.c.l.bf16 %v7524_v38  ;;  %v9568_v42 = vunpack.c.h.bf16 %v7524_v38  ;;  %v9575_v46 = vunpack.c.l.bf16 %v7525_v43  ;;  %v9577_v47 = vunpack.c.h.bf16 %v7525_v43  ;;  %v7529_v63 = vld [vmem:[%s9491_s23 + $0x68] sm:$0xff]   ;;  %v7530_v8 = vld [vmem:[%s9491_s23 + $0x70] sm:$0xff]  }
  0x20   : > { %13603 = vst [vmem:[#allocation16_spill] sm:$0xff] %v9557_v36  ;;  %13604 = vst [vmem:[#allocation17_spill] sm:$0xff] %v9559_v37  ;;  %v9584_v51 = vunpack.c.l.bf16 %v7526_v48  ;;  %v9586_v52 = vunpack.c.h.bf16 %v7526_v48  ;;  %v9593_v56 = vunpack.c.l.bf16 %v7527_v53  ;;  %v9595_v57 = vunpack.c.h.bf16 %v7527_v53 }
  0x21   : > { %13605 = vst [vmem:[#allocation18_spill] sm:$0xff] %v9566_v41  ;;  %13606 = vst [vmem:[#allocation19_spill] sm:$0xff] %v9568_v42  ;;  %v516_v44 = vsel %vm467_vm0, %v9566_v41, 0.0  ;;  %v519_v45 = vsel %vm467_vm0, %v9568_v42, 0.0  ;;  %v522_v49 = vsel %vm467_vm0, %v9575_v46, 0.0  ;;  %v525_v50 = vsel %vm467_vm0, %v9577_v47, 0.0 }
  0x22   : > { %481 = vadd.xlane.f32.xlu0 %v480_v14  ;;  %484 = vadd.xlane.f32.xlu1 %v483_v15  ;;  %13607 = vst [vmem:[#allocation20_spill] sm:$0xff] %v9575_v46  ;;  %13608 = vst [vmem:[#allocation21_spill] sm:$0xff] %v9577_v47  ;;  %v528_v54 = vsel %vm467_vm0, %v9584_v51, 0.0  ;;  %v531_v55 = vsel %vm467_vm0, %v9586_v52, 0.0  ;;  %v534_v59 = vsel %vm467_vm0, %v9593_v56, 0.0  ;;  %v537_v60 = vsel %vm467_vm0, %v9595_v57, 0.0 }
  0x23   : > { %13609 = vst [vmem:[#allocation22_spill] sm:$0xff] %v9584_v51  ;;  %13610 = vst [vmem:[#allocation23_spill] sm:$0xff] %v9586_v52  ;;  %v9602_v61 = vunpack.c.l.bf16 %v7528_v58  ;;  %v9604_v62 = vunpack.c.h.bf16 %v7528_v58  ;;  %v9611_v6 = vunpack.c.l.bf16 %v7529_v63  ;;  %v9613_v7 = vunpack.c.h.bf16 %v7529_v63  ;;  %v7531_v15 = vld [vmem:[%s9491_s23 + $0x78] sm:$0xff]   ;;  %s9388_s23 = smov 88  }
  0x24   : > { %13611 = vst [vmem:[#allocation24_spill] sm:$0xff] %v9593_v56  ;;  %13612 = vst [vmem:[#allocation25_spill] sm:$0xff] %v9595_v57  ;;  %v9620_v13 = vunpack.c.l.bf16 %v7530_v8  ;;  %v9622_v14 = vunpack.c.h.bf16 %v7530_v8  ;;  %v9631_v23 = vunpack.c.h.bf16 %v7531_v15 }
  0x25   : > { %13613 = vst [vmem:[#allocation26_spill] sm:$0xff] %v9602_v61  ;;  %13614 = vst [vmem:[#allocation27_spill] sm:$0xff] %v9604_v62  ;;  %v540_v0 = vsel %vm467_vm0, %v9602_v61, 0.0  ;;  %v543_v1 = vsel %vm467_vm0, %v9604_v62, 0.0  ;;  %v546_v9 = vsel %vm467_vm0, %v9611_v6, 0.0  ;;  %v549_v10 = vsel %vm467_vm0, %v9613_v7, 0.0 }
  0x26   : > { %487 = vadd.xlane.f32.xlu0 %v486_v19  ;;  %490 = vadd.xlane.f32.xlu1 %v489_v20  ;;  %13615 = vst [vmem:[#allocation28_spill] sm:$0xff] %v9611_v6  ;;  %13616 = vst [vmem:[#allocation29_spill] sm:$0xff] %v9613_v7  ;;  %v552_v18 = vsel %vm467_vm0, %v9620_v13, 0.0  ;;  %v555_v19 = vsel %vm467_vm0, %v9622_v14, 0.0  ;;  %v9629_v20 = vunpack.c.l.bf16 %v7531_v15 }
  0x27   : > { %13617 = vst [vmem:[#allocation30_spill] sm:$0xff] %v9620_v13  ;;  %13618 = vst [vmem:[#allocation31_spill] sm:$0xff] %v9622_v14 }
  0x28   : > { %13619 = vst [vmem:[#allocation32_spill] sm:$0xff] %v9629_v20  ;;  %13620 = vst [vmem:[#allocation33_spill] sm:$0xff] %v9631_v23 }
  0x2a   : > { %493 = vadd.xlane.f32.xlu0 %v492_v24  ;;  %496 = vadd.xlane.f32.xlu1 %v495_v25  ;;  %v558_v24 = vsel %vm467_vm0, %v9629_v20, 0.0  ;;  %v561_v25 = vsel %vm467_vm0, %v9631_v23, 0.0 }
  0x2e   : > { %499 = vadd.xlane.f32.xlu0 %v498_v29  ;;  %502 = vadd.xlane.f32.xlu1 %v501_v30 }
  0x32   : > { %505 = vadd.xlane.f32.xlu0 %v504_v34  ;;  %508 = vadd.xlane.f32.xlu1 %v507_v35 }
  0x36   : > { %511 = vadd.xlane.f32.xlu0 %v510_v39  ;;  %514 = vadd.xlane.f32.xlu1 %v513_v40 }
  0x3a   : > { %517 = vadd.xlane.f32.xlu0 %v516_v44  ;;  %520 = vadd.xlane.f32.xlu1 %v519_v45 }
  0x3e   : > { %523 = vadd.xlane.f32.xlu0 %v522_v49  ;;  %526 = vadd.xlane.f32.xlu1 %v525_v50 }
  0x42   : > { %529 = vadd.xlane.f32.xlu0 %v528_v54  ;;  %532 = vadd.xlane.f32.xlu1 %v531_v55 }
  0x46   : > { %535 = vadd.xlane.f32.xlu0 %v534_v59  ;;  %538 = vadd.xlane.f32.xlu1 %v537_v60 }
  0x4a   : > { %541 = vadd.xlane.f32.xlu0 %v540_v0  ;;  %544 = vadd.xlane.f32.xlu1 %v543_v1 }
  0x4e   : > { %547 = vadd.xlane.f32.xlu0 %v546_v9  ;;  %550 = vadd.xlane.f32.xlu1 %v549_v10 }
  0x52   : > { %553 = vadd.xlane.f32.xlu0 %v552_v18  ;;  %556 = vadd.xlane.f32.xlu1 %v555_v19 }
  0x56   : > { %559 = vadd.xlane.f32.xlu0 %v558_v24  ;;  %562 = vadd.xlane.f32.xlu1 %v561_v25 }
  0xa3   : > { %v470_v28 = vpop.xlane.xlu0 %469  ;;  %v476_v29 = vpop.xlane.xlu1 %475 }
  0xa4   : > { %v565_v30 = vmul.f32 0.03125, %v470_v28  ;;  %v567_v33 = vmul.f32 0.03125, %v476_v29 }
  0xa6   : > { %v9638_v34 = vsub.f32 %v9495_v2, %v565_v30  ;;  %v9641_v35 = vsub.f32 %v9497_v3, %v567_v33 }
  0xa7   : > { %v473_v38 = vpop.xlane.xlu0 %472  ;;  %v479_v39 = vpop.xlane.xlu1 %478 }
  0xa8   : > { %v566_v40 = vmul.f32 0.03125, %v473_v38  ;;  %v568_v43 = vmul.f32 0.03125, %v479_v39  ;;  %v629_v44 = vmul.f32 %v9638_v34, %v9638_v34  ;;  %v631_v45 = vmul.f32 %v9641_v35, %v9641_v35 }
  0xaa   : > { %v9648_v48 = vsub.f32 %v9499_v4, %v566_v40  ;;  %v9651_v49 = vsub.f32 %v9501_v5, %v568_v43  ;;  %v661_v50 = vsel %vm467_vm0, %v629_v44, 0.0  ;;  %v667_v55 = vsel %vm467_vm0, %v631_v45, 0.0 }
  0xab   : > { %662 = vadd.xlane.f32.xlu0 %v661_v50  ;;  %v482_v53 = vpop.xlane.xlu0 %481  ;;  %v485_v54 = vpop.xlane.xlu1 %484 }
  0xac   : > { %v569_v58 = vmul.f32 0.03125, %v482_v53  ;;  %v570_v59 = vmul.f32 0.03125, %v485_v54  ;;  %v630_v60 = vmul.f32 %v9648_v48, %v9648_v48  ;;  %v632_v63 = vmul.f32 %v9651_v49, %v9651_v49 }
  0xae   : > { %v9660_v0 = vsub.f32 %v9512_v11, %v569_v58  ;;  %v9663_v1 = vsub.f32 %v9514_v12, %v570_v59  ;;  %v664_v8 = vsel %vm467_vm0, %v630_v60, 0.0  ;;  %v670_v15 = vsel %vm467_vm0, %v632_v63, 0.0 }
  0xaf   : > { %668 = vadd.xlane.f32.xlu0 %v667_v55  ;;  %665 = vadd.xlane.f32.xlu1 %v664_v8  ;;  %v488_v9 = vpop.xlane.xlu0 %487  ;;  %v491_v10 = vpop.xlane.xlu1 %490 }
  0xb0   : > { %v571_v18 = vmul.f32 0.03125, %v488_v9  ;;  %v572_v19 = vmul.f32 0.03125, %v491_v10  ;;  %v633_v24 = vmul.f32 %v9660_v0, %v9660_v0  ;;  %v634_v25 = vmul.f32 %v9663_v1, %v9663_v1 }
  0xb2   : > { %v9672_v28 = vsub.f32 %v9521_v16, %v571_v18  ;;  %v9675_v29 = vsub.f32 %v9523_v17, %v572_v19  ;;  %v673_v30 = vsel %vm467_vm0, %v633_v24, 0.0  ;;  %v676_v39 = vsel %vm467_vm0, %v634_v25, 0.0 }
  0xb3   : > { %671 = vadd.xlane.f32.xlu1 %v670_v15  ;;  %674 = vadd.xlane.f32.xlu0 %v673_v30  ;;  %v494_v33 = vpop.xlane.xlu0 %493  ;;  %v497_v38 = vpop.xlane.xlu1 %496 }
  0xb4   : > { %v573_v40 = vmul.f32 0.03125, %v494_v33  ;;  %v574_v43 = vmul.f32 0.03125, %v497_v38  ;;  %v635_v44 = vmul.f32 %v9672_v28, %v9672_v28  ;;  %v636_v45 = vmul.f32 %v9675_v29, %v9675_v29 }
  0xb6   : > { %v9684_v50 = vsub.f32 %v9530_v21, %v573_v40  ;;  %v9687_v53 = vsub.f32 %v9532_v22, %v574_v43  ;;  %v679_v54 = vsel %vm467_vm0, %v635_v44, 0.0  ;;  %v682_v59 = vsel %vm467_vm0, %v636_v45, 0.0 }
  0xb7   : > { %677 = vadd.xlane.f32.xlu1 %v676_v39  ;;  %680 = vadd.xlane.f32.xlu0 %v679_v54  ;;  %v500_v55 = vpop.xlane.xlu0 %499  ;;  %v503_v58 = vpop.xlane.xlu1 %502 }
  0xb8   : > { %v575_v60 = vmul.f32 0.03125, %v500_v55  ;;  %v576_v63 = vmul.f32 0.03125, %v503_v58  ;;  %v637_v8 = vmul.f32 %v9684_v50, %v9684_v50  ;;  %v638_v9 = vmul.f32 %v9687_v53, %v9687_v53 }
  0xba   : > { %v9696_v10 = vsub.f32 %v9539_v26, %v575_v60  ;;  %v9699_v15 = vsub.f32 %v9541_v27, %v576_v63  ;;  %v685_v18 = vsel %vm467_vm0, %v637_v8, 0.0  ;;  %v688_v25 = vsel %vm467_vm0, %v638_v9, 0.0  ;;  %v1694_v27 = vld [vmem:[%s10215_s28 + $0x30] sm:$0xff]  ;;  %v1695_v26 = vld [vmem:[%s10215_s28 + $0x38] sm:$0xff] }
  0xbb   : > { %683 = vadd.xlane.f32.xlu1 %v682_v59  ;;  %686 = vadd.xlane.f32.xlu0 %v685_v18  ;;  %v506_v19 = vpop.xlane.xlu0 %505  ;;  %v509_v24 = vpop.xlane.xlu1 %508 }
  0xbc   : > { %v577_v30 = vmul.f32 0.03125, %v506_v19  ;;  %v578_v33 = vmul.f32 0.03125, %v509_v24  ;;  %v639_v38 = vmul.f32 %v9696_v10, %v9696_v10  ;;  %v640_v39 = vmul.f32 %v9699_v15, %v9699_v15 }
  0xbe   : > { %v9708_v40 = vsub.f32 %v9548_v31, %v577_v30  ;;  %v9711_v43 = vsub.f32 %v9550_v32, %v578_v33  ;;  %v691_v44 = vsel %vm467_vm0, %v639_v38, 0.0  ;;  %v694_v55 = vsel %vm467_vm0, %v640_v39, 0.0 }
  0xbf   : > { %689 = vadd.xlane.f32.xlu1 %v688_v25  ;;  %692 = vadd.xlane.f32.xlu0 %v691_v44  ;;  %v512_v45 = vpop.xlane.xlu0 %511  ;;  %v515_v54 = vpop.xlane.xlu1 %514 }
  0xc0   : > { %v579_v58 = vmul.f32 0.03125, %v512_v45  ;;  %v580_v59 = vmul.f32 0.03125, %v515_v54  ;;  %v641_v60 = vmul.f32 %v9708_v40, %v9708_v40  ;;  %v642_v63 = vmul.f32 %v9711_v43, %v9711_v43 }
  0xc2   : > { %v9720_v8 = vsub.f32 %v9557_v36, %v579_v58  ;;  %v9723_v9 = vsub.f32 %v9559_v37, %v580_v59  ;;  %v697_v18 = vsel %vm467_vm0, %v641_v60, 0.0  ;;  %v700_v25 = vsel %vm467_vm0, %v642_v63, 0.0 }
  0xc3   : > { %695 = vadd.xlane.f32.xlu1 %v694_v55  ;;  %698 = vadd.xlane.f32.xlu0 %v697_v18  ;;  %v518_v19 = vpop.xlane.xlu0 %517  ;;  %v521_v24 = vpop.xlane.xlu1 %520 }
  0xc4   : > { %v581_v30 = vmul.f32 0.03125, %v518_v19  ;;  %v582_v33 = vmul.f32 0.03125, %v521_v24  ;;  %v643_v38 = vmul.f32 %v9720_v8, %v9720_v8  ;;  %v644_v39 = vmul.f32 %v9723_v9, %v9723_v9 }
  0xc6   : > { %v9732_v44 = vsub.f32 %v9566_v41, %v581_v30  ;;  %v9735_v45 = vsub.f32 %v9568_v42, %v582_v33  ;;  %v703_v54 = vsel %vm467_vm0, %v643_v38, 0.0  ;;  %v706_v59 = vsel %vm467_vm0, %v644_v39, 0.0 }
  0xc7   : > { %701 = vadd.xlane.f32.xlu1 %v700_v25  ;;  %704 = vadd.xlane.f32.xlu0 %v703_v54  ;;  %v524_v55 = vpop.xlane.xlu0 %523  ;;  %v527_v58 = vpop.xlane.xlu1 %526 }
  0xc8   : > { %v583_v60 = vmul.f32 0.03125, %v524_v55  ;;  %v584_v63 = vmul.f32 0.03125, %v527_v58  ;;  %v645_v18 = vmul.f32 %v9732_v44, %v9732_v44  ;;  %v646_v19 = vmul.f32 %v9735_v45, %v9735_v45 }
  0xca   : > { %v9744_v24 = vsub.f32 %v9575_v46, %v583_v60  ;;  %v9747_v30 = vsub.f32 %v9577_v47, %v584_v63  ;;  %v709_v25 = vsel %vm467_vm0, %v645_v18, 0.0  ;;  %v712_v39 = vsel %vm467_vm0, %v646_v19, 0.0  ;;  %v8766_v18 = vld [vmem:[%s13407_s5 + $0x8] sm:$0xff]  }
  0xcb   : > { %707 = vadd.xlane.f32.xlu1 %v706_v59  ;;  %710 = vadd.xlane.f32.xlu0 %v709_v25  ;;  %v530_v33 = vpop.xlane.xlu0 %529  ;;  %v533_v38 = vpop.xlane.xlu1 %532 }
  0xcc   : > { %v585_v54 = vmul.f32 0.03125, %v530_v33  ;;  %v586_v55 = vmul.f32 0.03125, %v533_v38  ;;  %v647_v58 = vmul.f32 %v9744_v24, %v9744_v24  ;;  %v648_v60 = vmul.f32 %v9747_v30, %v9747_v30  ;;  %7824 = vmatprep.subr.bf16.mxu0 %v8766_v18 }
  0xcd   : > { %7825 = vmatpush3.bf16.msra.mxu0 %v8766_v18 }
  0xce   : > { %v9756_v42 = vsub.f32 %v9584_v51, %v585_v54  ;;  %v9759_v63 = vsub.f32 %v9586_v52, %v586_v55  ;;  %v715_v59 = vsel %vm467_vm0, %v647_v58, 0.0  ;;  %v718_v33 = vsel %vm467_vm0, %v648_v60, 0.0  ;;  %v8767_v60 = vld [vmem:[%s13407_s5] sm:$0xff]  }
  0xcf   : > { %713 = vadd.xlane.f32.xlu1 %v712_v39  ;;  %716 = vadd.xlane.f32.xlu0 %v715_v59  ;;  %v536_v19 = vpop.xlane.xlu0 %535  ;;  %v539_v25 = vpop.xlane.xlu1 %538 }
  0xd0   : > { %v587_v38 = vmul.f32 0.03125, %v536_v19  ;;  %v588_v47 = vmul.f32 0.03125, %v539_v25  ;;  %v649_v54 = vmul.f32 %v9756_v42, %v9756_v42  ;;  %v650_v55 = vmul.f32 %v9759_v63, %v9759_v63  ;;  %7826 = vmatprep.subr.bf16.mxu0 %v8767_v60 }
  0xd1   : > { %7827 = vmatpush3.bf16.msra.mxu0 %v8767_v60 }
  0xd2   : > { %v9771_v58 = vsub.f32 %v9593_v56, %v587_v38  ;;  %v9774_v39 = vsub.f32 %v9595_v57, %v588_v47  ;;  %v721_v59 = vsel %vm467_vm0, %v649_v54, 0.0  ;;  %v724_v52 = vsel %vm467_vm0, %v650_v55, 0.0 }
  0xd3   : > { %719 = vadd.xlane.f32.xlu1 %v718_v33  ;;  %722 = vadd.xlane.f32.xlu0 %v721_v59  ;;  %v542_v19 = vpop.xlane.xlu0 %541  ;;  %v545_v25 = vpop.xlane.xlu1 %544 }
  0xd4   : > { %v589_v51 = vmul.f32 0.03125, %v542_v19  ;;  %v590_v18 = vmul.f32 0.03125, %v545_v25  ;;  %v651_v38 = vmul.f32 %v9771_v58, %v9771_v58  ;;  %v652_v47 = vmul.f32 %v9774_v39, %v9774_v39 }
  0xd6   : > { %v9786_v54 = vsub.f32 %v9602_v61, %v589_v51  ;;  %v9789_v33 = vsub.f32 %v9604_v62, %v590_v18  ;;  %v727_v59 = vsel %vm467_vm0, %v651_v38, 0.0  ;;  %v730_v25 = vsel %vm467_vm0, %v652_v47, 0.0 }
  0xd7   : > { %725 = vadd.xlane.f32.xlu1 %v724_v52  ;;  %728 = vadd.xlane.f32.xlu0 %v727_v59  ;;  %v548_v55 = vpop.xlane.xlu0 %547  ;;  %v551_v19 = vpop.xlane.xlu1 %550 }
  0xd8   : > { %v591_v57 = vmul.f32 0.03125, %v548_v55  ;;  %v592_v56 = vmul.f32 0.03125, %v551_v19  ;;  %v653_v41 = vmul.f32 %v9786_v54, %v9786_v54  ;;  %v654_v51 = vmul.f32 %v9789_v33, %v9789_v33 }
  0xda   : > { %v9798_v60 = vsub.f32 %v9611_v6, %v591_v57  ;;  %v9801_v18 = vsub.f32 %v9613_v7, %v592_v56  ;;  %v733_v52 = vsel %vm467_vm0, %v653_v41, 0.0  ;;  %v736_v59 = vsel %vm467_vm0, %v654_v51, 0.0 }
  0xdb   : > { %731 = vadd.xlane.f32.xlu1 %v730_v25  ;;  %734 = vadd.xlane.f32.xlu0 %v733_v52  ;;  %v554_v38 = vpop.xlane.xlu0 %553  ;;  %v557_v47 = vpop.xlane.xlu1 %556 }
  0xdc   : > { %v593_v55 = vmul.f32 0.03125, %v554_v38  ;;  %v594_v19 = vmul.f32 0.03125, %v557_v47  ;;  %v655_v62 = vmul.f32 %v9798_v60, %v9798_v60  ;;  %v656_v57 = vmul.f32 %v9801_v18, %v9801_v18 }
  0xde   : > { %v9810_v61 = vsub.f32 %v9620_v13, %v593_v55  ;;  %v9813_v56 = vsub.f32 %v9622_v14, %v594_v19  ;;  %v739_v41 = vsel %vm467_vm0, %v655_v62, 0.0  ;;  %v742_v52 = vsel %vm467_vm0, %v656_v57, 0.0 }
  0xdf   : > { %737 = vadd.xlane.f32.xlu1 %v736_v59  ;;  %740 = vadd.xlane.f32.xlu0 %v739_v41  ;;  %v560_v25 = vpop.xlane.xlu0 %559  ;;  %v563_v51 = vpop.xlane.xlu1 %562 }
  0xe0   : > { %v595_v38 = vmul.f32 0.03125, %v560_v25  ;;  %v596_v47 = vmul.f32 0.03125, %v563_v51  ;;  %v657_v7 = vmul.f32 %v9810_v61, %v9810_v61  ;;  %v658_v55 = vmul.f32 %v9813_v56, %v9813_v56 }
  0xe2   : > { %v9822_v13 = vsub.f32 %v9629_v20, %v595_v38  ;;  %v9825_v19 = vsub.f32 %v9631_v23, %v596_v47  ;;  %v745_v62 = vsel %vm467_vm0, %v657_v7, 0.0  ;;  %v748_v59 = vsel %vm467_vm0, %v658_v55, 0.0 }
  0xe3   : > { %743 = vadd.xlane.f32.xlu1 %v742_v52  ;;  %746 = vadd.xlane.f32.xlu0 %v745_v62 }
  0xe4   : > { %v659_v57 = vmul.f32 %v9822_v13, %v9822_v13  ;;  %v660_v41 = vmul.f32 %v9825_v19, %v9825_v19 }
  0xe6   : > { %v751_v25 = vsel %vm467_vm0, %v659_v57, 0.0  ;;  %v754_v51 = vsel %vm467_vm0, %v660_v41, 0.0 }
  0xe7   : > { %749 = vadd.xlane.f32.xlu1 %v748_v59  ;;  %752 = vadd.xlane.f32.xlu0 %v751_v25 }
  0xeb   : > { %755 = vadd.xlane.f32.xlu1 %v754_v51 }
 0x134   : > { %v663_v38 = vpop.xlane.xlu0 %662 }
 0x135   : > { %v757_v47 = vmul.f32 0.03125, %v663_v38 }
 0x137   : > { %v789_v7 = vadd.f32 1e-05, %v757_v47 }
 0x138   : > { %v666_v52 = vpop.xlane.xlu1 %665  ;;  %v669_v62 = vpop.xlane.xlu0 %668 }
 0x139   : > { %8770 = vrsqrt.f32 %v789_v7  ;;  %v758_v55 = vmul.f32 0.03125, %v666_v52  ;;  %v759_v14 = vmul.f32 0.03125, %v669_v62 }
 0x13b   : > { %v790_v23 = vadd.f32 1e-05, %v758_v55  ;;  %v791_v20 = vadd.f32 1e-05, %v759_v14 }
 0x13c   : > { %v672_v6 = vpop.xlane.xlu1 %671  ;;  %v675_v46 = vpop.xlane.xlu0 %674 }
 0x13d   : > { %8772 = vrsqrt.f32 %v790_v23  ;;  %v760_v32 = vmul.f32 0.03125, %v672_v6  ;;  %v761_v57 = vmul.f32 0.03125, %v675_v46 }
 0x13e   : > { %8774 = vrsqrt.f32 %v791_v20  ;;  %v9839_v20 = vld [vmem:[%s13405_s3] ss:$0 sm:$0xff] }
 0x13f   : > { %v792_v59 = vadd.f32 1e-05, %v760_v32  ;;  %v793_v25 = vadd.f32 1e-05, %v761_v57 }
 0x140   : > { %v678_v41 = vpop.xlane.xlu1 %677  ;;  %v681_v51 = vpop.xlane.xlu0 %680 }
 0x141   : > { %8776 = vrsqrt.f32 %v792_v59  ;;  %v762_v38 = vmul.f32 0.03125, %v678_v41  ;;  %v763_v47 = vmul.f32 0.03125, %v681_v51 }
 0x142   : > { %8778 = vrsqrt.f32 %v793_v25 }
 0x143   : > { %v794_v37 = vadd.f32 1e-05, %v762_v38  ;;  %v795_v7 = vadd.f32 1e-05, %v763_v47 }
 0x144   : > { %v684_v52 = vpop.xlane.xlu1 %683  ;;  %v687_v62 = vpop.xlane.xlu0 %686 }
 0x145   : > { %8780 = vrsqrt.f32 %v794_v37  ;;  %v764_v14 = vmul.f32 0.03125, %v684_v52  ;;  %v765_v55 = vmul.f32 0.03125, %v687_v62 }
 0x146   : > { %v8771_v31 = vpop.eup %8770  ;;  %8782 = vrsqrt.f32 %v795_v7 }
 0x147   : > { %v796_v6 = vadd.f32 1e-05, %v764_v14  ;;  %v797_v46 = vadd.f32 1e-05, %v765_v55  ;;  %v853_v32 = vmul.f32 %v8771_v31, %v9638_v34  ;;  %v9846_v31 = vld [vmem:[%s13406_s4] ss:$0 sm:$0xff] }
 0x148   : > { %v690_v23 = vpop.xlane.xlu1 %689  ;;  %v693_v57 = vpop.xlane.xlu0 %692 }
 0x149   : > { %8784 = vrsqrt.f32 %v796_v6  ;;  %v766_v59 = vmul.f32 0.03125, %v690_v23  ;;  %v767_v25 = vmul.f32 0.03125, %v693_v57  ;;  %v892_v37 = vmul.f32 %v9839_v20, %v853_v32 }
 0x14a   : > { %v8773_v41 = vpop.eup %8772  ;;  %8786 = vrsqrt.f32 %v797_v46 }
 0x14b   : > { %v8775_v51 = vpop.eup %8774  ;;  %v798_v38 = vadd.f32 1e-05, %v766_v59  ;;  %v799_v47 = vadd.f32 1e-05, %v767_v25  ;;  %v854_v7 = vmul.f32 %v8773_v41, %v9648_v48  ;;  %v931_v32 = vadd.f32 %v9846_v31, %v892_v37 }
 0x14c   : > { %v696_v34 = vpop.xlane.xlu1 %695  ;;  %v699_v52 = vpop.xlane.xlu0 %698  ;;  %v855_v62 = vmul.f32 %v8775_v51, %v9641_v35 }
 0x14d   : > { %8788 = vrsqrt.f32 %v798_v38  ;;  %v768_v14 = vmul.f32 0.03125, %v696_v34  ;;  %v769_v55 = vmul.f32 0.03125, %v699_v52  ;;  %v893_v6 = vmul.f32 %v9839_v20, %v854_v7 }
 0x14e   : > { %v8777_v46 = vpop.eup %8776  ;;  %8790 = vrsqrt.f32 %v799_v47  ;;  %v894_v35 = vmul.f32 %v9839_v20, %v855_v62 }
 0x14f   : > { %v8779_v23 = vpop.eup %8778  ;;  %v800_v48 = vadd.f32 1e-05, %v768_v14  ;;  %v801_v57 = vadd.f32 1e-05, %v769_v55  ;;  %v932_v59 = vadd.f32 %v9846_v31, %v893_v6  ;;  %v856_v25 = vmul.f32 %v8777_v46, %v9651_v49 }
 0x150   : > { %v702_v41 = vpop.xlane.xlu1 %701  ;;  %v705_v36 = vpop.xlane.xlu0 %704  ;;  %v857_v51 = vmul.f32 %v8779_v23, %v9660_v0  ;;  %v933_v0 = vadd.f32 %v9846_v31, %v894_v35 }
 0x151   : > { %8792 = vrsqrt.f32 %v800_v48  ;;  %v770_v38 = vmul.f32 0.03125, %v702_v41  ;;  %v771_v7 = vmul.f32 0.03125, %v705_v36  ;;  %v963_v34 = vpack.c.bf16 %v932_v59, %v931_v32 }
 0x152   : > { %v8781_v47 = vpop.eup %8780  ;;  %8794 = vrsqrt.f32 %v801_v57  ;;  %v895_v37 = vmul.f32 %v9839_v20, %v856_v25  ;;  %v896_v52 = vmul.f32 %v9839_v20, %v857_v51 }
 0x153   : > { %v8783_v14 = vpop.eup %8782  ;;  %v802_v55 = vadd.f32 1e-05, %v770_v38  ;;  %v803_v6 = vadd.f32 1e-05, %v771_v7  ;;  %7828 = vmatprep.mubr.msk.bf16.mxu0 %vm467_vm0, %v963_v34  ;;  %v858_v49 = vmul.f32 %v8781_v47, %v9663_v1 }
 0x154   : > { %v708_v62 = vpop.xlane.xlu1 %707  ;;  %v711_v46 = vpop.xlane.xlu0 %710  ;;  %v934_v36 = vadd.f32 %v9846_v31, %v895_v37  ;;  %v859_v32 = vmul.f32 %v8783_v14, %v9672_v28  ;;  %v935_v41 = vadd.f32 %v9846_v31, %v896_v52 }
 0x155   : > { %8796 = vrsqrt.f32 %v802_v55  ;;  %v772_v23 = vmul.f32 0.03125, %v708_v62  ;;  %v773_v48 = vmul.f32 0.03125, %v711_v46  ;;  %v897_v57 = vmul.f32 %v9839_v20, %v858_v49 }
 0x156   : > { %v8785_v59 = vpop.eup %8784  ;;  %8798 = vrsqrt.f32 %v803_v6  ;;  %v964_v25 = vpack.c.bf16 %v934_v36, %v933_v0  ;;  %v898_v47 = vmul.f32 %v9839_v20, %v859_v32 }
 0x157   : > { %v8787_v51 = vpop.eup %8786  ;;  %v804_v1 = vadd.f32 1e-05, %v772_v23  ;;  %v805_v38 = vadd.f32 1e-05, %v773_v48  ;;  %v936_v7 = vadd.f32 %v9846_v31, %v897_v57  ;;  %v860_v35 = vmul.f32 %v8785_v59, %v9675_v29 }
 0x158   : > { %7829 = vmatmul.mubr.msk.bf16.vlgmr.msra.gmra.mxu0 %vm467_vm0, %v964_v25  ;;  %v714_v28 = vpop.xlane.xlu1 %713  ;;  %v717_v34 = vpop.xlane.xlu0 %716  ;;  %v861_v37 = vmul.f32 %v8787_v51, %v9684_v50  ;;  %v937_v50 = vadd.f32 %v9846_v31, %v898_v47 }
 0x159   : > { %8800 = vrsqrt.f32 %v804_v1  ;;  %v774_v14 = vmul.f32 0.03125, %v714_v28  ;;  %v775_v55 = vmul.f32 0.03125, %v717_v34  ;;  %v965_v6 = vpack.c.bf16 %v936_v7, %v935_v41 }
 0x15a   : > { %v8789_v52 = vpop.eup %8788  ;;  %8802 = vrsqrt.f32 %v805_v38  ;;  %v899_v49 = vmul.f32 %v9839_v20, %v860_v35  ;;  %v900_v62 = vmul.f32 %v9839_v20, %v861_v37 }
 0x15b   : > { %v8791_v46 = vpop.eup %8790  ;;  %v806_v29 = vadd.f32 1e-05, %v774_v14  ;;  %v807_v0 = vadd.f32 1e-05, %v775_v55  ;;  %7832 = vmatprep.mubr.msk.bf16.mxu0 %vm467_vm0, %v965_v6  ;;  %v862_v36 = vmul.f32 %v8789_v52, %v9687_v53 }
 0x15c   : > { %v720_v32 = vpop.xlane.xlu1 %719  ;;  %v723_v23 = vpop.xlane.xlu0 %722  ;;  %v938_v48 = vadd.f32 %v9846_v31, %v899_v49  ;;  %v863_v57 = vmul.f32 %v8791_v46, %v9696_v10  ;;  %v939_v38 = vadd.f32 %v9846_v31, %v900_v62 }
 0x15d   : > { %8804 = vrsqrt.f32 %v806_v29  ;;  %v776_v59 = vmul.f32 0.03125, %v720_v32  ;;  %v777_v25 = vmul.f32 0.03125, %v723_v23  ;;  %v901_v41 = vmul.f32 %v9839_v20, %v862_v36 }
 0x15e   : > { %v8793_v51 = vpop.eup %8792  ;;  %8806 = vrsqrt.f32 %v807_v0  ;;  %v966_v1 = vpack.c.bf16 %v938_v48, %v937_v50  ;;  %v902_v37 = vmul.f32 %v9839_v20, %v863_v57 }
 0x15f   : > { %v8795_v7 = vpop.eup %8794  ;;  %v808_v53 = vadd.f32 1e-05, %v776_v59  ;;  %v809_v35 = vadd.f32 1e-05, %v777_v25  ;;  %v940_v28 = vadd.f32 %v9846_v31, %v901_v41  ;;  %v864_v34 = vmul.f32 %v8793_v51, %v9699_v15 }
 0x160   : > { %7833 = vmatmul.mubr.msk.bf16.gmra.mxu0 %vm467_vm0, %v966_v1  ;;  %v726_v10 = vpop.xlane.xlu1 %725  ;;  %v729_v47 = vpop.xlane.xlu0 %728  ;;  %v865_v14 = vmul.f32 %v8795_v7, %v9708_v40  ;;  %v941_v40 = vadd.f32 %v9846_v31, %v902_v37 }
 0x161   : > { %8808 = vrsqrt.f32 %v808_v53  ;;  %v778_v55 = vmul.f32 0.03125, %v726_v10  ;;  %v779_v6 = vmul.f32 0.03125, %v729_v47  ;;  %v967_v52 = vpack.c.bf16 %v940_v28, %v939_v38 }
 0x162   : > { %v8797_v49 = vpop.eup %8796  ;;  %8810 = vrsqrt.f32 %v809_v35  ;;  %v903_v62 = vmul.f32 %v9839_v20, %v864_v34  ;;  %v904_v46 = vmul.f32 %v9839_v20, %v865_v14 }
 0x163   : > { %v8799_v29 = vpop.eup %8798  ;;  %v810_v15 = vadd.f32 1e-05, %v778_v55  ;;  %v811_v0 = vadd.f32 1e-05, %v779_v6  ;;  %7836 = vmatprep.mubr.msk.bf16.mxu0 %vm467_vm0, %v967_v52  ;;  %v866_v36 = vmul.f32 %v8797_v49, %v9711_v43 }
 0x164   : > { %v732_v32 = vpop.xlane.xlu1 %731  ;;  %v735_v23 = vpop.xlane.xlu0 %734  ;;  %v942_v50 = vadd.f32 %v9846_v31, %v903_v62  ;;  %v867_v48 = vmul.f32 %v8799_v29, %v9720_v8  ;;  %v943_v1 = vadd.f32 %v9846_v31, %v904_v46 }
 0x165   : > { %8812 = vrsqrt.f32 %v810_v15  ;;  %v780_v57 = vmul.f32 0.03125, %v732_v32  ;;  %v781_v59 = vmul.f32 0.03125, %v735_v23  ;;  %v905_v25 = vmul.f32 %v9839_v20, %v866_v36 }
 0x166   : > { %v8801_v41 = vpop.eup %8800  ;;  %8814 = vrsqrt.f32 %v811_v0  ;;  %v968_v51 = vpack.c.bf16 %v942_v50, %v941_v40  ;;  %v906_v34 = vmul.f32 %v9839_v20, %v867_v48 }
 0x167   : > { %v8803_v38 = vpop.eup %8802  ;;  %v812_v43 = vadd.f32 1e-05, %v780_v57  ;;  %v813_v7 = vadd.f32 1e-05, %v781_v59  ;;  %v944_v53 = vadd.f32 %v9846_v31, %v905_v25  ;;  %v868_v35 = vmul.f32 %v8801_v41, %v9723_v9 }
 0x168   : > { %7837 = vmatmul.mubr.msk.bf16.gmra.mxu0 %vm467_vm0, %v968_v51  ;;  %v738_v8 = vpop.xlane.xlu1 %737  ;;  %v741_v28 = vpop.xlane.xlu0 %740  ;;  %v869_v10 = vmul.f32 %v8803_v38, %v9732_v44  ;;  %v945_v44 = vadd.f32 %v9846_v31, %v906_v34 }
 0x169   : > { %8816 = vrsqrt.f32 %v812_v43  ;;  %v782_v47 = vmul.f32 0.03125, %v738_v8  ;;  %v783_v37 = vmul.f32 0.03125, %v741_v28  ;;  %v969_v14 = vpack.c.bf16 %v944_v53, %v943_v1 }
 0x16a   : > { %v8805_v55 = vpop.eup %8804  ;;  %8818 = vrsqrt.f32 %v813_v7  ;;  %v907_v6 = vmul.f32 %v9839_v20, %v868_v35  ;;  %v908_v52 = vmul.f32 %v9839_v20, %v869_v10 }
 0x16b   : > { %v8807_v49 = vpop.eup %8806  ;;  %v814_v9 = vadd.f32 1e-05, %v782_v47  ;;  %v815_v62 = vadd.f32 1e-05, %v783_v37  ;;  %7840 = vmatprep.mubr.msk.bf16.mxu0 %vm467_vm0, %v969_v14  ;;  %v870_v46 = vmul.f32 %v8805_v55, %v9735_v45 }
 0x16c   : > { %v744_v29 = vpop.xlane.xlu1 %743  ;;  %v747_v15 = vpop.xlane.xlu0 %746  ;;  %v946_v0 = vadd.f32 %v9846_v31, %v907_v6  ;;  %v871_v36 = vmul.f32 %v8807_v49, %v9744_v24  ;;  %v947_v57 = vadd.f32 %v9846_v31, %v908_v52 }
 0x16d   : > { %8820 = vrsqrt.f32 %v814_v9  ;;  %v784_v32 = vmul.f32 0.03125, %v744_v29  ;;  %v785_v23 = vmul.f32 0.03125, %v747_v15  ;;  %v909_v40 = vmul.f32 %v9839_v20, %v870_v46 }
 0x16e   : > { %v8809_v50 = vpop.eup %8808  ;;  %8822 = vrsqrt.f32 %v815_v62  ;;  %v970_v48 = vpack.c.bf16 %v946_v0, %v945_v44  ;;  %v910_v38 = vmul.f32 %v9839_v20, %v871_v36 }
 0x16f   : > { %v8811_v59 = vpop.eup %8810  ;;  %v816_v45 = vadd.f32 1e-05, %v784_v32  ;;  %v817_v25 = vadd.f32 1e-05, %v785_v23  ;;  %v948_v41 = vadd.f32 %v9846_v31, %v909_v40  ;;  %v872_v51 = vmul.f32 %v8809_v50, %v9747_v30 }
 0x170   : > { %7841 = vmatmul.mubr.msk.bf16.gmra.mxu0 %vm467_vm0, %v970_v48  ;;  %v750_v24 = vpop.xlane.xlu1 %749  ;;  %v753_v1 = vpop.xlane.xlu0 %752  ;;  %v873_v43 = vmul.f32 %v8811_v59, %v9756_v42  ;;  %v949_v42 = vadd.f32 %v9846_v31, %v910_v38 }
 0x171   : > { %8824 = vrsqrt.f32 %v816_v45  ;;  %v786_v7 = vmul.f32 0.03125, %v750_v24  ;;  %v787_v53 = vmul.f32 0.03125, %v753_v1  ;;  %v971_v35 = vpack.c.bf16 %v948_v41, %v947_v57 }
 0x172   : > { %v8813_v8 = vpop.eup %8812  ;;  %8826 = vrsqrt.f32 %v817_v25  ;;  %v911_v28 = vmul.f32 %v9839_v20, %v872_v51  ;;  %v912_v34 = vmul.f32 %v9839_v20, %v873_v43 }
 0x173   : > { %v8815_v10 = vpop.eup %8814  ;;  %v818_v30 = vadd.f32 1e-05, %v786_v7  ;;  %v819_v47 = vadd.f32 1e-05, %v787_v53  ;;  %7844 = vmatprep.mubr.msk.bf16.mxu0 %vm467_vm0, %v971_v35  ;;  %v874_v37 = vmul.f32 %v8813_v8, %v9759_v63 }
 0x174   : > { %v756_v14 = vpop.xlane.xlu1 %755  ;;  %v950_v55 = vadd.f32 %v9846_v31, %v911_v28  ;;  %v875_v6 = vmul.f32 %v8815_v10, %v9771_v58  ;;  %v951_v46 = vadd.f32 %v9846_v31, %v912_v34 }
 0x175   : > { %8828 = vrsqrt.f32 %v818_v30  ;;  %v788_v52 = vmul.f32 0.03125, %v756_v14  ;;  %v913_v49 = vmul.f32 %v9839_v20, %v874_v37 }
 0x176   : > { %v8817_v9 = vpop.eup %8816  ;;  %8830 = vrsqrt.f32 %v819_v47  ;;  %v972_v62 = vpack.c.bf16 %v950_v55, %v949_v42  ;;  %v914_v0 = vmul.f32 %v9839_v20, %v875_v6 }
 0x177   : > { %v8819_v29 = vpop.eup %8818  ;;  %v820_v15 = vadd.f32 1e-05, %v788_v52  ;;  %v952_v63 = vadd.f32 %v9846_v31, %v913_v49  ;;  %v876_v44 = vmul.f32 %v8817_v9, %v9774_v39 }
 0x178   : > { %7845 = vmatmul.mubr.msk.bf16.gmra.mxu0 %vm467_vm0, %v972_v62  ;;  %v877_v58 = vmul.f32 %v8819_v29, %v9786_v54  ;;  %v953_v50 = vadd.f32 %v9846_v31, %v914_v0 }
 0x179   : > { %8832 = vrsqrt.f32 %v820_v15  ;;  %v973_v36 = vpack.c.bf16 %v952_v63, %v951_v46  ;;  %v915_v32 = vmul.f32 %v9839_v20, %v876_v44 }
 0x17a   : > { %v8821_v23 = vpop.eup %8820  ;;  %v916_v57 = vmul.f32 %v9839_v20, %v877_v58 }
 0x17b   : > { %v8823_v40 = vpop.eup %8822  ;;  %7848 = vmatprep.mubr.msk.bf16.mxu0 %vm467_vm0, %v973_v36  ;;  %v954_v48 = vadd.f32 %v9846_v31, %v915_v32  ;;  %v878_v39 = vmul.f32 %v8821_v23, %v9789_v33 }
 0x17c   : > { %v879_v59 = vmul.f32 %v8823_v40, %v9798_v60  ;;  %v955_v51 = vadd.f32 %v9846_v31, %v916_v57 }
 0x17d   : > { %v974_v45 = vpack.c.bf16 %v954_v48, %v953_v50  ;;  %v917_v54 = vmul.f32 %v9839_v20, %v878_v39 }
 0x17e   : > { %v8825_v25 = vpop.eup %8824  ;;  %v918_v38 = vmul.f32 %v9839_v20, %v879_v59 }
 0x17f   : > { %v8827_v41 = vpop.eup %8826  ;;  %v956_v24 = vadd.f32 %v9846_v31, %v917_v54  ;;  %v880_v1 = vmul.f32 %v8825_v25, %v9801_v18 }
 0x180   : > { %7849 = vmatmul.mubr.msk.bf16.gmra.mxu0 %vm467_vm0, %v974_v45  ;;  %v881_v33 = vmul.f32 %v8827_v41, %v9810_v61  ;;  %v957_v35 = vadd.f32 %v9846_v31, %v918_v38 }
 0x181   : > { %v975_v43 = vpack.c.bf16 %v956_v24, %v955_v51  ;;  %v919_v60 = vmul.f32 %v9839_v20, %v880_v1 }
 0x182   : > { %v8829_v7 = vpop.eup %8828  ;;  %v920_v18 = vmul.f32 %v9839_v20, %v881_v33 }
 0x183   : > { %v8831_v53 = vpop.eup %8830  ;;  %7852 = vmatprep.mubr.msk.bf16.mxu0 %vm467_vm0, %v975_v43  ;;  %v958_v8 = vadd.f32 %v9846_v31, %v919_v60  ;;  %v882_v28 = vmul.f32 %v8829_v7, %v9813_v56 }
 0x184   : > { %v883_v34 = vmul.f32 %v8831_v53, %v9822_v13  ;;  %v959_v47 = vadd.f32 %v9846_v31, %v920_v18 }
 0x185   : > { %v976_v10 = vpack.c.bf16 %v958_v8, %v957_v35  ;;  %v921_v61 = vmul.f32 %v9839_v20, %v882_v28 }
 0x186   : > { %v8833_v30 = vpop.eup %8832  ;;  %v922_v42 = vmul.f32 %v9839_v20, %v883_v34 }
 0x187   : > { %v960_v37 = vadd.f32 %v9846_v31, %v921_v61  ;;  %v884_v14 = vmul.f32 %v8833_v30, %v9825_v19  ;;  %v9960_v19 = vld [vmem:[%s13408_s6] ss:$0 sm:$0xff] }
 0x188   : > { %7853 = vmatmul.mubr.msk.bf16.gmra.mxu0 %vm467_vm0, %v976_v10  ;;  %v961_v13 = vadd.f32 %v9846_v31, %v922_v42 }
 0x189   : > { %v977_v55 = vpack.c.bf16 %v960_v37, %v959_v47  ;;  %v923_v56 = vmul.f32 %v9839_v20, %v884_v14 }
 0x18b   : > { %7856 = vmatprep.mubr.msk.bf16.mxu0 %vm467_vm0, %v977_v55  ;;  %v962_v6 = vadd.f32 %v9846_v31, %v923_v56 }
 0x18d   : > { %v978_v52 = vpack.c.bf16 %v962_v6, %v961_v13 }
 0x190   : > { %7857 = vmatmul.mubr.msk.bf16.gmra.mxu0 %vm467_vm0, %v978_v52 }
 0x218   : > { %v7830_v49 = vpop.f32.mrf.mxu0 }
 0x219   : > { %v1093_v62 = vadd.f32 %v7830_v49, %v9960_v19 }
 0x21a   : > { %v1084_v9 = vpop.f32.mrf.mxu0 }
 0x21b   : > { %v1085_v20 = vadd.f32 %v9960_v19, %v1084_v9  ;;  %v1213_v63 = vmul.f32 0.35355338, %v1093_v62 }
 0x21c   : > { %v7831_v46 = vpop.f32.mrf.mxu0 }
 0x21d   : > { %v1096_v29 = vadd.f32 %v7831_v46, %v9960_v19  ;;  %v1211_v58 = vmul.f32 0.35355338, %v1085_v20 }
 0x21e   : > { %v1087_v15 = vpop.f32.mrf.mxu0 }
 0x21f   : > { %v1214_v31 = vmul.f32 0.35355338, %v1096_v29  ;;  %v1088_v44 = vadd.f32 %v9960_v19, %v1087_v15  ;;  %v9991_v8 = vpack.c.bf16 %v1096_v29, %v1093_v62 }
 0x220   : > { %v7834_v0 = vpop.f32.mrf.mxu0 }
 0x221   : > { %v9966_v36 = vpack.c.bf16 %v1214_v31, %v1213_v63  ;;  %v1212_v32 = vmul.f32 0.35355338, %v1088_v44  ;;  %v1109_v50 = vadd.f32 %v7834_v0, %v9960_v19  ;;  %v9984_v60 = vpack.c.bf16 %v1088_v44, %v1085_v20  ;;  %13626 = vst [vmem:[#allocation39_spill] sm:$0xff] %v9991_v8 }
 0x222   : > { %v1100_v23 = vpop.f32.mrf.mxu0 }
 0x223   : > { %v9968_v40 = vpack.c.bf16 %v1212_v32, %v1211_v58  ;;  %v1101_v39 = vadd.f32 %v9960_v19, %v1100_v23  ;;  %v1217_v45 = vmul.f32 0.35355338, %v1109_v50  ;;  %13624 = vst [vmem:[#allocation37_spill] sm:$0xff] %v9984_v60 }
 0x224   : > { %v7835_v48 = vpop.f32.mrf.mxu0 }
 0x225   : > { %13621 = vst [vmem:[#allocation34_spill] sm:$0xff] %v9968_v40  ;;  %v1112_v57 = vadd.f32 %v7835_v48, %v9960_v19  ;;  %7868 = vmatprep.mubr.msk.bf16.mxu0 %vm1295_vm1, %v9968_v40  ;;  %v1215_v24 = vmul.f32 0.35355338, %v1101_v39 }
 0x226   : > { %v1103_v59 = vpop.f32.mrf.mxu0 }
 0x227   : > { %v1218_v54 = vmul.f32 0.35355338, %v1112_v57  ;;  %v9975_v25 = vpack.c.bf16 %v1112_v57, %v1109_v50  ;;  %v1104_v41 = vadd.f32 %v9960_v19, %v1103_v59 }
 0x228   : > { %v7838_v51 = vpop.f32.mrf.mxu0 }
 0x229   : > { %13622 = vst [vmem:[#allocation35_spill] sm:$0xff] %v9975_v25  ;;  %v9978_v1 = vpack.c.bf16 %v1218_v54, %v1217_v45  ;;  %v1216_v38 = vmul.f32 0.35355338, %v1104_v41  ;;  %v9980_v33 = vpack.c.bf16 %v1104_v41, %v1101_v39  ;;  %1293 = vrot.lane.b32.xlu0 %v9975_v25, %s9386_s21  ;;  %v1125_v53 = vadd.f32 %v7838_v51, %v9960_v19 }
 0x22a   : > { %v1116_v43 = vpop.f32.mrf.mxu0 }
 0x22b   : > { %13623 = vst [vmem:[#allocation36_spill] sm:$0xff] %v9980_v33  ;;  %v9986_v7 = vpack.c.bf16 %v1216_v38, %v1215_v24  ;;  %1291 = vrot.lane.b32.xlu1 %v9980_v33, %s9386_s21  ;;  %v1117_v28 = vadd.f32 %v9960_v19, %v1116_v43  ;;  %v1221_v10 = vmul.f32 0.35355338, %v1125_v53 }
 0x22c   : > { %v7839_v35 = vpop.f32.mrf.mxu0 }
 0x22d   : > { %13625 = vst [vmem:[#allocation38_spill] sm:$0xff] %v9986_v7  ;;  %v1128_v18 = vadd.f32 %v7839_v35, %v9960_v19  ;;  %1287 = vrot.lane.b32.xlu0 %v9984_v60, %s9386_s21  ;;  %v1219_v14 = vmul.f32 0.35355338, %v1117_v28 }
 0x22e   : > { %v1119_v34 = vpop.f32.mrf.mxu0 }
 0x22f   : > { %v1222_v61 = vmul.f32 0.35355338, %v1128_v18  ;;  %v9997_v30 = vpack.c.bf16 %v1128_v18, %v1125_v53  ;;  %v1120_v47 = vadd.f32 %v9960_v19, %v1119_v34  ;;  %1289 = vrot.lane.b32.xlu1 %v9991_v8, %s9386_s21 }
 0x230   : > { %v7842_v37 = vpop.f32.mrf.mxu0 }
 0x231   : > { %13627 = vst [vmem:[#allocation40_spill] sm:$0xff] %v9997_v30  ;;  %v10002_v42 = vpack.c.bf16 %v1222_v61, %v1221_v10  ;;  %v1220_v55 = vmul.f32 0.35355338, %v1120_v47  ;;  %1391 = vrot.lane.b32.xlu0 %v9997_v30, %s9386_s21  ;;  %v10008_v6 = vpack.c.bf16 %v1120_v47, %v1117_v28  ;;  %v1141_v52 = vadd.f32 %v7842_v37, %v9960_v19 }
 0x232   : > { %v1132_v56 = vpop.f32.mrf.mxu0 }
 0x233   : > { %v10006_v13 = vpack.c.bf16 %v1220_v55, %v1219_v14  ;;  %v1133_v9 = vadd.f32 %v9960_v19, %v1132_v56  ;;  %v1225_v20 = vmul.f32 0.35355338, %v1141_v52 }
 0x234   : > { %v7843_v49 = vpop.f32.mrf.mxu0 }
 0x235   : > { %v1144_v62 = vadd.f32 %v7843_v49, %v9960_v19  ;;  %1389 = vrot.lane.b32.xlu0 %v10008_v6, %s9386_s21  ;;  %7884 = vmatprep.mubr.msk.bf16.mxu1 %vm1295_vm1, %v10006_v13  ;;  %v1223_v44 = vmul.f32 0.35355338, %v1133_v9 }
 0x236   : > { %v1135_v46 = vpop.f32.mrf.mxu0 }
 0x237   : > { %v1226_v29 = vmul.f32 0.35355338, %v1144_v62  ;;  %v10017_v15 = vpack.c.bf16 %v1144_v62, %v1141_v52  ;;  %v1136_v63 = vadd.f32 %v9960_v19, %v1135_v46 }
 0x238   : > { %v7846_v31 = vpop.f32.mrf.mxu0 }
 0x239   : > { %13628 = vst [vmem:[#allocation41_spill] sm:$0xff] %v10017_v15  ;;  %v10020_v0 = vpack.c.bf16 %v1226_v29, %v1225_v20  ;;  %v1224_v58 = vmul.f32 0.35355338, %v1136_v63  ;;  %1395 = vrot.lane.b32.xlu1 %v10017_v15, %s9386_s21  ;;  %v10026_v50 = vpack.c.bf16 %v1136_v63, %v1133_v9  ;;  %v1157_v48 = vadd.f32 %v7846_v31, %v9960_v19 }
 0x23a   : > { %v1148_v32 = vpop.f32.mrf.mxu0 }
 0x23b   : > { %13629 = vst [vmem:[#allocation42_spill] sm:$0xff] %v10020_v0  ;;  %v10024_v23 = vpack.c.bf16 %v1224_v58, %v1223_v44  ;;  %13631 = vst [vmem:[#allocation44_spill] sm:$0xff] %v10026_v50  ;;  %v1149_v57 = vadd.f32 %v9960_v19, %v1148_v32  ;;  %v1229_v54 = vmul.f32 0.35355338, %v1157_v48 }
 0x23c   : > { %v7847_v39 = vpop.f32.mrf.mxu0 }
 0x23d   : > { %13630 = vst [vmem:[#allocation43_spill] sm:$0xff] %v10024_v23  ;;  %v1160_v59 = vadd.f32 %v7847_v39, %v9960_v19  ;;  %1393 = vrot.lane.b32.xlu1 %v10026_v50, %s9386_s21  ;;  %v1227_v43 = vmul.f32 0.35355338, %v1149_v57 }
 0x23e   : > { %v1151_v45 = vpop.f32.mrf.mxu0 }
 0x23f   : > { %v1230_v41 = vmul.f32 0.35355338, %v1160_v59  ;;  %v10033_v51 = vpack.c.bf16 %v1160_v59, %v1157_v48  ;;  %v1152_v24 = vadd.f32 %v9960_v19, %v1151_v45 }
 0x240   : > { %v7850_v38 = vpop.f32.mrf.mxu0 }
 0x241   : > { %v10036_v53 = vpack.c.bf16 %v1230_v41, %v1229_v54  ;;  %v1228_v35 = vmul.f32 0.35355338, %v1152_v24  ;;  %1492 = vrot.lane.b32.xlu0 %v10033_v51, %s9386_s21  ;;  %v10042_v34 = vpack.c.bf16 %v1152_v24, %v1149_v57  ;;  %v1173_v10 = vadd.f32 %v7850_v38, %v9960_v19 }
 0x242   : > { %v1164_v28 = vpop.f32.mrf.mxu0 }
 0x243   : > { %v10040_v18 = vpack.c.bf16 %v1228_v35, %v1227_v43  ;;  %13633 = vst [vmem:[#allocation46_spill] sm:$0xff] %v10042_v34  ;;  %v1165_v47 = vadd.f32 %v9960_v19, %v1164_v28  ;;  %v1233_v55 = vmul.f32 0.35355338, %v1173_v10 }
 0x244   : > { %v7851_v61 = vpop.f32.mrf.mxu0 }
 0x245   : > { %13632 = vst [vmem:[#allocation45_spill] sm:$0xff] %v10040_v18  ;;  %v1176_v37 = vadd.f32 %v7851_v61, %v9960_v19  ;;  %1490 = vrot.lane.b32.xlu0 %v10042_v34, %s9386_s21  ;;  %v1231_v62 = vmul.f32 0.35355338, %v1165_v47 }
 0x246   : > { %v1167_v14 = vpop.f32.mrf.mxu0 }
 0x247   : > { %v1234_v56 = vmul.f32 0.35355338, %v1176_v37  ;;  %v10049_v52 = vpack.c.bf16 %v1176_v37, %v1173_v10  ;;  %v1168_v49 = vadd.f32 %v9960_v19, %v1167_v14 }
 0x248   : > { %v7854_v9 = vpop.f32.mrf.mxu0 }
 0x249   : > { %13634 = vst [vmem:[#allocation47_spill] sm:$0xff] %v10049_v52  ;;  %v10052_v46 = vpack.c.bf16 %v1234_v56, %v1233_v55  ;;  %v1232_v20 = vmul.f32 0.35355338, %v1168_v49  ;;  %1496 = vrot.lane.b32.xlu1 %v10049_v52, %s9386_s21  ;;  %v10058_v31 = vpack.c.bf16 %v1168_v49, %v1165_v47  ;;  %v1189_v44 = vadd.f32 %v7854_v9, %v9960_v19 }
 0x24a   : > { %v1180_v29 = vpop.f32.mrf.mxu0 }
 0x24b   : > { %13635 = vst [vmem:[#allocation48_spill] sm:$0xff] %v10052_v46  ;;  %v10056_v63 = vpack.c.bf16 %v1232_v20, %v1231_v62  ;;  %v1181_v32 = vadd.f32 %v9960_v19, %v1180_v29  ;;  %v1237_v57 = vmul.f32 0.35355338, %v1189_v44 }
 0x24c   : > { %v7855_v58 = vpop.f32.mrf.mxu0 }
 0x24d   : > { %13636 = vst [vmem:[#allocation49_spill] sm:$0xff] %v10056_v63  ;;  %v1192_v48 = vadd.f32 %v7855_v58, %v9960_v19  ;;  %1494 = vrot.lane.b32.xlu1 %v10058_v31, %s9386_s21  ;;  %v1235_v24 = vmul.f32 0.35355338, %v1181_v32 }
 0x24e   : > { %v1183_v39 = vpop.f32.mrf.mxu0 }
 0x24f   : > { %v1238_v59 = vmul.f32 0.35355338, %v1192_v48  ;;  %v10065_v45 = vpack.c.bf16 %v1192_v48, %v1189_v44  ;;  %v1184_v54 = vadd.f32 %v9960_v19, %v1183_v39 }
 0x250   : > { %v7858_v41 = vpop.f32.mrf.mxu0 }
 0x251   : > { %13637 = vst [vmem:[#allocation50_spill] sm:$0xff] %v10065_v45  ;;  %v10068_v38 = vpack.c.bf16 %v1238_v59, %v1237_v57  ;;  %v1236_v43 = vmul.f32 0.35355338, %v1184_v54  ;;  %1593 = vrot.lane.b32.xlu0 %v10065_v45, %s9386_s21  ;;  %v1205_v10 = vadd.f32 %v7858_v41, %v9960_v19 }
 0x252   : > { %v1196_v35 = vpop.f32.mrf.mxu0 }
 0x253   : > { %13638 = vst [vmem:[#allocation51_spill] sm:$0xff] %v10068_v38  ;;  %v10072_v28 = vpack.c.bf16 %v1236_v43, %v1235_v24  ;;  %v1197_v47 = vadd.f32 %v9960_v19, %v1196_v35  ;;  %v1241_v55 = vmul.f32 0.35355338, %v1205_v10 }
 0x254   : > { %v7859_v61 = vpop.f32.mrf.mxu0 }
 0x255   : > { %13639 = vst [vmem:[#allocation52_spill] sm:$0xff] %v10072_v28  ;;  %v1208_v37 = vadd.f32 %v7859_v61, %v9960_v19  ;;  %2127 = vrot.lane.b32.xlu0 %v9975_v25, %s9387_s22  ;;  %v1239_v62 = vmul.f32 0.35355338, %v1197_v47 }
 0x256   : > { %v1199_v14 = vpop.f32.mrf.mxu0 }
 0x257   : > { %v1242_v56 = vmul.f32 0.35355338, %v1208_v37  ;;  %v10079_v49 = vpack.c.bf16 %v1208_v37, %v1205_v10  ;;  %v1200_v9 = vadd.f32 %v9960_v19, %v1199_v14  ;;  %v10096_v19 = vpack.c.bf16 %v1184_v54, %v1181_v32 }
 0x259   : > { %v10082_v20 = vpack.c.bf16 %v1242_v56, %v1241_v55  ;;  %v1240_v29 = vmul.f32 0.35355338, %v1200_v9  ;;  %2121 = vrot.lane.b32.xlu0 %v9984_v60, %s9387_s22  ;;  %1597 = vrot.lane.b32.xlu1 %v10079_v49, %s9386_s21  ;;  %v10090_v58 = vpack.c.bf16 %v1200_v9, %v1197_v47 }
 0x25b   : > { %13640 = vst [vmem:[#allocation53_spill] sm:$0xff] %v10082_v20  ;;  %v10088_v44 = vpack.c.bf16 %v1240_v29, %v1239_v62 }
 0x25d   : > { %13641 = vst [vmem:[#allocation54_spill] sm:$0xff] %v10088_v44  ;;  %2305 = vrot.lane.b32.xlu0 %v10049_v52, %s9387_s22  ;;  %1595 = vrot.lane.b32.xlu1 %v10090_v58, %s9386_s21 }
 0x261   : > { %2214 = vrot.lane.b32.xlu0 %v10026_v50, %s9387_s22  ;;  %1591 = vrot.lane.b32.xlu1 %v10096_v19, %s9386_s21  ;;  %s9396_s21 = smov 40  }
 0x265   : > { %2212 = vrot.lane.b32.xlu0 %v9997_v30, %s9387_s22  ;;  %2125 = vrot.lane.b32.xlu1 %v9980_v33, %s9387_s22 }
 0x269   : > { %2210 = vrot.lane.b32.xlu0 %v10008_v6, %s9387_s22  ;;  %2123 = vrot.lane.b32.xlu1 %v9991_v8, %s9387_s22 }
 0x26d   : > { %2502 = vrot.lane.b32.xlu0 %v9980_v33, %s9388_s23  ;;  %2216 = vrot.lane.b32.xlu1 %v10017_v15, %s9387_s22 }
 0x271   : > { %2500 = vrot.lane.b32.xlu0 %v9991_v8, %s9388_s23  ;;  %2303 = vrot.lane.b32.xlu1 %v10058_v31, %s9387_s22  ;;  %v1710_v8 = vld [vmem:[%s10215_s28 + $0xb0] sm:$0xff] }
 0x275   : > { %2490 = vrot.lane.b32.xlu0 %v9968_v40, %s9389_s24  ;;  %2301 = vrot.lane.b32.xlu1 %v10033_v51, %s9387_s22 }
 0x279   : > { %2392 = vrot.lane.b32.xlu0 %v10090_v58, %s9387_s22  ;;  %2299 = vrot.lane.b32.xlu1 %v10042_v34, %s9387_s22 }
 0x27d   : > { %2394 = vrot.lane.b32.xlu1 %v10079_v49, %s9387_s22 }
 0x281   : > { %2504 = vrot.lane.b32.xlu1 %v9975_v25, %s9388_s23 }
 0x285   : > { %2390 = vrot.lane.b32.xlu1 %v10065_v45, %s9387_s22  ;;  %v1714_v45 = vld [vmem:[%s10215_s28 + $0xd0] sm:$0xff] }
 0x289   : > { %2388 = vrot.lane.b32.xlu1 %v10096_v19, %s9387_s22 }
 0x28d   : > { %2613 = vrot.lane.b32.xlu1 %v10017_v15, %s9388_s23 }
 0x291   : > { %2498 = vrot.lane.b32.xlu1 %v9984_v60, %s9388_s23 }
 0x295   : > { %2611 = vrot.lane.b32.xlu1 %v10026_v50, %s9388_s23 }
 0x299   : > { %2609 = vrot.lane.b32.xlu1 %v9997_v30, %s9388_s23  ;;  %v1702_v30 = vld [vmem:[%s10215_s28 + $0x70] sm:$0xff] }
 0x29b   : > { %v1294_v32 = vpop.permute.xlu0 %1293 }
 0x29c   : > { %8408 = vmatprep.subr.msk.bf16.mxu0 %vm1295_vm1, %v1294_v32  ;;  %v1318_v48 = vsel %vm1295_vm1, %v1294_v32, 0 }
 0x29d   : > { %v1292_v39 = vpop.permute.xlu1 %1291  ;;  %7861 = vmatpush3.bf16.xpose.msra.mxu0 %v1318_v48 }
 0x29e   : > { %8409 = vmatprep.subr.msk.bf16.mxu0 %vm1295_vm1, %v1292_v39  ;;  %v1315_v57 = vsel %vm1295_vm1, %v1292_v39, 0 }
 0x29f   : > { %v1288_v43 = vpop.permute.xlu0 %1287 }
 0x2a0   : > { %v1309_v10 = vsel %vm1295_vm1, %v1288_v43, 0 }
 0x2a1   : > { %v1290_v59 = vpop.permute.xlu1 %1289 }
 0x2a2   : > { %v1312_v41 = vsel %vm1295_vm1, %v1290_v59, 0 }
 0x2a3   : > { %v1392_v47 = vpop.permute.xlu0 %1391 }
 0x2a4   : > { %v1413_v14 = vsel %vm1295_vm1, %v1392_v47, 0 }
 0x2a5   : > { %7863 = vmatpush3.bf16.xpose.msra.mxu0 %v1315_v57 }
 0x2a6   : > { %8410 = vmatprep.subr.msk.bf16.mxu0 %vm1295_vm1, %v1290_v59 }
 0x2a7   : > { %v1390_v56 = vpop.permute.xlu0 %1389 }
 0x2a8   : > { %v1410_v62 = vsel %vm1295_vm1, %v1390_v56, 0 }
 0x2ab   : > { %v1396_v54 = vpop.permute.xlu1 %1395 }
 0x2ac   : > { %8412 = vmatprep.subr.msk.bf16.mxu1 %vm1295_vm1, %v1396_v54  ;;  %v1419_v24 = vsel %vm1295_vm1, %v1396_v54, 0 }
 0x2ad   : > { %7865 = vmatpush3.bf16.xpose.msra.mxu0 %v1312_v41  ;;  %7877 = vmatpush3.bf16.xpose.msra.mxu1 %v1419_v24 }
 0x2ae   : > { %8411 = vmatprep.subr.msk.bf16.mxu0 %vm1295_vm1, %v1288_v43 }
 0x2af   : > { %v1394_v35 = vpop.permute.xlu1 %1393 }
 0x2b0   : > { %8413 = vmatprep.subr.msk.bf16.mxu1 %vm1295_vm1, %v1394_v35  ;;  %v1416_v61 = vsel %vm1295_vm1, %v1394_v35, 0 }
 0x2b3   : > { %v1493_v32 = vpop.permute.xlu0 %1492 }
 0x2b4   : > { %v1514_v59 = vsel %vm1295_vm1, %v1493_v32, 0 }
 0x2b5   : > { %7867 = vmatpush3.bf16.xpose.msra.mxu0 %v1309_v10  ;;  %7879 = vmatpush3.bf16.xpose.msra.mxu1 %v1416_v61 }
 0x2b6   : > { %8414 = vmatprep.subr.msk.bf16.mxu1 %vm1295_vm1, %v1392_v47 }
 0x2b7   : > { %v1491_v39 = vpop.permute.xlu0 %1490 }
 0x2b8   : > { %v1511_v35 = vsel %vm1295_vm1, %v1491_v39, 0 }
 0x2bb   : > { %v1497_v37 = vpop.permute.xlu1 %1496 }
 0x2bc   : > { %7869 = vmatmul.mubr.msk.bf16.vlgmr.msra.gmra.mxu0 %vm1295_vm1, %v9966_v36  ;;  %8416 = vmatprep.subr.msk.bf16.mxu0 %vm1295_vm1, %v1497_v37  ;;  %v1520_v55 = vsel %vm1295_vm1, %v1497_v37, 0 }
 0x2bd   : > { %7872 = vmatprep.mubr.msk.bf16.mxu0 %vm1295_vm1, %v9986_v7  ;;  %7881 = vmatpush3.bf16.xpose.msra.mxu1 %v1413_v14 }
 0x2be   : > { %7893 = vmatpush3.bf16.xpose.msra.mxu0 %v1520_v55  ;;  %8415 = vmatprep.subr.msk.bf16.mxu1 %vm1295_vm1, %v1390_v56 }
 0x2bf   : > { %v1495_v9 = vpop.permute.xlu1 %1494 }
 0x2c0   : > { %8417 = vmatprep.subr.msk.bf16.mxu0 %vm1295_vm1, %v1495_v9  ;;  %v1517_v29 = vsel %vm1295_vm1, %v1495_v9, 0 }
 0x2c3   : > { %v1594_v41 = vpop.permute.xlu0 %1593 }
 0x2c4   : > { %7873 = vmatmul.mubr.msk.bf16.gmra.mxu0 %vm1295_vm1, %v9978_v1  ;;  %v1615_v37 = vsel %vm1295_vm1, %v1594_v41, 0 }
 0x2c5   : > { %7883 = vmatpush3.bf16.xpose.msra.mxu1 %v1410_v62  ;;  %7900 = vmatprep.mubr.msk.bf16.mxu0 %vm1295_vm1, %v10040_v18 }
 0x2c6   : > { %7895 = vmatpush3.bf16.xpose.msra.mxu0 %v1517_v29 }
 0x2c7   : > { %8418 = vmatprep.subr.msk.bf16.mxu0 %vm1295_vm1, %v1493_v32  ;;  %v2128_v10 = vpop.permute.xlu0 %2127 }
 0x2cb   : > { %v1598_v48 = vpop.permute.xlu1 %1597  ;;  %v2122_v14 = vpop.permute.xlu0 %2121 }
 0x2cc   : > { %7885 = vmatmul.mubr.msk.bf16.vlgmr.msra.gmra.mxu1 %vm1295_vm1, %v10002_v42  ;;  %8420 = vmatprep.subr.msk.bf16.mxu1 %vm1295_vm1, %v1598_v48  ;;  %v1621_v57 = vsel %vm1295_vm1, %v1598_v48, 0 }
 0x2cd   : > { %7888 = vmatprep.mubr.msk.bf16.mxu1 %vm1295_vm1, %v10024_v23  ;;  %7909 = vmatpush3.bf16.xpose.msra.mxu1 %v1621_v57  ;;  %v10220_v57 = vld [vmem:[%s13404_s2 + $0x10] sm:$0xff] }
 0x2ce   : > { %7897 = vmatpush3.bf16.xpose.msra.mxu0 %v1514_v59 }
 0x2cf   : > { %8419 = vmatprep.subr.msk.bf16.mxu0 %vm1295_vm1, %v1491_v39  ;;  %v1596_v54 = vpop.permute.xlu1 %1595  ;;  %v2306_v62 = vpop.permute.xlu0 %2305 }
 0x2d0   : > { %8421 = vmatprep.subr.msk.bf16.mxu1 %vm1295_vm1, %v1596_v54  ;;  %v1618_v43 = vsel %vm1295_vm1, %v1596_v54, 0  ;;  %v1690_v54 = vld [vmem:[%s10215_s28 + $0x10] sm:$0xff] }
 0x2d3   : > { %v1592_v24 = vpop.permute.xlu1 %1591 }
 0x2d4   : > { %7889 = vmatmul.mubr.msk.bf16.gmra.mxu1 %vm1295_vm1, %v10020_v0  ;;  %v1612_v9 = vsel %vm1295_vm1, %v1592_v24, 0 }
 0x2d5   : > { %7911 = vmatpush3.bf16.xpose.msra.mxu1 %v1618_v43  ;;  %7916 = vmatprep.mubr.msk.bf16.mxu1 %vm1295_vm1, %v10072_v28 }
 0x2d6   : > { %7899 = vmatpush3.bf16.xpose.msra.mxu0 %v1511_v35  ;;  %8422 = vmatprep.subr.msk.bf16.mxu1 %vm1295_vm1, %v1594_v41  ;;  %v10226_v41 = vld [vmem:[%s13404_s2] sm:$0xff] }
 0x2d7   : > { %7924 = vmatprep.subr.bf16.mxu0 %v2128_v10  ;;  %v2126_v61 = vpop.permute.xlu1 %2125  ;;  %v1688_v35 = vld [vmem:[%s10215_s28] sm:$0xff] }
 0x2db   : > { %v2124_v47 = vpop.permute.xlu1 %2123 }
 0x2dd   : > { %7901 = vmatmul.mubr.msk.bf16.vlgmr.msra.gmra.mxu0 %vm1295_vm1, %v10036_v53  ;;  %7913 = vmatpush3.bf16.xpose.msra.mxu1 %v1615_v37 }
 0x2de   : > { %7904 = vmatprep.mubr.msk.bf16.mxu0 %vm1295_vm1, %v10056_v63  ;;  %7925 = vmatpush3.bf16.msra.mxu0 %v2128_v10  ;;  %v10233_v10 = vld [vmem:[%s13404_s2 + $0x18] sm:$0xff] }
 0x2df   : > { %8423 = vmatprep.subr.msk.bf16.mxu1 %vm1295_vm1, %v1592_v24  ;;  %7926 = vmatprep.subr.bf16.mxu0 %v2126_v61  ;;  %v10193_v55 = vpop.permute.xlu1 %2216 }
 0x2e0   : > { %13642 = vst [vmem:[#allocation55_spill] sm:$0xff] %v10193_v55 }
 0x2e2   : > { %7927 = vmatpush3.bf16.msra.mxu0 %v2126_v61 }
 0x2e3   : > { %7928 = vmatprep.subr.bf16.mxu0 %v2124_v47  ;;  %v2304_v56 = vpop.permute.xlu1 %2303 }
 0x2e5   : > { %7905 = vmatmul.mubr.msk.bf16.gmra.mxu0 %vm1295_vm1, %v10052_v46  ;;  %7915 = vmatpush3.bf16.xpose.msra.mxu1 %v1612_v9 }
 0x2e6   : > { %7929 = vmatpush3.bf16.msra.mxu0 %v2124_v47  ;;  %7956 = vmatprep.subr.bf16.mxu1 %v2306_v62 }
 0x2e7   : > { %7930 = vmatprep.subr.bf16.mxu0 %v2122_v14  ;;  %v2302_v29 = vpop.permute.xlu1 %2301 }
 0x2ea   : > { %7931 = vmatpush3.bf16.msra.mxu0 %v2122_v14  ;;  %v10241_v14 = vld [vmem:[%s13404_s2 + $0x8] sm:$0xff] }
 0x2eb   : > { %7940 = vmatprep.subr.bf16.mxu0 %v10193_v55  ;;  %v2300_v32 = vpop.permute.xlu1 %2299 }
 0x2ec   : > { %7917 = vmatmul.mubr.msk.bf16.vlgmr.msra.gmra.mxu1 %vm1295_vm1, %v10068_v38 }
 0x2ed   : > { %7920 = vmatprep.mubr.msk.bf16.mxu1 %vm1295_vm1, %v10088_v44  ;;  %7957 = vmatpush3.bf16.msra.mxu1 %v2306_v62 }
 0x2ee   : > { %7958 = vmatprep.subr.bf16.mxu1 %v2304_v56 }
 0x2ef   : > { %v10203_v48 = vpop.permute.xlu1 %2394 }
 0x2f0   : > { %13643 = vst [vmem:[#allocation56_spill] sm:$0xff] %v10203_v48 }
 0x2f1   : > { %7959 = vmatpush3.bf16.msra.mxu1 %v2304_v56 }
 0x2f2   : > { %7960 = vmatprep.subr.bf16.mxu1 %v2302_v29 }
 0x2f3   : > { %v10207_v39 = vpop.permute.xlu1 %2504 }
 0x2f4   : > { %7921 = vmatmul.mubr.msk.bf16.gmra.mxu1 %vm1295_vm1, %v10082_v20  ;;  %13644 = vst [vmem:[#allocation57_spill] sm:$0xff] %v10207_v39 }
 0x2f5   : > { %7961 = vmatpush3.bf16.msra.mxu1 %v2302_v29  ;;  %v1691_v29 = vld [vmem:[%s10215_s28 + $0x18] sm:$0xff] }
 0x2f6   : > { %7962 = vmatprep.subr.bf16.mxu1 %v2300_v32 }
 0x2f9   : > { %7963 = vmatpush3.bf16.msra.mxu1 %v2300_v32 }
 0x2fa   : > { %8424 = vmatprep.subr.msk.bf16.mxu1 %vm1295_vm1, %v10207_v39 }
 0x37c   : > { %v7870_v59 = vpop.f32.mrf.mxu0 }
 0x37d   : > { %v1363_v24 = vadd.f32 %v7870_v59, %v10220_v57  ;;  %v10252_v59 = vld [vmem:[%s13404_s2 + $0x30] sm:$0xff] }
 0x37e   : > { %v1354_v43 = vpop.f32.mrf.mxu0 }
 0x37f   : > { %v10235_v61 = vadd.f32 %v1690_v54, %v1363_v24  ;;  %v1355_v47 = vadd.f32 %v1354_v43, %v10226_v41  ;;  %v1689_v54 = vld [vmem:[%s10215_s28 + $0x8] sm:$0xff] }
 0x380   : > { %v7871_v37 = vpop.f32.mrf.mxu0 }
 0x381   : > { %v10243_v56 = vadd.f32 %v1688_v35, %v1355_v47  ;;  %v1366_v9 = vadd.f32 %v7871_v37, %v10233_v10  ;;  %v1759_v62 = vsel %vm1752_vm2, %v10235_v61, -inf  ;;  %v10262_v37 = vld [vmem:[%s13404_s2 + $0x20] sm:$0xff] }
 0x382   : > { %1760 = vmax.xlane.f32.xlu0 %v1759_v62  ;;  %v1357_v32 = vpop.f32.mrf.mxu0 }
 0x383   : > { %v1358_v24 = vadd.f32 %v1357_v32, %v10241_v14  ;;  %v10256_v35 = vadd.f32 %v1691_v29, %v1366_v9  ;;  %v1753_v62 = vsel %vm1752_vm2, %v10243_v56, -inf  ;;  %v10272_v9 = vld [vmem:[%s13404_s2 + $0x38] sm:$0xff] }
 0x384   : > { %v7874_v43 = vpop.f32.mrf.mxu0 }
 0x385   : > { %v1379_v47 = vadd.f32 %v7874_v43, %v10252_v59  ;;  %v10266_v22 = vadd.f32 %v1689_v54, %v1358_v24  ;;  %v10281_v54 = vld [vmem:[%s13404_s2 + $0x28] sm:$0xff]  ;;  %v1762_v17 = vsel %vm1752_vm2, %v10256_v35, -inf }
 0x386   : > { %v1370_v21 = vpop.f32.mrf.mxu0  ;;  %1754 = vmax.xlane.f32.xlu0 %v1753_v62  ;;  %v1692_v62 = vld [vmem:[%s10215_s28 + $0x20] sm:$0xff] }
 0x387   : > { %v1756_v29 = vsel %vm1752_vm2, %v10266_v22, -inf  ;;  %v1371_v32 = vadd.f32 %v1370_v21, %v10262_v37  ;;  %v10283_v24 = vadd.f32 %v1694_v27, %v1379_v47  ;;  %v1693_v21 = vld [vmem:[%s10215_s28 + $0x28] sm:$0xff] }
 0x388   : > { %v7875_v43 = vpop.f32.mrf.mxu0  ;;  %1757 = vmax.xlane.f32.xlu1 %v1756_v29 }
 0x389   : > { %v1382_v12 = vadd.f32 %v7875_v43, %v10272_v9  ;;  %v10293_v4 = vadd.f32 %v1692_v62, %v1371_v32  ;;  %v1771_v43 = vsel %vm1752_vm2, %v10283_v24, -inf  ;;  %v1699_v32 = vld [vmem:[%s10215_s28 + $0x58] sm:$0xff] }
 0x38a   : > { %v1373_v11 = vpop.f32.mrf.mxu0  ;;  %1763 = vmax.xlane.f32.xlu0 %v1762_v17  ;;  %v1698_v17 = vld [vmem:[%s10215_s28 + $0x50] sm:$0xff] }
 0x38b   : > { %v10290_v16 = vadd.f32 %v1695_v26, %v1382_v12  ;;  %v1374_v29 = vadd.f32 %v1373_v11, %v10281_v54 }
 0x38c   : > { %v7886_v5 = vpop.f32.mrf.mxu1 }
 0x38d   : > { %v1464_v27 = vadd.f32 %v7886_v5, %v10220_v57  ;;  %v1774_v47 = vsel %vm1752_vm2, %v10290_v16, -inf  ;;  %v10300_v2 = vadd.f32 %v1693_v21, %v1374_v29  ;;  %v1696_v5 = vld [vmem:[%s10215_s28 + $0x40] sm:$0xff]  ;;  %v1765_v21 = vsel %vm1752_vm2, %v10293_v4, -inf }
 0x38e   : > { %1775 = vmax.xlane.f32.xlu1 %v1774_v47  ;;  %1772 = vmax.xlane.f32.xlu0 %v1771_v43  ;;  %v1455_v12 = vpop.f32.mrf.mxu1  ;;  %v1697_v47 = vld [vmem:[%s10215_s28 + $0x48] sm:$0xff] }
 0x38f   : > { %v1456_v11 = vadd.f32 %v1455_v12, %v10226_v41  ;;  %v10305_v62 = vadd.f32 %v1698_v17, %v1464_v27  ;;  %v1768_v40 = vsel %vm1752_vm2, %v10300_v2, -inf }
 0x390   : > { %v7887_v26 = vpop.f32.mrf.mxu1 }
 0x391   : > { %v1467_v3 = vadd.f32 %v7887_v26, %v10233_v10  ;;  %v10317_v17 = vadd.f32 %v1696_v5, %v1456_v11  ;;  %v1783_v39 = vsel %vm1752_vm2, %v10305_v62, -inf  ;;  %v1703_v11 = vld [vmem:[%s10215_s28 + $0x78] sm:$0xff] }
 0x392   : > { %1769 = vmax.xlane.f32.xlu1 %v1768_v40  ;;  %1766 = vmax.xlane.f32.xlu0 %v1765_v21  ;;  %v1458_v29 = vpop.f32.mrf.mxu1 }
 0x393   : > { %v10314_v43 = vadd.f32 %v1699_v32, %v1467_v3  ;;  %v1459_v27 = vadd.f32 %v1458_v29, %v10241_v14  ;;  %v1777_v5 = vsel %vm1752_vm2, %v10317_v17, -inf }
 0x394   : > { %v7890_v12 = vpop.f32.mrf.mxu1 }
 0x395   : > { %v1480_v26 = vadd.f32 %v7890_v12, %v10252_v59  ;;  %v1786_v40 = vsel %vm1752_vm2, %v10314_v43, -inf  ;;  %v10324_v21 = vadd.f32 %v1697_v47, %v1459_v27  ;;  %v1700_v27 = vld [vmem:[%s10215_s28 + $0x60] sm:$0xff] }
 0x396   : > { %1784 = vmax.xlane.f32.xlu0 %v1783_v39  ;;  %1787 = vmax.xlane.f32.xlu1 %v1786_v40  ;;  %v1471_v3 = vpop.f32.mrf.mxu1  ;;  %v1701_v39 = vld [vmem:[%s10215_s28 + $0x68] sm:$0xff] }
 0x397   : > { %v10330_v29 = vadd.f32 %v1702_v30, %v1480_v26  ;;  %v1472_v12 = vadd.f32 %v1471_v3, %v10262_v37  ;;  %v1780_v47 = vsel %vm1752_vm2, %v10324_v21, -inf }
 0x398   : > { %v7891_v32 = vpop.f32.mrf.mxu1 }
 0x399   : > { %v1483_v50 = vadd.f32 %v7891_v32, %v10272_v9  ;;  %v10341_v30 = vadd.f32 %v1700_v27, %v1472_v12  ;;  %v1795_v32 = vsel %vm1752_vm2, %v10330_v29, -inf  ;;  %v1707_v27 = vld [vmem:[%s10215_s28 + $0x98] sm:$0xff] }
 0x39a   : > { %v1474_v60 = vpop.f32.mrf.mxu1  ;;  %1781 = vmax.xlane.f32.xlu1 %v1780_v47  ;;  %1778 = vmax.xlane.f32.xlu0 %v1777_v5  ;;  %v1706_v47 = vld [vmem:[%s10215_s28 + $0x90] sm:$0xff] }
 0x39b   : > { %v10338_v40 = vadd.f32 %v1703_v11, %v1483_v50  ;;  %v1475_v25 = vadd.f32 %v1474_v60, %v10281_v54 }
 0x39d   : > { %v7902_v26 = vpop.f32.mrf.mxu0  ;;  %v1798_v3 = vsel %vm1752_vm2, %v10338_v40, -inf  ;;  %v10347_v44 = vadd.f32 %v1701_v39, %v1475_v25  ;;  %v1789_v25 = vsel %vm1752_vm2, %v10341_v30, -inf  ;;  %v1704_v39 = vld [vmem:[%s10215_s28 + $0x80] sm:$0xff] }
 0x39e   : > { %v1565_v5 = vadd.f32 %v7902_v26, %v10220_v57  ;;  %1799 = vmax.xlane.f32.xlu1 %v1798_v3  ;;  %1796 = vmax.xlane.f32.xlu0 %v1795_v32  ;;  %v1705_v32 = vld [vmem:[%s10215_s28 + $0x88] sm:$0xff] }
 0x39f   : > { %v1556_v50 = vpop.f32.mrf.mxu0  ;;  %v1792_v63 = vsel %vm1752_vm2, %v10347_v44, -inf }
 0x3a0   : > { %v10351_v60 = vadd.f32 %v1706_v47, %v1565_v5  ;;  %v1557_v11 = vadd.f32 %v1556_v50, %v10226_v41 }
 0x3a1   : > { %v7903_v12 = vpop.f32.mrf.mxu0 }
 0x3a2   : > { %v1568_v26 = vadd.f32 %v7903_v12, %v10233_v10  ;;  %1793 = vmax.xlane.f32.xlu1 %v1792_v63  ;;  %1790 = vmax.xlane.f32.xlu0 %v1789_v25  ;;  %v10365_v50 = vadd.f32 %v1704_v39, %v1557_v11  ;;  %v1807_v15 = vsel %vm1752_vm2, %v10351_v60, -inf }
 0x3a3   : > { %v1559_v3 = vpop.f32.mrf.mxu0 }
 0x3a4   : > { %v10362_v5 = vadd.f32 %v1707_v27, %v1568_v26  ;;  %v1560_v47 = vadd.f32 %v1559_v3, %v10241_v14  ;;  %v1711_v26 = vld [vmem:[%s10215_s28 + $0xb8] sm:$0xff]  ;;  %v1708_v3 = vld [vmem:[%s10215_s28 + $0xa0] sm:$0xff] }
 0x3a5   : > { %v7906_v48 = vpop.f32.mrf.mxu0 }
 0x3a6   : > { %v1581_v28 = vadd.f32 %v7906_v48, %v10252_v59  ;;  %1808 = vmax.xlane.f32.xlu0 %v1807_v15  ;;  %v1810_v63 = vsel %vm1752_vm2, %v10362_v5, -inf  ;;  %v10373_v12 = vadd.f32 %v1705_v32, %v1560_v47  ;;  %v1801_v48 = vsel %vm1752_vm2, %v10365_v50, -inf }
 0x3a7   : > { %1811 = vmax.xlane.f32.xlu1 %v1810_v63  ;;  %v1572_v27 = vpop.f32.mrf.mxu0 }
 0x3a8   : > { %v10375_v25 = vadd.f32 %v1710_v8, %v1581_v28  ;;  %v1573_v11 = vadd.f32 %v1572_v27, %v10262_v37  ;;  %v1804_v0 = vsel %vm1752_vm2, %v10373_v12, -inf  ;;  %v1709_v8 = vld [vmem:[%s10215_s28 + $0xa8] sm:$0xff] }
 0x3a9   : > { %v7907_v39 = vpop.f32.mrf.mxu0 }
 0x3aa   : > { %v1584_v15 = vadd.f32 %v7907_v39, %v10272_v9  ;;  %1802 = vmax.xlane.f32.xlu0 %v1801_v48  ;;  %v10389_v27 = vadd.f32 %v1708_v3, %v1573_v11  ;;  %v1819_v39 = vsel %vm1752_vm2, %v10375_v25, -inf }
 0x3ab   : > { %v1575_v32 = vpop.f32.mrf.mxu0  ;;  %1805 = vmax.xlane.f32.xlu1 %v1804_v0 }
 0x3ac   : > { %v10386_v28 = vadd.f32 %v1711_v26, %v1584_v15  ;;  %v1576_v47 = vadd.f32 %v1575_v32, %v10281_v54  ;;  %v7918_v63 = vpop.f32.mrf.mxu1  ;;  %v1715_v32 = vld [vmem:[%s10215_s28 + $0xd8] sm:$0xff]  ;;  %v1813_v3 = vsel %vm1752_vm2, %v10389_v27, -inf }
 0x3ad   : > { %v1666_v33 = vadd.f32 %v7918_v63, %v10220_v57  ;;  %v1712_v63 = vld [vmem:[%s10215_s28 + $0xc0] sm:$0xff] }
 0x3ae   : > { %v1822_v48 = vsel %vm1752_vm2, %v10386_v28, -inf  ;;  %1820 = vmax.xlane.f32.xlu0 %v1819_v39  ;;  %v1657_v0 = vpop.f32.mrf.mxu1  ;;  %v10397_v26 = vadd.f32 %v1709_v8, %v1576_v47 }
 0x3af   : > { %1823 = vmax.xlane.f32.xlu1 %v1822_v48  ;;  %v10400_v20 = vadd.f32 %v1714_v45, %v1666_v33  ;;  %v1658_v11 = vadd.f32 %v1657_v0, %v10226_v41  ;;  %v1713_v45 = vld [vmem:[%s10215_s28 + $0xc8] sm:$0xff] }
 0x3b0   : > { %v7919_v15 = vpop.f32.mrf.mxu1  ;;  %v1816_v39 = vsel %vm1752_vm2, %v10397_v26, -inf }
 0x3b1   : > { %v1669_v57 = vadd.f32 %v7919_v15, %v10233_v10  ;;  %v10413_v48 = vadd.f32 %v1712_v63, %v1658_v11  ;;  %v1831_v0 = vsel %vm1752_vm2, %v10400_v20, -inf }
 0x3b2   : > { %1814 = vmax.xlane.f32.xlu0 %v1813_v3  ;;  %v1660_v8 = vpop.f32.mrf.mxu1  ;;  %v1718_v3 = vld [vmem:[%s10215_s28 + $0xf0] sm:$0xff] }
 0x3b3   : > { %v10409_v47 = vadd.f32 %v1715_v32, %v1669_v57  ;;  %1817 = vmax.xlane.f32.xlu1 %v1816_v39  ;;  %v1661_v33 = vadd.f32 %v1660_v8, %v10241_v14  ;;  %v1719_v39 = vld [vmem:[%s10215_s28 + $0xf8] sm:$0xff]  ;;  %v1825_v63 = vsel %vm1752_vm2, %v10413_v48, -inf }
 0x3b4   : > { %v7922_v41 = vpop.f32.mrf.mxu1 }
 0x3b5   : > { %v1682_v10 = vadd.f32 %v7922_v41, %v10252_v59  ;;  %v1834_v15 = vsel %vm1752_vm2, %v10409_v47, -inf  ;;  %v10421_v57 = vadd.f32 %v1713_v45, %v1661_v33  ;;  %v1716_v41 = vld [vmem:[%s10215_s28 + $0xe0] sm:$0xff] }
 0x3b6   : > { %1832 = vmax.xlane.f32.xlu0 %v1831_v0  ;;  %v1673_v32 = vpop.f32.mrf.mxu1 }
 0x3b7   : > { %1835 = vmax.xlane.f32.xlu1 %v1834_v15  ;;  %v10424_v8 = vadd.f32 %v1718_v3, %v1682_v10  ;;  %v1674_v11 = vadd.f32 %v1673_v32, %v10262_v37  ;;  %v1828_v0 = vsel %vm1752_vm2, %v10421_v57, -inf  ;;  %v1717_v10 = vld [vmem:[%s10215_s28 + $0xe8] sm:$0xff] }
 0x3b8   : > { %v7923_v14 = vpop.f32.mrf.mxu1 }
 0x3b9   : > { %v1685_v59 = vadd.f32 %v7923_v14, %v10272_v9  ;;  %v10437_v15 = vadd.f32 %v1716_v41, %v1674_v11  ;;  %v1843_v9 = vsel %vm1752_vm2, %v10424_v8, -inf  ;;  %v10455_v11 = vpop.permute.xlu1 %2390 }
 0x3ba   : > { %v1676_v55 = vpop.f32.mrf.mxu1  ;;  %1826 = vmax.xlane.f32.xlu0 %v1825_v63  ;;  %13648 = vst [vmem:[#allocation61_spill] sm:$0xff] %v10455_v11 }
 0x3bb   : > { %v10433_v33 = vadd.f32 %v1719_v39, %v1685_v59  ;;  %v1677_v45 = vadd.f32 %v1676_v55, %v10281_v54  ;;  %1829 = vmax.xlane.f32.xlu1 %v1828_v0  ;;  %v1837_v32 = vsel %vm1752_vm2, %v10437_v15, -inf  ;;  %v10449_v54 = vpop.permute.xlu0 %2214 }
 0x3bc   : > { %13645 = vst [vmem:[#allocation58_spill] sm:$0xff] %v10449_v54 }
 0x3bd   : > { %v1846_v37 = vsel %vm1752_vm2, %v10433_v33, -inf  ;;  %v10443_v3 = vadd.f32 %v1717_v10, %v1677_v45  ;;  %v10459_v63 = vpop.permute.xlu1 %2388 }
 0x3be   : > { %1844 = vmax.xlane.f32.xlu0 %v1843_v9  ;;  %13650 = vst [vmem:[#allocation63_spill] sm:$0xff] %v10459_v63 }
 0x3bf   : > { %1847 = vmax.xlane.f32.xlu1 %v1846_v37  ;;  %v1840_v55 = vsel %vm1752_vm2, %v10443_v3, -inf  ;;  %v10451_v14 = vpop.permute.xlu0 %2212 }
 0x3c0   : > { %13646 = vst [vmem:[#allocation59_spill] sm:$0xff] %v10451_v14 }
 0x3c1   : > { %v10463_v0 = vpop.permute.xlu1 %2613 }
 0x3c2   : > { %1838 = vmax.xlane.f32.xlu0 %v1837_v32  ;;  %13652 = vst [vmem:[#allocation65_spill] sm:$0xff] %v10463_v0 }
 0x3c3   : > { %1841 = vmax.xlane.f32.xlu1 %v1840_v55  ;;  %v10453_v39 = vpop.permute.xlu0 %2210 }
 0x3c4   : > { %13647 = vst [vmem:[#allocation60_spill] sm:$0xff] %v10453_v39 }
 0x3c5   : > { %v10467_v10 = vpop.permute.xlu1 %2498 }
 0x3c6   : > { %13654 = vst [vmem:[#allocation67_spill] sm:$0xff] %v10467_v10 }
 0x3c7   : > { %v10457_v59 = vpop.permute.xlu0 %2502 }
 0x3c8   : > { %13649 = vst [vmem:[#allocation62_spill] sm:$0xff] %v10457_v59 }
 0x3c9   : > { %v10471_v9 = vpop.permute.xlu1 %2611 }
 0x3ca   : > { %13656 = vst [vmem:[#allocation69_spill] sm:$0xff] %v10471_v9 }
 0x3cb   : > { %v10461_v41 = vpop.permute.xlu0 %2500 }
 0x3cc   : > { %13651 = vst [vmem:[#allocation64_spill] sm:$0xff] %v10461_v41 }
 0x3cd   : > { %v10474_v11 = vpop.permute.xlu1 %2609 }
 0x3cf   : > { %v10465_v45 = vpop.permute.xlu0 %2490 }
 0x3d0   : > { %13653 = vst [vmem:[#allocation66_spill] sm:$0xff] %v10465_v45 }
 0x3d3   : > { %v10469_v37 = vpop.permute.xlu0 %2392 }
 0x3d4   : > { %13655 = vst [vmem:[#allocation68_spill] sm:$0xff] %v10469_v37 }
 0x40b   : > { %v1761_v32 = vpop.xlane.xlu0 %1760 }
 0x40c   : > { %v1851_v55 = vsub.f32 %v10235_v61, %v1761_v32 }
 0x40e   : > { %v1885_v59 = vmul.f32 1.442695, %v1851_v55 }
 0x40f   : > { %v1755_v39 = vpop.xlane.xlu0 %1754 }
 0x410   : > { %8834 = vpow2.f32 %v1885_v59  ;;  %v1849_v41 = vsub.f32 %v10243_v56, %v1755_v39 }
 0x411   : > { %v1758_v63 = vpop.xlane.xlu1 %1757 }
 0x412   : > { %v1881_v0 = vmul.f32 1.442695, %v1849_v41  ;;  %v1850_v45 = vsub.f32 %v10266_v22, %v1758_v63 }
 0x413   : > { %v1764_v14 = vpop.xlane.xlu0 %1763 }
 0x414   : > { %8836 = vpow2.f32 %v1881_v0  ;;  %v1852_v10 = vsub.f32 %v10256_v35, %v1764_v14  ;;  %v1883_v37 = vmul.f32 1.442695, %v1850_v45 }
 0x416   : > { %v1887_v9 = vmul.f32 1.442695, %v1852_v10 }
 0x417   : > { %v1776_v54 = vpop.xlane.xlu1 %1775  ;;  %v1773_v18 = vpop.xlane.xlu0 %1772 }
 0x418   : > { %8838 = vpow2.f32 %v1887_v9  ;;  %v1856_v61 = vsub.f32 %v10290_v16, %v1776_v54  ;;  %v1855_v32 = vsub.f32 %v10283_v24, %v1773_v18 }
 0x419   : > { %8840 = vpow2.f32 %v1883_v37 }
 0x41a   : > { %v1895_v59 = vmul.f32 1.442695, %v1856_v61  ;;  %v1893_v56 = vmul.f32 1.442695, %v1855_v32 }
 0x41b   : > { %v1770_v39 = vpop.xlane.xlu1 %1769  ;;  %v1767_v41 = vpop.xlane.xlu0 %1766 }
 0x41c   : > { %v1854_v22 = vsub.f32 %v10300_v2, %v1770_v39  ;;  %v1853_v63 = vsub.f32 %v10293_v4, %v1767_v41  ;;  %8842 = vpow2.f32 %v1893_v56 }
 0x41d   : > { %v10483_v0 = vpop.eup %8834  ;;  %8844 = vpow2.f32 %v1895_v59 }
 0x41e   : > { %v1891_v35 = vmul.f32 1.442695, %v1854_v22  ;;  %v1889_v14 = vmul.f32 1.442695, %v1853_v63  ;;  %v1951_v16 = vsel %vm1752_vm2, %v10483_v0, 0.0 }
 0x41f   : > { %v1788_v54 = vpop.xlane.xlu1 %1787  ;;  %1952 = vadd.xlane.f32.xlu0 %v1951_v16  ;;  %v1785_v18 = vpop.xlane.xlu0 %1784 }
 0x420   : > { %v1859_v24 = vsub.f32 %v10305_v62, %v1785_v18  ;;  %8846 = vpow2.f32 %v1889_v14  ;;  %v1860_v9 = vsub.f32 %v10314_v43, %v1788_v54 }
 0x421   : > { %v10488_v45 = vpop.eup %8836  ;;  %8848 = vpow2.f32 %v1891_v35 }
 0x422   : > { %v1901_v2 = vmul.f32 1.442695, %v1859_v24  ;;  %v1945_v4 = vsel %vm1752_vm2, %v10488_v45, 0.0  ;;  %v1903_v41 = vmul.f32 1.442695, %v1860_v9 }
 0x423   : > { %v1782_v10 = vpop.xlane.xlu1 %1781  ;;  %1946 = vadd.xlane.f32.xlu0 %v1945_v4  ;;  %v1779_v37 = vpop.xlane.xlu0 %1778 }
 0x424   : > { %v1857_v55 = vsub.f32 %v10317_v17, %v1779_v37  ;;  %8850 = vpow2.f32 %v1901_v2  ;;  %v1858_v17 = vsub.f32 %v10324_v21, %v1782_v10 }
 0x425   : > { %v10494_v61 = vpop.eup %8838 }
 0x426   : > { %v1897_v32 = vmul.f32 1.442695, %v1857_v55  ;;  %v1954_v62 = vsel %vm1752_vm2, %v10494_v61, 0.0  ;;  %v10498_v59 = vpop.eup %8840  ;;  %v1899_v2 = vmul.f32 1.442695, %v1858_v17 }
 0x427   : > { %v1800_v56 = vpop.xlane.xlu1 %1799  ;;  %1955 = vadd.xlane.f32.xlu1 %v1954_v62  ;;  %v1797_v39 = vpop.xlane.xlu0 %1796  ;;  %v1948_v14 = vsel %vm1752_vm2, %v10498_v59, 0.0 }
 0x428   : > { %v1864_v22 = vsub.f32 %v10338_v40, %v1800_v56  ;;  %v1863_v63 = vsub.f32 %v10330_v29, %v1797_v39  ;;  %8852 = vpow2.f32 %v1897_v32 }
 0x429   : > { %v10502_v43 = vpop.eup %8842  ;;  %8854 = vpow2.f32 %v1903_v41 }
 0x42a   : > { %v1909_v35 = vmul.f32 1.442695, %v1863_v63  ;;  %v10507_v16 = vpop.eup %8844  ;;  %v1911_v54 = vmul.f32 1.442695, %v1864_v22  ;;  %v1963_v24 = vsel %vm1752_vm2, %v10502_v43, 0.0 }
 0x42b   : > { %v1794_v18 = vpop.xlane.xlu1 %1793  ;;  %1949 = vadd.xlane.f32.xlu1 %v1948_v14  ;;  %v1791_v40 = vpop.xlane.xlu0 %1790  ;;  %1964 = vadd.xlane.f32.xlu0 %v1963_v24  ;;  %v1966_v10 = vsel %vm1752_vm2, %v10507_v16, 0.0 }
 0x42c   : > { %v1862_v29 = vsub.f32 %v10347_v44, %v1794_v18  ;;  %8856 = vpow2.f32 %v1909_v35  ;;  %v1861_v4 = vsub.f32 %v10341_v30, %v1791_v40 }
 0x42d   : > { %v10512_v21 = vpop.eup %8846  ;;  %8858 = vpow2.f32 %v1911_v54 }
 0x42e   : > { %v10517_v37 = vpop.eup %8848  ;;  %v1907_v9 = vmul.f32 1.442695, %v1862_v29  ;;  %v1957_v55 = vsel %vm1752_vm2, %v10512_v21, 0.0  ;;  %8860 = vpow2.f32 %v1899_v2  ;;  %v1905_v56 = vmul.f32 1.442695, %v1861_v4 }
 0x42f   : > { %1967 = vadd.xlane.f32.xlu1 %v1966_v10  ;;  %v1809_v32 = vpop.xlane.xlu0 %1808  ;;  %1958 = vadd.xlane.f32.xlu0 %v1957_v55  ;;  %v1960_v30 = vsel %vm1752_vm2, %v10517_v37, 0.0 }
 0x430   : > { %v1812_v44 = vpop.xlane.xlu1 %1811  ;;  %v1867_v62 = vsub.f32 %v10351_v60, %v1809_v32  ;;  %8862 = vpow2.f32 %v1907_v9 }
 0x431   : > { %v10524_v39 = vpop.eup %8850  ;;  %v1868_v35 = vsub.f32 %v10362_v5, %v1812_v44  ;;  %8864 = vpow2.f32 %v1905_v56 }
 0x432   : > { %v1917_v41 = vmul.f32 1.442695, %v1867_v62  ;;  %v1975_v60 = vsel %vm1752_vm2, %v10524_v39, 0.0 }
 0x433   : > { %1961 = vadd.xlane.f32.xlu1 %v1960_v30  ;;  %v1803_v22 = vpop.xlane.xlu0 %1802  ;;  %v1919_v2 = vmul.f32 1.442695, %v1868_v35 }
 0x434   : > { %v1806_v63 = vpop.xlane.xlu1 %1805  ;;  %v1865_v17 = vsub.f32 %v10365_v50, %v1803_v22  ;;  %8866 = vpow2.f32 %v1917_v41 }
 0x435   : > { %v10530_v54 = vpop.eup %8852  ;;  %v1866_v5 = vsub.f32 %v10373_v12, %v1806_v63 }
 0x436   : > { %v1913_v14 = vmul.f32 1.442695, %v1865_v17  ;;  %v10533_v29 = vpop.eup %8854  ;;  %v1969_v10 = vsel %vm1752_vm2, %v10530_v54, 0.0 }
 0x437   : > { %1976 = vadd.xlane.f32.xlu1 %v1975_v60  ;;  %v1821_v18 = vpop.xlane.xlu0 %1820  ;;  %v1978_v12 = vsel %vm1752_vm2, %v10533_v29, 0.0  ;;  %v1915_v56 = vmul.f32 1.442695, %v1866_v5 }
 0x438   : > { %v1824_v24 = vpop.xlane.xlu1 %1823  ;;  %v1871_v40 = vsub.f32 %v10375_v25, %v1821_v18  ;;  %8868 = vpow2.f32 %v1913_v14 }
 0x439   : > { %v10535_v4 = vpop.eup %8856  ;;  %v1872_v9 = vsub.f32 %v10386_v28, %v1824_v24 }
 0x43a   : > { %v1925_v50 = vmul.f32 1.442695, %v1871_v40  ;;  %v1987_v55 = vsel %vm1752_vm2, %v10535_v4, 0.0  ;;  %v10543_v25 = vpop.eup %8858 }
 0x43b   : > { %1970 = vadd.xlane.f32.xlu1 %v1969_v10  ;;  %v1815_v32 = vpop.xlane.xlu0 %1814  ;;  %1988 = vadd.xlane.f32.xlu0 %v1987_v55  ;;  %v10549_v41 = vpop.eup %8860  ;;  %v1927_v22 = vmul.f32 1.442695, %v1872_v9  ;;  %v1990_v63 = vsel %vm1752_vm2, %v10543_v25, 0.0 }
 0x43c   : > { %8870 = vpow2.f32 %v1925_v50  ;;  %v1818_v44 = vpop.xlane.xlu1 %1817  ;;  %v1869_v62 = vsub.f32 %v10389_v27, %v1815_v32 }
 0x43d   : > { %8872 = vpow2.f32 %v1919_v2  ;;  %v1870_v30 = vsub.f32 %v10397_v26, %v1818_v44  ;;  %v10553_v35 = vpop.eup %8862  ;;  %v1972_v26 = vsel %vm1752_vm2, %v10549_v41, 0.0 }
 0x43e   : > { %v1921_v28 = vmul.f32 1.442695, %v1869_v62  ;;  %v10558_v18 = vpop.eup %8864  ;;  %v1984_v40 = vsel %vm1752_vm2, %v10553_v35, 0.0 }
 0x43f   : > { %1979 = vadd.xlane.f32.xlu1 %v1978_v12  ;;  %v1833_v17 = vpop.xlane.xlu0 %1832  ;;  %1991 = vadd.xlane.f32.xlu0 %v1990_v63  ;;  %v1923_v60 = vmul.f32 1.442695, %v1870_v30  ;;  %v1981_v55 = vsel %vm1752_vm2, %v10558_v18, 0.0 }
 0x440   : > { %8874 = vpow2.f32 %v1921_v28  ;;  %v1836_v27 = vpop.xlane.xlu1 %1835  ;;  %v1875_v14 = vsub.f32 %v10400_v20, %v1833_v17 }
 0x441   : > { %8876 = vpow2.f32 %v1915_v56  ;;  %v10562_v5 = vpop.eup %8866  ;;  %v1876_v9 = vsub.f32 %v10409_v47, %v1836_v27 }
 0x442   : > { %8878 = vpow2.f32 %v1927_v22  ;;  %v1933_v24 = vmul.f32 1.442695, %v1875_v14  ;;  %v1999_v12 = vsel %vm1752_vm2, %v10562_v5, 0.0 }
 0x443   : > { %1973 = vadd.xlane.f32.xlu1 %v1972_v26  ;;  %v1827_v2 = vpop.xlane.xlu0 %1826  ;;  %1985 = vadd.xlane.f32.xlu0 %v1984_v40  ;;  %8880 = vpow2.f32 %v1923_v60  ;;  %v1935_v30 = vmul.f32 1.442695, %v1876_v9 }
 0x444   : > { %v1830_v50 = vpop.xlane.xlu1 %1829  ;;  %v1873_v20 = vsub.f32 %v10413_v48, %v1827_v2  ;;  %8882 = vpow2.f32 %v1933_v24 }
 0x445   : > { %v1874_v10 = vsub.f32 %v10421_v57, %v1830_v50  ;;  %v10569_v32 = vpop.eup %8868 }
 0x446   : > { %v1929_v62 = vmul.f32 1.442695, %v1873_v20  ;;  %v1993_v48 = vsel %vm1752_vm2, %v10569_v32, 0.0 }
 0x447   : > { %v1931_v44 = vmul.f32 1.442695, %v1874_v10  ;;  %1982 = vadd.xlane.f32.xlu1 %v1981_v55  ;;  %2000 = vadd.xlane.f32.xlu0 %v1999_v12 }
 0x449   : > { %v10573_v56 = vpop.eup %8870  ;;  %8884 = vpow2.f32 %v1931_v44 }
 0x44a   : > { %v2011_v47 = vsel %vm1752_vm2, %v10573_v56, 0.0  ;;  %v10579_v57 = vpop.eup %8872  ;;  %8886 = vpow2.f32 %v1929_v62  ;;  %v1845_v62 = vpop.xlane.xlu0 %1844 }
 0x44b   : > { %1994 = vadd.xlane.f32.xlu1 %v1993_v48  ;;  %2012 = vadd.xlane.f32.xlu0 %v2011_v47  ;;  %v2002_v22 = vsel %vm1752_vm2, %v10579_v57, 0.0  ;;  %8888 = vpow2.f32 %v1935_v30  ;;  %v1848_v47 = vpop.xlane.xlu1 %1847 }
 0x44d   : > { %v10581_v28 = vpop.eup %8874 }
 0x44e   : > { %v2005_v63 = vsel %vm1752_vm2, %v10581_v28, 0.0  ;;  %v10587_v17 = vpop.eup %8876  ;;  %v1839_v12 = vpop.xlane.xlu0 %1838 }
 0x44f   : > { %2003 = vadd.xlane.f32.xlu1 %v2002_v22  ;;  %v10589_v27 = vpop.eup %8878  ;;  %2006 = vadd.xlane.f32.xlu0 %v2005_v63  ;;  %v1996_v14 = vsel %vm1752_vm2, %v10587_v17, 0.0  ;;  %v1877_v48 = vsub.f32 %v10437_v15, %v1839_v12  ;;  %v1879_v22 = vsub.f32 %v10424_v8, %v1845_v62  ;;  %v1880_v63 = vsub.f32 %v10433_v33, %v1848_v47 }
 0x450   : > { %v10593_v60 = vpop.eup %8880  ;;  %v2014_v26 = vsel %vm1752_vm2, %v10589_v27, 0.0 }
 0x451   : > { %v10597_v24 = vpop.eup %8882  ;;  %v2008_v40 = vsel %vm1752_vm2, %v10593_v60, 0.0  ;;  %v1937_v30 = vmul.f32 1.442695, %v1877_v48 }
 0x452   : > { %v2023_v50 = vsel %vm1752_vm2, %v10597_v24, 0.0 }
 0x453   : > { %1997 = vadd.xlane.f32.xlu1 %v1996_v14  ;;  %2015 = vadd.xlane.f32.xlu0 %v2014_v26  ;;  %8890 = vpow2.f32 %v1937_v30  ;;  %v1941_v14 = vmul.f32 1.442695, %v1879_v22  ;;  %v1842_v26 = vpop.xlane.xlu1 %1841 }
 0x455   : > { %8892 = vpow2.f32 %v1941_v14 }
 0x456   : > { %v10601_v2 = vpop.eup %8884 }
 0x457   : > { %2009 = vadd.xlane.f32.xlu1 %v2008_v40  ;;  %v10605_v20 = vpop.eup %8886  ;;  %2024 = vadd.xlane.f32.xlu0 %v2023_v50  ;;  %v2020_v10 = vsel %vm1752_vm2, %v10601_v2, 0.0  ;;  %v1943_v40 = vmul.f32 1.442695, %v1880_v63  ;;  %v1878_v50 = vsub.f32 %v10443_v3, %v1842_v26 }
 0x458   : > { %v2017_v9 = vsel %vm1752_vm2, %v10605_v20, 0.0  ;;  %v10611_v55 = vpop.eup %8888 }
 0x459   : > { %v2026_v44 = vsel %vm1752_vm2, %v10611_v55, 0.0  ;;  %8894 = vpow2.f32 %v1943_v40 }
 0x45b   : > { %2021 = vadd.xlane.f32.xlu1 %v2020_v10  ;;  %2018 = vadd.xlane.f32.xlu0 %v2017_v9  ;;  %v1939_v10 = vmul.f32 1.442695, %v1878_v50 }
 0x45d   : > { %8896 = vpow2.f32 %v1939_v10 }
 0x45f   : > { %2027 = vadd.xlane.f32.xlu0 %v2026_v44 }
 0x460   : > { %v10623_v9 = vpop.eup %8890 }
 0x461   : > { %v2029_v15 = vsel %vm1752_vm2, %v10623_v9, 0.0 }
 0x462   : > { %v10627_v44 = vpop.eup %8892 }
 0x463   : > { %v2035_v8 = vsel %vm1752_vm2, %v10627_v44, 0.0 }
 0x466   : > { %v10631_v33 = vpop.eup %8894 }
 0x467   : > { %v2038_v3 = vsel %vm1752_vm2, %v10631_v33, 0.0 }
 0x46a   : > { %v10635_v62 = vpop.eup %8896 }
 0x46b   : > { %v2032_v12 = vsel %vm1752_vm2, %v10635_v62, 0.0 }
 0x46c   : > { %2492 = vrot.lane.b32.xlu1 %v9966_v36, %s9389_s24 }
 0x475   : > { %2722 = vrot.lane.b32.xlu0 %v10049_v52, %s9388_s23 }
 0x490   : > { %2030 = vadd.xlane.f32.xlu1 %v2029_v15 }
 0x494   : > { %2036 = vadd.xlane.f32.xlu0 %v2035_v8 }
 0x498   : > { %2039 = vadd.xlane.f32.xlu0 %v2038_v3 }
 0x49c   : > { %2033 = vadd.xlane.f32.xlu0 %v2032_v12 }
 0x4a1   : > { %2720 = vrot.lane.b32.xlu1 %v10058_v31, %s9388_s23 }
 0x4a5   : > { %2718 = vrot.lane.b32.xlu1 %v10033_v51, %s9388_s23 }
 0x4a8   : > { %v1953_v48 = vpop.xlane.xlu0 %1952 }
 0x4a9   : > { %2601 = vrot.lane.b32.xlu1 %v10002_v42, %s9389_s24 }
 0x4ac   : > { %v1947_v47 = vpop.xlane.xlu0 %1946 }
 0x4ad   : > { %2496 = vrot.lane.b32.xlu1 %v9978_v1, %s9389_s24 }
 0x4b0   : > { %v1956_v30 = vpop.xlane.xlu1 %1955 }
 0x4b1   : > { %2829 = vrot.lane.b32.xlu1 %v10090_v58, %s9388_s23  ;;  %8898 = vrcp.f32 %v1956_v30 }
 0x4b2   : > { %8900 = vrcp.f32 %v1947_v47  ;;  %2607 = vrot.lane.b32.xlu0 %v10008_v6, %s9388_s23 }
 0x4b3   : > { %8902 = vrcp.f32 %v1953_v48 }
 0x4b4   : > { %v1950_v22 = vpop.xlane.xlu1 %1949  ;;  %v1965_v63 = vpop.xlane.xlu0 %1964 }
 0x4b5   : > { %8904 = vrcp.f32 %v1950_v22  ;;  %2710 = vrot.lane.b32.xlu1 %v10036_v53, %s9389_s24 }
 0x4b6   : > { %2599 = vrot.lane.b32.xlu0 %v10006_v13, %s9389_s24 }
 0x4b8   : > { %v1968_v14 = vpop.xlane.xlu1 %1967  ;;  %v1959_v26 = vpop.xlane.xlu0 %1958 }
 0x4b9   : > { %2603 = vrot.lane.b32.xlu1 %v10024_v23, %s9389_s24  ;;  %8906 = vrcp.f32 %v1968_v14 }
 0x4ba   : > { %8908 = vrcp.f32 %v1959_v26  ;;  %2831 = vrot.lane.b32.xlu0 %v10079_v49, %s9388_s23 }
 0x4bb   : > { %8910 = vrcp.f32 %v1965_v63 }
 0x4bc   : > { %v1962_v40 = vpop.xlane.xlu1 %1961 }
 0x4bd   : > { %8912 = vrcp.f32 %v1962_v40  ;;  %2825 = vrot.lane.b32.xlu1 %v10096_v19, %s9388_s23 }
 0x4be   : > { %v8899_v50 = vpop.eup %8898  ;;  %2494 = vrot.lane.b32.xlu0 %v9986_v7, %s9389_s24 }
 0x4bf   : > { %v8901_v10 = vpop.eup %8900  ;;  %v2076_v12 = vmul.f32 %v8899_v50, %v10494_v61 }
 0x4c0   : > { %v1977_v15 = vpop.xlane.xlu1 %1976  ;;  %v8903_v8 = vpop.eup %8902  ;;  %v2073_v48 = vmul.f32 %v8901_v10, %v10488_v45  ;;  %v13659_v10 = vld [vmem:[#allocation53_spill] sm:$0xff] }
 0x4c1   : > { %2819 = vrot.lane.b32.xlu1 %v10068_v38, %s9389_s24  ;;  %v2075_v30 = vmul.f32 %v8903_v8, %v10483_v0  ;;  %v13657_v38 = vld [vmem:[#allocation45_spill] sm:$0xff] }
 0x4c2   : > { %v8905_v3 = vpop.eup %8904  ;;  %2716 = vrot.lane.b32.xlu0 %v10042_v34, %s9388_s23 }
 0x4c3   : > { %v2074_v47 = vmul.f32 %v8905_v3, %v10498_v59  ;;  %v2106_v26 = vpack.c.bf16 %v2076_v12, %v2075_v30  ;;  %v13658_v59 = vld [vmem:[#allocation55_spill] sm:$0xff]  ;;  %v13660_v3 = vld [vmem:[#allocation58_spill] sm:$0xff] }
 0x4c4   : > { %v1971_v22 = vpop.xlane.xlu1 %1970  ;;  %v1989_v63 = vpop.xlane.xlu0 %1988 }
 0x4c5   : > { %2714 = vrot.lane.b32.xlu1 %v10052_v46, %s9389_s24  ;;  %v2105_v14 = vpack.c.bf16 %v2074_v47, %v2073_v48  ;;  %v13661_v48 = vld [vmem:[#allocation50_spill] sm:$0xff] }
 0x4c6   : > { %v8907_v40 = vpop.eup %8906  ;;  %2708 = vrot.lane.b32.xlu0 %v13657_v38, %s9389_s24 }
 0x4c7   : > { %7932 = vmatprep.mubr.msk.bf16.mxu0 %vm1752_vm2, %v2105_v14  ;;  %v8909_v61 = vpop.eup %8908  ;;  %v2080_v12 = vmul.f32 %v8907_v40, %v10507_v16 }
 0x4c8   : > { %v1980_v50 = vpop.xlane.xlu1 %1979  ;;  %7933 = vmatmul.mubr.msk.bf16.vlgmr.msra.gmra.mxu0 %vm1752_vm2, %v2106_v26  ;;  %v8911_v45 = vpop.eup %8910  ;;  %v2077_v47 = vmul.f32 %v8909_v61, %v10512_v21  ;;  %v13664_v21 = vld [vmem:[#allocation42_spill] sm:$0xff]  ;;  %v13666_v61 = vld [vmem:[#allocation60_spill] sm:$0xff] }
 0x4c9   : > { %7941 = vmatpush3.bf16.msra.mxu0 %v13658_v59  ;;  %v1992_v0 = vpop.xlane.xlu0 %1991  ;;  %2823 = vrot.lane.b32.xlu1 %v13659_v10, %s9389_s24  ;;  %8914 = vrcp.f32 %v1980_v50  ;;  %v2079_v26 = vmul.f32 %v8911_v45, %v10502_v43  ;;  %v13662_v59 = vld [vmem:[#allocation36_spill] sm:$0xff] }
 0x4ca   : > { %v8913_v8 = vpop.eup %8912  ;;  %7942 = vmatprep.subr.bf16.mxu0 %v13660_v3  ;;  %8916 = vrcp.f32 %v1971_v22  ;;  %2827 = vrot.lane.b32.xlu0 %v13661_v48, %s9388_s23  ;;  %v13663_v22 = vld [vmem:[#allocation59_spill] sm:$0xff]  ;;  %v13667_v45 = vld [vmem:[#allocation52_spill] sm:$0xff]  ;;  %s9391_s23 = smov 80  }
 0x4cb   : > { %v2078_v30 = vmul.f32 %v8913_v8, %v10517_v37  ;;  %8918 = vrcp.f32 %v1977_v15  ;;  %v2108_v40 = vpack.c.bf16 %v2080_v12, %v2079_v26  ;;  %v13665_v15 = vld [vmem:[#allocation39_spill] sm:$0xff]  ;;  %v13668_v12 = vld [vmem:[#allocation41_spill] sm:$0xff] }
 0x4cc   : > { %v1974_v14 = vpop.xlane.xlu1 %1973 }
 0x4cd   : > { %8920 = vrcp.f32 %v1974_v14  ;;  %7943 = vmatpush3.bf16.msra.mxu0 %v13660_v3  ;;  %v1986_v50 = vpop.xlane.xlu0 %1985  ;;  %3358 = vrot.lane.b32.xlu1 %v13662_v59, %s9390_s18  ;;  %v2107_v16 = vpack.c.bf16 %v2078_v30, %v2077_v47  ;;  %v13669_v47 = vld [vmem:[#allocation56_spill] sm:$0xff]  ;;  %v13670_v14 = vld [vmem:[#allocation49_spill] sm:$0xff] }
 0x4ce   : > { %7944 = vmatprep.subr.bf16.mxu0 %v13663_v22  ;;  %8922 = vrcp.f32 %v1986_v50  ;;  %2605 = vrot.lane.b32.xlu0 %v13664_v21, %s9389_s24 }
 0x4cf   : > { %7936 = vmatprep.mubr.msk.bf16.mxu0 %vm1752_vm2, %v2107_v16 }
 0x4d0   : > { %v1983_v37 = vpop.xlane.xlu1 %1982  ;;  %7937 = vmatmul.mubr.msk.bf16.gmra.mxu0 %vm1752_vm2, %v2108_v40  ;;  %v13671_v40 = vld [vmem:[#allocation54_spill] sm:$0xff] }
 0x4d1   : > { %8924 = vrcp.f32 %v1983_v37  ;;  %7945 = vmatpush3.bf16.msra.mxu0 %v13663_v22  ;;  %v2001_v43 = vpop.xlane.xlu0 %2000  ;;  %3356 = vrot.lane.b32.xlu1 %v13665_v15, %s9390_s18 }
 0x4d2   : > { %8926 = vrcp.f32 %v1992_v0  ;;  %7946 = vmatprep.subr.bf16.mxu0 %v13666_v61  ;;  %2817 = vrot.lane.b32.xlu0 %v13667_v45, %s9389_s24 }
 0x4d3   : > { %8928 = vrcp.f32 %v1989_v63 }
 0x4d4   : > { %v1995_v8 = vpop.xlane.xlu1 %1994 }
 0x4d5   : > { %7947 = vmatpush3.bf16.msra.mxu0 %v13666_v61  ;;  %v2013_v3 = vpop.xlane.xlu0 %2012  ;;  %3449 = vrot.lane.b32.xlu1 %v13668_v12, %s9390_s18 }
 0x4d6   : > { %7972 = vmatprep.subr.bf16.mxu0 %v13669_v47  ;;  %v8915_v30 = vpop.eup %8914  ;;  %2712 = vrot.lane.b32.xlu0 %v13670_v14, %s9389_s24 }
 0x4d7   : > { %v8917_v0 = vpop.eup %8916  ;;  %v2084_v22 = vmul.f32 %v8915_v30, %v10533_v29 }
 0x4d8   : > { %v2004_v26 = vpop.xlane.xlu1 %2003  ;;  %v8919_v50 = vpop.eup %8918  ;;  %v2081_v37 = vmul.f32 %v8917_v0, %v10530_v54  ;;  %v13673_v0 = vld [vmem:[#allocation68_spill] sm:$0xff] }
 0x4d9   : > { %v2007_v16 = vpop.xlane.xlu0 %2006  ;;  %3536 = vrot.lane.b32.xlu1 %v10058_v31, %s9390_s18  ;;  %8930 = vrcp.f32 %v2004_v26  ;;  %v2083_v45 = vmul.f32 %v8919_v50, %v10524_v39 }
 0x4da   : > { %v8921_v63 = vpop.eup %8920  ;;  %8932 = vrcp.f32 %v1995_v8  ;;  %2821 = vrot.lane.b32.xlu0 %v13671_v40, %s9389_s24  ;;  %v13672_v40 = vld [vmem:[#allocation35_spill] sm:$0xff]  ;;  %s9392_s24 = smov 112  }
 0x4db   : > { %v2082_v61 = vmul.f32 %v8921_v63, %v10549_v41  ;;  %v8923_v14 = vpop.eup %8922  ;;  %8934 = vrcp.f32 %v2001_v43  ;;  %v2110_v8 = vpack.c.bf16 %v2084_v22, %v2083_v45 }
 0x4dc   : > { %v1998_v21 = vpop.xlane.xlu1 %1997  ;;  %v2086_v39 = vmul.f32 %v8923_v14, %v10553_v35 }
 0x4dd   : > { %8936 = vrcp.f32 %v1998_v21  ;;  %v2016_v10 = vpop.xlane.xlu0 %2015  ;;  %3534 = vrot.lane.b32.xlu1 %v10033_v51, %s9390_s18  ;;  %v2109_v29 = vpack.c.bf16 %v2082_v61, %v2081_v37  ;;  %v13676_v61 = vld [vmem:[#allocation63_spill] sm:$0xff] }
 0x4de   : > { %v8925_v30 = vpop.eup %8924  ;;  %8938 = vrcp.f32 %v2007_v16  ;;  %3360 = vrot.lane.b32.xlu0 %v13672_v40, %s9390_s18 }
 0x4df   : > { %v8927_v26 = vpop.eup %8926  ;;  %7948 = vmatprep.mubr.msk.bf16.mxu0 %vm1752_vm2, %v2109_v29  ;;  %v2085_v54 = vmul.f32 %v8925_v30, %v10558_v18  ;;  %v13674_v18 = vld [vmem:[#allocation37_spill] sm:$0xff]  ;;  %v13677_v29 = vld [vmem:[#allocation44_spill] sm:$0xff] }
 0x4e0   : > { %v2010_v41 = vpop.xlane.xlu1 %2009  ;;  %7949 = vmatmul.mubr.msk.bf16.vlgmr.msra.gmra.mxu0 %vm1752_vm2, %v2110_v8  ;;  %v8929_v21 = vpop.eup %8928  ;;  %v2088_v50 = vmul.f32 %v8927_v26, %v10543_v25 }
 0x4e1   : > { %8940 = vrcp.f32 %v2010_v41  ;;  %7973 = vmatpush3.bf16.msra.mxu0 %v13669_v47  ;;  %v2025_v43 = vpop.xlane.xlu0 %2024  ;;  %3532 = vrot.lane.b32.xlu1 %v10042_v34, %s9390_s18  ;;  %v2111_v45 = vpack.c.bf16 %v2086_v39, %v2085_v54  ;;  %v2087_v14 = vmul.f32 %v8929_v21, %v10535_v4  ;;  %v13678_v41 = vld [vmem:[#allocation65_spill] sm:$0xff] }
 0x4e2   : > { %8942 = vrcp.f32 %v2016_v10  ;;  %7974 = vmatprep.subr.bf16.mxu0 %v13673_v0  ;;  %3354 = vrot.lane.b32.xlu0 %v13674_v18, %s9390_s18  ;;  %v13675_v10 = vld [vmem:[#allocation61_spill] sm:$0xff] }
 0x4e3   : > { %7952 = vmatprep.mubr.msk.bf16.mxu0 %vm1752_vm2, %v2111_v45  ;;  %8944 = vrcp.f32 %v2013_v3  ;;  %v2112_v25 = vpack.c.bf16 %v2088_v50, %v2087_v14  ;;  %v13679_v45 = vld [vmem:[#allocation40_spill] sm:$0xff] }
 0x4e4   : > { %v2022_v35 = vpop.xlane.xlu1 %2021 }
 0x4e5   : > { %8946 = vrcp.f32 %v2022_v35  ;;  %7975 = vmatpush3.bf16.msra.mxu0 %v13673_v0  ;;  %v2019_v47 = vpop.xlane.xlu0 %2018  ;;  %3627 = vrot.lane.b32.xlu1 %v10079_v49, %s9390_s18 }
 0x4e6   : > { %8948 = vrcp.f32 %v2019_v47  ;;  %7976 = vmatprep.subr.bf16.mxu0 %v13675_v10  ;;  %v8931_v16 = vpop.eup %8930  ;;  %3538 = vrot.lane.b32.xlu0 %v10049_v52, %s9390_s18  ;;  %v13681_v47 = vld [vmem:[#allocation62_spill] sm:$0xff] }
 0x4e7   : > { %v8933_v63 = vpop.eup %8932  ;;  %8950 = vrcp.f32 %v2025_v43  ;;  %v2092_v37 = vmul.f32 %v8931_v16, %v10579_v57 }
 0x4e8   : > { %7953 = vmatmul.mubr.msk.bf16.gmra.mxu0 %vm1752_vm2, %v2112_v25  ;;  %v8935_v4 = vpop.eup %8934  ;;  %v2089_v30 = vmul.f32 %v8933_v63, %v10569_v32 }
 0x4e9   : > { %7977 = vmatpush3.bf16.msra.mxu0 %v13675_v10  ;;  %v2028_v3 = vpop.xlane.xlu0 %2027  ;;  %3733 = vrot.lane.b32.xlu1 %v13672_v40, %s9391_s23  ;;  %v2091_v54 = vmul.f32 %v8935_v4, %v10562_v5 }
 0x4ea   : > { %v8937_v22 = vpop.eup %8936  ;;  %8952 = vrcp.f32 %v2028_v3  ;;  %7978 = vmatprep.subr.bf16.mxu0 %v13676_v61  ;;  %3447 = vrot.lane.b32.xlu0 %v13677_v29, %s9390_s18 }
 0x4eb   : > { %v2090_v8 = vmul.f32 %v8937_v22, %v10587_v17  ;;  %v8939_v26 = vpop.eup %8938  ;;  %v2114_v21 = vpack.c.bf16 %v2092_v37, %v2091_v54  ;;  %v13680_v17 = vld [vmem:[#allocation57_spill] sm:$0xff] }
 0x4ec   : > { %v2093_v32 = vmul.f32 %v8939_v26, %v10581_v28  ;;  %v2528_v0 = vsel %vm1295_vm1, %v13680_v17, 0  ;;  %v13686_v26 = vld [vmem:[#allocation34_spill] sm:$0xff] }
 0x4ed   : > { %7979 = vmatpush3.bf16.msra.mxu0 %v13676_v61  ;;  %3623 = vrot.lane.b32.xlu1 %v13661_v48, %s9390_s18  ;;  %v2113_v39 = vpack.c.bf16 %v2090_v8, %v2089_v30  ;;  %v13684_v61 = vld [vmem:[#allocation69_spill] sm:$0xff]  ;;  %v13685_v8 = vld [vmem:[#allocation67_spill] sm:$0xff] }
 0x4ee   : > { %v8941_v57 = vpop.eup %8940  ;;  %8428 = vmatprep.subr.msk.bf16.mxu0 %vm1295_vm1, %v13678_v41  ;;  %3445 = vrot.lane.b32.xlu0 %v13679_v45, %s9390_s18  ;;  %v2634_v54 = vsel %vm1295_vm1, %v13684_v61, 0  ;;  %v2945_v48 = vld [vmem:[%s10215_s28 + $0xb8] sm:$0xff] }
 0x4ef   : > { %v8943_v43 = vpop.eup %8942  ;;  %7964 = vmatprep.mubr.msk.bf16.mxu1 %vm1752_vm2, %v2113_v39  ;;  %v2094_v5 = vmul.f32 %v8941_v57, %v10593_v60  ;;  %v2519_v39 = vsel %vm1295_vm1, %v13685_v8, 0  ;;  %v2723_v57 = vpop.permute.xlu0 %2722 }
 0x4f0   : > { %7965 = vmatmul.mubr.msk.bf16.vlgmr.msra.gmra.mxu1 %vm1752_vm2, %v2114_v21  ;;  %v8945_v50 = vpop.eup %8944  ;;  %v2096_v10 = vmul.f32 %v8943_v43, %v10589_v27  ;;  %v2493_v21 = vpop.permute.xlu1 %2492  ;;  %v2746_v43 = vsel %vm1295_vm1, %v2723_v57, 0 }
 0x4f1   : > { %7989 = vmatpush3.bf16.xpose.msra.mxu1 %v2528_v0  ;;  %3621 = vrot.lane.b32.xlu1 %v10096_v19, %s9390_s18  ;;  %v2115_v35 = vpack.c.bf16 %v2094_v5, %v2093_v32  ;;  %v2095_v16 = vmul.f32 %v8945_v50, %v10573_v56  ;;  %v2525_v56 = vsel %vm1295_vm1, %v13681_v47, 0 }
 0x4f2   : > { %v8947_v14 = vpop.eup %8946  ;;  %8425 = vmatprep.subr.msk.bf16.mxu1 %vm1295_vm1, %v13681_v47  ;;  %3443 = vrot.lane.b32.xlu0 %v10008_v6, %s9390_s18 }
 0x4f3   : > { %v8949_v28 = vpop.eup %8948  ;;  %7968 = vmatprep.mubr.msk.bf16.mxu1 %vm1752_vm2, %v2115_v35  ;;  %v2098_v60 = vmul.f32 %v8947_v14, %v10601_v2  ;;  %v2116_v3 = vpack.c.bf16 %v2096_v10, %v2095_v16  ;;  %v13682_v2 = vld [vmem:[#allocation64_spill] sm:$0xff] }
 0x4f4   : > { %v2097_v25 = vmul.f32 %v8949_v28, %v10605_v20  ;;  %v8951_v63 = vpop.eup %8950  ;;  %v13683_v20 = vld [vmem:[#allocation66_spill] sm:$0xff]  ;;  %v2522_v30 = vsel %vm1295_vm1, %v13682_v2, 0 }
 0x4f5   : > { %3838 = vrot.lane.b32.xlu1 %v13668_v12, %s9391_s23  ;;  %v2099_v27 = vmul.f32 %v8951_v63, %v10597_v24 }
 0x4f6   : > { %v2117_v4 = vpack.c.bf16 %v2098_v60, %v2097_v25  ;;  %3625 = vrot.lane.b32.xlu0 %v10090_v58, %s9390_s18 }
 0x4f7   : > { %v8953_v22 = vpop.eup %8952 }
 0x4f8   : > { %v2100_v37 = vmul.f32 %v8953_v22, %v10611_v55  ;;  %7980 = vmatprep.mubr.msk.bf16.mxu0 %vm1752_vm2, %v2117_v4  ;;  %7969 = vmatmul.mubr.msk.bf16.gmra.mxu1 %vm1752_vm2, %v2116_v3  ;;  %v2637_v55 = vsel %vm1295_vm1, %v13678_v41, 0  ;;  %v2631_v41 = vsel %vm1295_vm1, %v10474_v11, 0 }
 0x4f9   : > { %7991 = vmatpush3.bf16.xpose.msra.mxu1 %v2525_v56  ;;  %3727 = vrot.lane.b32.xlu1 %v13674_v18, %s9391_s23 }
 0x4fa   : > { %8426 = vmatprep.subr.msk.bf16.mxu1 %vm1295_vm1, %v13682_v2  ;;  %7996 = vmatprep.mubr.msk.bf16.mxu1 %vm1295_vm1, %v13683_v20  ;;  %v2118_v24 = vpack.c.bf16 %v2100_v37, %v2099_v27 }
 0x4fb   : > { %3731 = vrot.lane.b32.xlu0 %v13662_v59, %s9391_s23  ;;  %v2944_v59 = vld [vmem:[%s10215_s28 + $0xb0] sm:$0xff] }
 0x4fc   : > { %7981 = vmatmul.mubr.msk.bf16.vlgmr.msra.gmra.mxu0 %vm1752_vm2, %v2118_v24 }
 0x4fd   : > { %8005 = vmatpush3.bf16.xpose.msra.mxu0 %v2637_v55  ;;  %3836 = vrot.lane.b32.xlu1 %v13677_v29, %s9391_s23 }
 0x4fe   : > { %8429 = vmatprep.subr.msk.bf16.mxu0 %vm1295_vm1, %v13684_v61 }
 0x4ff   : > { %3729 = vrot.lane.b32.xlu0 %v13665_v15, %s9391_s23 }
 0x501   : > { %7993 = vmatpush3.bf16.xpose.msra.mxu1 %v2522_v30  ;;  %3834 = vrot.lane.b32.xlu1 %v13679_v45, %s9391_s23 }
 0x502   : > { %8427 = vmatprep.subr.msk.bf16.mxu1 %vm1295_vm1, %v13685_v8 }
 0x503   : > { %3719 = vrot.lane.b32.xlu0 %v13686_v26, %s9392_s24 }
 0x505   : > { %8007 = vmatpush3.bf16.xpose.msra.mxu0 %v2634_v54 }
 0x506   : > { %8430 = vmatprep.subr.msk.bf16.mxu0 %vm1295_vm1, %v10474_v11 }
 0x509   : > { %7995 = vmatpush3.bf16.xpose.msra.mxu1 %v2519_v39 }
 0x50a   : > { %8432 = vmatprep.subr.msk.bf16.mxu1 %vm1295_vm1, %v2723_v57 }
 0x50d   : > { %8009 = vmatpush3.bf16.xpose.msra.mxu0 %v2631_v41 }
 0x510   : > { %7997 = vmatmul.mubr.msk.bf16.vlgmr.msra.gmra.mxu1 %vm1295_vm1, %v2493_v21 }
 0x511   : > { %8021 = vmatpush3.bf16.xpose.msra.mxu1 %v2746_v43 }
 0x519   : > { %v2031_v32 = vpop.xlane.xlu1 %2030 }
 0x51d   : > { %v2721_v5 = vpop.permute.xlu1 %2720  ;;  %v2037_v17 = vpop.xlane.xlu0 %2036 }
 0x51e   : > { %8433 = vmatprep.subr.msk.bf16.mxu1 %vm1295_vm1, %v2721_v5  ;;  %v2743_v0 = vsel %vm1295_vm1, %v2721_v5, 0 }
 0x51f   : > { %8023 = vmatpush3.bf16.xpose.msra.mxu1 %v2743_v0 }
 0x521   : > { %v2719_v50 = vpop.permute.xlu1 %2718  ;;  %v2040_v35 = vpop.xlane.xlu0 %2039 }
 0x522   : > { %8434 = vmatprep.subr.msk.bf16.mxu1 %vm1295_vm1, %v2719_v50  ;;  %8954 = vrcp.f32 %v2040_v35  ;;  %v2740_v47 = vsel %vm1295_vm1, %v2719_v50, 0 }
 0x523   : > { %8956 = vrcp.f32 %v2031_v32 }
 0x524   : > { %8958 = vrcp.f32 %v2037_v17 }
 0x525   : > { %v2602_v11 = vpop.permute.xlu1 %2601  ;;  %v2034_v14 = vpop.xlane.xlu0 %2033 }
 0x526   : > { %8960 = vrcp.f32 %v2034_v14 }
 0x527   : > { %8025 = vmatpush3.bf16.xpose.msra.mxu1 %v2740_v47 }
 0x529   : > { %v2497_v10 = vpop.permute.xlu1 %2496  ;;  %v2608_v28 = vpop.permute.xlu0 %2607 }
 0x52a   : > { %8431 = vmatprep.subr.msk.bf16.mxu0 %vm1295_vm1, %v2608_v28  ;;  %v2628_v60 = vsel %vm1295_vm1, %v2608_v28, 0 }
 0x52b   : > { %8011 = vmatpush3.bf16.xpose.msra.mxu0 %v2628_v60 }
 0x52d   : > { %v2830_v25 = vpop.permute.xlu1 %2829  ;;  %v2600_v16 = vpop.permute.xlu0 %2599 }
 0x52e   : > { %v2852_v32 = vsel %vm1295_vm1, %v2830_v25, 0 }
 0x52f   : > { %v8955_v63 = vpop.eup %8954 }
 0x530   : > { %v8957_v3 = vpop.eup %8956  ;;  %v2104_v56 = vmul.f32 %v8955_v63, %v10631_v33 }
 0x531   : > { %v2711_v4 = vpop.permute.xlu1 %2710  ;;  %v2832_v22 = vpop.permute.xlu0 %2831  ;;  %v2101_v20 = vmul.f32 %v8957_v3, %v10623_v9 }
 0x532   : > { %v8959_v27 = vpop.eup %8958  ;;  %8436 = vmatprep.subr.msk.bf16.mxu0 %vm1295_vm1, %v2832_v22  ;;  %v2855_v57 = vsel %vm1295_vm1, %v2832_v22, 0 }
 0x533   : > { %v8961_v37 = vpop.eup %8960  ;;  %v2103_v61 = vmul.f32 %v8959_v27, %v10627_v44 }
 0x534   : > { %v2102_v24 = vmul.f32 %v8961_v37, %v10635_v62 }
 0x535   : > { %v2604_v2 = vpop.permute.xlu1 %2603  ;;  %v2495_v55 = vpop.permute.xlu0 %2494  ;;  %v2120_v8 = vpack.c.bf16 %v2104_v56, %v2103_v61 }
 0x536   : > { %8000 = vmatprep.mubr.msk.bf16.mxu1 %vm1295_vm1, %v2495_v55  ;;  %v2119_v30 = vpack.c.bf16 %v2102_v24, %v2101_v20 }
 0x537   : > { %8001 = vmatmul.mubr.msk.bf16.gmra.mxu1 %vm1295_vm1, %v2497_v10 }
 0x538   : > { %7984 = vmatprep.mubr.msk.bf16.mxu0 %vm1752_vm2, %v2119_v30 }
 0x539   : > { %v2826_v54 = vpop.permute.xlu1 %2825  ;;  %7985 = vmatmul.mubr.msk.bf16.gmra.mxu0 %vm1752_vm2, %v2120_v8  ;;  %v2717_v33 = vpop.permute.xlu0 %2716 }
 0x53a   : > { %8012 = vmatprep.mubr.msk.bf16.mxu0 %vm1295_vm1, %v2600_v16  ;;  %8435 = vmatprep.subr.msk.bf16.mxu1 %vm1295_vm1, %v2717_v33  ;;  %v2737_v9 = vsel %vm1295_vm1, %v2717_v33, 0  ;;  %v2846_v10 = vsel %vm1295_vm1, %v2826_v54, 0 }
 0x53b   : > { %8027 = vmatpush3.bf16.xpose.msra.mxu1 %v2737_v9 }
 0x53d   : > { %v2820_v44 = vpop.permute.xlu1 %2819  ;;  %v2709_v62 = vpop.permute.xlu0 %2708 }
 0x53e   : > { %8028 = vmatprep.mubr.msk.bf16.mxu1 %vm1295_vm1, %v2709_v62 }
 0x541   : > { %v2715_v39 = vpop.permute.xlu1 %2714  ;;  %8013 = vmatmul.mubr.msk.bf16.vlgmr.msra.gmra.mxu0 %vm1295_vm1, %v2602_v11  ;;  %v2828_v41 = vpop.permute.xlu0 %2827 }
 0x542   : > { %8037 = vmatpush3.bf16.xpose.msra.mxu0 %v2855_v57  ;;  %8016 = vmatprep.mubr.msk.bf16.mxu0 %vm1295_vm1, %v2604_v2  ;;  %v2849_v35 = vsel %vm1295_vm1, %v2828_v41, 0 }
 0x543   : > { %8029 = vmatmul.mubr.msk.bf16.vlgmr.msra.gmra.mxu1 %vm1295_vm1, %v2711_v4  ;;  %8437 = vmatprep.subr.msk.bf16.mxu0 %vm1295_vm1, %v2830_v25 }
 0x545   : > { %v2824_v21 = vpop.permute.xlu1 %2823  ;;  %v2606_v43 = vpop.permute.xlu0 %2605 }
 0x549   : > { %8017 = vmatmul.mubr.msk.bf16.gmra.mxu0 %vm1295_vm1, %v2606_v43  ;;  %v2818_v5 = vpop.permute.xlu0 %2817  ;;  %v3359_v17 = vpop.permute.xlu1 %3358 }
 0x54a   : > { %8039 = vmatpush3.bf16.xpose.msra.mxu0 %v2852_v32  ;;  %8044 = vmatprep.mubr.msk.bf16.mxu0 %vm1295_vm1, %v2818_v5  ;;  %v2924_v32 = vld [vmem:[%s10215_s28 + $0x10] sm:$0xff]  ;;  %v10910_v5 = vld [vmem:[%s13404_s2 + $0x40] sm:$0xff] }
 0x54b   : > { %8438 = vmatprep.subr.msk.bf16.mxu0 %vm1295_vm1, %v2828_v41 }
 0x54d   : > { %v2713_v0 = vpop.permute.xlu0 %2712  ;;  %v3357_v50 = vpop.permute.xlu1 %3356 }
 0x54e   : > { %8032 = vmatprep.mubr.msk.bf16.mxu1 %vm1295_vm1, %v2713_v0 }
 0x54f   : > { %8033 = vmatmul.mubr.msk.bf16.gmra.mxu1 %vm1295_vm1, %v2715_v39 }
 0x551   : > { %v2822_v11 = vpop.permute.xlu0 %2821  ;;  %v3450_v47 = vpop.permute.xlu1 %3449 }
 0x552   : > { %8041 = vmatpush3.bf16.xpose.msra.mxu0 %v2849_v35  ;;  %v2922_v35 = vld [vmem:[%s10215_s28] sm:$0xff] }
 0x553   : > { %8439 = vmatprep.subr.msk.bf16.mxu0 %vm1295_vm1, %v2826_v54 }
 0x555   : > { %v3361_v14 = vpop.permute.xlu0 %3360  ;;  %v10852_v60 = vpop.permute.xlu1 %3536 }
 0x556   : > { %8052 = vmatprep.subr.bf16.mxu1 %v3361_v14 }
 0x557   : > { %8053 = vmatpush3.bf16.msra.mxu1 %v3361_v14 }
 0x558   : > { %8054 = vmatprep.subr.bf16.mxu1 %v3359_v17 }
 0x559   : > { %v3355_v28 = vpop.permute.xlu0 %3354  ;;  %v10857_v63 = vpop.permute.xlu1 %3534 }
 0x55a   : > { %8043 = vmatpush3.bf16.xpose.msra.mxu0 %v2846_v10 }
 0x55b   : > { %8068 = vmatprep.subr.bf16.mxu0 %v3450_v47  ;;  %8055 = vmatpush3.bf16.msra.mxu1 %v3359_v17 }
 0x55c   : > { %8056 = vmatprep.subr.bf16.mxu1 %v3357_v50 }
 0x55d   : > { %v10854_v25 = vpop.permute.xlu0 %3538  ;;  %v10861_v3 = vpop.permute.xlu1 %3532 }
 0x55f   : > { %8057 = vmatpush3.bf16.msra.mxu1 %v3357_v50 }
 0x560   : > { %8058 = vmatprep.subr.bf16.mxu1 %v3355_v28 }
 0x561   : > { %8045 = vmatmul.mubr.msk.bf16.vlgmr.msra.gmra.mxu0 %vm1295_vm1, %v2820_v44  ;;  %v3448_v16 = vpop.permute.xlu0 %3447  ;;  %v10864_v27 = vpop.permute.xlu1 %3627 }
 0x562   : > { %8048 = vmatprep.mubr.msk.bf16.mxu0 %vm1295_vm1, %v2822_v11  ;;  %8069 = vmatpush3.bf16.msra.mxu0 %v3450_v47  ;;  %13687 = vst [vmem:[#allocation55_spill] sm:$0xff] %v10864_v27  ;;  %v10919_v11 = vld [vmem:[%s13404_s2 + $0x58] sm:$0xff] }
 0x563   : > { %8070 = vmatprep.subr.bf16.mxu0 %v3448_v16  ;;  %8059 = vmatpush3.bf16.msra.mxu1 %v3355_v28  ;;  %v10927_v28 = vld [vmem:[%s13404_s2 + $0x48] sm:$0xff] }
 0x564   : > { %8084 = vmatprep.subr.bf16.mxu1 %v10854_v25 }
 0x565   : > { %v3446_v4 = vpop.permute.xlu0 %3445 }
 0x566   : > { %8071 = vmatpush3.bf16.msra.mxu0 %v3448_v16 }
 0x567   : > { %8072 = vmatprep.subr.bf16.mxu0 %v3446_v4 }
 0x569   : > { %8049 = vmatmul.mubr.msk.bf16.gmra.mxu0 %vm1295_vm1, %v2824_v21  ;;  %v3444_v22 = vpop.permute.xlu0 %3443  ;;  %v10904_v21 = vld [vmem:[%s13404_s2 + $0x50] sm:$0xff] }
 0x56a   : > { %8073 = vmatpush3.bf16.msra.mxu0 %v3446_v4 }
 0x56b   : > { %8074 = vmatprep.subr.bf16.mxu0 %v3444_v22 }
 0x56e   : > { %8075 = vmatpush3.bf16.msra.mxu0 %v3444_v22 }
 0x56f   : > { %8100 = vmatprep.subr.bf16.mxu0 %v10864_v27 }
 0x588   : > { %v10867_v37 = vpop.f32.mrf.mxu0 }
 0x589   : > { %13688 = vst [vmem:[#allocation58_spill] sm:$0xff] %v10867_v37 }
 0x58a   : > { %v10871_v2 = vpop.f32.mrf.mxu0 }
 0x58b   : > { %13690 = vst [vmem:[#allocation60_spill] sm:$0xff] %v10871_v2  ;;  %v2929_v2 = vld [vmem:[%s10215_s28 + $0x38] sm:$0xff] }
 0x58c   : > { %v10875_v24 = vpop.f32.mrf.mxu0 }
 0x58d   : > { %13692 = vst [vmem:[#allocation68_spill] sm:$0xff] %v10875_v24 }
 0x58e   : > { %v10879_v61 = vpop.f32.mrf.mxu0 }
 0x58f   : > { %13694 = vst [vmem:[#allocation63_spill] sm:$0xff] %v10879_v61 }
 0x590   : > { %v10883_v8 = vpop.f32.mrf.mxu0 }
 0x591   : > { %13696 = vst [vmem:[#allocation57_spill] sm:$0xff] %v10883_v8 }
 0x592   : > { %v10887_v33 = vpop.f32.mrf.mxu0 }
 0x593   : > { %13698 = vst [vmem:[#allocation64_spill] sm:$0xff] %v10887_v33  ;;  %v10985_v33 = vld [vmem:[%s13404_s2 + $0x78] sm:$0xff] }
 0x594   : > { %v10891_v44 = vpop.f32.mrf.mxu0 }
 0x595   : > { %13700 = vst [vmem:[#allocation69_spill] sm:$0xff] %v10891_v44 }
 0x596   : > { %v10895_v39 = vpop.f32.mrf.mxu0 }
 0x597   : > { %13702 = vst [vmem:[#allocation70_spill] sm:$0xff] %v10895_v39 }
 0x5a0   : > { %v10897_v57 = vpop.f32.mrf.mxu0 }
 0x5a1   : > { %13703 = vst [vmem:[#allocation71_spill] sm:$0xff] %v10897_v57 }
 0x5a2   : > { %v10913_v0 = vpop.f32.mrf.mxu0 }
 0x5a3   : > { %13705 = vst [vmem:[#allocation73_spill] sm:$0xff] %v10913_v0  ;;  %v2930_v0 = vld [vmem:[%s10215_s28 + $0x40] sm:$0xff] }
 0x5b0   : > { %v10869_v56 = vpop.f32.mrf.mxu1 }
 0x5b1   : > { %13689 = vst [vmem:[#allocation59_spill] sm:$0xff] %v10869_v56  ;;  %v10976_v56 = vld [vmem:[%s13404_s2 + $0x60] sm:$0xff] }
 0x5b2   : > { %v10873_v20 = vpop.f32.mrf.mxu1 }
 0x5b3   : > { %13691 = vst [vmem:[#allocation56_spill] sm:$0xff] %v10873_v20 }
 0x5b4   : > { %v10877_v55 = vpop.f32.mrf.mxu1 }
 0x5b5   : > { %13693 = vst [vmem:[#allocation61_spill] sm:$0xff] %v10877_v55  ;;  %v2926_v55 = vld [vmem:[%s10215_s28 + $0x20] sm:$0xff] }
 0x5b6   : > { %v10881_v30 = vpop.f32.mrf.mxu1 }
 0x5b7   : > { %13695 = vst [vmem:[#allocation65_spill] sm:$0xff] %v10881_v30  ;;  %v2928_v30 = vld [vmem:[%s10215_s28 + $0x30] sm:$0xff] }
 0x5b8   : > { %v10885_v54 = vpop.f32.mrf.mxu1 }
 0x5b9   : > { %13697 = vst [vmem:[#allocation62_spill] sm:$0xff] %v10885_v54 }
 0x5ba   : > { %v10889_v9 = vpop.f32.mrf.mxu1 }
 0x5bb   : > { %13699 = vst [vmem:[#allocation66_spill] sm:$0xff] %v10889_v9  ;;  %v2925_v9 = vld [vmem:[%s10215_s28 + $0x18] sm:$0xff] }
 0x5bc   : > { %v10893_v62 = vpop.f32.mrf.mxu1 }
 0x5bd   : > { %13701 = vst [vmem:[#allocation67_spill] sm:$0xff] %v10893_v62 }
 0x5be   : > { %v10899_v41 = vpop.f32.mrf.mxu1 }
 0x5bf   : > { %13704 = vst [vmem:[#allocation72_spill] sm:$0xff] %v10899_v41 }
 0x5d0   : > { %v7998_v43 = vpop.f32.mrf.mxu1 }
 0x5d1   : > { %v2573_v17 = vadd.f32 %v7998_v43, %v10904_v21  ;;  %v10934_v43 = vpop.f32.mrf.mxu0 }
 0x5d2   : > { %v2564_v50 = vpop.f32.mrf.mxu1  ;;  %13706 = vst [vmem:[#allocation74_spill] sm:$0xff] %v10934_v43  ;;  %v2936_v43 = vld [vmem:[%s10215_s28 + $0x70] sm:$0xff] }
 0x5d3   : > { %v10921_v14 = vadd.f32 %v2924_v32, %v2573_v17  ;;  %v2565_v47 = vadd.f32 %v10910_v5, %v2564_v50  ;;  %v2923_v17 = vld [vmem:[%s10215_s28 + $0x8] sm:$0xff] }
 0x5d4   : > { %v7999_v10 = vpop.f32.mrf.mxu1 }
 0x5d5   : > { %v10929_v16 = vadd.f32 %v2922_v35, %v2565_v47  ;;  %v2576_v4 = vadd.f32 %v7999_v10, %v10919_v11  ;;  %v2992_v22 = vsel %vm1752_vm2, %v10921_v14, -inf  ;;  %v10945_v47 = vpop.f32.mrf.mxu0 }
 0x5d6   : > { %2993 = vmax.xlane.f32.xlu0 %v2992_v22  ;;  %v2567_v32 = vpop.f32.mrf.mxu1  ;;  %13707 = vst [vmem:[#allocation75_spill] sm:$0xff] %v10945_v47 }
 0x5d7   : > { %v2568_v50 = vadd.f32 %v10927_v28, %v2567_v32  ;;  %v10939_v41 = vadd.f32 %v2925_v9, %v2576_v4  ;;  %v2986_v54 = vsel %vm1752_vm2, %v10929_v16, -inf  ;;  %v10951_v62 = vpop.f32.mrf.mxu0 }
 0x5d8   : > { %13708 = vst [vmem:[#allocation76_spill] sm:$0xff] %v10951_v62 }
 0x5d9   : > { %v10943_v35 = vadd.f32 %v2923_v17, %v2568_v50  ;;  %v2995_v22 = vsel %vm1752_vm2, %v10939_v41, -inf  ;;  %v10953_v9 = vpop.f32.mrf.mxu0 }
 0x5da   : > { %2987 = vmax.xlane.f32.xlu0 %v2986_v54  ;;  %13709 = vst [vmem:[#allocation77_spill] sm:$0xff] %v10953_v9 }
 0x5db   : > { %v2989_v10 = vsel %vm1752_vm2, %v10943_v35, -inf  ;;  %v10955_v4 = vpop.f32.mrf.mxu0 }
 0x5dc   : > { %2990 = vmax.xlane.f32.xlu1 %v2989_v10  ;;  %13710 = vst [vmem:[#allocation78_spill] sm:$0xff] %v10955_v4  ;;  %v10968_v10 = vld [vmem:[%s13404_s2 + $0x70] sm:$0xff]  ;;  %v2931_v4 = vld [vmem:[%s10215_s28 + $0x48] sm:$0xff] }
 0x5dd   : > { %v10957_v32 = vpop.f32.mrf.mxu0 }
 0x5de   : > { %2996 = vmax.xlane.f32.xlu0 %v2995_v22  ;;  %13711 = vst [vmem:[#allocation79_spill] sm:$0xff] %v10957_v32 }
 0x5df   : > { %v10959_v17 = vpop.f32.mrf.mxu0 }
 0x5e0   : > { %13712 = vst [vmem:[#allocation80_spill] sm:$0xff] %v10959_v17 }
 0x5e1   : > { %v10961_v54 = vpop.f32.mrf.mxu0 }
 0x5e2   : > { %13713 = vst [vmem:[#allocation81_spill] sm:$0xff] %v10961_v54 }
 0x5e3   : > { %v10963_v50 = vpop.f32.mrf.mxu0 }
 0x5e4   : > { %13714 = vst [vmem:[#allocation82_spill] sm:$0xff] %v10963_v50 }
 0x5e5   : > { %v10970_v20 = vpop.f32.mrf.mxu0 }
 0x5e6   : > { %13715 = vst [vmem:[#allocation83_spill] sm:$0xff] %v10970_v20 }
 0x5f7   : > { %v8002_v22 = vpop.f32.mrf.mxu1 }
 0x5f8   : > { %v2589_v17 = vadd.f32 %v8002_v22, %v10968_v10  ;;  %v10996_v22 = vld [vmem:[%s13404_s2 + $0x68] sm:$0xff] }
 0x5f9   : > { %v10979_v54 = vpop.f32.mrf.mxu0  ;;  %v2580_v50 = vpop.f32.mrf.mxu1 }
 0x5fa   : > { %13716 = vst [vmem:[#allocation84_spill] sm:$0xff] %v10979_v54  ;;  %v10987_v20 = vadd.f32 %v2928_v30, %v2589_v17  ;;  %v2581_v39 = vadd.f32 %v10976_v56, %v2580_v50 }
 0x5fb   : > { %v10990_v8 = vpop.f32.mrf.mxu0  ;;  %v8003_v44 = vpop.f32.mrf.mxu1 }
 0x5fc   : > { %13717 = vst [vmem:[#allocation85_spill] sm:$0xff] %v10990_v8  ;;  %v10998_v54 = vadd.f32 %v2926_v55, %v2581_v39  ;;  %v2592_v61 = vadd.f32 %v8003_v44, %v10985_v33  ;;  %v3004_v30 = vsel %vm1752_vm2, %v10987_v20, -inf  ;;  %v2927_v8 = vld [vmem:[%s10215_s28 + $0x28] sm:$0xff] }
 0x5fd   : > { %v11003_v17 = vpop.f32.mrf.mxu0  ;;  %3005 = vmax.xlane.f32.xlu0 %v3004_v30  ;;  %v2583_v50 = vpop.f32.mrf.mxu1  ;;  %v2932_v30 = vld [vmem:[%s10215_s28 + $0x50] sm:$0xff] }
 0x5fe   : > { %13718 = vst [vmem:[#allocation86_spill] sm:$0xff] %v11003_v17  ;;  %v11006_v37 = vadd.f32 %v2929_v2, %v2592_v61  ;;  %v2584_v24 = vadd.f32 %v10996_v22, %v2583_v50  ;;  %v2998_v44 = vsel %vm1752_vm2, %v10998_v54, -inf }
 0x5ff   : > { %v11009_v9 = vpop.f32.mrf.mxu0 }
 0x600   : > { %13719 = vst [vmem:[#allocation87_spill] sm:$0xff] %v11009_v9  ;;  %v3007_v55 = vsel %vm1752_vm2, %v11006_v37, -inf  ;;  %v11015_v39 = vadd.f32 %v2927_v8, %v2584_v24  ;;  %v2933_v8 = vld [vmem:[%s10215_s28 + $0x58] sm:$0xff] }
 0x601   : > { %v8014_v17 = vpop.f32.mrf.mxu0  ;;  %3008 = vmax.xlane.f32.xlu1 %v3007_v55  ;;  %2999 = vmax.xlane.f32.xlu0 %v2998_v44 }
 0x602   : > { %v2682_v2 = vadd.f32 %v8014_v17, %v10904_v21  ;;  %v3001_v47 = vsel %vm1752_vm2, %v11015_v39, -inf }
 0x603   : > { %v8030_v61 = vpop.f32.mrf.mxu1  ;;  %v2673_v50 = vpop.f32.mrf.mxu0 }
 0x604   : > { %v11019_v32 = vadd.f32 %v2932_v30, %v2682_v2  ;;  %v2674_v9 = vadd.f32 %v10910_v5, %v2673_v50  ;;  %v2791_v18 = vadd.f32 %v8030_v61, %v10904_v21 }
 0x605   : > { %v8015_v24 = vpop.f32.mrf.mxu0  ;;  %3002 = vmax.xlane.f32.xlu1 %v3001_v47  ;;  %v2782_v62 = vpop.f32.mrf.mxu1 }
 0x606   : > { %v2685_v55 = vadd.f32 %v8015_v24, %v10919_v11  ;;  %v11027_v44 = vadd.f32 %v2930_v0, %v2674_v9  ;;  %v3016_v30 = vsel %vm1752_vm2, %v11019_v32, -inf  ;;  %v2783_v12 = vadd.f32 %v10910_v5, %v2782_v62 }
 0x607   : > { %v2676_v17 = vpop.f32.mrf.mxu0  ;;  %3017 = vmax.xlane.f32.xlu0 %v3016_v30  ;;  %v8031_v47 = vpop.f32.mrf.mxu1  ;;  %v2934_v30 = vld [vmem:[%s10215_s28 + $0x60] sm:$0xff] }
 0x608   : > { %v11031_v2 = vadd.f32 %v2933_v8, %v2685_v55  ;;  %v2677_v50 = vadd.f32 %v10927_v28, %v2676_v17  ;;  %v3010_v9 = vsel %vm1752_vm2, %v11027_v44, -inf  ;;  %v2794_v15 = vadd.f32 %v8031_v47, %v10919_v11 }
 0x609   : > { %v8018_v57 = vpop.f32.mrf.mxu0 }
 0x60a   : > { %v2698_v26 = vadd.f32 %v8018_v57, %v10968_v10  ;;  %v11037_v24 = vadd.f32 %v2931_v4, %v2677_v50  ;;  %v3019_v0 = vsel %vm1752_vm2, %v11031_v2, -inf  ;;  %v2937_v57 = vld [vmem:[%s10215_s28 + $0x78] sm:$0xff]  ;;  %v2785_v4 = vpop.f32.mrf.mxu1 }
 0x60b   : > { %v2689_v8 = vpop.f32.mrf.mxu0  ;;  %3020 = vmax.xlane.f32.xlu1 %v3019_v0  ;;  %3011 = vmax.xlane.f32.xlu0 %v3010_v9  ;;  %v2940_v0 = vld [vmem:[%s10215_s28 + $0x90] sm:$0xff] }
 0x60c   : > { %v11043_v55 = vadd.f32 %v2936_v43, %v2698_v26  ;;  %v2690_v17 = vadd.f32 %v10976_v56, %v2689_v8  ;;  %v3013_v26 = vsel %vm1752_vm2, %v11037_v24, -inf  ;;  %v2935_v8 = vld [vmem:[%s10215_s28 + $0x68] sm:$0xff] }
 0x60d   : > { %v8019_v45 = vpop.f32.mrf.mxu0 }
 0x60e   : > { %v2701_v50 = vadd.f32 %v8019_v45, %v10985_v33  ;;  %v3028_v29 = vsel %vm1752_vm2, %v11043_v55, -inf  ;;  %v11052_v40 = vadd.f32 %v2934_v30, %v2690_v17  ;;  %v11064_v17 = vadd.f32 %v2940_v0, %v2791_v18  ;;  %v2938_v30 = vld [vmem:[%s10215_s28 + $0x80] sm:$0xff] }
 0x60f   : > { %v2692_v43 = vpop.f32.mrf.mxu0  ;;  %3014 = vmax.xlane.f32.xlu1 %v3013_v26  ;;  %3029 = vmax.xlane.f32.xlu0 %v3028_v29  ;;  %v8034_v27 = vpop.f32.mrf.mxu1  ;;  %v11073_v62 = vadd.f32 %v2938_v30, %v2783_v12 }
 0x610   : > { %v11057_v9 = vadd.f32 %v2937_v57, %v2701_v50  ;;  %v2693_v45 = vadd.f32 %v10996_v22, %v2692_v43  ;;  %v3022_v29 = vsel %vm1752_vm2, %v11052_v40, -inf  ;;  %v2941_v50 = vld [vmem:[%s10215_s28 + $0x98] sm:$0xff]  ;;  %v2786_v43 = vadd.f32 %v10927_v28, %v2785_v4 }
 0x611   : > { %v2798_v26 = vpop.f32.mrf.mxu1  ;;  %v11076_v18 = vadd.f32 %v2941_v50, %v2794_v15  ;;  %v2807_v0 = vadd.f32 %v8034_v27, %v10968_v10  ;;  %v3034_v12 = vsel %vm1752_vm2, %v11073_v62, -inf  ;;  %v2942_v50 = vld [vmem:[%s10215_s28 + $0xa0] sm:$0xff] }
 0x612   : > { %v3031_v61 = vsel %vm1752_vm2, %v11057_v9, -inf  ;;  %v11068_v57 = vadd.f32 %v2935_v8, %v2693_v45  ;;  %v3040_v45 = vsel %vm1752_vm2, %v11064_v17, -inf  ;;  %v2939_v8 = vld [vmem:[%s10215_s28 + $0x88] sm:$0xff]  ;;  %v2799_v27 = vadd.f32 %v10976_v56, %v2798_v26 }
 0x613   : > { %3032 = vmax.xlane.f32.xlu1 %v3031_v61  ;;  %3023 = vmax.xlane.f32.xlu0 %v3022_v29  ;;  %v8035_v61 = vpop.f32.mrf.mxu1  ;;  %v11087_v4 = vadd.f32 %v2939_v8, %v2786_v43  ;;  %v11089_v15 = vadd.f32 %v2944_v59, %v2807_v0  ;;  %v3043_v29 = vsel %vm1752_vm2, %v11076_v18, -inf  ;;  %v2943_v8 = vld [vmem:[%s10215_s28 + $0xa8] sm:$0xff] }
 0x614   : > { %v3025_v47 = vsel %vm1752_vm2, %v11068_v57, -inf  ;;  %v2810_v30 = vadd.f32 %v8035_v61, %v10985_v33 }
 0x615   : > { %v3037_v43 = vsel %vm1752_vm2, %v11087_v4, -inf  ;;  %v3052_v0 = vsel %vm1752_vm2, %v11089_v15, -inf }
 0x616   : > { %v11101_v59 = vadd.f32 %v2945_v48, %v2810_v30 }
 0x617   : > { %3026 = vmax.xlane.f32.xlu1 %v3025_v47  ;;  %3041 = vmax.xlane.f32.xlu0 %v3040_v45  ;;  %v2801_v47 = vpop.f32.mrf.mxu1  ;;  %v11099_v45 = vadd.f32 %v2942_v50, %v2799_v27 }
 0x618   : > { %v2802_v26 = vadd.f32 %v10996_v22, %v2801_v47  ;;  %v3055_v27 = vsel %vm1752_vm2, %v11101_v59, -inf }
 0x619   : > { %v3046_v48 = vsel %vm1752_vm2, %v11099_v45, -inf }
 0x61a   : > { %v11113_v30 = vadd.f32 %v2943_v8, %v2802_v26 }
 0x61b   : > { %3044 = vmax.xlane.f32.xlu1 %v3043_v29  ;;  %3035 = vmax.xlane.f32.xlu0 %v3034_v12  ;;  %v2948_v29 = vld [vmem:[%s10215_s28 + $0xd0] sm:$0xff] }
 0x61c   : > { %v3049_v26 = vsel %vm1752_vm2, %v11113_v30, -inf }
 0x61f   : > { %3038 = vmax.xlane.f32.xlu1 %v3037_v43  ;;  %3053 = vmax.xlane.f32.xlu0 %v3052_v0  ;;  %v2946_v43 = vld [vmem:[%s10215_s28 + $0xc0] sm:$0xff] }
 0x621   : > { %v8046_v61 = vpop.f32.mrf.mxu0 }
 0x622   : > { %v2900_v12 = vadd.f32 %v8046_v61, %v10904_v21  ;;  %v2949_v21 = vld [vmem:[%s10215_s28 + $0xd8] sm:$0xff] }
 0x623   : > { %v2891_v38 = vpop.f32.mrf.mxu0  ;;  %3056 = vmax.xlane.f32.xlu1 %v3055_v27  ;;  %3047 = vmax.xlane.f32.xlu0 %v3046_v48 }
 0x624   : > { %v11115_v50 = vadd.f32 %v2948_v29, %v2900_v12  ;;  %v2892_v47 = vadd.f32 %v10910_v5, %v2891_v38  ;;  %v2947_v5 = vld [vmem:[%s10215_s28 + $0xc8] sm:$0xff] }
 0x625   : > { %v8047_v0 = vpop.f32.mrf.mxu0 }
 0x626   : > { %v2903_v61 = vadd.f32 %v8047_v0, %v10919_v11  ;;  %v3064_v46 = vsel %vm1752_vm2, %v11115_v50, -inf  ;;  %v11123_v34 = vadd.f32 %v2946_v43, %v2892_v47  ;;  %v2952_v11 = vld [vmem:[%s10215_s28 + $0xf0] sm:$0xff] }
 0x627   : > { %v2894_v7 = vpop.f32.mrf.mxu0  ;;  %3050 = vmax.xlane.f32.xlu1 %v3049_v26  ;;  %3065 = vmax.xlane.f32.xlu0 %v3064_v46 }
 0x628   : > { %v11127_v8 = vadd.f32 %v2949_v21, %v2903_v61  ;;  %v2895_v38 = vadd.f32 %v10927_v28, %v2894_v7  ;;  %v3058_v43 = vsel %vm1752_vm2, %v11123_v34, -inf  ;;  %v2950_v28 = vld [vmem:[%s10215_s28 + $0xe0] sm:$0xff]  ;;  %v2953_v21 = vld [vmem:[%s10215_s28 + $0xf8] sm:$0xff] }
 0x629   : > { %v8050_v29 = vpop.f32.mrf.mxu0 }
 0x62a   : > { %v2916_v12 = vadd.f32 %v8050_v29, %v10968_v10  ;;  %v3067_v27 = vsel %vm1752_vm2, %v11127_v8, -inf  ;;  %v11135_v48 = vadd.f32 %v2947_v5, %v2895_v38 }
 0x62b   : > { %v2907_v47 = vpop.f32.mrf.mxu0  ;;  %3068 = vmax.xlane.f32.xlu1 %v3067_v27  ;;  %3059 = vmax.xlane.f32.xlu0 %v3058_v43  ;;  %v11163_v43 = vpop.permute.xlu1 %3733 }
 0x62c   : > { %v11139_v0 = vadd.f32 %v2952_v11, %v2916_v12  ;;  %v2908_v7 = vadd.f32 %v10976_v56, %v2907_v47  ;;  %v3061_v5 = vsel %vm1752_vm2, %v11135_v48, -inf  ;;  %v2951_v11 = vld [vmem:[%s10215_s28 + $0xe8] sm:$0xff] }
 0x62d   : > { %v8051_v46 = vpop.f32.mrf.mxu0 }
 0x62e   : > { %v2919_v10 = vadd.f32 %v8051_v46, %v10985_v33  ;;  %v3076_v61 = vsel %vm1752_vm2, %v11139_v0, -inf  ;;  %v11147_v26 = vadd.f32 %v2950_v28, %v2908_v7  ;;  %v11169_v28 = vpop.permute.xlu0 %3625 }
 0x62f   : > { %v2910_v38 = vpop.f32.mrf.mxu0  ;;  %3062 = vmax.xlane.f32.xlu1 %v3061_v5  ;;  %3077 = vmax.xlane.f32.xlu0 %v3076_v61  ;;  %13722 = vst [vmem:[#allocation90_spill] sm:$0xff] %v11169_v28 }
 0x630   : > { %v11151_v29 = vadd.f32 %v2953_v21, %v2919_v10  ;;  %v2911_v56 = vadd.f32 %v10996_v22, %v2910_v38  ;;  %v3070_v27 = vsel %vm1752_vm2, %v11147_v26, -inf  ;;  %v11165_v22 = vpop.permute.xlu1 %3623 }
 0x631   : > { %13720 = vst [vmem:[#allocation88_spill] sm:$0xff] %v11165_v22 }
 0x632   : > { %v3079_v12 = vsel %vm1752_vm2, %v11151_v29, -inf  ;;  %v11157_v33 = vadd.f32 %v2951_v11, %v2911_v56  ;;  %v11173_v21 = vpop.permute.xlu0 %3731 }
 0x633   : > { %3080 = vmax.xlane.f32.xlu1 %v3079_v12  ;;  %3071 = vmax.xlane.f32.xlu0 %v3070_v27  ;;  %13724 = vst [vmem:[#allocation92_spill] sm:$0xff] %v11173_v21 }
 0x634   : > { %v3073_v47 = vsel %vm1752_vm2, %v11157_v33, -inf  ;;  %v11167_v7 = vpop.permute.xlu1 %3621 }
 0x635   : > { %13721 = vst [vmem:[#allocation89_spill] sm:$0xff] %v11167_v7 }
 0x636   : > { %v11177_v61 = vpop.permute.xlu0 %3729 }
 0x637   : > { %3074 = vmax.xlane.f32.xlu1 %v3073_v47  ;;  %13726 = vst [vmem:[#allocation94_spill] sm:$0xff] %v11177_v61 }
 0x638   : > { %v11171_v46 = vpop.permute.xlu1 %3838 }
 0x639   : > { %13723 = vst [vmem:[#allocation91_spill] sm:$0xff] %v11171_v46 }
 0x63a   : > { %v11181_v5 = vpop.permute.xlu0 %3719 }
 0x63b   : > { %13728 = vst [vmem:[#allocation96_spill] sm:$0xff] %v11181_v5 }
 0x63c   : > { %v11175_v10 = vpop.permute.xlu1 %3727 }
 0x63d   : > { %13725 = vst [vmem:[#allocation93_spill] sm:$0xff] %v11175_v10 }
 0x640   : > { %v11179_v38 = vpop.permute.xlu1 %3836 }
 0x641   : > { %13727 = vst [vmem:[#allocation95_spill] sm:$0xff] %v11179_v38 }
 0x644   : > { %v11184_v12 = vpop.permute.xlu1 %3834 }
 0x645   : > { %13729 = vst [vmem:[#allocation97_spill] sm:$0xff] %v11184_v12 }
 0x65f   : > { %v2994_v56 = vpop.xlane.xlu0 %2993 }
 0x660   : > { %v3084_v11 = vsub.f32 %v10921_v14, %v2994_v56 }
 0x662   : > { %v3118_v27 = vmul.f32 1.442695, %v3084_v11 }
 0x663   : > { %v2988_v47 = vpop.xlane.xlu0 %2987 }
 0x664   : > { %8962 = vpow2.f32 %v3118_v27  ;;  %v3082_v46 = vsub.f32 %v10929_v16, %v2988_v47 }
 0x665   : > { %v2991_v7 = vpop.xlane.xlu1 %2990 }
 0x666   : > { %v3114_v21 = vmul.f32 1.442695, %v3082_v46  ;;  %v3083_v10 = vsub.f32 %v10943_v35, %v2991_v7 }
 0x667   : > { %v2997_v22 = vpop.xlane.xlu0 %2996 }
 0x668   : > { %8964 = vpow2.f32 %v3114_v21  ;;  %v3085_v38 = vsub.f32 %v10939_v41, %v2997_v22  ;;  %v3116_v61 = vmul.f32 1.442695, %v3083_v10 }
 0x66a   : > { %v3120_v5 = vmul.f32 1.442695, %v3085_v38 }
 0x66c   : > { %8966 = vpow2.f32 %v3120_v5 }
 0x66d   : > { %8968 = vpow2.f32 %v3116_v61 }
 0x671   : > { %v11189_v14 = vpop.eup %8962 }
 0x672   : > { %v3184_v56 = vsel %vm1752_vm2, %v11189_v14, 0.0 }
 0x673   : > { %3185 = vadd.xlane.f32.xlu0 %v3184_v56 }
 0x675   : > { %v11193_v11 = vpop.eup %8964 }
 0x676   : > { %v3178_v16 = vsel %vm1752_vm2, %v11193_v11, 0.0 }
 0x677   : > { %3179 = vadd.xlane.f32.xlu0 %v3178_v16 }
 0x679   : > { %v11197_v35 = vpop.eup %8966 }
 0x67a   : > { %v3187_v41 = vsel %vm1752_vm2, %v11197_v35, 0.0  ;;  %v11201_v22 = vpop.eup %8968 }
 0x67b   : > { %3188 = vadd.xlane.f32.xlu1 %v3187_v41  ;;  %v3181_v7 = vsel %vm1752_vm2, %v11201_v22, 0.0 }
 0x67f   : > { %3182 = vadd.xlane.f32.xlu1 %v3181_v7 }
 0x686   : > { %v3006_v46 = vpop.xlane.xlu0 %3005 }
 0x687   : > { %v3088_v21 = vsub.f32 %v10987_v20, %v3006_v46 }
 0x689   : > { %v3126_v10 = vmul.f32 1.442695, %v3088_v21 }
 0x68a   : > { %v3009_v61 = vpop.xlane.xlu1 %3008  ;;  %v3000_v38 = vpop.xlane.xlu0 %2999 }
 0x68b   : > { %8970 = vpow2.f32 %v3126_v10  ;;  %v3089_v5 = vsub.f32 %v11006_v37, %v3009_v61  ;;  %v3086_v27 = vsub.f32 %v10998_v54, %v3000_v38 }
 0x68d   : > { %v3128_v47 = vmul.f32 1.442695, %v3089_v5  ;;  %v3122_v56 = vmul.f32 1.442695, %v3086_v27 }
 0x68e   : > { %v3003_v16 = vpop.xlane.xlu1 %3002 }
 0x68f   : > { %8972 = vpow2.f32 %v3128_v47  ;;  %v3087_v41 = vsub.f32 %v11015_v39, %v3003_v16 }
 0x690   : > { %8974 = vpow2.f32 %v3122_v56  ;;  %v3018_v7 = vpop.xlane.xlu0 %3017 }
 0x691   : > { %v3124_v12 = vmul.f32 1.442695, %v3087_v41  ;;  %v3092_v28 = vsub.f32 %v11019_v32, %v3018_v7 }
 0x693   : > { %8976 = vpow2.f32 %v3124_v12  ;;  %v3134_v20 = vmul.f32 1.442695, %v3092_v28 }
 0x694   : > { %v3021_v46 = vpop.xlane.xlu1 %3020  ;;  %v3012_v21 = vpop.xlane.xlu0 %3011 }
 0x695   : > { %8978 = vpow2.f32 %v3134_v20  ;;  %v3093_v37 = vsub.f32 %v11031_v2, %v3021_v46  ;;  %v3090_v54 = vsub.f32 %v11027_v44, %v3012_v21 }
 0x697   : > { %v3130_v61 = vmul.f32 1.442695, %v3090_v54  ;;  %v3136_v38 = vmul.f32 1.442695, %v3093_v37 }
 0x698   : > { %v11212_v10 = vpop.eup %8970  ;;  %v3015_v5 = vpop.xlane.xlu1 %3014 }
 0x699   : > { %v3030_v39 = vpop.xlane.xlu0 %3029  ;;  %v3196_v27 = vsel %vm1752_vm2, %v11212_v10, 0.0  ;;  %v3091_v32 = vsub.f32 %v11037_v24, %v3015_v5  ;;  %8980 = vpow2.f32 %v3130_v61 }
 0x69a   : > { %v3096_v28 = vsub.f32 %v11043_v55, %v3030_v39  ;;  %3197 = vadd.xlane.f32.xlu0 %v3196_v27  ;;  %8982 = vpow2.f32 %v3136_v38 }
 0x69b   : > { %v3132_v44 = vmul.f32 1.442695, %v3091_v32 }
 0x69c   : > { %v11218_v12 = vpop.eup %8972  ;;  %v3142_v2 = vmul.f32 1.442695, %v3096_v28  ;;  %v3033_v56 = vpop.xlane.xlu1 %3032 }
 0x69d   : > { %v11220_v47 = vpop.eup %8974  ;;  %v3024_v16 = vpop.xlane.xlu0 %3023  ;;  %v3199_v41 = vsel %vm1752_vm2, %v11218_v12, 0.0  ;;  %v3097_v7 = vsub.f32 %v11057_v9, %v3033_v56 }
 0x69e   : > { %v3094_v24 = vsub.f32 %v11052_v40, %v3024_v16  ;;  %3200 = vadd.xlane.f32.xlu1 %v3199_v41  ;;  %v3190_v55 = vsel %vm1752_vm2, %v11220_v47, 0.0  ;;  %8984 = vpow2.f32 %v3142_v2 }
 0x69f   : > { %3191 = vadd.xlane.f32.xlu0 %v3190_v55  ;;  %v3144_v46 = vmul.f32 1.442695, %v3097_v7  ;;  %8986 = vpow2.f32 %v3132_v44 }
 0x6a0   : > { %v11228_v20 = vpop.eup %8976  ;;  %v3138_v21 = vmul.f32 1.442695, %v3094_v24  ;;  %v3027_v37 = vpop.xlane.xlu1 %3026 }
 0x6a1   : > { %v3042_v54 = vpop.xlane.xlu0 %3041  ;;  %v3193_v61 = vsel %vm1752_vm2, %v11228_v20, 0.0  ;;  %8988 = vpow2.f32 %v3144_v46  ;;  %v3095_v9 = vsub.f32 %v11068_v57, %v3027_v37 }
 0x6a2   : > { %v3100_v40 = vsub.f32 %v11064_v17, %v3042_v54  ;;  %3194 = vadd.xlane.f32.xlu1 %v3193_v61  ;;  %v11234_v38 = vpop.eup %8978  ;;  %8990 = vpow2.f32 %v3138_v21 }
 0x6a3   : > { %v3140_v5 = vmul.f32 1.442695, %v3095_v9  ;;  %v3208_v28 = vsel %vm1752_vm2, %v11234_v38, 0.0 }
 0x6a4   : > { %v3150_v39 = vmul.f32 1.442695, %v3100_v40  ;;  %v3045_v27 = vpop.xlane.xlu1 %3044 }
 0x6a5   : > { %v3036_v32 = vpop.xlane.xlu0 %3035  ;;  %8992 = vpow2.f32 %v3140_v5  ;;  %v3101_v2 = vsub.f32 %v11076_v18, %v3045_v27 }
 0x6a6   : > { %v3098_v44 = vsub.f32 %v11073_v62, %v3036_v32  ;;  %3209 = vadd.xlane.f32.xlu1 %v3208_v28  ;;  %v11240_v57 = vpop.eup %8980  ;;  %8994 = vpow2.f32 %v3150_v39 }
 0x6a7   : > { %v3152_v56 = vmul.f32 1.442695, %v3101_v2  ;;  %v3202_v7 = vsel %vm1752_vm2, %v11240_v57, 0.0  ;;  %v11244_v24 = vpop.eup %8982 }
 0x6a8   : > { %v3146_v17 = vmul.f32 1.442695, %v3098_v44  ;;  %v3039_v16 = vpop.xlane.xlu1 %3038  ;;  %v3211_v9 = vsel %vm1752_vm2, %v11244_v24, 0.0 }
 0x6a9   : > { %v3054_v41 = vpop.xlane.xlu0 %3053  ;;  %v3099_v55 = vsub.f32 %v11087_v4, %v3039_v16 }
 0x6aa   : > { %v3104_v46 = vsub.f32 %v11089_v15, %v3054_v41  ;;  %3203 = vadd.xlane.f32.xlu1 %v3202_v7  ;;  %8996 = vpow2.f32 %v3146_v17 }
 0x6ab   : > { %v11248_v62 = vpop.eup %8984  ;;  %8998 = vpow2.f32 %v3152_v56  ;;  %v3148_v21 = vmul.f32 1.442695, %v3099_v55 }
 0x6ac   : > { %v3158_v18 = vmul.f32 1.442695, %v3104_v46  ;;  %v3057_v37 = vpop.xlane.xlu1 %3056  ;;  %v3220_v54 = vsel %vm1752_vm2, %v11248_v62, 0.0  ;;  %v11254_v40 = vpop.eup %8986 }
 0x6ad   : > { %v3048_v61 = vpop.xlane.xlu0 %3047  ;;  %v3105_v4 = vsub.f32 %v11101_v59, %v3057_v37  ;;  %3221 = vadd.xlane.f32.xlu0 %v3220_v54  ;;  %v3205_v44 = vsel %vm1752_vm2, %v11254_v40, 0.0 }
 0x6ae   : > { %v3102_v15 = vsub.f32 %v11099_v45, %v3048_v61  ;;  %3212 = vadd.xlane.f32.xlu1 %v3211_v9  ;;  %v11258_v5 = vpop.eup %8988  ;;  %9000 = vpow2.f32 %v3158_v18 }
 0x6af   : > { %v3223_v27 = vsel %vm1752_vm2, %v11258_v5, 0.0  ;;  %9002 = vpow2.f32 %v3148_v21  ;;  %v3160_v32 = vmul.f32 1.442695, %v3105_v4  ;;  %v11264_v17 = vpop.eup %8990 }
 0x6b0   : > { %v3154_v39 = vmul.f32 1.442695, %v3102_v15  ;;  %v3051_v28 = vpop.xlane.xlu1 %3050 }
 0x6b1   : > { %v3066_v2 = vpop.xlane.xlu0 %3065  ;;  %v3103_v59 = vsub.f32 %v11113_v30, %v3051_v28  ;;  %3224 = vadd.xlane.f32.xlu0 %v3223_v27  ;;  %v3214_v30 = vsel %vm1752_vm2, %v11264_v17, 0.0 }
 0x6b2   : > { %v3108_v45 = vsub.f32 %v11115_v50, %v3066_v2  ;;  %3206 = vadd.xlane.f32.xlu1 %v3205_v44  ;;  %v11268_v56 = vpop.eup %8992  ;;  %9004 = vpow2.f32 %v3154_v39 }
 0x6b3   : > { %v3156_v16 = vmul.f32 1.442695, %v3103_v59  ;;  %v3217_v41 = vsel %vm1752_vm2, %v11268_v56, 0.0  ;;  %v11272_v7 = vpop.eup %8994  ;;  %9006 = vpow2.f32 %v3160_v32 }
 0x6b4   : > { %v3166_v55 = vmul.f32 1.442695, %v3108_v45  ;;  %v3069_v46 = vpop.xlane.xlu1 %3068  ;;  %v3232_v37 = vsel %vm1752_vm2, %v11272_v7, 0.0 }
 0x6b5   : > { %v3060_v18 = vpop.xlane.xlu0 %3059  ;;  %9008 = vpow2.f32 %v3156_v16  ;;  %3218 = vadd.xlane.f32.xlu0 %v3217_v41  ;;  %v3109_v54 = vsub.f32 %v11127_v8, %v3069_v46 }
 0x6b6   : > { %v3106_v50 = vsub.f32 %v11123_v34, %v3060_v18  ;;  %3215 = vadd.xlane.f32.xlu1 %v3214_v30  ;;  %9010 = vpow2.f32 %v3166_v55 }
 0x6b7   : > { %v11277_v21 = vpop.eup %8996  ;;  %v3168_v32 = vmul.f32 1.442695, %v3109_v54 }
 0x6b8   : > { %v3162_v61 = vmul.f32 1.442695, %v3106_v50  ;;  %v3063_v9 = vpop.xlane.xlu1 %3062  ;;  %v3226_v4 = vsel %vm1752_vm2, %v11277_v21, 0.0  ;;  %v11284_v15 = vpop.eup %8998 }
 0x6b9   : > { %v3107_v39 = vsub.f32 %v11135_v48, %v3063_v9  ;;  %3233 = vadd.xlane.f32.xlu0 %v3232_v37  ;;  %v3235_v8 = vsel %vm1752_vm2, %v11284_v15, 0.0 }
 0x6ba   : > { %3227 = vadd.xlane.f32.xlu1 %v3226_v4  ;;  %9012 = vpow2.f32 %v3162_v61  ;;  %v3078_v4 = vpop.xlane.xlu0 %3077 }
 0x6bb   : > { %v11287_v34 = vpop.eup %9000  ;;  %v3164_v27 = vmul.f32 1.442695, %v3107_v39 }
 0x6bc   : > { %v3244_v28 = vsel %vm1752_vm2, %v11287_v34, 0.0  ;;  %v11293_v2 = vpop.eup %9002 }
 0x6bd   : > { %9014 = vpow2.f32 %v3164_v27  ;;  %3245 = vadd.xlane.f32.xlu0 %v3244_v28  ;;  %v3229_v59 = vsel %vm1752_vm2, %v11293_v2, 0.0 }
 0x6be   : > { %3236 = vadd.xlane.f32.xlu1 %v3235_v8  ;;  %9016 = vpow2.f32 %v3168_v32  ;;  %v3072_v39 = vpop.xlane.xlu0 %3071  ;;  %v3081_v32 = vpop.xlane.xlu1 %3080  ;;  %v3112_v8 = vsub.f32 %v11139_v0, %v3078_v4 }
 0x6bf   : > { %v11295_v44 = vpop.eup %9004  ;;  %v3110_v27 = vsub.f32 %v11147_v26, %v3072_v39 }
 0x6c0   : > { %v3238_v48 = vsel %vm1752_vm2, %v11295_v44, 0.0  ;;  %v11301_v45 = vpop.eup %9006 }
 0x6c1   : > { %3239 = vadd.xlane.f32.xlu0 %v3238_v48  ;;  %v3247_v41 = vsel %vm1752_vm2, %v11301_v45, 0.0  ;;  %v3170_v28 = vmul.f32 1.442695, %v3110_v27  ;;  %v3174_v48 = vmul.f32 1.442695, %v3112_v8 }
 0x6c2   : > { %3230 = vadd.xlane.f32.xlu1 %v3229_v59  ;;  %v11303_v16 = vpop.eup %9008  ;;  %v3113_v59 = vsub.f32 %v11151_v29, %v3081_v32 }
 0x6c3   : > { %v3241_v55 = vsel %vm1752_vm2, %v11303_v16, 0.0  ;;  %v11309_v46 = vpop.eup %9010  ;;  %9018 = vpow2.f32 %v3170_v28 }
 0x6c4   : > { %v3256_v18 = vsel %vm1752_vm2, %v11309_v46, 0.0  ;;  %9020 = vpow2.f32 %v3174_v48 }
 0x6c5   : > { %3248 = vadd.xlane.f32.xlu0 %v3247_v41  ;;  %v3075_v41 = vpop.xlane.xlu1 %3074 }
 0x6c6   : > { %3242 = vadd.xlane.f32.xlu1 %v3241_v55  ;;  %v3176_v55 = vmul.f32 1.442695, %v3113_v59 }
 0x6c7   : > { %v11313_v30 = vpop.eup %9012 }
 0x6c8   : > { %v3250_v54 = vsel %vm1752_vm2, %v11313_v30, 0.0  ;;  %9022 = vpow2.f32 %v3176_v55 }
 0x6c9   : > { %3257 = vadd.xlane.f32.xlu0 %v3256_v18  ;;  %v3111_v18 = vsub.f32 %v11157_v33, %v3075_v41 }
 0x6ca   : > { %v11315_v50 = vpop.eup %9014 }
 0x6cb   : > { %v3253_v37 = vsel %vm1752_vm2, %v11315_v50, 0.0  ;;  %v11321_v61 = vpop.eup %9016 }
 0x6cc   : > { %3254 = vadd.xlane.f32.xlu1 %v3253_v37  ;;  %v3259_v9 = vsel %vm1752_vm2, %v11321_v61, 0.0  ;;  %v3172_v37 = vmul.f32 1.442695, %v3111_v18 }
 0x6cd   : > { %3251 = vadd.xlane.f32.xlu0 %v3250_v54 }
 0x6ce   : > { %9024 = vpow2.f32 %v3172_v37 }
 0x6d1   : > { %3260 = vadd.xlane.f32.xlu0 %v3259_v9  ;;  %v11333_v9 = vpop.eup %9018 }
 0x6d2   : > { %v3262_v26 = vsel %vm1752_vm2, %v11333_v9, 0.0  ;;  %v11337_v0 = vpop.eup %9020 }
 0x6d3   : > { %v3268_v29 = vsel %vm1752_vm2, %v11337_v0, 0.0 }
 0x6d5   : > { %v11341_v33 = vpop.eup %9022 }
 0x6d6   : > { %v3271_v32 = vsel %vm1752_vm2, %v11341_v33, 0.0 }
 0x6db   : > { %v11345_v28 = vpop.eup %9024 }
 0x6dc   : > { %v3265_v8 = vsel %vm1752_vm2, %v11345_v28, 0.0 }
 0x6dd   : > { %3721 = vrot.lane.b32.xlu1 %v9966_v36, %s9392_s24 }
 0x6e7   : > { %3943 = vrot.lane.b32.xlu0 %v10049_v52, %s9391_s23 }
 0x6fc   : > { %v3186_v54 = vpop.xlane.xlu0 %3185 }
 0x700   : > { %v3180_v4 = vpop.xlane.xlu0 %3179 }
 0x701   : > { %3263 = vadd.xlane.f32.xlu1 %v3262_v26 }
 0x704   : > { %v3189_v39 = vpop.xlane.xlu1 %3188 }
 0x705   : > { %9026 = vrcp.f32 %v3189_v39 }
 0x706   : > { %9028 = vrcp.f32 %v3180_v4  ;;  %3269 = vadd.xlane.f32.xlu0 %v3268_v29  ;;  %v13732_v29 = vld [vmem:[#allocation46_spill] sm:$0xff] }
 0x707   : > { %9030 = vrcp.f32 %v3186_v54 }
 0x708   : > { %v3183_v27 = vpop.xlane.xlu1 %3182 }
 0x709   : > { %9032 = vrcp.f32 %v3183_v27 }
 0x70a   : > { %3272 = vadd.xlane.f32.xlu0 %v3271_v32 }
 0x70e   : > { %3266 = vadd.xlane.f32.xlu0 %v3265_v8 }
 0x712   : > { %v9027_v48 = vpop.eup %9026  ;;  %3941 = vrot.lane.b32.xlu1 %v10058_v31, %s9391_s23 }
 0x713   : > { %v9029_v59 = vpop.eup %9028  ;;  %v3309_v18 = vmul.f32 %v9027_v48, %v11197_v35  ;;  %v13731_v35 = vld [vmem:[#allocation51_spill] sm:$0xff]  ;;  %v13733_v48 = vld [vmem:[#allocation48_spill] sm:$0xff] }
 0x714   : > { %v9031_v41 = vpop.eup %9030  ;;  %v3306_v37 = vmul.f32 %v9029_v59, %v11193_v11  ;;  %v13730_v11 = vld [vmem:[#allocation38_spill] sm:$0xff] }
 0x715   : > { %v3308_v26 = vmul.f32 %v9031_v41, %v11189_v14 }
 0x716   : > { %v9033_v55 = vpop.eup %9032  ;;  %3939 = vrot.lane.b32.xlu1 %v10033_v51, %s9391_s23 }
 0x717   : > { %v3307_v54 = vmul.f32 %v9033_v55, %v11201_v22  ;;  %v3339_v39 = vpack.c.bf16 %v3309_v18, %v3308_v26  ;;  %v13734_v18 = vld [vmem:[#allocation45_spill] sm:$0xff] }
 0x719   : > { %v3338_v4 = vpack.c.bf16 %v3307_v54, %v3306_v37 }
 0x71a   : > { %3826 = vrot.lane.b32.xlu1 %v10002_v42, %s9392_s24 }
 0x71b   : > { %8060 = vmatprep.mubr.msk.bf16.mxu1 %vm1752_vm2, %v3338_v4 }
 0x71c   : > { %8061 = vmatmul.mubr.msk.bf16.vlgmr.msra.gmra.mxu1 %vm1752_vm2, %v3339_v39  ;;  %v13735_v39 = vld [vmem:[#allocation53_spill] sm:$0xff] }
 0x71d   : > { %8085 = vmatpush3.bf16.msra.mxu1 %v10854_v25 }
 0x71e   : > { %8086 = vmatprep.subr.bf16.mxu1 %v10852_v60  ;;  %3725 = vrot.lane.b32.xlu1 %v9978_v1, %s9392_s24 }
 0x721   : > { %8087 = vmatpush3.bf16.msra.mxu1 %v10852_v60 }
 0x722   : > { %8088 = vmatprep.subr.bf16.mxu1 %v10857_v63  ;;  %4046 = vrot.lane.b32.xlu1 %v10090_v58, %s9391_s23 }
 0x723   : > { %v3198_v14 = vpop.xlane.xlu0 %3197 }
 0x724   : > { %3832 = vrot.lane.b32.xlu0 %v10008_v6, %s9391_s23 }
 0x725   : > { %8089 = vmatpush3.bf16.msra.mxu1 %v10857_v63 }
 0x726   : > { %8090 = vmatprep.subr.bf16.mxu1 %v10861_v3  ;;  %3931 = vrot.lane.b32.xlu1 %v10036_v53, %s9392_s24 }
 0x727   : > { %v3201_v25 = vpop.xlane.xlu1 %3200 }
 0x728   : > { %v3192_v60 = vpop.xlane.xlu0 %3191  ;;  %9034 = vrcp.f32 %v3201_v25  ;;  %3824 = vrot.lane.b32.xlu0 %v10006_v13, %s9392_s24 }
 0x729   : > { %8091 = vmatpush3.bf16.msra.mxu1 %v10861_v3  ;;  %9036 = vrcp.f32 %v3192_v60 }
 0x72a   : > { %8440 = vmatprep.subr.msk.bf16.mxu1 %vm1295_vm1, %v11163_v43  ;;  %9038 = vrcp.f32 %v3198_v14  ;;  %3828 = vrot.lane.b32.xlu1 %v10024_v23, %s9392_s24 }
 0x72b   : > { %v3195_v63 = vpop.xlane.xlu1 %3194 }
 0x72c   : > { %9040 = vrcp.f32 %v3195_v63  ;;  %4048 = vrot.lane.b32.xlu0 %v10079_v49, %s9391_s23  ;;  %v13736_v63 = vld [vmem:[#allocation50_spill] sm:$0xff] }
 0x72e   : > { %4042 = vrot.lane.b32.xlu1 %v10096_v19, %s9391_s23 }
 0x72f   : > { %v3210_v3 = vpop.xlane.xlu1 %3209 }
 0x730   : > { %3723 = vrot.lane.b32.xlu0 %v13730_v11, %s9392_s24 }
 0x732   : > { %4036 = vrot.lane.b32.xlu1 %v13731_v35, %s9392_s24 }
 0x733   : > { %v3204_v22 = vpop.xlane.xlu1 %3203 }
 0x734   : > { %3937 = vrot.lane.b32.xlu0 %v13732_v29, %s9391_s23 }
 0x735   : > { %v9035_v27 = vpop.eup %9034 }
 0x736   : > { %v9037_v32 = vpop.eup %9036  ;;  %v3222_v8 = vpop.xlane.xlu0 %3221  ;;  %3935 = vrot.lane.b32.xlu1 %v13733_v48, %s9392_s24  ;;  %v3313_v37 = vmul.f32 %v9035_v27, %v11218_v12  ;;  %v13739_v27 = vld [vmem:[#allocation39_spill] sm:$0xff] }
 0x737   : > { %v3213_v59 = vpop.xlane.xlu1 %3212  ;;  %v9039_v41 = vpop.eup %9038  ;;  %v3310_v54 = vmul.f32 %v9037_v32, %v11220_v47 }
 0x738   : > { %3929 = vrot.lane.b32.xlu0 %v13734_v18, %s9392_s24  ;;  %9042 = vrcp.f32 %v3213_v59  ;;  %v3312_v25 = vmul.f32 %v9039_v41, %v11212_v10  ;;  %v13738_v10 = vld [vmem:[#allocation42_spill] sm:$0xff]  ;;  %v13740_v59 = vld [vmem:[#allocation52_spill] sm:$0xff] }
 0x739   : > { %v9041_v55 = vpop.eup %9040  ;;  %9044 = vrcp.f32 %v3204_v22  ;;  %v13743_v18 = vld [vmem:[#allocation54_spill] sm:$0xff] }
 0x73a   : > { %v3311_v26 = vmul.f32 %v9041_v55, %v11228_v20  ;;  %v3225_v4 = vpop.xlane.xlu0 %3224  ;;  %4040 = vrot.lane.b32.xlu1 %v13735_v39, %s9392_s24  ;;  %9046 = vrcp.f32 %v3210_v3  ;;  %v3341_v12 = vpack.c.bf16 %v3313_v37, %v3312_v25  ;;  %v13737_v20 = vld [vmem:[#allocation36_spill] sm:$0xff]  ;;  %v13741_v37 = vld [vmem:[#allocation41_spill] sm:$0xff] }
 0x73b   : > { %v3207_v14 = vpop.xlane.xlu1 %3206  ;;  %v13742_v25 = vld [vmem:[#allocation49_spill] sm:$0xff] }
 0x73c   : > { %v3340_v60 = vpack.c.bf16 %v3311_v26, %v3310_v54  ;;  %9048 = vrcp.f32 %v3207_v14  ;;  %4044 = vrot.lane.b32.xlu0 %v13736_v63, %s9391_s23  ;;  %s9394_s23 = smov 72  }
 0x73e   : > { %8064 = vmatprep.mubr.msk.bf16.mxu1 %vm1752_vm2, %v3340_v60  ;;  %v3219_v47 = vpop.xlane.xlu0 %3218  ;;  %4575 = vrot.lane.b32.xlu1 %v13737_v20, %s9393_s29 }
 0x73f   : > { %v3216_v22 = vpop.xlane.xlu1 %3215  ;;  %8065 = vmatmul.mubr.msk.bf16.gmra.mxu1 %vm1752_vm2, %v3341_v12  ;;  %9050 = vrcp.f32 %v3219_v47 }
 0x740   : > { %9052 = vrcp.f32 %v3216_v22  ;;  %3830 = vrot.lane.b32.xlu0 %v13738_v10, %s9392_s24 }
 0x741   : > { %9054 = vrcp.f32 %v3225_v4 }
 0x742   : > { %v3234_v3 = vpop.xlane.xlu0 %3233  ;;  %4573 = vrot.lane.b32.xlu1 %v13739_v27, %s9393_s29  ;;  %9056 = vrcp.f32 %v3222_v8 }
 0x743   : > { %v3228_v32 = vpop.xlane.xlu1 %3227 }
 0x744   : > { %4034 = vrot.lane.b32.xlu0 %v13740_v59, %s9392_s24 }
 0x745   : > { %v9043_v41 = vpop.eup %9042 }
 0x746   : > { %v3246_v55 = vpop.xlane.xlu0 %3245  ;;  %4666 = vrot.lane.b32.xlu1 %v13741_v37, %s9393_s29  ;;  %v9045_v26 = vpop.eup %9044  ;;  %v3317_v60 = vmul.f32 %v9043_v41, %v11244_v24 }
 0x747   : > { %v3237_v54 = vpop.xlane.xlu1 %3236  ;;  %v9047_v14 = vpop.eup %9046  ;;  %v3314_v47 = vmul.f32 %v9045_v26, %v11240_v57  ;;  %v13744_v26 = vld [vmem:[#allocation55_spill] sm:$0xff] }
 0x748   : > { %3933 = vrot.lane.b32.xlu0 %v13742_v25, %s9392_s24  ;;  %9058 = vrcp.f32 %v3237_v54  ;;  %v3316_v59 = vmul.f32 %v9047_v14, %v11234_v38 }
 0x749   : > { %v9049_v4 = vpop.eup %9048  ;;  %9060 = vrcp.f32 %v3228_v32 }
 0x74a   : > { %v3240_v8 = vpop.xlane.xlu0 %3239  ;;  %4753 = vrot.lane.b32.xlu1 %v10058_v31, %s9393_s29  ;;  %v3315_v22 = vmul.f32 %v9049_v4, %v11254_v40  ;;  %9062 = vrcp.f32 %v3234_v3  ;;  %v3343_v32 = vpack.c.bf16 %v3317_v60, %v3316_v59  ;;  %v13745_v59 = vld [vmem:[#allocation35_spill] sm:$0xff]  ;;  %v13746_v4 = vld [vmem:[#allocation90_spill] sm:$0xff] }
 0x74b   : > { %v3231_v12 = vpop.xlane.xlu1 %3230 }
 0x74c   : > { %v9051_v48 = vpop.eup %9050  ;;  %9064 = vrcp.f32 %v3231_v12  ;;  %4038 = vrot.lane.b32.xlu0 %v13743_v18, %s9392_s24  ;;  %v3342_v24 = vpack.c.bf16 %v3315_v22, %v3314_v47  ;;  %s9395_s24 = smov 104  }
 0x74d   : > { %v9053_v41 = vpop.eup %9052  ;;  %9066 = vrcp.f32 %v3240_v8  ;;  %v3319_v40 = vmul.f32 %v9051_v48, %v11268_v56  ;;  %v13747_v56 = vld [vmem:[#allocation37_spill] sm:$0xff]  ;;  %v13748_v48 = vld [vmem:[#allocation88_spill] sm:$0xff] }
 0x74e   : > { %v9055_v54 = vpop.eup %9054  ;;  %v3249_v39 = vpop.xlane.xlu0 %3248  ;;  %8076 = vmatprep.mubr.msk.bf16.mxu0 %vm1752_vm2, %v3342_v24  ;;  %4751 = vrot.lane.b32.xlu1 %v10033_v51, %s9393_s29  ;;  %v3318_v38 = vmul.f32 %v9053_v41, %v11264_v17  ;;  %v13749_v41 = vld [vmem:[#allocation89_spill] sm:$0xff] }
 0x74f   : > { %v3243_v57 = vpop.xlane.xlu1 %3242  ;;  %8077 = vmatmul.mubr.msk.bf16.vlgmr.msra.gmra.mxu0 %vm1752_vm2, %v3343_v32  ;;  %v9057_v3 = vpop.eup %9056  ;;  %v3321_v60 = vmul.f32 %v9055_v54, %v11258_v5 }
 0x750   : > { %8101 = vmatpush3.bf16.msra.mxu0 %v13744_v26  ;;  %9068 = vrcp.f32 %v3243_v57  ;;  %4577 = vrot.lane.b32.xlu0 %v13745_v59, %s9393_s29  ;;  %v3344_v14 = vpack.c.bf16 %v3319_v40, %v3318_v38  ;;  %v3320_v17 = vmul.f32 %v9057_v3, %v11248_v62 }
 0x751   : > { %9070 = vrcp.f32 %v3249_v39  ;;  %8102 = vmatprep.subr.bf16.mxu0 %v13746_v4 }
 0x752   : > { %v3258_v8 = vpop.xlane.xlu0 %3257  ;;  %4749 = vrot.lane.b32.xlu1 %v13732_v29, %s9393_s29  ;;  %8080 = vmatprep.mubr.msk.bf16.mxu0 %vm1752_vm2, %v3344_v14  ;;  %9072 = vrcp.f32 %v3246_v55  ;;  %v3345_v12 = vpack.c.bf16 %v3321_v60, %v3320_v17  ;;  %v13751_v14 = vld [vmem:[#allocation91_spill] sm:$0xff]  ;;  %v13752_v17 = vld [vmem:[#allocation40_spill] sm:$0xff] }
 0x754   : > { %8103 = vmatpush3.bf16.msra.mxu0 %v13746_v4  ;;  %4571 = vrot.lane.b32.xlu0 %v13747_v56, %s9393_s29 }
 0x755   : > { %8104 = vmatprep.subr.bf16.mxu0 %v13748_v48  ;;  %v3255_v39 = vpop.xlane.xlu1 %3254  ;;  %v9059_v47 = vpop.eup %9058 }
 0x756   : > { %9074 = vrcp.f32 %v3255_v39  ;;  %v3252_v5 = vpop.xlane.xlu0 %3251  ;;  %4844 = vrot.lane.b32.xlu1 %v10079_v49, %s9393_s29  ;;  %v9061_v22 = vpop.eup %9060  ;;  %v3325_v24 = vmul.f32 %v9059_v47, %v11284_v15  ;;  %v13750_v15 = vld [vmem:[#allocation44_spill] sm:$0xff] }
 0x757   : > { %9076 = vrcp.f32 %v3252_v5  ;;  %8081 = vmatmul.mubr.msk.bf16.gmra.mxu0 %vm1752_vm2, %v3345_v12  ;;  %v9063_v62 = vpop.eup %9062  ;;  %v3322_v54 = vmul.f32 %v9061_v22, %v11277_v21  ;;  %v13753_v39 = vld [vmem:[#allocation92_spill] sm:$0xff] }
 0x758   : > { %8105 = vmatpush3.bf16.msra.mxu0 %v13748_v48  ;;  %4755 = vrot.lane.b32.xlu0 %v10049_v52, %s9393_s29  ;;  %9078 = vrcp.f32 %v3258_v8  ;;  %v3324_v40 = vmul.f32 %v9063_v62, %v11272_v7 }
 0x759   : > { %v9065_v55 = vpop.eup %9064  ;;  %8106 = vmatprep.subr.bf16.mxu0 %v13749_v41 }
 0x75a   : > { %v3261_v32 = vpop.xlane.xlu0 %3260  ;;  %4950 = vrot.lane.b32.xlu1 %v13745_v59, %s9394_s23  ;;  %v3323_v57 = vmul.f32 %v9065_v55, %v11293_v2  ;;  %v9067_v38 = vpop.eup %9066  ;;  %v3347_v4 = vpack.c.bf16 %v3325_v24, %v3324_v40  ;;  %v3757_v2 = vsel %vm1295_vm1, %v11163_v43, 0 }
 0x75b   : > { %9080 = vrcp.f32 %v3261_v32  ;;  %v3326_v7 = vmul.f32 %v9067_v38, %v11295_v44  ;;  %v13758_v38 = vld [vmem:[#allocation34_spill] sm:$0xff] }
 0x75c   : > { %8107 = vmatpush3.bf16.msra.mxu0 %v13749_v41  ;;  %4664 = vrot.lane.b32.xlu0 %v13750_v15, %s9393_s29  ;;  %v3346_v3 = vpack.c.bf16 %v3323_v57, %v3322_v54  ;;  %v13755_v41 = vld [vmem:[#allocation96_spill] sm:$0xff]  ;;  %v13757_v57 = vld [vmem:[#allocation93_spill] sm:$0xff] }
 0x75d   : > { %v9069_v26 = vpop.eup %9068  ;;  %8444 = vmatprep.subr.msk.bf16.mxu0 %vm1295_vm1, %v13751_v14 }
 0x75e   : > { %v9071_v60 = vpop.eup %9070  ;;  %4840 = vrot.lane.b32.xlu1 %v13736_v63, %s9393_s29  ;;  %8092 = vmatprep.mubr.msk.bf16.mxu1 %vm1752_vm2, %v3346_v3  ;;  %v3327_v21 = vmul.f32 %v9069_v26, %v11303_v16  ;;  %v13759_v3 = vld [vmem:[#allocation97_spill] sm:$0xff]  ;;  %v3748_v26 = vsel %vm1295_vm1, %v13757_v57, 0 }
 0x75f   : > { %8093 = vmatmul.mubr.msk.bf16.vlgmr.msra.gmra.mxu1 %vm1752_vm2, %v3347_v4  ;;  %v9073_v8 = vpop.eup %9072  ;;  %v3329_v12 = vmul.f32 %v9071_v60, %v11301_v45  ;;  %v3754_v45 = vsel %vm1295_vm1, %v13753_v39, 0  ;;  %v3722_v4 = vpop.permute.xlu1 %3721  ;;  %v4162_v63 = vld [vmem:[%s10215_s28 + $0xb8] sm:$0xff] }
 0x760   : > { %4662 = vrot.lane.b32.xlu0 %v13752_v17, %s9393_s29  ;;  %8117 = vmatpush3.bf16.xpose.msra.mxu1 %v3757_v2  ;;  %v3348_v48 = vpack.c.bf16 %v3327_v21, %v3326_v7  ;;  %v3328_v16 = vmul.f32 %v9073_v8, %v11287_v34 }
 0x761   : > { %8441 = vmatprep.subr.msk.bf16.mxu1 %vm1295_vm1, %v13753_v39 }
 0x762   : > { %4838 = vrot.lane.b32.xlu1 %v10096_v19, %s9393_s29  ;;  %8096 = vmatprep.mubr.msk.bf16.mxu1 %vm1752_vm2, %v3348_v48  ;;  %v3349_v5 = vpack.c.bf16 %v3329_v12, %v3328_v16 }
 0x763   : > { %v9075_v44 = vpop.eup %9074 }
 0x764   : > { %v9077_v43 = vpop.eup %9076  ;;  %4660 = vrot.lane.b32.xlu0 %v10008_v6, %s9393_s29  ;;  %v3331_v47 = vmul.f32 %v9075_v44, %v11315_v50 }
 0x765   : > { %v3330_v22 = vmul.f32 %v9077_v43, %v11313_v30  ;;  %v9079_v62 = vpop.eup %9078  ;;  %v13754_v30 = vld [vmem:[#allocation94_spill] sm:$0xff] }
 0x766   : > { %5055 = vrot.lane.b32.xlu1 %v13741_v37, %s9394_s23  ;;  %v3332_v50 = vmul.f32 %v9079_v62, %v11309_v46  ;;  %v3862_v46 = vsel %vm1295_vm1, %v13751_v14, 0  ;;  %v3751_v54 = vsel %vm1295_vm1, %v13754_v30, 0  ;;  %v3944_v14 = vpop.permute.xlu0 %3943  ;;  %v4161_v37 = vld [vmem:[%s10215_s28 + $0xb0] sm:$0xff] }
 0x767   : > { %8097 = vmatmul.mubr.msk.bf16.gmra.mxu1 %vm1752_vm2, %v3349_v5  ;;  %v3350_v55 = vpack.c.bf16 %v3331_v47, %v3330_v22  ;;  %v3967_v60 = vsel %vm1295_vm1, %v3944_v14, 0 }
 0x768   : > { %v9081_v34 = vpop.eup %9080  ;;  %4842 = vrot.lane.b32.xlu0 %v10090_v58, %s9393_s29  ;;  %8119 = vmatpush3.bf16.xpose.msra.mxu1 %v3754_v45 }
 0x769   : > { %v3333_v24 = vmul.f32 %v9081_v34, %v11321_v61  ;;  %8108 = vmatprep.mubr.msk.bf16.mxu0 %vm1752_vm2, %v3350_v55  ;;  %8442 = vmatprep.subr.msk.bf16.mxu1 %vm1295_vm1, %v13754_v30  ;;  %v13756_v61 = vld [vmem:[#allocation95_spill] sm:$0xff] }
 0x76a   : > { %8124 = vmatprep.mubr.msk.bf16.mxu1 %vm1295_vm1, %v13755_v41  ;;  %4944 = vrot.lane.b32.xlu1 %v13747_v56, %s9394_s23  ;;  %v3859_v40 = vsel %vm1295_vm1, %v13756_v61, 0 }
 0x76b   : > { %v3351_v32 = vpack.c.bf16 %v3333_v24, %v3332_v50 }
 0x76c   : > { %4948 = vrot.lane.b32.xlu0 %v13737_v20, %s9394_s23 }
 0x76d   : > { %8109 = vmatmul.mubr.msk.bf16.vlgmr.msra.gmra.mxu0 %vm1752_vm2, %v3351_v32 }
 0x76e   : > { %8133 = vmatpush3.bf16.xpose.msra.mxu0 %v3862_v46  ;;  %5053 = vrot.lane.b32.xlu1 %v13750_v15, %s9394_s23 }
 0x76f   : > { %8445 = vmatprep.subr.msk.bf16.mxu0 %vm1295_vm1, %v13756_v61 }
 0x770   : > { %4946 = vrot.lane.b32.xlu0 %v13739_v27, %s9394_s23  ;;  %8121 = vmatpush3.bf16.xpose.msra.mxu1 %v3751_v54 }
 0x771   : > { %8443 = vmatprep.subr.msk.bf16.mxu1 %vm1295_vm1, %v13757_v57 }
 0x772   : > { %4938 = vrot.lane.b32.xlu1 %v9966_v36, %s9395_s24  ;;  %v3856_v36 = vsel %vm1295_vm1, %v13759_v3, 0 }
 0x774   : > { %4936 = vrot.lane.b32.xlu0 %v13758_v38, %s9395_s24 }
 0x776   : > { %8135 = vmatpush3.bf16.xpose.msra.mxu0 %v3859_v40  ;;  %5160 = vrot.lane.b32.xlu1 %v10049_v52, %s9394_s23 }
 0x777   : > { %8446 = vmatprep.subr.msk.bf16.mxu0 %vm1295_vm1, %v13759_v3 }
 0x778   : > { %5051 = vrot.lane.b32.xlu0 %v13752_v17, %s9394_s23  ;;  %8123 = vmatpush3.bf16.xpose.msra.mxu1 %v3748_v26 }
 0x779   : > { %8448 = vmatprep.subr.msk.bf16.mxu1 %vm1295_vm1, %v3944_v14 }
 0x77e   : > { %8137 = vmatpush3.bf16.xpose.msra.mxu0 %v3856_v36 }
 0x77f   : > { %8125 = vmatmul.mubr.msk.bf16.vlgmr.msra.gmra.mxu1 %vm1295_vm1, %v3722_v4 }
 0x780   : > { %8149 = vmatpush3.bf16.xpose.msra.mxu1 %v3967_v60 }
 0x78a   : > { %v3264_v7 = vpop.xlane.xlu1 %3263 }
 0x78e   : > { %v3942_v21 = vpop.permute.xlu1 %3941 }
 0x78f   : > { %v3270_v2 = vpop.xlane.xlu0 %3269  ;;  %8449 = vmatprep.subr.msk.bf16.mxu1 %vm1295_vm1, %v3942_v21  ;;  %v3964_v8 = vsel %vm1295_vm1, %v3942_v21, 0 }
 0x790   : > { %8151 = vmatpush3.bf16.xpose.msra.mxu1 %v3964_v8 }
 0x792   : > { %v3940_v48 = vpop.permute.xlu1 %3939 }
 0x793   : > { %v3273_v39 = vpop.xlane.xlu0 %3272  ;;  %8450 = vmatprep.subr.msk.bf16.mxu1 %vm1295_vm1, %v3940_v48  ;;  %v3961_v16 = vsel %vm1295_vm1, %v3940_v48, 0 }
 0x794   : > { %9082 = vrcp.f32 %v3273_v39 }
 0x795   : > { %9084 = vrcp.f32 %v3264_v7 }
 0x796   : > { %v3827_v12 = vpop.permute.xlu1 %3826  ;;  %9086 = vrcp.f32 %v3270_v2 }
 0x797   : > { %v3267_v44 = vpop.xlane.xlu0 %3266 }
 0x798   : > { %9088 = vrcp.f32 %v3267_v44  ;;  %8153 = vmatpush3.bf16.xpose.msra.mxu1 %v3961_v16 }
 0x79a   : > { %v3726_v43 = vpop.permute.xlu1 %3725 }
 0x79b   : > { %v3833_v47 = vpop.permute.xlu0 %3832 }
 0x79c   : > { %8447 = vmatprep.subr.msk.bf16.mxu0 %vm1295_vm1, %v3833_v47  ;;  %v3853_v5 = vsel %vm1295_vm1, %v3833_v47, 0 }
 0x79d   : > { %8139 = vmatpush3.bf16.xpose.msra.mxu0 %v3853_v5 }
 0x79e   : > { %v4047_v22 = vpop.permute.xlu1 %4046 }
 0x79f   : > { %v3825_v62 = vpop.permute.xlu0 %3824  ;;  %v4069_v7 = vsel %vm1295_vm1, %v4047_v22, 0 }
 0x7a1   : > { %v9083_v45 = vpop.eup %9082 }
 0x7a2   : > { %v3932_v55 = vpop.permute.xlu1 %3931  ;;  %v9085_v34 = vpop.eup %9084  ;;  %v3337_v41 = vmul.f32 %v9083_v45, %v11341_v33 }
 0x7a3   : > { %v4049_v50 = vpop.permute.xlu0 %4048  ;;  %v9087_v24 = vpop.eup %9086  ;;  %v3334_v46 = vmul.f32 %v9085_v34, %v11333_v9 }
 0x7a4   : > { %8452 = vmatprep.subr.msk.bf16.mxu0 %vm1295_vm1, %v4049_v50  ;;  %v3336_v57 = vmul.f32 %v9087_v24, %v11337_v0  ;;  %v4072_v14 = vsel %vm1295_vm1, %v4049_v50, 0 }
 0x7a5   : > { %v9089_v30 = vpop.eup %9088 }
 0x7a6   : > { %v3829_v32 = vpop.permute.xlu1 %3828  ;;  %v3335_v61 = vmul.f32 %v9089_v30, %v11345_v28  ;;  %v3353_v40 = vpack.c.bf16 %v3337_v41, %v3336_v57 }
 0x7a7   : > { %v3724_v54 = vpop.permute.xlu0 %3723 }
 0x7a8   : > { %8128 = vmatprep.mubr.msk.bf16.mxu1 %vm1295_vm1, %v3724_v54  ;;  %v3352_v38 = vpack.c.bf16 %v3335_v61, %v3334_v46  ;;  %v4141_v54 = vld [vmem:[%s10215_s28 + $0x10] sm:$0xff] }
 0x7a9   : > { %8129 = vmatmul.mubr.msk.bf16.gmra.mxu1 %vm1295_vm1, %v3726_v43 }
 0x7aa   : > { %8112 = vmatprep.mubr.msk.bf16.mxu0 %vm1752_vm2, %v3352_v38  ;;  %v4043_v3 = vpop.permute.xlu1 %4042 }
 0x7ab   : > { %8113 = vmatmul.mubr.msk.bf16.gmra.mxu0 %vm1752_vm2, %v3353_v40  ;;  %v3938_v33 = vpop.permute.xlu0 %3937  ;;  %v4063_v43 = vsel %vm1295_vm1, %v4043_v3, 0 }
 0x7ac   : > { %8140 = vmatprep.mubr.msk.bf16.mxu0 %vm1295_vm1, %v3825_v62  ;;  %8451 = vmatprep.subr.msk.bf16.mxu1 %vm1295_vm1, %v3938_v33  ;;  %v3958_v9 = vsel %vm1295_vm1, %v3938_v33, 0 }
 0x7ad   : > { %8155 = vmatpush3.bf16.xpose.msra.mxu1 %v3958_v9 }
 0x7ae   : > { %v4037_v0 = vpop.permute.xlu1 %4036 }
 0x7af   : > { %v3930_v28 = vpop.permute.xlu0 %3929 }
 0x7b0   : > { %8156 = vmatprep.mubr.msk.bf16.mxu1 %vm1295_vm1, %v3930_v28 }
 0x7b2   : > { %v3936_v26 = vpop.permute.xlu1 %3935 }
 0x7b3   : > { %8141 = vmatmul.mubr.msk.bf16.vlgmr.msra.gmra.mxu0 %vm1295_vm1, %v3827_v12  ;;  %v4045_v36 = vpop.permute.xlu0 %4044 }
 0x7b4   : > { %8165 = vmatpush3.bf16.xpose.msra.mxu0 %v4072_v14  ;;  %8144 = vmatprep.mubr.msk.bf16.mxu0 %vm1295_vm1, %v3829_v32  ;;  %v4066_v39 = vsel %vm1295_vm1, %v4045_v36, 0 }
 0x7b5   : > { %8157 = vmatmul.mubr.msk.bf16.vlgmr.msra.gmra.mxu1 %vm1295_vm1, %v3932_v55  ;;  %8453 = vmatprep.subr.msk.bf16.mxu0 %vm1295_vm1, %v4047_v22 }
 0x7b6   : > { %v4041_v4 = vpop.permute.xlu1 %4040 }
 0x7b7   : > { %v3831_v60 = vpop.permute.xlu0 %3830 }
 0x7ba   : > { %v4576_v2 = vpop.permute.xlu1 %4575 }
 0x7bb   : > { %8145 = vmatmul.mubr.msk.bf16.gmra.mxu0 %vm1295_vm1, %v3831_v60  ;;  %v4035_v21 = vpop.permute.xlu0 %4034 }
 0x7bc   : > { %8167 = vmatpush3.bf16.xpose.msra.mxu0 %v4069_v7  ;;  %8172 = vmatprep.mubr.msk.bf16.mxu0 %vm1295_vm1, %v4035_v21 }
 0x7bd   : > { %8454 = vmatprep.subr.msk.bf16.mxu0 %vm1295_vm1, %v4045_v36 }
 0x7be   : > { %v4574_v48 = vpop.permute.xlu1 %4573 }
 0x7bf   : > { %v3934_v8 = vpop.permute.xlu0 %3933 }
 0x7c0   : > { %8160 = vmatprep.mubr.msk.bf16.mxu1 %vm1295_vm1, %v3934_v8 }
 0x7c1   : > { %8161 = vmatmul.mubr.msk.bf16.gmra.mxu1 %vm1295_vm1, %v3936_v26 }
 0x7c2   : > { %v4667_v16 = vpop.permute.xlu1 %4666 }
 0x7c3   : > { %v4039_v12 = vpop.permute.xlu0 %4038 }
 0x7c4   : > { %8169 = vmatpush3.bf16.xpose.msra.mxu0 %v4066_v39 }
 0x7c5   : > { %8455 = vmatprep.subr.msk.bf16.mxu0 %vm1295_vm1, %v4043_v3  ;;  %v11682_v3 = vld [vmem:[%s13404_s2 + $0x98] sm:$0xff] }
 0x7c6   : > { %v11567_v5 = vpop.permute.xlu1 %4753 }
 0x7c7   : > { %v4578_v44 = vpop.permute.xlu0 %4577 }
 0x7c8   : > { %8180 = vmatprep.subr.bf16.mxu1 %v4578_v44 }
 0x7c9   : > { %8181 = vmatpush3.bf16.msra.mxu1 %v4578_v44 }
 0x7ca   : > { %8182 = vmatprep.subr.bf16.mxu1 %v4576_v2  ;;  %v11572_v45 = vpop.permute.xlu1 %4751 }
 0x7cb   : > { %v4572_v47 = vpop.permute.xlu0 %4571 }
 0x7cc   : > { %8171 = vmatpush3.bf16.xpose.msra.mxu0 %v4063_v43 }
 0x7cd   : > { %8196 = vmatprep.subr.bf16.mxu0 %v4667_v16  ;;  %8183 = vmatpush3.bf16.msra.mxu1 %v4576_v2 }
 0x7ce   : > { %8184 = vmatprep.subr.bf16.mxu1 %v4574_v48  ;;  %v11576_v34 = vpop.permute.xlu1 %4749 }
 0x7cf   : > { %v11569_v22 = vpop.permute.xlu0 %4755 }
 0x7d1   : > { %8185 = vmatpush3.bf16.msra.mxu1 %v4574_v48  ;;  %v11669_v48 = vld [vmem:[%s13404_s2 + $0x90] sm:$0xff] }
 0x7d2   : > { %8186 = vmatprep.subr.bf16.mxu1 %v4572_v47  ;;  %v11587_v46 = vpop.permute.xlu1 %4844 }
 0x7d3   : > { %8173 = vmatmul.mubr.msk.bf16.vlgmr.msra.gmra.mxu0 %vm1295_vm1, %v4037_v0  ;;  %v4665_v62 = vpop.permute.xlu0 %4664  ;;  %13763 = vst [vmem:[#allocation55_spill] sm:$0xff] %v11587_v46 }
 0x7d4   : > { %8176 = vmatprep.mubr.msk.bf16.mxu0 %vm1295_vm1, %v4039_v12  ;;  %8197 = vmatpush3.bf16.msra.mxu0 %v4667_v16 }
 0x7d5   : > { %8198 = vmatprep.subr.bf16.mxu0 %v4665_v62  ;;  %8187 = vmatpush3.bf16.msra.mxu1 %v4572_v47 }
 0x7d6   : > { %8212 = vmatprep.subr.bf16.mxu1 %v11569_v22 }
 0x7d7   : > { %v4663_v55 = vpop.permute.xlu0 %4662 }
 0x7d8   : > { %8199 = vmatpush3.bf16.msra.mxu0 %v4665_v62 }
 0x7d9   : > { %8200 = vmatprep.subr.bf16.mxu0 %v4663_v55 }
 0x7db   : > { %8177 = vmatmul.mubr.msk.bf16.gmra.mxu0 %vm1295_vm1, %v4041_v4  ;;  %v4661_v24 = vpop.permute.xlu0 %4660 }
 0x7dc   : > { %v11578_v50 = vpop.f32.mrf.mxu1  ;;  %8201 = vmatpush3.bf16.msra.mxu0 %v4663_v55 }
 0x7dd   : > { %13760 = vst [vmem:[#allocation38_spill] sm:$0xff] %v11578_v50  ;;  %8202 = vmatprep.subr.bf16.mxu0 %v4661_v24 }
 0x7de   : > { %v11581_v30 = vpop.f32.mrf.mxu1 }
 0x7df   : > { %13761 = vst [vmem:[#allocation42_spill] sm:$0xff] %v11581_v30  ;;  %v4146_v30 = vld [vmem:[%s10215_s28 + $0x38] sm:$0xff] }
 0x7e0   : > { %v11583_v41 = vpop.f32.mrf.mxu1  ;;  %8203 = vmatpush3.bf16.msra.mxu0 %v4661_v24 }
 0x7e1   : > { %13762 = vst [vmem:[#allocation49_spill] sm:$0xff] %v11583_v41  ;;  %8228 = vmatprep.subr.bf16.mxu0 %v11587_v46  ;;  %v4153_v41 = vld [vmem:[%s10215_s28 + $0x70] sm:$0xff] }
 0x7e2   : > { %v11589_v61 = vpop.f32.mrf.mxu1 }
 0x7e3   : > { %13764 = vst [vmem:[#allocation90_spill] sm:$0xff] %v11589_v61 }
 0x7ff   : > { %v11594_v57 = vpop.f32.mrf.mxu1 }
 0x800   : > { %13765 = vst [vmem:[#allocation88_spill] sm:$0xff] %v11594_v57 }
 0x801   : > { %v11596_v38 = vpop.f32.mrf.mxu1 }
 0x802   : > { %13766 = vst [vmem:[#allocation89_spill] sm:$0xff] %v11596_v38 }
 0x803   : > { %v11598_v40 = vpop.f32.mrf.mxu1 }
 0x804   : > { %13767 = vst [vmem:[#allocation91_spill] sm:$0xff] %v11598_v40  ;;  %v4148_v40 = vld [vmem:[%s10215_s28 + $0x48] sm:$0xff] }
 0x805   : > { %v11602_v33 = vpop.f32.mrf.mxu1 }
 0x806   : > { %13768 = vst [vmem:[#allocation92_spill] sm:$0xff] %v11602_v33 }
 0x80f   : > { %v11606_v0 = vpop.f32.mrf.mxu0 }
 0x810   : > { %13769 = vst [vmem:[#allocation94_spill] sm:$0xff] %v11606_v0 }
 0x811   : > { %v11608_v28 = vpop.f32.mrf.mxu0 }
 0x812   : > { %13770 = vst [vmem:[#allocation96_spill] sm:$0xff] %v11608_v28 }
 0x813   : > { %v11610_v26 = vpop.f32.mrf.mxu0 }
 0x814   : > { %13771 = vst [vmem:[#allocation95_spill] sm:$0xff] %v11610_v26  ;;  %v4149_v26 = vld [vmem:[%s10215_s28 + $0x50] sm:$0xff] }
 0x815   : > { %v11614_v36 = vpop.f32.mrf.mxu0 }
 0x816   : > { %13772 = vst [vmem:[#allocation93_spill] sm:$0xff] %v11614_v36 }
 0x817   : > { %v11618_v60 = vpop.f32.mrf.mxu0 }
 0x818   : > { %13773 = vst [vmem:[#allocation34_spill] sm:$0xff] %v11618_v60 }
 0x819   : > { %v11620_v7 = vpop.f32.mrf.mxu0 }
 0x81a   : > { %13774 = vst [vmem:[#allocation97_spill] sm:$0xff] %v11620_v7 }
 0x81b   : > { %v11622_v21 = vpop.f32.mrf.mxu0 }
 0x81c   : > { %13775 = vst [vmem:[#allocation98_spill] sm:$0xff] %v11622_v21 }
 0x81d   : > { %v11626_v8 = vpop.f32.mrf.mxu0 }
 0x81e   : > { %13776 = vst [vmem:[#allocation99_spill] sm:$0xff] %v11626_v8 }
 0x81f   : > { %v11630_v39 = vpop.f32.mrf.mxu1 }
 0x820   : > { %13777 = vst [vmem:[#allocation100_spill] sm:$0xff] %v11630_v39 }
 0x821   : > { %v11632_v12 = vpop.f32.mrf.mxu1 }
 0x822   : > { %13778 = vst [vmem:[#allocation101_spill] sm:$0xff] %v11632_v12 }
 0x823   : > { %v11634_v44 = vpop.f32.mrf.mxu1 }
 0x824   : > { %13779 = vst [vmem:[#allocation102_spill] sm:$0xff] %v11634_v44  ;;  %v4144_v44 = vld [vmem:[%s10215_s28 + $0x28] sm:$0xff] }
 0x825   : > { %v11638_v43 = vpop.f32.mrf.mxu1 }
 0x826   : > { %13780 = vst [vmem:[#allocation103_spill] sm:$0xff] %v11638_v43  ;;  %v4142_v43 = vld [vmem:[%s10215_s28 + $0x18] sm:$0xff] }
 0x827   : > { %v11642_v62 = vpop.f32.mrf.mxu1 }
 0x828   : > { %13781 = vst [vmem:[#allocation104_spill] sm:$0xff] %v11642_v62  ;;  %v11690_v62 = vld [vmem:[%s13404_s2 + $0x88] sm:$0xff] }
 0x829   : > { %v11644_v55 = vpop.f32.mrf.mxu1 }
 0x82a   : > { %13782 = vst [vmem:[#allocation105_spill] sm:$0xff] %v11644_v55  ;;  %v11675_v55 = vld [vmem:[%s13404_s2 + $0x80] sm:$0xff] }
 0x82b   : > { %v11646_v24 = vpop.f32.mrf.mxu1 }
 0x82c   : > { %13783 = vst [vmem:[#allocation106_spill] sm:$0xff] %v11646_v24 }
 0x82d   : > { %v11650_v4 = vpop.f32.mrf.mxu0  ;;  %v11652_v9 = vpop.f32.mrf.mxu1 }
 0x82e   : > { %13784 = vst [vmem:[#allocation107_spill] sm:$0xff] %v11650_v4  ;;  %13785 = vst [vmem:[#allocation108_spill] sm:$0xff] %v11652_v9 }
 0x82f   : > { %v11656_v16 = vpop.f32.mrf.mxu0 }
 0x830   : > { %13786 = vst [vmem:[#allocation109_spill] sm:$0xff] %v11656_v16 }
 0x831   : > { %v11658_v47 = vpop.f32.mrf.mxu0 }
 0x832   : > { %13787 = vst [vmem:[#allocation110_spill] sm:$0xff] %v11658_v47  ;;  %v4139_v47 = vld [vmem:[%s10215_s28] sm:$0xff] }
 0x833   : > { %v11662_v14 = vpop.f32.mrf.mxu0 }
 0x834   : > { %13788 = vst [vmem:[#allocation111_spill] sm:$0xff] %v11662_v14 }
 0x83f   : > { %v8126_v32 = vpop.f32.mrf.mxu1 }
 0x840   : > { %v3802_v2 = vadd.f32 %v8126_v32, %v11669_v48 }
 0x841   : > { %v3793_v4 = vpop.f32.mrf.mxu1 }
 0x842   : > { %v11684_v16 = vadd.f32 %v4141_v54, %v3802_v2  ;;  %v3794_v14 = vadd.f32 %v11675_v55, %v3793_v4  ;;  %v4140_v2 = vld [vmem:[%s10215_s28 + $0x8] sm:$0xff] }
 0x843   : > { %v8127_v9 = vpop.f32.mrf.mxu1 }
 0x844   : > { %v11692_v24 = vadd.f32 %v4139_v47, %v3794_v14  ;;  %v3805_v32 = vadd.f32 %v8127_v9, %v11682_v3  ;;  %v4209_v12 = vsel %vm1752_vm2, %v11684_v16, -inf }
 0x845   : > { %4210 = vmax.xlane.f32.xlu0 %v4209_v12  ;;  %v3796_v54 = vpop.f32.mrf.mxu1 }
 0x846   : > { %v3797_v4 = vadd.f32 %v11690_v62, %v3796_v54  ;;  %v11700_v7 = vadd.f32 %v4142_v43, %v3805_v32  ;;  %v4203_v14 = vsel %vm1752_vm2, %v11692_v24, -inf  ;;  %v11713_v43 = vld [vmem:[%s13404_s2 + $0xb0] sm:$0xff]  ;;  %v11719_v54 = vld [vmem:[%s13404_s2 + $0xa0] sm:$0xff] }
 0x847   : > { %v4145_v32 = vld [vmem:[%s10215_s28 + $0x30] sm:$0xff] }
 0x848   : > { %v11702_v8 = vadd.f32 %v4140_v2, %v3797_v4  ;;  %v4212_v12 = vsel %vm1752_vm2, %v11700_v7, -inf }
 0x849   : > { %4204 = vmax.xlane.f32.xlu0 %v4203_v14 }
 0x84a   : > { %v4206_v9 = vsel %vm1752_vm2, %v11702_v8, -inf }
 0x84b   : > { %4207 = vmax.xlane.f32.xlu1 %v4206_v9  ;;  %v4143_v9 = vld [vmem:[%s10215_s28 + $0x20] sm:$0xff] }
 0x84d   : > { %4213 = vmax.xlane.f32.xlu0 %v4212_v12  ;;  %v11728_v12 = vld [vmem:[%s13404_s2 + $0xb8] sm:$0xff] }
 0x869   : > { %v8130_v47 = vpop.f32.mrf.mxu1 }
 0x86a   : > { %v3818_v2 = vadd.f32 %v8130_v47, %v11713_v43  ;;  %v11739_v47 = vld [vmem:[%s13404_s2 + $0xa8] sm:$0xff] }
 0x86b   : > { %v11722_v4 = vpop.f32.mrf.mxu0  ;;  %v3809_v14 = vpop.f32.mrf.mxu1 }
 0x86c   : > { %13789 = vst [vmem:[#allocation112_spill] sm:$0xff] %v11722_v4  ;;  %v11730_v28 = vadd.f32 %v4145_v32, %v3818_v2  ;;  %v3810_v36 = vadd.f32 %v11719_v54, %v3809_v14 }
 0x86d   : > { %v11733_v38 = vpop.f32.mrf.mxu0  ;;  %v8131_v33 = vpop.f32.mrf.mxu1 }
 0x86e   : > { %13790 = vst [vmem:[#allocation113_spill] sm:$0xff] %v11733_v38  ;;  %v11741_v61 = vadd.f32 %v4143_v9, %v3810_v36  ;;  %v3821_v39 = vadd.f32 %v8131_v33, %v11728_v12  ;;  %v4221_v32 = vsel %vm1752_vm2, %v11730_v28, -inf  ;;  %v4147_v33 = vld [vmem:[%s10215_s28 + $0x40] sm:$0xff] }
 0x86f   : > { %v11746_v2 = vpop.f32.mrf.mxu0  ;;  %4222 = vmax.xlane.f32.xlu0 %v4221_v32  ;;  %v3812_v14 = vpop.f32.mrf.mxu1 }
 0x870   : > { %13791 = vst [vmem:[#allocation114_spill] sm:$0xff] %v11746_v2  ;;  %v11749_v60 = vadd.f32 %v4146_v30, %v3821_v39  ;;  %v3813_v36 = vadd.f32 %v11739_v47, %v3812_v14  ;;  %v4215_v30 = vsel %vm1752_vm2, %v11741_v61, -inf  ;;  %v4150_v2 = vld [vmem:[%s10215_s28 + $0x58] sm:$0xff] }
 0x871   : > { %v11754_v9 = vpop.f32.mrf.mxu0 }
 0x872   : > { %13792 = vst [vmem:[#allocation115_spill] sm:$0xff] %v11754_v9  ;;  %v11756_v0 = vadd.f32 %v4144_v44, %v3813_v36  ;;  %v4224_v32 = vsel %vm1752_vm2, %v11749_v60, -inf }
 0x873   : > { %v8142_v39 = vpop.f32.mrf.mxu0  ;;  %4225 = vmax.xlane.f32.xlu1 %v4224_v32  ;;  %4216 = vmax.xlane.f32.xlu0 %v4215_v30 }
 0x874   : > { %v3907_v14 = vadd.f32 %v8142_v39, %v11669_v48  ;;  %v4218_v38 = vsel %vm1752_vm2, %v11756_v0, -inf }
 0x875   : > { %v8158_v21 = vpop.f32.mrf.mxu1  ;;  %v3898_v44 = vpop.f32.mrf.mxu0 }
 0x876   : > { %v11766_v36 = vadd.f32 %v4149_v26, %v3907_v14  ;;  %v3899_v4 = vadd.f32 %v11675_v55, %v3898_v44  ;;  %v4012_v27 = vadd.f32 %v8158_v21, %v11669_v48 }
 0x877   : > { %v8143_v9 = vpop.f32.mrf.mxu0  ;;  %4219 = vmax.xlane.f32.xlu1 %v4218_v38  ;;  %v4003_v57 = vpop.f32.mrf.mxu1 }
 0x878   : > { %v3910_v32 = vadd.f32 %v8143_v9, %v11682_v3  ;;  %v11774_v30 = vadd.f32 %v4147_v33, %v3899_v4  ;;  %v4233_v26 = vsel %vm1752_vm2, %v11766_v36, -inf  ;;  %v4004_v18 = vadd.f32 %v11675_v55, %v4003_v57 }
 0x879   : > { %v3901_v39 = vpop.f32.mrf.mxu0  ;;  %4234 = vmax.xlane.f32.xlu0 %v4233_v26  ;;  %v8159_v38 = vpop.f32.mrf.mxu1  ;;  %v4151_v26 = vld [vmem:[%s10215_s28 + $0x60] sm:$0xff] }
 0x87a   : > { %v11778_v14 = vadd.f32 %v4150_v2, %v3910_v32  ;;  %v3902_v44 = vadd.f32 %v11690_v62, %v3901_v39  ;;  %v4227_v2 = vsel %vm1752_vm2, %v11774_v30, -inf  ;;  %v4015_v15 = vadd.f32 %v8159_v38, %v11682_v3 }
 0x87b   : > { %v8146_v50 = vpop.f32.mrf.mxu0 }
 0x87c   : > { %v3923_v52 = vadd.f32 %v8146_v50, %v11713_v43  ;;  %v11784_v9 = vadd.f32 %v4148_v40, %v3902_v44  ;;  %v4236_v4 = vsel %vm1752_vm2, %v11778_v14, -inf  ;;  %v4154_v50 = vld [vmem:[%s10215_s28 + $0x78] sm:$0xff]  ;;  %v4006_v40 = vpop.f32.mrf.mxu1 }
 0x87d   : > { %v3914_v33 = vpop.f32.mrf.mxu0  ;;  %4237 = vmax.xlane.f32.xlu1 %v4236_v4  ;;  %4228 = vmax.xlane.f32.xlu0 %v4227_v2  ;;  %v4157_v4 = vld [vmem:[%s10215_s28 + $0x90] sm:$0xff]  ;;  %v4007_v57 = vadd.f32 %v11690_v62, %v4006_v40 }
 0x87e   : > { %v11790_v32 = vadd.f32 %v4153_v41, %v3923_v52  ;;  %v3915_v39 = vadd.f32 %v11719_v54, %v3914_v33  ;;  %v4230_v52 = vsel %vm1752_vm2, %v11784_v9, -inf  ;;  %v4152_v33 = vld [vmem:[%s10215_s28 + $0x68] sm:$0xff] }
 0x87f   : > { %v8147_v17 = vpop.f32.mrf.mxu0 }
 0x880   : > { %v3926_v44 = vadd.f32 %v8147_v17, %v11728_v12  ;;  %v4245_v56 = vsel %vm1752_vm2, %v11790_v32, -inf  ;;  %v11799_v46 = vadd.f32 %v4151_v26, %v3915_v39  ;;  %v11811_v39 = vadd.f32 %v4157_v4, %v4012_v27  ;;  %v4155_v26 = vld [vmem:[%s10215_s28 + $0x80] sm:$0xff]  ;;  %v4156_v4 = vld [vmem:[%s10215_s28 + $0x88] sm:$0xff] }
 0x881   : > { %v3917_v41 = vpop.f32.mrf.mxu0  ;;  %4231 = vmax.xlane.f32.xlu1 %v4230_v52  ;;  %4246 = vmax.xlane.f32.xlu0 %v4245_v56  ;;  %v8162_v59 = vpop.f32.mrf.mxu1 }
 0x882   : > { %v11804_v2 = vadd.f32 %v4154_v50, %v3926_v44  ;;  %v3918_v17 = vadd.f32 %v11739_v47, %v3917_v41  ;;  %v4239_v56 = vsel %vm1752_vm2, %v11799_v46, -inf  ;;  %v4158_v44 = vld [vmem:[%s10215_s28 + $0x98] sm:$0xff]  ;;  %v11820_v41 = vadd.f32 %v4155_v26, %v4004_v18 }
 0x883   : > { %v4019_v52 = vpop.f32.mrf.mxu1  ;;  %v11823_v27 = vadd.f32 %v4158_v44, %v4015_v15  ;;  %v4028_v38 = vadd.f32 %v8162_v59, %v11713_v43  ;;  %v11832_v18 = vadd.f32 %v4156_v4, %v4007_v57  ;;  %v4159_v44 = vld [vmem:[%s10215_s28 + $0xa0] sm:$0xff] }
 0x884   : > { %v4248_v21 = vsel %vm1752_vm2, %v11804_v2, -inf  ;;  %v11815_v50 = vadd.f32 %v4152_v33, %v3918_v17  ;;  %v4257_v33 = vsel %vm1752_vm2, %v11811_v39, -inf  ;;  %v4251_v15 = vsel %vm1752_vm2, %v11820_v41, -inf }
 0x885   : > { %4249 = vmax.xlane.f32.xlu1 %v4248_v21  ;;  %4240 = vmax.xlane.f32.xlu0 %v4239_v56  ;;  %v8163_v21 = vpop.f32.mrf.mxu1  ;;  %v11836_v40 = vadd.f32 %v4161_v37, %v4028_v38  ;;  %v4020_v59 = vadd.f32 %v11719_v54, %v4019_v52  ;;  %v4260_v56 = vsel %vm1752_vm2, %v11823_v27, -inf  ;;  %v4254_v57 = vsel %vm1752_vm2, %v11832_v18, -inf }
 0x886   : > { %v4242_v17 = vsel %vm1752_vm2, %v11815_v50, -inf  ;;  %v4031_v26 = vadd.f32 %v8163_v21, %v11728_v12 }
 0x887   : > { %v11846_v4 = vadd.f32 %v4159_v44, %v4020_v59  ;;  %v4269_v38 = vsel %vm1752_vm2, %v11836_v40, -inf }
 0x888   : > { %v11848_v37 = vadd.f32 %v4162_v63, %v4031_v26 }
 0x889   : > { %4243 = vmax.xlane.f32.xlu1 %v4242_v17  ;;  %4258 = vmax.xlane.f32.xlu0 %v4257_v33  ;;  %v4022_v17 = vpop.f32.mrf.mxu1  ;;  %v4160_v33 = vld [vmem:[%s10215_s28 + $0xa8] sm:$0xff]  ;;  %v4263_v26 = vsel %vm1752_vm2, %v11846_v4, -inf }
 0x88a   : > { %v4023_v52 = vadd.f32 %v11739_v47, %v4022_v17  ;;  %v4272_v63 = vsel %vm1752_vm2, %v11848_v37, -inf }
 0x88c   : > { %v11856_v20 = vadd.f32 %v4160_v33, %v4023_v52 }
 0x88d   : > { %4261 = vmax.xlane.f32.xlu1 %v4260_v56  ;;  %4252 = vmax.xlane.f32.xlu0 %v4251_v15  ;;  %v4165_v56 = vld [vmem:[%s10215_s28 + $0xd0] sm:$0xff] }
 0x891   : > { %4255 = vmax.xlane.f32.xlu1 %v4254_v57  ;;  %4270 = vmax.xlane.f32.xlu0 %v4269_v38  ;;  %v4163_v57 = vld [vmem:[%s10215_s28 + $0xc0] sm:$0xff] }
 0x893   : > { %v8174_v21 = vpop.f32.mrf.mxu0 }
 0x894   : > { %v4117_v15 = vadd.f32 %v8174_v21, %v11669_v48  ;;  %v4166_v48 = vld [vmem:[%s10215_s28 + $0xd8] sm:$0xff] }
 0x895   : > { %v4108_v59 = vpop.f32.mrf.mxu0  ;;  %4273 = vmax.xlane.f32.xlu1 %v4272_v63  ;;  %4264 = vmax.xlane.f32.xlu0 %v4263_v26 }
 0x896   : > { %v11862_v44 = vadd.f32 %v4165_v56, %v4117_v15  ;;  %v4109_v17 = vadd.f32 %v11675_v55, %v4108_v59  ;;  %v4266_v56 = vsel %vm1752_vm2, %v11856_v20, -inf  ;;  %v4164_v59 = vld [vmem:[%s10215_s28 + $0xc8] sm:$0xff] }
 0x897   : > { %v8175_v38 = vpop.f32.mrf.mxu0 }
 0x898   : > { %v4120_v52 = vadd.f32 %v8175_v38, %v11682_v3  ;;  %v4281_v33 = vsel %vm1752_vm2, %v11862_v44, -inf  ;;  %v11870_v21 = vadd.f32 %v4163_v57, %v4109_v17  ;;  %v4169_v3 = vld [vmem:[%s10215_s28 + $0xf0] sm:$0xff] }
 0x899   : > { %v4111_v29 = vpop.f32.mrf.mxu0  ;;  %4267 = vmax.xlane.f32.xlu1 %v4266_v56  ;;  %4282 = vmax.xlane.f32.xlu0 %v4281_v33  ;;  %v4170_v56 = vld [vmem:[%s10215_s28 + $0xf8] sm:$0xff] }
 0x89a   : > { %v11874_v15 = vadd.f32 %v4166_v48, %v4120_v52  ;;  %v4112_v55 = vadd.f32 %v11690_v62, %v4111_v29  ;;  %v4275_v48 = vsel %vm1752_vm2, %v11870_v21, -inf  ;;  %v4167_v62 = vld [vmem:[%s10215_s28 + $0xe0] sm:$0xff] }
 0x89b   : > { %v8178_v63 = vpop.f32.mrf.mxu0 }
 0x89c   : > { %v4133_v26 = vadd.f32 %v8178_v63, %v11713_v43  ;;  %v4284_v17 = vsel %vm1752_vm2, %v11874_v15, -inf  ;;  %v11882_v57 = vadd.f32 %v4164_v59, %v4112_v55 }
 0x89d   : > { %v4124_v38 = vpop.f32.mrf.mxu0  ;;  %4285 = vmax.xlane.f32.xlu1 %v4284_v17  ;;  %4276 = vmax.xlane.f32.xlu0 %v4275_v48  ;;  %v11908_v48 = vpop.permute.xlu1 %4950 }
 0x89e   : > { %v11886_v52 = vadd.f32 %v4169_v3, %v4133_v26  ;;  %v4125_v29 = vadd.f32 %v11719_v54, %v4124_v38  ;;  %v4278_v35 = vsel %vm1752_vm2, %v11882_v57, -inf  ;;  %v4168_v26 = vld [vmem:[%s10215_s28 + $0xe8] sm:$0xff] }
 0x89f   : > { %v8179_v33 = vpop.f32.mrf.mxu0 }
 0x8a0   : > { %v4136_v43 = vadd.f32 %v8179_v33, %v11728_v12  ;;  %v4293_v55 = vsel %vm1752_vm2, %v11886_v52, -inf  ;;  %v11894_v59 = vadd.f32 %v4167_v62, %v4125_v29  ;;  %v11916_v62 = vpop.permute.xlu0 %4842 }
 0x8a1   : > { %v4127_v63 = vpop.f32.mrf.mxu0  ;;  %4279 = vmax.xlane.f32.xlu1 %v4278_v35  ;;  %4294 = vmax.xlane.f32.xlu0 %v4293_v55  ;;  %13795 = vst [vmem:[#allocation118_spill] sm:$0xff] %v11916_v62 }
 0x8a2   : > { %v11898_v3 = vadd.f32 %v4170_v56, %v4136_v43  ;;  %v4128_v54 = vadd.f32 %v11739_v47, %v4127_v63  ;;  %v4287_v38 = vsel %vm1752_vm2, %v11894_v59, -inf  ;;  %v11912_v47 = vpop.permute.xlu1 %4840 }
 0x8a3   : > { %13793 = vst [vmem:[#allocation116_spill] sm:$0xff] %v11912_v47 }
 0x8a4   : > { %v4296_v17 = vsel %vm1752_vm2, %v11898_v3, -inf  ;;  %v11904_v12 = vadd.f32 %v4168_v26, %v4128_v54  ;;  %v11920_v56 = vpop.permute.xlu0 %4948 }
 0x8a5   : > { %4297 = vmax.xlane.f32.xlu1 %v4296_v17  ;;  %4288 = vmax.xlane.f32.xlu0 %v4287_v38  ;;  %13797 = vst [vmem:[#allocation120_spill] sm:$0xff] %v11920_v56 }
 0x8a6   : > { %v4290_v29 = vsel %vm1752_vm2, %v11904_v12, -inf  ;;  %v11914_v35 = vpop.permute.xlu1 %4838 }
 0x8a7   : > { %13794 = vst [vmem:[#allocation117_spill] sm:$0xff] %v11914_v35 }
 0x8a8   : > { %v11924_v55 = vpop.permute.xlu0 %4946 }
 0x8a9   : > { %4291 = vmax.xlane.f32.xlu1 %v4290_v29  ;;  %13799 = vst [vmem:[#allocation122_spill] sm:$0xff] %v11924_v55 }
 0x8aa   : > { %v11918_v33 = vpop.permute.xlu1 %5055 }
 0x8ab   : > { %13796 = vst [vmem:[#allocation119_spill] sm:$0xff] %v11918_v33 }
 0x8ac   : > { %v11928_v54 = vpop.permute.xlu0 %4936 }
 0x8ad   : > { %13801 = vst [vmem:[#allocation124_spill] sm:$0xff] %v11928_v54 }
 0x8ae   : > { %v11922_v43 = vpop.permute.xlu1 %4944 }
 0x8af   : > { %13798 = vst [vmem:[#allocation121_spill] sm:$0xff] %v11922_v43 }
 0x8b0   : > { %v11932_v17 = vpop.permute.xlu0 %5051 }
 0x8b1   : > { %13803 = vst [vmem:[#allocation126_spill] sm:$0xff] %v11932_v17 }
 0x8b2   : > { %v11926_v63 = vpop.permute.xlu1 %5053 }
 0x8b3   : > { %13800 = vst [vmem:[#allocation123_spill] sm:$0xff] %v11926_v63 }
 0x8b6   : > { %v11930_v26 = vpop.permute.xlu1 %4938 }
 0x8b7   : > { %13802 = vst [vmem:[#allocation125_spill] sm:$0xff] %v11930_v26 }
 0x8ba   : > { %v11935_v35 = vpop.permute.xlu1 %5160 }
 0x8bb   : > { %13804 = vst [vmem:[#allocation127_spill] sm:$0xff] %v11935_v35 }
 0x8ce   : > { %v4211_v38 = vpop.xlane.xlu0 %4210 }
 0x8cf   : > { %v4301_v29 = vsub.f32 %v11684_v16, %v4211_v38 }
 0x8d1   : > { %v4335_v33 = vmul.f32 1.442695, %v4301_v29 }
 0x8d2   : > { %v4205_v47 = vpop.xlane.xlu0 %4204 }
 0x8d3   : > { %9090 = vpow2.f32 %v4335_v33  ;;  %v4299_v43 = vsub.f32 %v11692_v24, %v4205_v47 }
 0x8d4   : > { %v4208_v56 = vpop.xlane.xlu1 %4207 }
 0x8d5   : > { %v4331_v55 = vmul.f32 1.442695, %v4299_v43  ;;  %v4300_v63 = vsub.f32 %v11702_v8, %v4208_v56 }
 0x8d6   : > { %v4214_v62 = vpop.xlane.xlu0 %4213 }
 0x8d7   : > { %9092 = vpow2.f32 %v4331_v55  ;;  %v4302_v26 = vsub.f32 %v11700_v7, %v4214_v62  ;;  %v4333_v54 = vmul.f32 1.442695, %v4300_v63 }
 0x8d9   : > { %v4337_v17 = vmul.f32 1.442695, %v4302_v26 }
 0x8db   : > { %9094 = vpow2.f32 %v4337_v17 }
 0x8dc   : > { %9096 = vpow2.f32 %v4333_v54 }
 0x8e0   : > { %v11940_v16 = vpop.eup %9090 }
 0x8e1   : > { %v4401_v38 = vsel %vm1752_vm2, %v11940_v16, 0.0 }
 0x8e2   : > { %4402 = vadd.xlane.f32.xlu0 %v4401_v38 }
 0x8e4   : > { %v11944_v33 = vpop.eup %9092 }
 0x8e5   : > { %v4395_v24 = vsel %vm1752_vm2, %v11944_v33, 0.0 }
 0x8e6   : > { %4396 = vadd.xlane.f32.xlu0 %v4395_v24 }
 0x8e8   : > { %v11948_v8 = vpop.eup %9094 }
 0x8e9   : > { %v4404_v7 = vsel %vm1752_vm2, %v11948_v8, 0.0  ;;  %v11952_v47 = vpop.eup %9096 }
 0x8ea   : > { %4405 = vadd.xlane.f32.xlu1 %v4404_v7  ;;  %v4398_v62 = vsel %vm1752_vm2, %v11952_v47, 0.0 }
 0x8ee   : > { %4399 = vadd.xlane.f32.xlu1 %v4398_v62 }
 0x8f8   : > { %v4223_v56 = vpop.xlane.xlu0 %4222 }
 0x8f9   : > { %v4305_v43 = vsub.f32 %v11730_v28, %v4223_v56 }
 0x8fb   : > { %v4343_v55 = vmul.f32 1.442695, %v4305_v43 }
 0x8fc   : > { %v4226_v63 = vpop.xlane.xlu1 %4225  ;;  %v4217_v54 = vpop.xlane.xlu0 %4216 }
 0x8fd   : > { %9098 = vpow2.f32 %v4343_v55  ;;  %v4306_v26 = vsub.f32 %v11749_v60, %v4226_v63  ;;  %v4303_v17 = vsub.f32 %v11741_v61, %v4217_v54 }
 0x8ff   : > { %v4345_v29 = vmul.f32 1.442695, %v4306_v26  ;;  %v4339_v38 = vmul.f32 1.442695, %v4303_v17 }
 0x900   : > { %v4220_v24 = vpop.xlane.xlu1 %4219 }
 0x901   : > { %9100 = vpow2.f32 %v4345_v29  ;;  %v4304_v7 = vsub.f32 %v11756_v0, %v4220_v24 }
 0x902   : > { %9102 = vpow2.f32 %v4339_v38  ;;  %v4235_v62 = vpop.xlane.xlu0 %4234 }
 0x903   : > { %v4341_v35 = vmul.f32 1.442695, %v4304_v7  ;;  %v4309_v23 = vsub.f32 %v11766_v36, %v4235_v62 }
 0x905   : > { %9104 = vpow2.f32 %v4341_v35  ;;  %v4351_v28 = vmul.f32 1.442695, %v4309_v23 }
 0x906   : > { %v4238_v56 = vpop.xlane.xlu1 %4237  ;;  %v4229_v43 = vpop.xlane.xlu0 %4228 }
 0x907   : > { %9106 = vpow2.f32 %v4351_v28  ;;  %v4310_v60 = vsub.f32 %v11778_v14, %v4238_v56  ;;  %v4307_v61 = vsub.f32 %v11774_v30, %v4229_v43 }
 0x909   : > { %v4347_v63 = vmul.f32 1.442695, %v4307_v61  ;;  %v4353_v54 = vmul.f32 1.442695, %v4310_v60 }
 0x90a   : > { %v11963_v55 = vpop.eup %9098  ;;  %v4232_v26 = vpop.xlane.xlu1 %4231 }
 0x90b   : > { %v4247_v0 = vpop.xlane.xlu0 %4246  ;;  %v4413_v17 = vsel %vm1752_vm2, %v11963_v55, 0.0  ;;  %v4308_v36 = vsub.f32 %v11784_v9, %v4232_v26  ;;  %9108 = vpow2.f32 %v4347_v63 }
 0x90c   : > { %v4313_v23 = vsub.f32 %v11790_v32, %v4247_v0  ;;  %4414 = vadd.xlane.f32.xlu0 %v4413_v17  ;;  %9110 = vpow2.f32 %v4353_v54 }
 0x90d   : > { %v4349_v30 = vmul.f32 1.442695, %v4308_v36 }
 0x90e   : > { %v11969_v35 = vpop.eup %9100  ;;  %v4359_v14 = vmul.f32 1.442695, %v4313_v23  ;;  %v4250_v38 = vpop.xlane.xlu1 %4249 }
 0x90f   : > { %v11971_v29 = vpop.eup %9102  ;;  %v4241_v24 = vpop.xlane.xlu0 %4240  ;;  %v4416_v7 = vsel %vm1752_vm2, %v11969_v35, 0.0  ;;  %v4314_v62 = vsub.f32 %v11804_v2, %v4250_v38 }
 0x910   : > { %v4311_v9 = vsub.f32 %v11799_v46, %v4241_v24  ;;  %4417 = vadd.xlane.f32.xlu1 %v4416_v7  ;;  %v4407_v32 = vsel %vm1752_vm2, %v11971_v29, 0.0  ;;  %9112 = vpow2.f32 %v4359_v14 }
 0x911   : > { %4408 = vadd.xlane.f32.xlu0 %v4407_v32  ;;  %v4361_v56 = vmul.f32 1.442695, %v4314_v62  ;;  %9114 = vpow2.f32 %v4349_v30 }
 0x912   : > { %v11979_v28 = vpop.eup %9104  ;;  %v4355_v43 = vmul.f32 1.442695, %v4311_v9  ;;  %v4244_v60 = vpop.xlane.xlu1 %4243 }
 0x913   : > { %v4259_v61 = vpop.xlane.xlu0 %4258  ;;  %v4410_v63 = vsel %vm1752_vm2, %v11979_v28, 0.0  ;;  %9116 = vpow2.f32 %v4361_v56  ;;  %v4312_v2 = vsub.f32 %v11815_v50, %v4244_v60 }
 0x914   : > { %v4317_v46 = vsub.f32 %v11811_v39, %v4259_v61  ;;  %4411 = vadd.xlane.f32.xlu1 %v4410_v63  ;;  %v11985_v54 = vpop.eup %9106  ;;  %9118 = vpow2.f32 %v4355_v43 }
 0x915   : > { %v4357_v26 = vmul.f32 1.442695, %v4312_v2  ;;  %v4425_v23 = vsel %vm1752_vm2, %v11985_v54, 0.0 }
 0x916   : > { %v4367_v0 = vmul.f32 1.442695, %v4317_v46  ;;  %v4262_v17 = vpop.xlane.xlu1 %4261 }
 0x917   : > { %v4253_v36 = vpop.xlane.xlu0 %4252  ;;  %9120 = vpow2.f32 %v4357_v26  ;;  %v4318_v14 = vsub.f32 %v11823_v27, %v4262_v17 }
 0x918   : > { %v4315_v30 = vsub.f32 %v11820_v41, %v4253_v36  ;;  %4426 = vadd.xlane.f32.xlu1 %v4425_v23  ;;  %v11991_v50 = vpop.eup %9108  ;;  %9122 = vpow2.f32 %v4367_v0 }
 0x919   : > { %v4369_v38 = vmul.f32 1.442695, %v4318_v14  ;;  %v4419_v62 = vsel %vm1752_vm2, %v11991_v50, 0.0  ;;  %v11995_v9 = vpop.eup %9110 }
 0x91a   : > { %v4363_v39 = vmul.f32 1.442695, %v4315_v30  ;;  %v4256_v24 = vpop.xlane.xlu1 %4255  ;;  %v4428_v2 = vsel %vm1752_vm2, %v11995_v9, 0.0 }
 0x91b   : > { %v4271_v7 = vpop.xlane.xlu0 %4270  ;;  %v4316_v32 = vsub.f32 %v11832_v18, %v4256_v24 }
 0x91c   : > { %v4321_v56 = vsub.f32 %v11836_v40, %v4271_v7  ;;  %4420 = vadd.xlane.f32.xlu1 %v4419_v62  ;;  %9124 = vpow2.f32 %v4363_v39 }
 0x91d   : > { %v11999_v41 = vpop.eup %9112  ;;  %9126 = vpow2.f32 %v4369_v38  ;;  %v4365_v43 = vmul.f32 1.442695, %v4316_v32 }
 0x91e   : > { %v4375_v27 = vmul.f32 1.442695, %v4321_v56  ;;  %v4274_v60 = vpop.xlane.xlu1 %4273  ;;  %v4437_v61 = vsel %vm1752_vm2, %v11999_v41, 0.0  ;;  %v12005_v46 = vpop.eup %9114 }
 0x91f   : > { %v4265_v63 = vpop.xlane.xlu0 %4264  ;;  %v4322_v18 = vsub.f32 %v11848_v37, %v4274_v60  ;;  %4438 = vadd.xlane.f32.xlu0 %v4437_v61  ;;  %v4422_v30 = vsel %vm1752_vm2, %v12005_v46, 0.0 }
 0x920   : > { %v4319_v40 = vsub.f32 %v11846_v4, %v4265_v63  ;;  %4429 = vadd.xlane.f32.xlu1 %v4428_v2  ;;  %v12009_v26 = vpop.eup %9116  ;;  %9128 = vpow2.f32 %v4375_v27 }
 0x921   : > { %v4440_v17 = vsel %vm1752_vm2, %v12009_v26, 0.0  ;;  %9130 = vpow2.f32 %v4365_v43  ;;  %v4377_v36 = vmul.f32 1.442695, %v4322_v18  ;;  %v12015_v39 = vpop.eup %9118 }
 0x922   : > { %v4371_v0 = vmul.f32 1.442695, %v4319_v40  ;;  %v4268_v23 = vpop.xlane.xlu1 %4267 }
 0x923   : > { %v4283_v14 = vpop.xlane.xlu0 %4282  ;;  %v4320_v37 = vsub.f32 %v11856_v20, %v4268_v23  ;;  %4441 = vadd.xlane.f32.xlu0 %v4440_v17  ;;  %v4431_v20 = vsel %vm1752_vm2, %v12015_v39, 0.0 }
 0x924   : > { %v4325_v4 = vsub.f32 %v11862_v44, %v4283_v14  ;;  %4423 = vadd.xlane.f32.xlu1 %v4422_v30  ;;  %v12019_v38 = vpop.eup %9120  ;;  %9132 = vpow2.f32 %v4371_v0 }
 0x925   : > { %v4373_v24 = vmul.f32 1.442695, %v4320_v37  ;;  %v4434_v7 = vsel %vm1752_vm2, %v12019_v38, 0.0  ;;  %v12023_v62 = vpop.eup %9122  ;;  %9134 = vpow2.f32 %v4377_v36 }
 0x926   : > { %v4383_v32 = vmul.f32 1.442695, %v4325_v4  ;;  %v4286_v56 = vpop.xlane.xlu1 %4285  ;;  %v4449_v60 = vsel %vm1752_vm2, %v12023_v62, 0.0 }
 0x927   : > { %v4277_v27 = vpop.xlane.xlu0 %4276  ;;  %9136 = vpow2.f32 %v4373_v24  ;;  %4435 = vadd.xlane.f32.xlu0 %v4434_v7  ;;  %v4326_v61 = vsub.f32 %v11874_v15, %v4286_v56 }
 0x928   : > { %v4323_v44 = vsub.f32 %v11870_v21, %v4277_v27  ;;  %4432 = vadd.xlane.f32.xlu1 %v4431_v20  ;;  %9138 = vpow2.f32 %v4383_v32 }
 0x929   : > { %v12028_v43 = vpop.eup %9124  ;;  %v4385_v36 = vmul.f32 1.442695, %v4326_v61 }
 0x92a   : > { %v4379_v63 = vmul.f32 1.442695, %v4323_v44  ;;  %v4280_v2 = vpop.xlane.xlu1 %4279  ;;  %v4443_v18 = vsel %vm1752_vm2, %v12028_v43, 0.0  ;;  %v12035_v40 = vpop.eup %9126 }
 0x92b   : > { %v4324_v0 = vsub.f32 %v11882_v57, %v4280_v2  ;;  %4450 = vadd.xlane.f32.xlu0 %v4449_v60  ;;  %v4452_v15 = vsel %vm1752_vm2, %v12035_v40, 0.0 }
 0x92c   : > { %4444 = vadd.xlane.f32.xlu1 %v4443_v18  ;;  %9140 = vpow2.f32 %v4379_v63  ;;  %v4295_v18 = vpop.xlane.xlu0 %4294 }
 0x92d   : > { %v12038_v21 = vpop.eup %9128  ;;  %v4381_v17 = vmul.f32 1.442695, %v4324_v0 }
 0x92e   : > { %v4461_v23 = vsel %vm1752_vm2, %v12038_v21, 0.0  ;;  %v12044_v14 = vpop.eup %9130 }
 0x92f   : > { %9142 = vpow2.f32 %v4381_v17  ;;  %4462 = vadd.xlane.f32.xlu0 %v4461_v23  ;;  %v4446_v37 = vsel %vm1752_vm2, %v12044_v14, 0.0 }
 0x930   : > { %4453 = vadd.xlane.f32.xlu1 %v4452_v15  ;;  %9144 = vpow2.f32 %v4385_v36  ;;  %v4289_v0 = vpop.xlane.xlu0 %4288  ;;  %v4298_v36 = vpop.xlane.xlu1 %4297  ;;  %v4329_v15 = vsub.f32 %v11886_v52, %v4295_v18 }
 0x931   : > { %v12046_v30 = vpop.eup %9132  ;;  %v4327_v17 = vsub.f32 %v11894_v59, %v4289_v0 }
 0x932   : > { %v4455_v57 = vsel %vm1752_vm2, %v12046_v30, 0.0  ;;  %v12052_v4 = vpop.eup %9134 }
 0x933   : > { %4456 = vadd.xlane.f32.xlu0 %v4455_v57  ;;  %v4464_v7 = vsel %vm1752_vm2, %v12052_v4, 0.0  ;;  %v4387_v23 = vmul.f32 1.442695, %v4327_v17  ;;  %v4391_v57 = vmul.f32 1.442695, %v4329_v15 }
 0x934   : > { %4447 = vadd.xlane.f32.xlu1 %v4446_v37  ;;  %v12054_v24 = vpop.eup %9136  ;;  %v4330_v37 = vsub.f32 %v11898_v3, %v4298_v36 }
 0x935   : > { %v4458_v32 = vsel %vm1752_vm2, %v12054_v24, 0.0  ;;  %v12060_v56 = vpop.eup %9138  ;;  %9146 = vpow2.f32 %v4387_v23 }
 0x936   : > { %v4473_v27 = vsel %vm1752_vm2, %v12060_v56, 0.0  ;;  %9148 = vpow2.f32 %v4391_v57 }
 0x937   : > { %4465 = vadd.xlane.f32.xlu0 %v4464_v7  ;;  %v4292_v7 = vpop.xlane.xlu1 %4291 }
 0x938   : > { %4459 = vadd.xlane.f32.xlu1 %v4458_v32  ;;  %v4393_v32 = vmul.f32 1.442695, %v4330_v37 }
 0x939   : > { %v12064_v20 = vpop.eup %9140 }
 0x93a   : > { %v4467_v61 = vsel %vm1752_vm2, %v12064_v20, 0.0  ;;  %9150 = vpow2.f32 %v4393_v32 }
 0x93b   : > { %4474 = vadd.xlane.f32.xlu0 %v4473_v27 }
 0x93c   : > { %v12066_v44 = vpop.eup %9142 }
 0x93d   : > { %v4470_v60 = vsel %vm1752_vm2, %v12066_v44, 0.0  ;;  %v12072_v63 = vpop.eup %9144 }
 0x93e   : > { %4471 = vadd.xlane.f32.xlu1 %v4470_v60  ;;  %v4476_v2 = vsel %vm1752_vm2, %v12072_v63, 0.0 }
 0x93f   : > { %4468 = vadd.xlane.f32.xlu0 %v4467_v61 }
 0x942   : > { %v12084_v61 = vpop.eup %9146 }
 0x943   : > { %4477 = vadd.xlane.f32.xlu0 %v4476_v2  ;;  %v4479_v52 = vsel %vm1752_vm2, %v12084_v61, 0.0  ;;  %v12088_v2 = vpop.eup %9148 }
 0x947   : > { %v12092_v18 = vpop.eup %9150 }
 0x948   : > { %v4488_v0 = vsel %vm1752_vm2, %v12092_v18, 0.0 }
 0x94f   : > { %4942 = vrot.lane.b32.xlu1 %v9978_v1, %s9395_s24  ;;  %v4328_v1 = vsub.f32 %v11904_v12, %v4292_v7  ;;  %v4485_v12 = vsel %vm1752_vm2, %v12088_v2, 0.0 }
 0x951   : > { %v4389_v27 = vmul.f32 1.442695, %v4328_v1 }
 0x953   : > { %9152 = vpow2.f32 %v4389_v27 }
 0x959   : > { %4940 = vrot.lane.b32.xlu0 %v13730_v11, %s9395_s24 }
 0x960   : > { %v12096_v17 = vpop.eup %9152 }
 0x961   : > { %v4482_v36 = vsel %vm1752_vm2, %v12096_v17, 0.0 }
 0x96b   : > { %v4403_v60 = vpop.xlane.xlu0 %4402 }
 0x96f   : > { %v4397_v11 = vpop.xlane.xlu0 %4396 }
 0x973   : > { %v4406_v59 = vpop.xlane.xlu1 %4405  ;;  %4480 = vadd.xlane.f32.xlu1 %v4479_v52 }
 0x974   : > { %9154 = vrcp.f32 %v4406_v59 }
 0x975   : > { %9156 = vrcp.f32 %v4397_v11 }
 0x976   : > { %9158 = vrcp.f32 %v4403_v60 }
 0x977   : > { %v4400_v3 = vpop.xlane.xlu1 %4399 }
 0x978   : > { %9160 = vrcp.f32 %v4400_v3  ;;  %4486 = vadd.xlane.f32.xlu0 %v4485_v12  ;;  %v13809_v12 = vld [vmem:[#allocation45_spill] sm:$0xff] }
 0x97c   : > { %4489 = vadd.xlane.f32.xlu0 %v4488_v0 }
 0x980   : > { %4483 = vadd.xlane.f32.xlu0 %v4482_v36 }
 0x981   : > { %v9155_v23 = vpop.eup %9154 }
 0x982   : > { %v9157_v15 = vpop.eup %9156  ;;  %v4526_v7 = vmul.f32 %v9155_v23, %v11948_v8 }
 0x983   : > { %v9159_v57 = vpop.eup %9158  ;;  %v4523_v32 = vmul.f32 %v9157_v15, %v11944_v33 }
 0x984   : > { %5158 = vrot.lane.b32.xlu1 %v10058_v31, %s9394_s23  ;;  %v4525_v27 = vmul.f32 %v9159_v57, %v11940_v16  ;;  %v13807_v16 = vld [vmem:[#allocation46_spill] sm:$0xff]  ;;  %v13810_v57 = vld [vmem:[#allocation36_spill] sm:$0xff] }
 0x985   : > { %v9161_v37 = vpop.eup %9160 }
 0x986   : > { %v4524_v1 = vmul.f32 %v9161_v37, %v11952_v47  ;;  %v4556_v11 = vpack.c.bf16 %v4526_v7, %v4525_v27  ;;  %v13808_v47 = vld [vmem:[#allocation53_spill] sm:$0xff] }
 0x988   : > { %v4555_v60 = vpack.c.bf16 %v4524_v1, %v4523_v32  ;;  %5043 = vrot.lane.b32.xlu1 %v10002_v42, %s9395_s24  ;;  %v13811_v1 = vld [vmem:[#allocation50_spill] sm:$0xff] }
 0x98a   : > { %8188 = vmatprep.mubr.msk.bf16.mxu1 %vm1752_vm2, %v4555_v60 }
 0x98b   : > { %8189 = vmatmul.mubr.msk.bf16.vlgmr.msra.gmra.mxu1 %vm1752_vm2, %v4556_v11  ;;  %v13814_v11 = vld [vmem:[#allocation44_spill] sm:$0xff] }
 0x98c   : > { %8213 = vmatpush3.bf16.msra.mxu1 %v11569_v22  ;;  %5265 = vrot.lane.b32.xlu1 %v10079_v49, %s9394_s23 }
 0x98d   : > { %8214 = vmatprep.subr.bf16.mxu1 %v11567_v5 }
 0x990   : > { %8215 = vmatpush3.bf16.msra.mxu1 %v11567_v5  ;;  %5047 = vrot.lane.b32.xlu1 %v13738_v10, %s9395_s24 }
 0x991   : > { %8216 = vmatprep.subr.bf16.mxu1 %v11572_v45 }
 0x994   : > { %8217 = vmatpush3.bf16.msra.mxu1 %v11572_v45  ;;  %5263 = vrot.lane.b32.xlu1 %v10090_v58, %s9394_s23  ;;  %v13805_v45 = vld [vmem:[#allocation43_spill] sm:$0xff] }
 0x995   : > { %8218 = vmatprep.subr.bf16.mxu1 %v11576_v34  ;;  %v4415_v42 = vpop.xlane.xlu0 %4414 }
 0x996   : > { %5049 = vrot.lane.b32.xlu0 %v10008_v6, %s9394_s23 }
 0x998   : > { %8219 = vmatpush3.bf16.msra.mxu1 %v11576_v34  ;;  %5148 = vrot.lane.b32.xlu1 %v10036_v53, %s9395_s24  ;;  %v13806_v34 = vld [vmem:[#allocation51_spill] sm:$0xff] }
 0x999   : > { %8456 = vmatprep.subr.msk.bf16.mxu1 %vm1295_vm1, %v11908_v48  ;;  %v4418_v10 = vpop.xlane.xlu1 %4417 }
 0x99a   : > { %v4409_v5 = vpop.xlane.xlu0 %4408  ;;  %9162 = vrcp.f32 %v4418_v10  ;;  %5041 = vrot.lane.b32.xlu0 %v10006_v13, %s9395_s24  ;;  %v13815_v10 = vld [vmem:[#allocation52_spill] sm:$0xff] }
 0x99b   : > { %9164 = vrcp.f32 %v4409_v5 }
 0x99c   : > { %9166 = vrcp.f32 %v4415_v42  ;;  %5150 = vrot.lane.b32.xlu1 %v13742_v25, %s9395_s24 }
 0x99d   : > { %v4412_v22 = vpop.xlane.xlu1 %4411 }
 0x99e   : > { %9168 = vrcp.f32 %v4412_v22  ;;  %5156 = vrot.lane.b32.xlu0 %v10033_v51, %s9394_s23 }
 0x9a0   : > { %5259 = vrot.lane.b32.xlu1 %v10096_v19, %s9394_s23 }
 0x9a1   : > { %v4427_v53 = vpop.xlane.xlu1 %4426 }
 0x9a2   : > { %5045 = vrot.lane.b32.xlu0 %v13805_v45, %s9395_s24 }
 0x9a4   : > { %5253 = vrot.lane.b32.xlu1 %v13806_v34, %s9395_s24 }
 0x9a5   : > { %v4421_v13 = vpop.xlane.xlu1 %4420 }
 0x9a6   : > { %5154 = vrot.lane.b32.xlu0 %v13807_v16, %s9394_s23 }
 0x9a7   : > { %v9163_v25 = vpop.eup %9162 }
 0x9a8   : > { %v9165_v33 = vpop.eup %9164  ;;  %v4439_v8 = vpop.xlane.xlu0 %4438  ;;  %5257 = vrot.lane.b32.xlu1 %v13808_v47, %s9395_s24  ;;  %v4530_v0 = vmul.f32 %v9163_v25, %v11969_v35 }
 0x9a9   : > { %v4430_v59 = vpop.xlane.xlu1 %4429  ;;  %v9167_v52 = vpop.eup %9166  ;;  %v4527_v36 = vmul.f32 %v9165_v33, %v11971_v29 }
 0x9aa   : > { %5146 = vrot.lane.b32.xlu0 %v13809_v12, %s9395_s24  ;;  %9170 = vrcp.f32 %v4430_v59  ;;  %v4529_v7 = vmul.f32 %v9167_v52, %v11963_v55  ;;  %v13813_v55 = vld [vmem:[#allocation48_spill] sm:$0xff]  ;;  %v13817_v12 = vld [vmem:[#allocation35_spill] sm:$0xff] }
 0x9ab   : > { %v9169_v3 = vpop.eup %9168  ;;  %9172 = vrcp.f32 %v4421_v13  ;;  %v13816_v13 = vld [vmem:[#allocation54_spill] sm:$0xff] }
 0x9ac   : > { %v4528_v23 = vmul.f32 %v9169_v3, %v11979_v28  ;;  %v4442_v15 = vpop.xlane.xlu0 %4441  ;;  %5792 = vrot.lane.b32.xlu1 %v13810_v57, %s9396_s21  ;;  %9174 = vrcp.f32 %v4427_v53  ;;  %v4558_v35 = vpack.c.bf16 %v4530_v0, %v4529_v7  ;;  %v13812_v28 = vld [vmem:[#allocation41_spill] sm:$0xff]  ;;  %v13818_v57 = vld [vmem:[#allocation55_spill] sm:$0xff] }
 0x9ad   : > { %v4424_v37 = vpop.xlane.xlu1 %4423 }
 0x9ae   : > { %v4557_v32 = vpack.c.bf16 %v4528_v23, %v4527_v36  ;;  %9176 = vrcp.f32 %v4424_v37  ;;  %5261 = vrot.lane.b32.xlu0 %v13811_v1, %s9394_s23  ;;  %v13819_v37 = vld [vmem:[#allocation39_spill] sm:$0xff] }
 0x9b0   : > { %8192 = vmatprep.mubr.msk.bf16.mxu1 %vm1752_vm2, %v4557_v32  ;;  %v4436_v29 = vpop.xlane.xlu0 %4435  ;;  %5883 = vrot.lane.b32.xlu1 %v13812_v28, %s9396_s21  ;;  %v13820_v32 = vld [vmem:[#allocation118_spill] sm:$0xff]  ;;  %v13822_v28 = vld [vmem:[#allocation116_spill] sm:$0xff] }
 0x9b1   : > { %v4433_v27 = vpop.xlane.xlu1 %4432  ;;  %8193 = vmatmul.mubr.msk.bf16.gmra.mxu1 %vm1752_vm2, %v4558_v35  ;;  %9178 = vrcp.f32 %v4436_v29 }
 0x9b2   : > { %9180 = vrcp.f32 %v4433_v27  ;;  %5152 = vrot.lane.b32.xlu0 %v13813_v55, %s9395_s24 }
 0x9b3   : > { %9182 = vrcp.f32 %v4442_v15 }
 0x9b4   : > { %v4451_v60 = vpop.xlane.xlu0 %4450  ;;  %5881 = vrot.lane.b32.xlu1 %v13814_v11, %s9396_s21  ;;  %9184 = vrcp.f32 %v4439_v8 }
 0x9b5   : > { %v4445_v42 = vpop.xlane.xlu1 %4444 }
 0x9b6   : > { %5251 = vrot.lane.b32.xlu0 %v13815_v10, %s9395_s24 }
 0x9b7   : > { %v9171_v5 = vpop.eup %9170 }
 0x9b8   : > { %v4463_v22 = vpop.xlane.xlu0 %4462  ;;  %5877 = vrot.lane.b32.xlu1 %v10008_v6, %s9396_s21  ;;  %v9173_v45 = vpop.eup %9172  ;;  %v4534_v33 = vmul.f32 %v9171_v5, %v11995_v9 }
 0x9b9   : > { %v4454_v53 = vpop.xlane.xlu1 %4453  ;;  %v9175_v34 = vpop.eup %9174  ;;  %v4531_v59 = vmul.f32 %v9173_v45, %v11991_v50 }
 0x9ba   : > { %5255 = vrot.lane.b32.xlu0 %v13816_v13, %s9395_s24  ;;  %9186 = vrcp.f32 %v4454_v53  ;;  %v4533_v52 = vmul.f32 %v9175_v34, %v11985_v54  ;;  %s13260_s24 = scalar_lea.vmem %s13411_s9, %s7186_s20 }
 0x9bb   : > { %v9177_v25 = vpop.eup %9176  ;;  %9188 = vrcp.f32 %v4445_v42 }
 0x9bc   : > { %v4457_v8 = vpop.xlane.xlu0 %4456  ;;  %5970 = vrot.lane.b32.xlu1 %v10058_v31, %s9396_s21  ;;  %v4532_v6 = vmul.f32 %v9177_v25, %v12005_v46  ;;  %9190 = vrcp.f32 %v4451_v60  ;;  %v4560_v36 = vpack.c.bf16 %v4534_v33, %v4533_v52  ;;  %v13825_v33 = vld [vmem:[#allocation47_spill] sm:$0xff] }
 0x9bd   : > { %v4448_v47 = vpop.xlane.xlu1 %4447 }
 0x9be   : > { %v9179_v3 = vpop.eup %9178  ;;  %9192 = vrcp.f32 %v4448_v47  ;;  %5794 = vrot.lane.b32.xlu0 %v13817_v12, %s9396_s21  ;;  %v4559_v9 = vpack.c.bf16 %v4532_v6, %v4531_v59  ;;  %v13827_v12 = vld [vmem:[#allocation120_spill] sm:$0xff] }
 0x9bf   : > { %v9181_v0 = vpop.eup %9180  ;;  %9194 = vrcp.f32 %v4457_v8  ;;  %v4536_v46 = vmul.f32 %v9179_v3, %v12019_v38  ;;  %v13821_v38 = vld [vmem:[#allocation37_spill] sm:$0xff] }
 0x9c0   : > { %v9183_v23 = vpop.eup %9182  ;;  %v4466_v15 = vpop.xlane.xlu0 %4465  ;;  %8204 = vmatprep.mubr.msk.bf16.mxu0 %vm1752_vm2, %v4559_v9  ;;  %v4535_v50 = vmul.f32 %v9181_v0, %v12015_v39 }
 0x9c1   : > { %v4460_v31 = vpop.xlane.xlu1 %4459  ;;  %8205 = vmatmul.mubr.msk.bf16.vlgmr.msra.gmra.mxu0 %vm1752_vm2, %v4560_v36  ;;  %v9185_v54 = vpop.eup %9184  ;;  %v4538_v35 = vmul.f32 %v9183_v23, %v12009_v26 }
 0x9c2   : > { %8229 = vmatpush3.bf16.msra.mxu0 %v13818_v57  ;;  %9196 = vrcp.f32 %v4460_v31  ;;  %5790 = vrot.lane.b32.xlu0 %v13819_v37, %s9396_s21  ;;  %v4561_v7 = vpack.c.bf16 %v4536_v46, %v4535_v50  ;;  %v4537_v39 = vmul.f32 %v9185_v54, %v11999_v41  ;;  %v13823_v41 = vld [vmem:[#allocation40_spill] sm:$0xff]  ;;  %v4971_v31 = vsel %vm1295_vm1, %v13827_v12, 0  ;;  %v13830_v37 = vld [vmem:[#allocation123_spill] sm:$0xff] }
 0x9c3   : > { %9198 = vrcp.f32 %v4466_v15  ;;  %8230 = vmatprep.subr.bf16.mxu0 %v13820_v32 }
 0x9c4   : > { %v4475_v29 = vpop.xlane.xlu0 %4474  ;;  %8208 = vmatprep.mubr.msk.bf16.mxu0 %vm1752_vm2, %v4561_v7  ;;  %9200 = vrcp.f32 %v4463_v22  ;;  %v4562_v55 = vpack.c.bf16 %v4538_v35, %v4537_v39  ;;  %v13824_v22 = vld [vmem:[#allocation117_spill] sm:$0xff]  ;;  %v5076_v7 = vsel %vm1295_vm1, %v13830_v37, 0 }
 0x9c6   : > { %8231 = vmatpush3.bf16.msra.mxu0 %v13820_v32  ;;  %5788 = vrot.lane.b32.xlu0 %v13821_v38, %s9396_s21  ;;  %v13832_v32 = vld [vmem:[#allocation126_spill] sm:$0xff] }
 0x9c7   : > { %8232 = vmatprep.subr.bf16.mxu0 %v13822_v28  ;;  %v4472_v27 = vpop.xlane.xlu1 %4471  ;;  %v9187_v60 = vpop.eup %9186  ;;  %v5073_v39 = vsel %vm1295_vm1, %v13832_v32, 0 }
 0x9c8   : > { %9202 = vrcp.f32 %v4472_v27  ;;  %v4469_v11 = vpop.xlane.xlu0 %4468  ;;  %v9189_v42 = vpop.eup %9188  ;;  %v4542_v5 = vmul.f32 %v9187_v60, %v12035_v40  ;;  %v13826_v40 = vld [vmem:[#allocation119_spill] sm:$0xff] }
 0x9c9   : > { %9204 = vrcp.f32 %v4469_v11  ;;  %8209 = vmatmul.mubr.msk.bf16.gmra.mxu0 %vm1752_vm2, %v4562_v55  ;;  %v9191_v26 = vpop.eup %9190  ;;  %v4539_v45 = vmul.f32 %v9189_v42, %v12028_v43  ;;  %v5079_v57 = vsel %vm1295_vm1, %v13826_v40, 0 }
 0x9ca   : > { %8233 = vmatpush3.bf16.msra.mxu0 %v13822_v28  ;;  %5879 = vrot.lane.b32.xlu0 %v13823_v41, %s9396_s21  ;;  %9206 = vrcp.f32 %v4475_v29  ;;  %v4541_v25 = vmul.f32 %v9191_v26, %v12023_v62  ;;  %v4974_v62 = vsel %vm1295_vm1, %v11908_v48, 0  ;;  %v13833_v29 = vld [vmem:[#allocation127_spill] sm:$0xff]  ;;  %v13834_v28 = vld [vmem:[#allocation125_spill] sm:$0xff] }
 0x9cb   : > { %v9193_v10 = vpop.eup %9192  ;;  %8234 = vmatprep.subr.bf16.mxu0 %v13824_v22  ;;  %v5184_v27 = vsel %vm1295_vm1, %v13833_v29, 0  ;;  %v4943_v55 = vpop.permute.xlu1 %4942 }
 0x9cc   : > { %v4478_v53 = vpop.xlane.xlu0 %4477  ;;  %v4540_v34 = vmul.f32 %v9193_v10, %v12044_v14  ;;  %v9195_v13 = vpop.eup %9194  ;;  %v4564_v59 = vpack.c.bf16 %v4542_v5, %v4541_v25 }
 0x9cd   : > { %9208 = vrcp.f32 %v4478_v53  ;;  %v4543_v43 = vmul.f32 %v9195_v13, %v12046_v30 }
 0x9ce   : > { %8235 = vmatpush3.bf16.msra.mxu0 %v13824_v22  ;;  %5972 = vrot.lane.b32.xlu0 %v13825_v33, %s9396_s21  ;;  %v4563_v8 = vpack.c.bf16 %v4540_v34, %v4539_v45 }
 0x9cf   : > { %v9197_v47 = vpop.eup %9196  ;;  %8460 = vmatprep.subr.msk.bf16.mxu0 %vm1295_vm1, %v13826_v40 }
 0x9d0   : > { %v9199_v6 = vpop.eup %9198  ;;  %8220 = vmatprep.mubr.msk.bf16.mxu1 %vm1752_vm2, %v4563_v8  ;;  %v4544_v14 = vmul.f32 %v9197_v47, %v12054_v24  ;;  %v4941_v38 = vpop.permute.xlu0 %4940 }
 0x9d1   : > { %8221 = vmatmul.mubr.msk.bf16.vlgmr.msra.gmra.mxu1 %vm1752_vm2, %v4564_v59  ;;  %v9201_v52 = vpop.eup %9200  ;;  %v4546_v9 = vmul.f32 %v9199_v6, %v12052_v4  ;;  %v13828_v4 = vld [vmem:[#allocation124_spill] sm:$0xff] }
 0x9d2   : > { %8245 = vmatpush3.bf16.xpose.msra.mxu1 %v4974_v62  ;;  %v4565_v3 = vpack.c.bf16 %v4544_v14, %v4543_v43  ;;  %v4545_v30 = vmul.f32 %v9201_v52, %v12038_v21 }
 0x9d3   : > { %8457 = vmatprep.subr.msk.bf16.mxu1 %vm1295_vm1, %v13827_v12 }
 0x9d4   : > { %8224 = vmatprep.mubr.msk.bf16.mxu1 %vm1752_vm2, %v4565_v3  ;;  %v4566_v23 = vpack.c.bf16 %v4546_v9, %v4545_v30 }
 0x9d5   : > { %v9203_v0 = vpop.eup %9202 }
 0x9d6   : > { %v9205_v36 = vpop.eup %9204  ;;  %v4548_v24 = vmul.f32 %v9203_v0, %v12066_v44  ;;  %v13829_v44 = vld [vmem:[#allocation122_spill] sm:$0xff] }
 0x9d7   : > { %v4547_v15 = vmul.f32 %v9205_v36, %v12064_v20  ;;  %v9207_v48 = vpop.eup %9206 }
 0x9d8   : > { %v4549_v21 = vmul.f32 %v9207_v48, %v12060_v56  ;;  %v4968_v56 = vsel %vm1295_vm1, %v13829_v44, 0 }
 0x9d9   : > { %8225 = vmatmul.mubr.msk.bf16.gmra.mxu1 %vm1752_vm2, %v4566_v23  ;;  %v4567_v50 = vpack.c.bf16 %v4548_v24, %v4547_v15 }
 0x9da   : > { %v9209_v46 = vpop.eup %9208  ;;  %8247 = vmatpush3.bf16.xpose.msra.mxu1 %v4971_v31  ;;  %8252 = vmatprep.mubr.msk.bf16.mxu1 %vm1295_vm1, %v13828_v4 }
 0x9db   : > { %v4550_v54 = vmul.f32 %v9209_v46, %v12072_v63  ;;  %8236 = vmatprep.mubr.msk.bf16.mxu0 %vm1752_vm2, %v4567_v50  ;;  %8458 = vmatprep.subr.msk.bf16.mxu1 %vm1295_vm1, %v13829_v44  ;;  %v13831_v63 = vld [vmem:[#allocation121_spill] sm:$0xff] }
 0x9dc   : > { %v4965_v35 = vsel %vm1295_vm1, %v13831_v63, 0 }
 0x9dd   : > { %v4568_v20 = vpack.c.bf16 %v4550_v54, %v4549_v21 }
 0x9df   : > { %8237 = vmatmul.mubr.msk.bf16.vlgmr.msra.gmra.mxu0 %vm1752_vm2, %v4568_v20 }
 0x9e0   : > { %8261 = vmatpush3.bf16.xpose.msra.mxu0 %v5079_v57 }
 0x9e1   : > { %8461 = vmatprep.subr.msk.bf16.mxu0 %vm1295_vm1, %v13830_v37 }
 0x9e2   : > { %8249 = vmatpush3.bf16.xpose.msra.mxu1 %v4968_v56 }
 0x9e3   : > { %8459 = vmatprep.subr.msk.bf16.mxu1 %vm1295_vm1, %v13831_v63 }
 0x9e8   : > { %8263 = vmatpush3.bf16.xpose.msra.mxu0 %v5076_v7 }
 0x9e9   : > { %8462 = vmatprep.subr.msk.bf16.mxu0 %vm1295_vm1, %v13832_v32 }
 0x9ea   : > { %8251 = vmatpush3.bf16.xpose.msra.mxu1 %v4965_v35 }
 0x9eb   : > { %8464 = vmatprep.subr.msk.bf16.mxu1 %vm1295_vm1, %v13833_v29 }
 0x9f0   : > { %8265 = vmatpush3.bf16.xpose.msra.mxu0 %v5073_v39 }
 0x9f1   : > { %8253 = vmatmul.mubr.msk.bf16.vlgmr.msra.gmra.mxu1 %vm1295_vm1, %v13834_v28 }
 0x9f2   : > { %8256 = vmatprep.mubr.msk.bf16.mxu1 %vm1295_vm1, %v4941_v38  ;;  %8277 = vmatpush3.bf16.xpose.msra.mxu1 %v5184_v27 }
 0x9f9   : > { %8257 = vmatmul.mubr.msk.bf16.gmra.mxu1 %vm1295_vm1, %v4943_v55 }
 0x9fc   : > { %v4481_v60 = vpop.xlane.xlu1 %4480 }
 0xa00   : > { %v5159_v11 = vpop.permute.xlu1 %5158 }
 0xa01   : > { %v4487_v42 = vpop.xlane.xlu0 %4486  ;;  %8465 = vmatprep.subr.msk.bf16.mxu1 %vm1295_vm1, %v5159_v11  ;;  %v5181_v26 = vsel %vm1295_vm1, %v5159_v11, 0 }
 0xa02   : > { %8279 = vmatpush3.bf16.xpose.msra.mxu1 %v5181_v26 }
 0xa04   : > { %v5044_v41 = vpop.permute.xlu1 %5043 }
 0xa05   : > { %v4490_v10 = vpop.xlane.xlu0 %4489 }
 0xa06   : > { %9210 = vrcp.f32 %v4490_v10 }
 0xa07   : > { %9212 = vrcp.f32 %v4481_v60 }
 0xa08   : > { %v5266_v5 = vpop.permute.xlu1 %5265  ;;  %9214 = vrcp.f32 %v4487_v42 }
 0xa09   : > { %v4484_v22 = vpop.xlane.xlu0 %4483 }
 0xa0a   : > { %9216 = vrcp.f32 %v4484_v22 }
 0xa0c   : > { %v5048_v53 = vpop.permute.xlu1 %5047 }
 0xa0d   : > { %v5050_v45 = vpop.permute.xlu0 %5049 }
 0xa0e   : > { %8463 = vmatprep.subr.msk.bf16.mxu0 %vm1295_vm1, %v5050_v45  ;;  %v5070_v34 = vsel %vm1295_vm1, %v5050_v45, 0 }
 0xa0f   : > { %8267 = vmatpush3.bf16.xpose.msra.mxu0 %v5070_v34  ;;  %v5360_v34 = vld [vmem:[%s10215_s28 + $0x20] sm:$0xff] }
 0xa10   : > { %8468 = vmatprep.subr.msk.bf16.mxu0 %vm1295_vm1, %v5266_v5  ;;  %v5264_v25 = vpop.permute.xlu1 %5263 }
 0xa11   : > { %v5042_v13 = vpop.permute.xlu0 %5041  ;;  %v5286_v48 = vsel %vm1295_vm1, %v5264_v25, 0 }
 0xa13   : > { %v9211_v33 = vpop.eup %9210 }
 0xa14   : > { %v9213_v8 = vpop.eup %9212  ;;  %v4554_v43 = vmul.f32 %v9211_v33, %v12092_v18  ;;  %v5149_v52 = vpop.permute.xlu1 %5148 }
 0xa15   : > { %v5157_v47 = vpop.permute.xlu0 %5156  ;;  %v9215_v40 = vpop.eup %9214  ;;  %v4551_v14 = vmul.f32 %v9213_v8, %v12084_v61 }
 0xa16   : > { %8466 = vmatprep.subr.msk.bf16.mxu1 %vm1295_vm1, %v5157_v47  ;;  %v5178_v59 = vsel %vm1295_vm1, %v5157_v47, 0  ;;  %v4553_v12 = vmul.f32 %v9215_v40, %v12088_v2  ;;  %v5289_v2 = vsel %vm1295_vm1, %v5266_v5, 0 }
 0xa17   : > { %v9217_v6 = vpop.eup %9216  ;;  %8281 = vmatpush3.bf16.xpose.msra.mxu1 %v5178_v59 }
 0xa18   : > { %v4552_v62 = vmul.f32 %v9217_v6, %v12096_v17  ;;  %v4570_v0 = vpack.c.bf16 %v4554_v43, %v4553_v12  ;;  %v5151_v61 = vpop.permute.xlu1 %5150 }
 0xa19   : > { %v5046_v3 = vpop.permute.xlu0 %5045 }
 0xa1a   : > { %v4569_v9 = vpack.c.bf16 %v4552_v62, %v4551_v14 }
 0xa1c   : > { %8240 = vmatprep.mubr.msk.bf16.mxu0 %vm1752_vm2, %v4569_v9  ;;  %v5260_v36 = vpop.permute.xlu1 %5259 }
 0xa1d   : > { %8241 = vmatmul.mubr.msk.bf16.gmra.mxu0 %vm1752_vm2, %v4570_v0  ;;  %v5155_v30 = vpop.permute.xlu0 %5154  ;;  %v5280_v20 = vsel %vm1295_vm1, %v5260_v36, 0 }
 0xa1e   : > { %8268 = vmatprep.mubr.msk.bf16.mxu0 %vm1295_vm1, %v5042_v13  ;;  %8467 = vmatprep.subr.msk.bf16.mxu1 %vm1295_vm1, %v5155_v30  ;;  %v5175_v18 = vsel %vm1295_vm1, %v5155_v30, 0 }
 0xa1f   : > { %8283 = vmatpush3.bf16.xpose.msra.mxu1 %v5175_v18 }
 0xa20   : > { %v5254_v15 = vpop.permute.xlu1 %5253 }
 0xa21   : > { %v5147_v17 = vpop.permute.xlu0 %5146 }
 0xa22   : > { %8284 = vmatprep.mubr.msk.bf16.mxu1 %vm1295_vm1, %v5147_v17 }
 0xa24   : > { %v5258_v50 = vpop.permute.xlu1 %5257 }
 0xa25   : > { %8269 = vmatmul.mubr.msk.bf16.vlgmr.msra.gmra.mxu0 %vm1295_vm1, %v5044_v41  ;;  %v5262_v24 = vpop.permute.xlu0 %5261 }
 0xa26   : > { %8293 = vmatpush3.bf16.xpose.msra.mxu0 %v5289_v2  ;;  %8272 = vmatprep.mubr.msk.bf16.mxu0 %vm1295_vm1, %v5046_v3  ;;  %v5283_v4 = vsel %vm1295_vm1, %v5262_v24, 0 }
 0xa27   : > { %8285 = vmatmul.mubr.msk.bf16.vlgmr.msra.gmra.mxu1 %vm1295_vm1, %v5149_v52  ;;  %8469 = vmatprep.subr.msk.bf16.mxu0 %vm1295_vm1, %v5264_v25  ;;  %v12425_v52 = vld [vmem:[%s13404_s2 + $0xe0] sm:$0xff] }
 0xa28   : > { %8288 = vmatprep.mubr.msk.bf16.mxu1 %vm1295_vm1, %v5151_v61  ;;  %v5793_v54 = vpop.permute.xlu1 %5792  ;;  %v5362_v61 = vld [vmem:[%s10215_s28 + $0x30] sm:$0xff] }
 0xa29   : > { %v5153_v23 = vpop.permute.xlu0 %5152 }
 0xa2c   : > { %v5884_v37 = vpop.permute.xlu1 %5883 }
 0xa2d   : > { %8273 = vmatmul.mubr.msk.bf16.gmra.mxu0 %vm1295_vm1, %v5048_v53  ;;  %v5252_v31 = vpop.permute.xlu0 %5251 }
 0xa2e   : > { %8295 = vmatpush3.bf16.xpose.msra.mxu0 %v5286_v48  ;;  %8300 = vmatprep.mubr.msk.bf16.mxu0 %vm1295_vm1, %v5252_v31  ;;  %v5358_v31 = vld [vmem:[%s10215_s28 + $0x10] sm:$0xff] }
 0xa2f   : > { %8289 = vmatmul.mubr.msk.bf16.gmra.mxu1 %vm1295_vm1, %v5153_v23  ;;  %8470 = vmatprep.subr.msk.bf16.mxu0 %vm1295_vm1, %v5262_v24 }
 0xa30   : > { %v5882_v7 = vpop.permute.xlu1 %5881 }
 0xa31   : > { %v5256_v46 = vpop.permute.xlu0 %5255 }
 0xa34   : > { %v5878_v29 = vpop.permute.xlu1 %5877 }
 0xa35   : > { %v5795_v21 = vpop.permute.xlu0 %5794 }
 0xa36   : > { %8297 = vmatpush3.bf16.xpose.msra.mxu0 %v5283_v4  ;;  %8308 = vmatprep.subr.bf16.mxu1 %v5795_v21 }
 0xa37   : > { %8471 = vmatprep.subr.msk.bf16.mxu0 %vm1295_vm1, %v5260_v36  ;;  %8309 = vmatpush3.bf16.msra.mxu1 %v5795_v21  ;;  %v5356_v21 = vld [vmem:[%s10215_s28] sm:$0xff] }
 0xa38   : > { %8310 = vmatprep.subr.bf16.mxu1 %v5793_v54 }
 0xa39   : > { %v5791_v44 = vpop.permute.xlu0 %5790 }
 0xa3b   : > { %8311 = vmatpush3.bf16.msra.mxu1 %v5793_v54  ;;  %v12391_v54 = vld [vmem:[%s13404_s2 + $0xd8] sm:$0xff] }
 0xa3c   : > { %8312 = vmatprep.subr.bf16.mxu1 %v5791_v44 }
 0xa3d   : > { %v5789_v57 = vpop.permute.xlu0 %5788 }
 0xa3e   : > { %8299 = vmatpush3.bf16.xpose.msra.mxu0 %v5280_v20 }
 0xa3f   : > { %8324 = vmatprep.subr.bf16.mxu0 %v5884_v37  ;;  %8313 = vmatpush3.bf16.msra.mxu1 %v5791_v44 }
 0xa40   : > { %8314 = vmatprep.subr.bf16.mxu1 %v5789_v57 }
 0xa41   : > { %v5880_v56 = vpop.permute.xlu0 %5879 }
 0xa43   : > { %8315 = vmatpush3.bf16.msra.mxu1 %v5789_v57 }
 0xa45   : > { %8301 = vmatmul.mubr.msk.bf16.vlgmr.msra.gmra.mxu0 %vm1295_vm1, %v5254_v15  ;;  %v12286_v63 = vpop.permute.xlu0 %5972  ;;  %v12378_v15 = vld [vmem:[%s13404_s2 + $0xd0] sm:$0xff] }
 0xa46   : > { %8304 = vmatprep.mubr.msk.bf16.mxu0 %vm1295_vm1, %v5256_v46  ;;  %8325 = vmatpush3.bf16.msra.mxu0 %v5884_v37  ;;  %v12399_v37 = vld [vmem:[%s13404_s2 + $0xc8] sm:$0xff] }
 0xa47   : > { %8326 = vmatprep.subr.bf16.mxu0 %v5882_v7  ;;  %8340 = vmatprep.subr.bf16.mxu1 %v12286_v63 }
 0xa4a   : > { %8327 = vmatpush3.bf16.msra.mxu0 %v5882_v7 }
 0xa4b   : > { %v12290_v32 = vpop.f32.mrf.mxu1  ;;  %8328 = vmatprep.subr.bf16.mxu0 %v5880_v56 }
 0xa4d   : > { %v12292_v35 = vpop.f32.mrf.mxu1  ;;  %8305 = vmatmul.mubr.msk.bf16.gmra.mxu0 %vm1295_vm1, %v5258_v50  ;;  %v12384_v50 = vld [vmem:[%s13404_s2 + $0xc0] sm:$0xff] }
 0xa4e   : > { %8329 = vmatpush3.bf16.msra.mxu0 %v5880_v56 }
 0xa4f   : > { %v12295_v39 = vpop.f32.mrf.mxu1  ;;  %8330 = vmatprep.subr.bf16.mxu0 %v5878_v29 }
 0xa51   : > { %v12299_v28 = vpop.f32.mrf.mxu1 }
 0xa52   : > { %8331 = vmatpush3.bf16.msra.mxu0 %v5878_v29 }
 0xa71   : > { %v12303_v55 = vpop.f32.mrf.mxu1 }
 0xa73   : > { %v12305_v60 = vpop.f32.mrf.mxu1 }
 0xa74   : > { %13835 = vst [vmem:[#allocation43_spill] sm:$0xff] %v12305_v60 }
 0xa75   : > { %v12307_v11 = vpop.f32.mrf.mxu1 }
 0xa77   : > { %v12311_v26 = vpop.f32.mrf.mxu1 }
 0xa81   : > { %v12315_v10 = vpop.f32.mrf.mxu0 }
 0xa83   : > { %v12317_v5 = vpop.f32.mrf.mxu0 }
 0xa84   : > { %13836 = vst [vmem:[#allocation51_spill] sm:$0xff] %v12317_v5 }
 0xa85   : > { %v12319_v22 = vpop.f32.mrf.mxu0 }
 0xa87   : > { %v12323_v45 = vpop.f32.mrf.mxu0 }
 0xa88   : > { %13837 = vst [vmem:[#allocation46_spill] sm:$0xff] %v12323_v45 }
 0xa89   : > { %v12327_v13 = vpop.f32.mrf.mxu0 }
 0xa8b   : > { %v12329_v25 = vpop.f32.mrf.mxu0 }
 0xa8c   : > { %13838 = vst [vmem:[#allocation53_spill] sm:$0xff] %v12329_v25 }
 0xa8d   : > { %v12331_v33 = vpop.f32.mrf.mxu0 }
 0xa8f   : > { %v12335_v47 = vpop.f32.mrf.mxu0 }
 0xa90   : > { %13839 = vst [vmem:[#allocation45_spill] sm:$0xff] %v12335_v47  ;;  %v5379_v47 = vld [vmem:[%s10215_s28 + $0xb8] sm:$0xff] }
 0xa91   : > { %v12339_v59 = vpop.f32.mrf.mxu1 }
 0xa92   : > { %13840 = vst [vmem:[#allocation36_spill] sm:$0xff] %v12339_v59 }
 0xa93   : > { %v12341_v6 = vpop.f32.mrf.mxu1 }
 0xa94   : > { %13841 = vst [vmem:[#allocation50_spill] sm:$0xff] %v12341_v6 }
 0xa95   : > { %v12343_v43 = vpop.f32.mrf.mxu1 }
 0xa96   : > { %13842 = vst [vmem:[#allocation41_spill] sm:$0xff] %v12343_v43 }
 0xa97   : > { %v12347_v62 = vpop.f32.mrf.mxu1 }
 0xa98   : > { %13843 = vst [vmem:[#allocation48_spill] sm:$0xff] %v12347_v62 }
 0xa99   : > { %v12351_v3 = vpop.f32.mrf.mxu1 }
 0xa9a   : > { %13844 = vst [vmem:[#allocation44_spill] sm:$0xff] %v12351_v3 }
 0xa9b   : > { %v12353_v12 = vpop.f32.mrf.mxu1 }
 0xa9c   : > { %13845 = vst [vmem:[#allocation52_spill] sm:$0xff] %v12353_v12 }
 0xa9d   : > { %v12355_v9 = vpop.f32.mrf.mxu1 }
 0xa9e   : > { %13846 = vst [vmem:[#allocation54_spill] sm:$0xff] %v12355_v9 }
 0xa9f   : > { %v12359_v30 = vpop.f32.mrf.mxu0  ;;  %v12361_v18 = vpop.f32.mrf.mxu1 }
 0xaa0   : > { %13847 = vst [vmem:[#allocation35_spill] sm:$0xff] %v12359_v30  ;;  %13848 = vst [vmem:[#allocation55_spill] sm:$0xff] %v12361_v18 }
 0xaa1   : > { %v12365_v17 = vpop.f32.mrf.mxu0 }
 0xaa2   : > { %13849 = vst [vmem:[#allocation39_spill] sm:$0xff] %v12365_v17  ;;  %v5364_v17 = vld [vmem:[%s10215_s28 + $0x40] sm:$0xff] }
 0xaa3   : > { %v12367_v36 = vpop.f32.mrf.mxu0 }
 0xaa4   : > { %13850 = vst [vmem:[#allocation118_spill] sm:$0xff] %v12367_v36  ;;  %v5370_v36 = vld [vmem:[%s10215_s28 + $0x70] sm:$0xff] }
 0xaa5   : > { %v12371_v24 = vpop.f32.mrf.mxu0 }
 0xaa6   : > { %13851 = vst [vmem:[#allocation37_spill] sm:$0xff] %v12371_v24 }
 0xab1   : > { %v8254_v48 = vpop.f32.mrf.mxu1 }
 0xab2   : > { %v5019_v46 = vadd.f32 %v8254_v48, %v12378_v15  ;;  %v5359_v48 = vld [vmem:[%s10215_s28 + $0x18] sm:$0xff] }
 0xab3   : > { %v5010_v4 = vpop.f32.mrf.mxu1 }
 0xab4   : > { %v12393_v44 = vadd.f32 %v5358_v31, %v5019_v46  ;;  %v5011_v20 = vadd.f32 %v12384_v50, %v5010_v4  ;;  %v5357_v46 = vld [vmem:[%s10215_s28 + $0x8] sm:$0xff]  ;;  %v12411_v4 = vld [vmem:[%s13404_s2 + $0xf0] sm:$0xff] }
 0xab5   : > { %v8255_v57 = vpop.f32.mrf.mxu1 }
 0xab6   : > { %v12401_v56 = vadd.f32 %v5356_v21, %v5011_v20  ;;  %v5022_v7 = vadd.f32 %v8255_v57, %v12391_v54  ;;  %v5426_v29 = vsel %vm1752_vm2, %v12393_v44, -inf }
 0xab7   : > { %5427 = vmax.xlane.f32.xlu0 %v5426_v29  ;;  %v5013_v31 = vpop.f32.mrf.mxu1 }
 0xab8   : > { %v5014_v23 = vadd.f32 %v12399_v37, %v5013_v31  ;;  %v12414_v21 = vadd.f32 %v5359_v48, %v5022_v7  ;;  %v5420_v29 = vsel %vm1752_vm2, %v12401_v56, -inf  ;;  %v5363_v48 = vld [vmem:[%s10215_s28 + $0x38] sm:$0xff]  ;;  %v12438_v31 = vld [vmem:[%s13404_s2 + $0xe8] sm:$0xff] }
 0xab9   : > { %v8258_v2 = vpop.f32.mrf.mxu1 }
 0xaba   : > { %v12416_v20 = vadd.f32 %v5357_v46, %v5014_v23  ;;  %v5035_v57 = vadd.f32 %v8258_v2, %v12411_v4  ;;  %v12430_v23 = vld [vmem:[%s13404_s2 + $0xf8] sm:$0xff]  ;;  %v5429_v40 = vsel %vm1752_vm2, %v12414_v21, -inf }
 0xabb   : > { %5421 = vmax.xlane.f32.xlu0 %v5420_v29  ;;  %v5026_v0 = vpop.f32.mrf.mxu1 }
 0xabc   : > { %v5423_v2 = vsel %vm1752_vm2, %v12416_v20, -inf  ;;  %v12440_v46 = vadd.f32 %v5362_v61, %v5035_v57  ;;  %v5027_v29 = vadd.f32 %v12425_v52, %v5026_v0 }
 0xabd   : > { %5424 = vmax.xlane.f32.xlu1 %v5423_v2  ;;  %v8259_v7 = vpop.f32.mrf.mxu1  ;;  %v5361_v2 = vld [vmem:[%s10215_s28 + $0x28] sm:$0xff] }
 0xabe   : > { %v5038_v14 = vadd.f32 %v8259_v7, %v12430_v23  ;;  %v12451_v53 = vadd.f32 %v5360_v34, %v5027_v29  ;;  %v5438_v0 = vsel %vm1752_vm2, %v12440_v46, -inf }
 0xabf   : > { %5430 = vmax.xlane.f32.xlu0 %v5429_v40  ;;  %v5029_v41 = vpop.f32.mrf.mxu1 }
 0xac0   : > { %v12448_v27 = vadd.f32 %v5363_v48, %v5038_v14  ;;  %v5030_v8 = vadd.f32 %v12438_v31, %v5029_v41  ;;  %v5432_v14 = vsel %vm1752_vm2, %v12451_v53, -inf }
 0xac2   : > { %v12453_v42 = vadd.f32 %v5361_v2, %v5030_v8  ;;  %v5441_v61 = vsel %vm1752_vm2, %v12448_v27, -inf  ;;  %v5366_v2 = vld [vmem:[%s10215_s28 + $0x50] sm:$0xff] }
 0xac3   : > { %5439 = vmax.xlane.f32.xlu0 %v5438_v0  ;;  %5442 = vmax.xlane.f32.xlu1 %v5441_v61 }
 0xac4   : > { %v5435_v40 = vsel %vm1752_vm2, %v12453_v42, -inf }
 0xac7   : > { %5436 = vmax.xlane.f32.xlu1 %v5435_v40  ;;  %5433 = vmax.xlane.f32.xlu0 %v5432_v14 }
 0xadd   : > { %v12463_v41 = vpop.f32.mrf.mxu0 }
 0xade   : > { %13852 = vst [vmem:[#allocation116_spill] sm:$0xff] %v12463_v41  ;;  %v5367_v41 = vld [vmem:[%s10215_s28 + $0x58] sm:$0xff] }
 0xadf   : > { %v12465_v34 = vpop.f32.mrf.mxu0 }
 0xae0   : > { %13853 = vst [vmem:[#allocation40_spill] sm:$0xff] %v12465_v34 }
 0xae1   : > { %v12467_v8 = vpop.f32.mrf.mxu0 }
 0xae2   : > { %13854 = vst [vmem:[#allocation117_spill] sm:$0xff] %v12467_v8 }
 0xae3   : > { %v12471_v7 = vpop.f32.mrf.mxu0 }
 0xae4   : > { %13855 = vst [vmem:[#allocation47_spill] sm:$0xff] %v12471_v7 }
 0xae5   : > { %v8270_v29 = vpop.f32.mrf.mxu0 }
 0xae6   : > { %v5124_v0 = vadd.f32 %v8270_v29, %v12378_v15 }
 0xae7   : > { %v8286_v61 = vpop.f32.mrf.mxu1  ;;  %v5115_v40 = vpop.f32.mrf.mxu0 }
 0xae8   : > { %v12477_v14 = vadd.f32 %v5366_v2, %v5124_v0  ;;  %v5116_v38 = vadd.f32 %v12384_v50, %v5115_v40  ;;  %v5365_v40 = vld [vmem:[%s10215_s28 + $0x48] sm:$0xff]  ;;  %v5229_v9 = vadd.f32 %v8286_v61, %v12378_v15 }
 0xae9   : > { %v5220_v24 = vpop.f32.mrf.mxu1  ;;  %v8271_v57 = vpop.f32.mrf.mxu0 }
 0xaea   : > { %v5127_v8 = vadd.f32 %v8271_v57, %v12391_v54  ;;  %v12483_v30 = vadd.f32 %v5364_v17, %v5116_v38  ;;  %v5450_v48 = vsel %vm1752_vm2, %v12477_v14, -inf  ;;  %v5221_v59 = vadd.f32 %v12384_v50, %v5220_v24 }
 0xaeb   : > { %v5118_v29 = vpop.f32.mrf.mxu0  ;;  %v8287_v2 = vpop.f32.mrf.mxu1  ;;  %5451 = vmax.xlane.f32.xlu0 %v5450_v48 }
 0xaec   : > { %v12487_v34 = vadd.f32 %v5367_v41, %v5127_v8  ;;  %v5119_v0 = vadd.f32 %v12399_v37, %v5118_v29  ;;  %v5444_v17 = vsel %vm1752_vm2, %v12483_v30, -inf  ;;  %v5368_v29 = vld [vmem:[%s10215_s28 + $0x60] sm:$0xff]  ;;  %v5232_v43 = vadd.f32 %v8287_v2, %v12391_v54 }
 0xaed   : > { %v8274_v7 = vpop.f32.mrf.mxu0  ;;  %v5223_v8 = vpop.f32.mrf.mxu1 }
 0xaee   : > { %v5140_v12 = vadd.f32 %v8274_v7, %v12411_v4  ;;  %v12493_v57 = vadd.f32 %v5365_v40, %v5119_v0  ;;  %v5453_v38 = vsel %vm1752_vm2, %v12487_v34, -inf  ;;  %v5371_v0 = vld [vmem:[%s10215_s28 + $0x78] sm:$0xff]  ;;  %v5224_v24 = vadd.f32 %v12399_v37, %v5223_v8 }
 0xaef   : > { %v5131_v41 = vpop.f32.mrf.mxu0  ;;  %5454 = vmax.xlane.f32.xlu1 %v5453_v38  ;;  %5445 = vmax.xlane.f32.xlu0 %v5444_v17  ;;  %v5374_v38 = vld [vmem:[%s10215_s28 + $0x90] sm:$0xff]  ;;  %v8290_v17 = vpop.f32.mrf.mxu1 }
 0xaf0   : > { %v12499_v48 = vadd.f32 %v5370_v36, %v5140_v12  ;;  %v5132_v18 = vadd.f32 %v12425_v52, %v5131_v41  ;;  %v5447_v12 = vsel %vm1752_vm2, %v12493_v57, -inf  ;;  %v12520_v61 = vadd.f32 %v5374_v38, %v5229_v9 }
 0xaf1   : > { %v8275_v7 = vpop.f32.mrf.mxu0  ;;  %v5245_v2 = vadd.f32 %v8290_v17, %v12411_v4 }
 0xaf2   : > { %v5143_v40 = vadd.f32 %v8275_v7, %v12430_v23  ;;  %v5462_v3 = vsel %vm1752_vm2, %v12499_v48, -inf  ;;  %v12508_v6 = vadd.f32 %v5368_v29, %v5132_v18  ;;  %v5369_v7 = vld [vmem:[%s10215_s28 + $0x68] sm:$0xff]  ;;  %v5372_v29 = vld [vmem:[%s10215_s28 + $0x80] sm:$0xff]  ;;  %v5474_v38 = vsel %vm1752_vm2, %v12520_v61, -inf }
 0xaf3   : > { %v5134_v36 = vpop.f32.mrf.mxu0  ;;  %5448 = vmax.xlane.f32.xlu1 %v5447_v12  ;;  %5463 = vmax.xlane.f32.xlu0 %v5462_v3  ;;  %v12529_v12 = vadd.f32 %v5372_v29, %v5221_v59 }
 0xaf4   : > { %v12513_v41 = vadd.f32 %v5371_v0, %v5143_v40  ;;  %v5135_v62 = vadd.f32 %v12438_v31, %v5134_v36  ;;  %v5456_v3 = vsel %vm1752_vm2, %v12508_v6, -inf  ;;  %v5375_v0 = vld [vmem:[%s10215_s28 + $0x98] sm:$0xff]  ;;  %v5236_v40 = vpop.f32.mrf.mxu1  ;;  %v5373_v36 = vld [vmem:[%s10215_s28 + $0x88] sm:$0xff] }
 0xaf5   : > { %v12532_v9 = vadd.f32 %v5375_v0, %v5232_v43  ;;  %v12541_v59 = vadd.f32 %v5373_v36, %v5224_v24  ;;  %v5468_v43 = vsel %vm1752_vm2, %v12529_v12, -inf  ;;  %v5237_v17 = vadd.f32 %v12425_v52, %v5236_v40  ;;  %v5376_v0 = vld [vmem:[%s10215_s28 + $0xa0] sm:$0xff] }
 0xaf6   : > { %v5465_v18 = vsel %vm1752_vm2, %v12513_v41, -inf  ;;  %v12524_v25 = vadd.f32 %v5369_v7, %v5135_v62  ;;  %v5378_v7 = vld [vmem:[%s10215_s28 + $0xb0] sm:$0xff] }
 0xaf7   : > { %5466 = vmax.xlane.f32.xlu1 %v5465_v18  ;;  %5457 = vmax.xlane.f32.xlu0 %v5456_v3  ;;  %v8291_v18 = vpop.f32.mrf.mxu1  ;;  %v12545_v8 = vadd.f32 %v5378_v7, %v5245_v2  ;;  %v5477_v3 = vsel %vm1752_vm2, %v12532_v9, -inf  ;;  %v5471_v24 = vsel %vm1752_vm2, %v12541_v59, -inf  ;;  %v12555_v36 = vadd.f32 %v5376_v0, %v5237_v17  ;;  %v5377_v7 = vld [vmem:[%s10215_s28 + $0xa8] sm:$0xff] }
 0xaf8   : > { %v5459_v62 = vsel %vm1752_vm2, %v12524_v25, -inf  ;;  %v5248_v29 = vadd.f32 %v8291_v18, %v12430_v23 }
 0xafa   : > { %v12557_v2 = vadd.f32 %v5379_v47, %v5248_v29  ;;  %v5480_v29 = vsel %vm1752_vm2, %v12555_v36, -inf }
 0xafb   : > { %5460 = vmax.xlane.f32.xlu1 %v5459_v62  ;;  %5475 = vmax.xlane.f32.xlu0 %v5474_v38  ;;  %v5239_v62 = vpop.f32.mrf.mxu1  ;;  %v5486_v38 = vsel %vm1752_vm2, %v12545_v8, -inf }
 0xafc   : > { %v5240_v40 = vadd.f32 %v12438_v31, %v5239_v62  ;;  %v5489_v47 = vsel %vm1752_vm2, %v12557_v2, -inf }
 0xafe   : > { %v12565_v5 = vadd.f32 %v5377_v7, %v5240_v40 }
 0xaff   : > { %5478 = vmax.xlane.f32.xlu1 %v5477_v3  ;;  %5469 = vmax.xlane.f32.xlu0 %v5468_v43  ;;  %v5382_v3 = vld [vmem:[%s10215_s28 + $0xd0] sm:$0xff] }
 0xb03   : > { %5472 = vmax.xlane.f32.xlu1 %v5471_v24  ;;  %5487 = vmax.xlane.f32.xlu0 %v5486_v38  ;;  %v5380_v24 = vld [vmem:[%s10215_s28 + $0xc0] sm:$0xff] }
 0xb05   : > { %v8302_v18 = vpop.f32.mrf.mxu0 }
 0xb06   : > { %v5334_v43 = vadd.f32 %v8302_v18, %v12378_v15  ;;  %v5383_v15 = vld [vmem:[%s10215_s28 + $0xd8] sm:$0xff] }
 0xb07   : > { %v5325_v17 = vpop.f32.mrf.mxu0  ;;  %5490 = vmax.xlane.f32.xlu1 %v5489_v47  ;;  %5481 = vmax.xlane.f32.xlu0 %v5480_v29  ;;  %v5386_v29 = vld [vmem:[%s10215_s28 + $0xf0] sm:$0xff] }
 0xb08   : > { %v12571_v0 = vadd.f32 %v5382_v3, %v5334_v43  ;;  %v5326_v62 = vadd.f32 %v12384_v50, %v5325_v17  ;;  %v5483_v3 = vsel %vm1752_vm2, %v12565_v5, -inf  ;;  %v5381_v17 = vld [vmem:[%s10215_s28 + $0xc8] sm:$0xff] }
 0xb09   : > { %v8303_v38 = vpop.f32.mrf.mxu0 }
 0xb0a   : > { %v5337_v40 = vadd.f32 %v8303_v38, %v12391_v54  ;;  %v5498_v7 = vsel %vm1752_vm2, %v12571_v0, -inf  ;;  %v12579_v18 = vadd.f32 %v5380_v24, %v5326_v62 }
 0xb0b   : > { %v5328_v45 = vpop.f32.mrf.mxu0  ;;  %5484 = vmax.xlane.f32.xlu1 %v5483_v3  ;;  %5499 = vmax.xlane.f32.xlu0 %v5498_v7 }
 0xb0c   : > { %v12583_v43 = vadd.f32 %v5383_v15, %v5337_v40  ;;  %v5329_v50 = vadd.f32 %v12399_v37, %v5328_v45  ;;  %v5492_v60 = vsel %vm1752_vm2, %v12579_v18, -inf  ;;  %v5384_v37 = vld [vmem:[%s10215_s28 + $0xe0] sm:$0xff] }
 0xb0d   : > { %v8306_v47 = vpop.f32.mrf.mxu0 }
 0xb0e   : > { %v5350_v54 = vadd.f32 %v8306_v47, %v12411_v4  ;;  %v5501_v62 = vsel %vm1752_vm2, %v12583_v43, -inf  ;;  %v12591_v24 = vadd.f32 %v5381_v17, %v5329_v50  ;;  %v5387_v17 = vld [vmem:[%s10215_s28 + $0xf8] sm:$0xff] }
 0xb0f   : > { %v5341_v38 = vpop.f32.mrf.mxu0  ;;  %5502 = vmax.xlane.f32.xlu1 %v5501_v62  ;;  %5493 = vmax.xlane.f32.xlu0 %v5492_v60 }
 0xb10   : > { %v12595_v15 = vadd.f32 %v5386_v29, %v5350_v54  ;;  %v5342_v45 = vadd.f32 %v12425_v52, %v5341_v38  ;;  %v5495_v7 = vsel %vm1752_vm2, %v12591_v24, -inf  ;;  %v12614_v54 = vpop.permute.xlu1 %5970 }
 0xb11   : > { %v8307_v60 = vpop.f32.mrf.mxu0 }
 0xb12   : > { %v5510_v4 = vsel %vm1752_vm2, %v12595_v15, -inf  ;;  %v12601_v40 = vadd.f32 %v5384_v37, %v5342_v45  ;;  %v5353_v52 = vadd.f32 %v8307_v60, %v12430_v23 }
 0xb13   : > { %5496 = vmax.xlane.f32.xlu1 %v5495_v7  ;;  %5511 = vmax.xlane.f32.xlu0 %v5510_v4  ;;  %v5344_v47 = vpop.f32.mrf.mxu0 }
 0xb14   : > { %v5504_v3 = vsel %vm1752_vm2, %v12601_v40, -inf  ;;  %v12616_v38 = vadd.f32 %v5387_v17, %v5353_v52  ;;  %v5345_v45 = vadd.f32 %v12438_v31, %v5344_v47 }
 0xb17   : > { %5505 = vmax.xlane.f32.xlu0 %v5504_v3 }
 0xb24   : > { %5966 = vrot.lane.b32.xlu1 %v13807_v16, %s9396_s21  ;;  %v5385_v16 = vld [vmem:[%s10215_s28 + $0xe8] sm:$0xff]  ;;  %s9397_s28 = smov 8  }
 0xb25   : > { %v12622_v3 = vadd.f32 %v5385_v16, %v5345_v45 }
 0xb2d   : > { %5968 = vrot.lane.b32.xlu0 %v10033_v51, %s9396_s21 }
 0xb40   : > { %v5428_v50 = vpop.xlane.xlu0 %5427 }
 0xb41   : > { %v5518_v29 = vsub.f32 %v12393_v44, %v5428_v50  ;;  %v5513_v44 = vsel %vm1752_vm2, %v12616_v38, -inf }
 0xb43   : > { %v5552_v62 = vmul.f32 1.442695, %v5518_v29 }
 0xb44   : > { %v5422_v37 = vpop.xlane.xlu0 %5421 }
 0xb45   : > { %9218 = vpow2.f32 %v5552_v62  ;;  %v5516_v51 = vsub.f32 %v12401_v56, %v5422_v37  ;;  %v5507_v56 = vsel %vm1752_vm2, %v12622_v3, -inf }
 0xb46   : > { %v5425_v4 = vpop.xlane.xlu1 %5424 }
 0xb47   : > { %v5548_v7 = vmul.f32 1.442695, %v5516_v51  ;;  %v5517_v23 = vsub.f32 %v12416_v20, %v5425_v4 }
 0xb48   : > { %v5431_v60 = vpop.xlane.xlu0 %5430  ;;  %5514 = vmax.xlane.f32.xlu1 %v5513_v44 }
 0xb49   : > { %9220 = vpow2.f32 %v5548_v7  ;;  %v5519_v52 = vsub.f32 %v12414_v21, %v5431_v60  ;;  %v5550_v31 = vmul.f32 1.442695, %v5517_v23 }
 0xb4b   : > { %v5554_v50 = vmul.f32 1.442695, %v5519_v52 }
 0xb4c   : > { %v5443_v17 = vpop.xlane.xlu1 %5442  ;;  %v5440_v47 = vpop.xlane.xlu0 %5439  ;;  %5508 = vmax.xlane.f32.xlu1 %v5507_v56 }
 0xb4d   : > { %9222 = vpow2.f32 %v5554_v50  ;;  %v5523_v20 = vsub.f32 %v12448_v27, %v5443_v17  ;;  %v5522_v29 = vsub.f32 %v12440_v46, %v5440_v47 }
 0xb4e   : > { %9224 = vpow2.f32 %v5550_v31 }
 0xb4f   : > { %v5562_v62 = vmul.f32 1.442695, %v5523_v20  ;;  %v5560_v45 = vmul.f32 1.442695, %v5522_v29 }
 0xb50   : > { %v5437_v37 = vpop.xlane.xlu1 %5436  ;;  %v5434_v16 = vpop.xlane.xlu0 %5433 }
 0xb51   : > { %v5521_v21 = vsub.f32 %v12453_v42, %v5437_v37  ;;  %v5520_v51 = vsub.f32 %v12451_v53, %v5434_v16  ;;  %9226 = vpow2.f32 %v5560_v45 }
 0xb52   : > { %v12633_v4 = vpop.eup %9218  ;;  %9228 = vpow2.f32 %v5562_v62 }
 0xb53   : > { %v5558_v7 = vmul.f32 1.442695, %v5521_v21  ;;  %v5556_v23 = vmul.f32 1.442695, %v5520_v51  ;;  %v5618_v27 = vsel %vm1752_vm2, %v12633_v4, 0.0 }
 0xb54   : > { %5619 = vadd.xlane.f32.xlu0 %v5618_v27 }
 0xb55   : > { %9230 = vpow2.f32 %v5556_v23 }
 0xb56   : > { %v12637_v46 = vpop.eup %9220  ;;  %9232 = vpow2.f32 %v5558_v7 }
 0xb57   : > { %v5612_v44 = vsel %vm1752_vm2, %v12637_v46, 0.0 }
 0xb58   : > { %5613 = vadd.xlane.f32.xlu0 %v5612_v44 }
 0xb5a   : > { %v12641_v42 = vpop.eup %9222 }
 0xb5b   : > { %v5621_v53 = vsel %vm1752_vm2, %v12641_v42, 0.0  ;;  %v12645_v60 = vpop.eup %9224 }
 0xb5c   : > { %5622 = vadd.xlane.f32.xlu1 %v5621_v53  ;;  %v5615_v31 = vsel %vm1752_vm2, %v12645_v60, 0.0 }
 0xb5e   : > { %v12647_v52 = vpop.eup %9226 }
 0xb5f   : > { %v12651_v50 = vpop.eup %9228  ;;  %v5630_v17 = vsel %vm1752_vm2, %v12647_v52, 0.0 }
 0xb60   : > { %5616 = vadd.xlane.f32.xlu1 %v5615_v31  ;;  %5631 = vadd.xlane.f32.xlu0 %v5630_v17  ;;  %v5633_v47 = vsel %vm1752_vm2, %v12651_v50, 0.0 }
 0xb62   : > { %v12655_v56 = vpop.eup %9230 }
 0xb63   : > { %v12659_v20 = vpop.eup %9232  ;;  %v5624_v29 = vsel %vm1752_vm2, %v12655_v56, 0.0 }
 0xb64   : > { %5634 = vadd.xlane.f32.xlu1 %v5633_v47  ;;  %5625 = vadd.xlane.f32.xlu0 %v5624_v29  ;;  %v5627_v62 = vsel %vm1752_vm2, %v12659_v20, 0.0 }
 0xb68   : > { %5628 = vadd.xlane.f32.xlu1 %v5627_v62 }
 0xb74   : > { %v5452_v45 = vpop.xlane.xlu0 %5451 }
 0xb75   : > { %v5526_v37 = vsub.f32 %v12477_v14, %v5452_v45 }
 0xb77   : > { %v5568_v16 = vmul.f32 1.442695, %v5526_v37 }
 0xb78   : > { %v5455_v21 = vpop.xlane.xlu1 %5454  ;;  %v5446_v51 = vpop.xlane.xlu0 %5445 }
 0xb79   : > { %9234 = vpow2.f32 %v5568_v16  ;;  %v5527_v7 = vsub.f32 %v12487_v34, %v5455_v21  ;;  %v5524_v23 = vsub.f32 %v12483_v30, %v5446_v51 }
 0xb7b   : > { %v5564_v27 = vmul.f32 1.442695, %v5524_v23  ;;  %v5570_v44 = vmul.f32 1.442695, %v5527_v7 }
 0xb7c   : > { %v5449_v53 = vpop.xlane.xlu1 %5448  ;;  %v5464_v31 = vpop.xlane.xlu0 %5463 }
 0xb7d   : > { %v5525_v17 = vsub.f32 %v12493_v57, %v5449_v53  ;;  %v5530_v47 = vsub.f32 %v12499_v48, %v5464_v31  ;;  %9236 = vpow2.f32 %v5564_v27 }
 0xb7e   : > { %9238 = vpow2.f32 %v5570_v44 }
 0xb7f   : > { %v5576_v29 = vmul.f32 1.442695, %v5530_v47  ;;  %v5566_v14 = vmul.f32 1.442695, %v5525_v17 }
 0xb80   : > { %v5467_v62 = vpop.xlane.xlu1 %5466  ;;  %v5458_v45 = vpop.xlane.xlu0 %5457 }
 0xb81   : > { %v5531_v37 = vsub.f32 %v12513_v41, %v5467_v62  ;;  %v5528_v34 = vsub.f32 %v12508_v6, %v5458_v45  ;;  %9240 = vpow2.f32 %v5576_v29 }
 0xb82   : > { %9242 = vpow2.f32 %v5566_v14 }
 0xb83   : > { %v5572_v30 = vmul.f32 1.442695, %v5528_v34  ;;  %v5578_v16 = vmul.f32 1.442695, %v5531_v37 }
 0xb84   : > { %v5461_v21 = vpop.xlane.xlu1 %5460  ;;  %v5476_v51 = vpop.xlane.xlu0 %5475 }
 0xb85   : > { %v5529_v57 = vsub.f32 %v12524_v25, %v5461_v21  ;;  %v5534_v48 = vsub.f32 %v12520_v61, %v5476_v51  ;;  %9244 = vpow2.f32 %v5572_v30 }
 0xb86   : > { %v12674_v7 = vpop.eup %9234  ;;  %9246 = vpow2.f32 %v5578_v16 }
 0xb87   : > { %v5574_v23 = vmul.f32 1.442695, %v5529_v57  ;;  %v5642_v27 = vsel %vm1752_vm2, %v12674_v7, 0.0  ;;  %v5584_v41 = vmul.f32 1.442695, %v5534_v48 }
 0xb88   : > { %v5479_v6 = vpop.xlane.xlu1 %5478  ;;  %5643 = vadd.xlane.f32.xlu1 %v5642_v27  ;;  %v5470_v44 = vpop.xlane.xlu0 %5469 }
 0xb89   : > { %9248 = vpow2.f32 %v5574_v23  ;;  %v5535_v53 = vsub.f32 %v12532_v9, %v5479_v6  ;;  %v5532_v31 = vsub.f32 %v12529_v12, %v5470_v44 }
 0xb8a   : > { %v12680_v25 = vpop.eup %9236  ;;  %9250 = vpow2.f32 %v5584_v41 }
 0xb8b   : > { %v5580_v61 = vmul.f32 1.442695, %v5532_v31  ;;  %v5586_v17 = vmul.f32 1.442695, %v5535_v53  ;;  %v5636_v29 = vsel %vm1752_vm2, %v12680_v25, 0.0  ;;  %v12684_v62 = vpop.eup %9238 }
 0xb8c   : > { %v5473_v47 = vpop.xlane.xlu1 %5472  ;;  %v5488_v14 = vpop.xlane.xlu0 %5487  ;;  %5637 = vadd.xlane.f32.xlu1 %v5636_v29  ;;  %v5645_v16 = vsel %vm1752_vm2, %v12684_v62, 0.0 }
 0xb8d   : > { %v5533_v45 = vsub.f32 %v12541_v59, %v5473_v47  ;;  %v5538_v37 = vsub.f32 %v12545_v8, %v5488_v14  ;;  %9252 = vpow2.f32 %v5580_v61 }
 0xb8e   : > { %v12688_v9 = vpop.eup %9240  ;;  %9254 = vpow2.f32 %v5586_v17 }
 0xb8f   : > { %v5592_v12 = vmul.f32 1.442695, %v5538_v37  ;;  %v5582_v34 = vmul.f32 1.442695, %v5533_v45  ;;  %v5654_v21 = vsel %vm1752_vm2, %v12688_v9, 0.0  ;;  %v12694_v57 = vpop.eup %9242 }
 0xb90   : > { %v5491_v30 = vpop.xlane.xlu1 %5490  ;;  %v5482_v51 = vpop.xlane.xlu0 %5481  ;;  %5646 = vadd.xlane.f32.xlu1 %v5645_v16  ;;  %5655 = vadd.xlane.f32.xlu0 %v5654_v21  ;;  %v5639_v6 = vsel %vm1752_vm2, %v12694_v57, 0.0 }
 0xb91   : > { %v5539_v59 = vsub.f32 %v12557_v2, %v5491_v30  ;;  %v5536_v8 = vsub.f32 %v12555_v36, %v5482_v51  ;;  %9256 = vpow2.f32 %v5592_v12 }
 0xb92   : > { %v12698_v48 = vpop.eup %9244  ;;  %9258 = vpow2.f32 %v5582_v34 }
 0xb93   : > { %v5588_v23 = vmul.f32 1.442695, %v5536_v8  ;;  %v5594_v27 = vmul.f32 1.442695, %v5539_v59  ;;  %v5648_v44 = vsel %vm1752_vm2, %v12698_v48, 0.0  ;;  %v12704_v31 = vpop.eup %9246 }
 0xb94   : > { %v5485_v41 = vpop.xlane.xlu1 %5484  ;;  %v5500_v53 = vpop.xlane.xlu0 %5499  ;;  %5640 = vadd.xlane.f32.xlu1 %v5639_v6  ;;  %5649 = vadd.xlane.f32.xlu0 %v5648_v44  ;;  %v5657_v45 = vsel %vm1752_vm2, %v12704_v31, 0.0 }
 0xb95   : > { %v5537_v2 = vsub.f32 %v12565_v5, %v5485_v41  ;;  %v5542_v36 = vsub.f32 %v12571_v0, %v5500_v53  ;;  %9260 = vpow2.f32 %v5588_v23 }
 0xb96   : > { %v12708_v61 = vpop.eup %9248  ;;  %9262 = vpow2.f32 %v5594_v27 }
 0xb97   : > { %v5600_v17 = vmul.f32 1.442695, %v5542_v36  ;;  %v5651_v47 = vsel %vm1752_vm2, %v12708_v61, 0.0  ;;  %v5590_v29 = vmul.f32 1.442695, %v5537_v2  ;;  %v12714_v12 = vpop.eup %9250 }
 0xb98   : > { %v5503_v14 = vpop.xlane.xlu1 %5502  ;;  %v5494_v37 = vpop.xlane.xlu0 %5493  ;;  %5652 = vadd.xlane.f32.xlu1 %v5651_v47  ;;  %5658 = vadd.xlane.f32.xlu0 %v5657_v45  ;;  %v5666_v51 = vsel %vm1752_vm2, %v12714_v12, 0.0 }
 0xb99   : > { %v5543_v5 = vsub.f32 %v12583_v43, %v5503_v14  ;;  %v5540_v0 = vsub.f32 %v12579_v18, %v5494_v37  ;;  %9264 = vpow2.f32 %v5600_v17 }
 0xb9a   : > { %v12718_v34 = vpop.eup %9252  ;;  %9266 = vpow2.f32 %v5590_v29 }
 0xb9b   : > { %v5596_v30 = vmul.f32 1.442695, %v5540_v0  ;;  %v5602_v16 = vmul.f32 1.442695, %v5543_v5  ;;  %v5660_v59 = vsel %vm1752_vm2, %v12718_v34, 0.0  ;;  %v12724_v23 = vpop.eup %9254 }
 0xb9c   : > { %v5497_v21 = vpop.xlane.xlu1 %5496  ;;  %v5512_v8 = vpop.xlane.xlu0 %5511  ;;  %5667 = vadd.xlane.f32.xlu0 %v5666_v51  ;;  %5661 = vadd.xlane.f32.xlu1 %v5660_v59  ;;  %v5669_v44 = vsel %vm1752_vm2, %v12724_v23, 0.0 }
 0xb9d   : > { %v5541_v43 = vsub.f32 %v12591_v24, %v5497_v21  ;;  %v5546_v18 = vsub.f32 %v12595_v15, %v5512_v8  ;;  %9268 = vpow2.f32 %v5596_v30 }
 0xb9e   : > { %v12728_v27 = vpop.eup %9256  ;;  %9270 = vpow2.f32 %v5602_v16 }
 0xb9f   : > { %v5608_v41 = vmul.f32 1.442695, %v5546_v18  ;;  %v5598_v6 = vmul.f32 1.442695, %v5541_v43  ;;  %v5678_v53 = vsel %vm1752_vm2, %v12728_v27, 0.0  ;;  %v12734_v36 = vpop.eup %9258 }
 0xba0   : > { %v5506_v2 = vpop.xlane.xlu0 %5505  ;;  %5670 = vadd.xlane.f32.xlu0 %v5669_v44  ;;  %5679 = vadd.xlane.f32.xlu1 %v5678_v53  ;;  %v5663_v47 = vsel %vm1752_vm2, %v12734_v36, 0.0  ;;  %v12779_v44 = vpop.permute.xlu1 %5966 }
 0xba1   : > { %v5544_v24 = vsub.f32 %v12601_v40, %v5506_v2  ;;  %9272 = vpow2.f32 %v5608_v41 }
 0xba2   : > { %v12737_v15 = vpop.eup %9260  ;;  %9274 = vpow2.f32 %v5598_v6 }
 0xba3   : > { %v5604_v17 = vmul.f32 1.442695, %v5544_v24  ;;  %v5672_v29 = vsel %vm1752_vm2, %v12737_v15, 0.0  ;;  %v12743_v14 = vpop.eup %9262  ;;  %v13856_v24 = vld [vmem:[#allocation49_spill] sm:$0xff] }
 0xba4   : > { %5664 = vadd.xlane.f32.xlu0 %v5663_v47  ;;  %5673 = vadd.xlane.f32.xlu1 %v5672_v29  ;;  %v5681_v40 = vsel %vm1752_vm2, %v12743_v14, 0.0 }
 0xba5   : > { %9276 = vpow2.f32 %v5604_v17  ;;  %v13857_v17 = vld [vmem:[#allocation38_spill] sm:$0xff] }
 0xba6   : > { %v12745_v45 = vpop.eup %9264  ;;  %v13858_v47 = vpack.i.bf16 %v13856_v24, %v13857_v17 }
 0xba7   : > { %v5690_v37 = vsel %vm1752_vm2, %v12745_v45, 0.0  ;;  %v12751_v5 = vpop.eup %9266 }
 0xba8   : > { %5682 = vadd.xlane.f32.xlu0 %v5681_v40  ;;  %5691 = vadd.xlane.f32.xlu1 %v5690_v37  ;;  %v5675_v30 = vsel %vm1752_vm2, %v12751_v5, 0.0  ;;  %v5969_v37 = vpop.permute.xlu0 %5968 }
 0xbaa   : > { %v12753_v0 = vpop.eup %9268 }
 0xbab   : > { %v5684_v16 = vsel %vm1752_vm2, %v12753_v0, 0.0  ;;  %v12759_v21 = vpop.eup %9270 }
 0xbac   : > { %5676 = vadd.xlane.f32.xlu0 %v5675_v30  ;;  %5685 = vadd.xlane.f32.xlu1 %v5684_v16  ;;  %v5693_v59 = vsel %vm1752_vm2, %v12759_v21, 0.0  ;;  %v13861_v30 = vld [vmem:[#allocation88_spill] sm:$0xff] }
 0xbae   : > { %v12761_v51 = vpop.eup %9272 }
 0xbaf   : > { %v5702_v8 = vsel %vm1752_vm2, %v12761_v51, 0.0  ;;  %v12767_v43 = vpop.eup %9274 }
 0xbb0   : > { %5694 = vadd.xlane.f32.xlu0 %v5693_v59  ;;  %5703 = vadd.xlane.f32.xlu1 %v5702_v8  ;;  %v5687_v6 = vsel %vm1752_vm2, %v12767_v43, 0.0  ;;  %v13863_v59 = vpack.i.bf16 %v12307_v11, %v12303_v55  ;;  %v13864_v8 = vld [vmem:[#allocation95_spill] sm:$0xff]  ;;  %v13867_v55 = vpack.i.bf16 %v12319_v22, %v12315_v10  ;;  %v13871_v10 = vpack.i.bf16 %v12331_v33, %v12327_v13 }
 0xbb2   : > { %v12769_v18 = vpop.eup %9276 }
 0xbb3   : > { %v5696_v41 = vsel %vm1752_vm2, %v12769_v18, 0.0 }
 0xbb4   : > { %5688 = vadd.xlane.f32.xlu0 %v5687_v6  ;;  %5697 = vadd.xlane.f32.xlu1 %v5696_v41  ;;  %v13865_v41 = vld [vmem:[#allocation94_spill] sm:$0xff] }
 0xbb5   : > { %v13866_v6 = vpack.i.bf16 %v13864_v8, %v13865_v41 }
 0xbc5   : > { %6059 = vrot.lane.b32.xlu1 %v10090_v58, %s9396_s21 }
 0xbc9   : > { %6057 = vrot.lane.b32.xlu1 %v13811_v1, %s9396_s21  ;;  %v13859_v1 = vpack.i.bf16 %v12295_v39, %v12290_v32 }
 0xbcd   : > { %6055 = vrot.lane.b32.xlu1 %v10096_v19, %s9396_s21 }
 0xbd1   : > { %v5515_v53 = vpop.xlane.xlu1 %5514  ;;  %8532 = vrot.lane.b32.xlu1 %v13858_v47, %s9397_s28 }
 0xbd2   : > { %v5547_v2 = vsub.f32 %v12616_v38, %v5515_v53  ;;  %v13860_v38 = vld [vmem:[#allocation91_spill] sm:$0xff] }
 0xbd3   : > { %v13862_v16 = vpack.i.bf16 %v13860_v38, %v13861_v30  ;;  %v13872_v38 = vld [vmem:[#allocation102_spill] sm:$0xff]  ;;  %v13873_v30 = vld [vmem:[#allocation100_spill] sm:$0xff] }
 0xbd4   : > { %v5610_v29 = vmul.f32 1.442695, %v5547_v2 }
 0xbd5   : > { %v5509_v40 = vpop.xlane.xlu1 %5508  ;;  %8542 = vrot.lane.b32.xlu1 %v13859_v1, %s9398_s26 }
 0xbd6   : > { %9278 = vpow2.f32 %v5610_v29  ;;  %v5545_v58 = vsub.f32 %v12622_v3, %v5509_v40  ;;  %v13868_v29 = vld [vmem:[#allocation98_spill] sm:$0xff] }
 0xbd7   : > { %v13869_v40 = vld [vmem:[#allocation34_spill] sm:$0xff] }
 0xbd8   : > { %v5606_v19 = vmul.f32 1.442695, %v5545_v58  ;;  %v13870_v58 = vpack.i.bf16 %v13868_v29, %v13869_v40 }
 0xbd9   : > { %8552 = vrot.lane.b32.xlu1 %v13862_v16, %s9397_s28  ;;  %v13874_v16 = vpack.i.bf16 %v13872_v38, %v13873_v30 }
 0xbda   : > { %9280 = vpow2.f32 %v5606_v19 }
 0xbdd   : > { %8562 = vrot.lane.b32.xlu1 %v13863_v59, %s9398_s26  ;;  %v5620_v3 = vpop.xlane.xlu0 %5619 }
 0xbe1   : > { %8572 = vrot.lane.b32.xlu1 %v13866_v6, %s9397_s28  ;;  %v5614_v39 = vpop.xlane.xlu0 %5613 }
 0xbe3   : > { %v12805_v32 = vpop.eup %9278 }
 0xbe4   : > { %v5705_v2 = vsel %vm1752_vm2, %v12805_v32, 0.0 }
 0xbe5   : > { %v5623_v53 = vpop.xlane.xlu1 %5622  ;;  %5706 = vadd.xlane.f32.xlu0 %v5705_v2  ;;  %8582 = vrot.lane.b32.xlu1 %v13867_v55, %s9398_s26 }
 0xbe6   : > { %9282 = vrcp.f32 %v5623_v53 }
 0xbe7   : > { %v12813_v11 = vpop.eup %9280  ;;  %9284 = vrcp.f32 %v5614_v39 }
 0xbe8   : > { %9286 = vrcp.f32 %v5620_v3  ;;  %v5699_v17 = vsel %vm1752_vm2, %v12813_v11, 0.0 }
 0xbe9   : > { %v5617_v24 = vpop.xlane.xlu1 %5616  ;;  %5700 = vadd.xlane.f32.xlu0 %v5699_v17  ;;  %v5632_v47 = vpop.xlane.xlu0 %5631  ;;  %8592 = vrot.lane.b32.xlu1 %v13870_v58, %s9397_s28  ;;  %v13876_v58 = vld [vmem:[#allocation42_spill] sm:$0xff] }
 0xbea   : > { %9288 = vrcp.f32 %v5617_v24 }
 0xbed   : > { %v5635_v1 = vpop.xlane.xlu1 %5634  ;;  %v5626_v19 = vpop.xlane.xlu0 %5625  ;;  %8602 = vrot.lane.b32.xlu1 %v13871_v10, %s9398_s26  ;;  %v13885_v10 = vld [vmem:[#allocation96_spill] sm:$0xff] }
 0xbee   : > { %9290 = vrcp.f32 %v5635_v1 }
 0xbef   : > { %9292 = vrcp.f32 %v5626_v19  ;;  %v13884_v19 = vld [vmem:[#allocation93_spill] sm:$0xff] }
 0xbf0   : > { %9294 = vrcp.f32 %v5632_v47 }
 0xbf1   : > { %v5629_v22 = vpop.xlane.xlu1 %5628  ;;  %8612 = vrot.lane.b32.xlu1 %v13874_v16, %s9397_s28 }
 0xbf2   : > { %9296 = vrcp.f32 %v5629_v22  ;;  %v13886_v22 = vpack.i.bf16 %v13884_v19, %v13885_v10 }
 0xbf3   : > { %v9283_v59 = vpop.eup %9282 }
 0xbf4   : > { %v9285_v3 = vpop.eup %9284  ;;  %v5743_v6 = vmul.f32 %v9283_v59, %v12641_v42  ;;  %v13890_v59 = vld [vmem:[#allocation99_spill] sm:$0xff] }
 0xbf5   : > { %v9287_v8 = vpop.eup %9286  ;;  %v5740_v39 = vmul.f32 %v9285_v3, %v12637_v46  ;;  %v13891_v3 = vld [vmem:[#allocation97_spill] sm:$0xff] }
 0xbf6   : > { %v5742_v33 = vmul.f32 %v9287_v8, %v12633_v4  ;;  %v13892_v8 = vpack.i.bf16 %v13890_v59, %v13891_v3 }
 0xbf7   : > { %v9289_v41 = vpop.eup %9288 }
 0xbf8   : > { %v5741_v13 = vmul.f32 %v9289_v41, %v12645_v60  ;;  %v5773_v2 = vpack.c.bf16 %v5743_v6, %v5742_v33  ;;  %v13893_v6 = vld [vmem:[#allocation45_spill] sm:$0xff] }
 0xbfa   : > { %v5772_v53 = vpack.c.bf16 %v5741_v13, %v5740_v39  ;;  %v13894_v39 = vld [vmem:[#allocation53_spill] sm:$0xff] }
 0xbfb   : > { %v9291_v55 = vpop.eup %9290  ;;  %v13895_v13 = vpack.i.bf16 %v13893_v6, %v13894_v39 }
 0xbfc   : > { %8316 = vmatprep.mubr.msk.bf16.mxu1 %vm1752_vm2, %v5772_v53  ;;  %v9293_v24 = vpop.eup %9292  ;;  %v5747_v46 = vmul.f32 %v9291_v55, %v12651_v50  ;;  %v13897_v55 = vld [vmem:[#allocation101_spill] sm:$0xff] }
 0xbfd   : > { %8317 = vmatmul.mubr.msk.bf16.vlgmr.msra.gmra.mxu1 %vm1752_vm2, %v5773_v2  ;;  %v9295_v17 = vpop.eup %9294  ;;  %v5744_v4 = vmul.f32 %v9293_v24, %v12655_v56  ;;  %v13882_v56 = vld [vmem:[#allocation43_spill] sm:$0xff] }
 0xbfe   : > { %8341 = vmatpush3.bf16.msra.mxu1 %v12286_v63  ;;  %v5746_v60 = vmul.f32 %v9295_v17, %v12647_v52  ;;  %v13875_v63 = vld [vmem:[#allocation90_spill] sm:$0xff]  ;;  %v13880_v52 = vld [vmem:[#allocation89_spill] sm:$0xff]  ;;  %v13896_v2 = vld [vmem:[#allocation103_spill] sm:$0xff] }
 0xbff   : > { %v9297_v47 = vpop.eup %9296  ;;  %8342 = vmatprep.subr.bf16.mxu1 %v12614_v54  ;;  %6061 = vrot.lane.b32.xlu0 %v10079_v49, %s9396_s21  ;;  %v13877_v1 = vpack.i.bf16 %v13875_v63, %v13876_v58  ;;  %v13878_v49 = vpack.i.bf16 %v12299_v28, %v12292_v35  ;;  %v13887_v28 = vld [vmem:[#allocation46_spill] sm:$0xff]  ;;  %v13898_v24 = vpack.i.bf16 %v13896_v2, %v13897_v55 }
 0xc00   : > { %v5745_v42 = vmul.f32 %v9297_v47, %v12659_v20  ;;  %v5775_v40 = vpack.c.bf16 %v5747_v46, %v5746_v60  ;;  %v13883_v20 = vpack.i.bf16 %v12311_v26, %v13882_v56 }
 0xc02   : > { %8343 = vmatpush3.bf16.msra.mxu1 %v12614_v54  ;;  %v5774_v29 = vpack.c.bf16 %v5745_v42, %v5744_v4  ;;  %v13879_v54 = vld [vmem:[#allocation92_spill] sm:$0xff] }
 0xc03   : > { %8344 = vmatprep.subr.bf16.mxu1 %v5969_v37  ;;  %8527 = vrot.lane.b32.xlu0 %v13877_v1, %s9397_s28  ;;  %v13881_v50 = vpack.i.bf16 %v13879_v54, %v13880_v52 }
 0xc04   : > { %8320 = vmatprep.mubr.msk.bf16.mxu1 %vm1752_vm2, %v5774_v29 }
 0xc05   : > { %8321 = vmatmul.mubr.msk.bf16.gmra.mxu1 %vm1752_vm2, %v5775_v40 }
 0xc06   : > { %8345 = vmatpush3.bf16.msra.mxu1 %v5969_v37 }
 0xc07   : > { %8346 = vmatprep.subr.bf16.mxu1 %v12779_v44  ;;  %8537 = vrot.lane.b32.xlu0 %v13878_v49, %s9398_s26 }
 0xc0a   : > { %8347 = vmatpush3.bf16.msra.mxu1 %v12779_v44  ;;  %v13888_v44 = vld [vmem:[#allocation51_spill] sm:$0xff] }
 0xc0b   : > { %8547 = vrot.lane.b32.xlu0 %v13881_v50, %s9397_s28  ;;  %v13889_v38 = vpack.i.bf16 %v13887_v28, %v13888_v44 }
 0xc0f   : > { %8557 = vrot.lane.b32.xlu0 %v13883_v20, %s9398_s26 }
 0xc11   : > { %v5644_v37 = vpop.xlane.xlu1 %5643 }
 0xc13   : > { %8567 = vrot.lane.b32.xlu0 %v13886_v22, %s9397_s28 }
 0xc15   : > { %v5638_v35 = vpop.xlane.xlu1 %5637 }
 0xc17   : > { %8577 = vrot.lane.b32.xlu0 %v13889_v38, %s9398_s26 }
 0xc19   : > { %v5647_v30 = vpop.xlane.xlu1 %5646  ;;  %v5656_v16 = vpop.xlane.xlu0 %5655 }
 0xc1a   : > { %9298 = vrcp.f32 %v5647_v30 }
 0xc1b   : > { %8587 = vrot.lane.b32.xlu0 %v13892_v8, %s9397_s28  ;;  %9300 = vrcp.f32 %v5638_v35 }
 0xc1c   : > { %9302 = vrcp.f32 %v5644_v37 }
 0xc1d   : > { %v5641_v26 = vpop.xlane.xlu1 %5640  ;;  %v5650_v41 = vpop.xlane.xlu0 %5649 }
 0xc1e   : > { %9304 = vrcp.f32 %v5641_v26 }
 0xc1f   : > { %8597 = vrot.lane.b32.xlu0 %v13895_v13, %s9398_s26  ;;  %9306 = vrcp.f32 %v5650_v41 }
 0xc21   : > { %v5653_v33 = vpop.xlane.xlu1 %5652  ;;  %v5659_v53 = vpop.xlane.xlu0 %5658 }
 0xc22   : > { %9308 = vrcp.f32 %v5653_v33 }
 0xc23   : > { %8607 = vrot.lane.b32.xlu0 %v13898_v24, %s9397_s28  ;;  %9310 = vrcp.f32 %v5659_v53 }
 0xc24   : > { %9312 = vrcp.f32 %v5656_v16 }
 0xc25   : > { %v5662_v17 = vpop.xlane.xlu1 %5661  ;;  %v5668_v47 = vpop.xlane.xlu0 %5667 }
 0xc27   : > { %v9299_v46 = vpop.eup %9298 }
 0xc28   : > { %v9301_v4 = vpop.eup %9300  ;;  %v5751_v63 = vmul.f32 %v9299_v46, %v12684_v62 }
 0xc29   : > { %v5680_v42 = vpop.xlane.xlu1 %5679  ;;  %v5671_v60 = vpop.xlane.xlu0 %5670  ;;  %v5748_v58 = vmul.f32 %v9301_v4, %v12680_v25 }
 0xc2a   : > { %v9303_v29 = vpop.eup %9302  ;;  %9314 = vrcp.f32 %v5671_v60 }
 0xc2b   : > { %v9305_v40 = vpop.eup %9304  ;;  %v5750_v54 = vmul.f32 %v9303_v29, %v12674_v7  ;;  %9316 = vrcp.f32 %v5662_v17 }
 0xc2c   : > { %v5749_v1 = vmul.f32 %v9305_v40, %v12694_v57  ;;  %v9307_v49 = vpop.eup %9306  ;;  %9318 = vrcp.f32 %v5668_v47 }
 0xc2d   : > { %v5674_v52 = vpop.xlane.xlu1 %5673  ;;  %v5665_v50 = vpop.xlane.xlu0 %5664  ;;  %v5777_v37 = vpack.c.bf16 %v5751_v63, %v5750_v54  ;;  %v5752_v62 = vmul.f32 %v9307_v49, %v12698_v48 }
 0xc2e   : > { %v5776_v56 = vpack.c.bf16 %v5749_v1, %v5748_v58  ;;  %9320 = vrcp.f32 %v5665_v50 }
 0xc2f   : > { %v9309_v20 = vpop.eup %9308 }
 0xc30   : > { %v9311_v19 = vpop.eup %9310  ;;  %8332 = vmatprep.mubr.msk.bf16.mxu0 %vm1752_vm2, %v5776_v56  ;;  %v5753_v25 = vmul.f32 %v9309_v20, %v12708_v61  ;;  %v13899_v20 = vld [vmem:[#allocation74_spill] sm:$0xff] }
 0xc31   : > { %8333 = vmatmul.mubr.msk.bf16.vlgmr.msra.gmra.mxu0 %vm1752_vm2, %v5777_v37  ;;  %v12892_v57 = vpop.xlane.xlu1 %5691  ;;  %v5683_v7 = vpop.xlane.xlu0 %5682  ;;  %v5755_v35 = vmul.f32 %v9311_v19, %v12704_v31 }
 0xc32   : > { %v9313_v10 = vpop.eup %9312  ;;  %v5778_v22 = vpack.c.bf16 %v5753_v25, %v5752_v62  ;;  %9322 = vrcp.f32 %v5683_v7 }
 0xc33   : > { %9324 = vrcp.f32 %v5674_v52  ;;  %v5754_v38 = vmul.f32 %v9313_v10, %v12688_v9 }
 0xc34   : > { %8336 = vmatprep.mubr.msk.bf16.mxu0 %vm1752_vm2, %v5778_v22  ;;  %9326 = vrcp.f32 %v5680_v42 }
 0xc35   : > { %v5686_v28 = vpop.xlane.xlu1 %5685  ;;  %v5677_v44 = vpop.xlane.xlu0 %5676  ;;  %v5779_v48 = vpack.c.bf16 %v5755_v35, %v5754_v38 }
 0xc36   : > { %9328 = vrcp.f32 %v5677_v44  ;;  %v13901_v44 = vld [vmem:[#allocation78_spill] sm:$0xff] }
 0xc37   : > { %v9315_v61 = vpop.eup %9314  ;;  %9330 = vrcp.f32 %v5686_v28 }
 0xc38   : > { %v9317_v59 = vpop.eup %9316  ;;  %v5759_v8 = vmul.f32 %v9315_v61, %v12724_v23 }
 0xc39   : > { %v12897_v30 = vpop.xlane.xlu1 %5703  ;;  %8337 = vmatmul.mubr.msk.bf16.gmra.mxu0 %vm1752_vm2, %v5779_v48  ;;  %v12900_v16 = vpop.xlane.xlu0 %5694  ;;  %v5756_v9 = vmul.f32 %v9317_v59, %v12718_v34  ;;  %v13902_v48 = vld [vmem:[#allocation76_spill] sm:$0xff] }
 0xc3a   : > { %v9319_v31 = vpop.eup %9318 }
 0xc3b   : > { %v9321_v3 = vpop.eup %9320  ;;  %v5758_v39 = vmul.f32 %v9319_v31, %v12714_v12 }
 0xc3c   : > { %v5757_v6 = vmul.f32 %v9321_v3, %v12734_v36 }
 0xc3d   : > { %v5698_v26 = vpop.xlane.xlu1 %5697  ;;  %v5689_v41 = vpop.xlane.xlu0 %5688  ;;  %v5781_v33 = vpack.c.bf16 %v5759_v8, %v5758_v39 }
 0xc3e   : > { %9332 = vrcp.f32 %v5689_v41  ;;  %v5780_v13 = vpack.c.bf16 %v5757_v6, %v5756_v9 }
 0xc3f   : > { %v9323_v53 = vpop.eup %9322  ;;  %9334 = vrcp.f32 %v12900_v16 }
 0xc40   : > { %8348 = vmatprep.mubr.msk.bf16.mxu1 %vm1752_vm2, %v5780_v13  ;;  %v9325_v55 = vpop.eup %9324  ;;  %v5763_v17 = vmul.f32 %v9323_v53, %v12743_v14  ;;  %9336 = vrcp.f32 %v12892_v57 }
 0xc41   : > { %v6060_v2 = vpop.permute.xlu1 %6059  ;;  %8349 = vmatmul.mubr.msk.bf16.vlgmr.msra.gmra.mxu1 %vm1752_vm2, %v5781_v33  ;;  %v9327_v23 = vpop.eup %9326  ;;  %v5760_v34 = vmul.f32 %v9325_v55, %v12737_v15 }
 0xc42   : > { %v5762_v12 = vmul.f32 %v9327_v23, %v12728_v27 }
 0xc43   : > { %v9329_v24 = vpop.eup %9328 }
 0xc44   : > { %v5761_v36 = vmul.f32 %v9329_v24, %v12751_v5  ;;  %v5783_v4 = vpack.c.bf16 %v5763_v17, %v5762_v12  ;;  %v9331_v60 = vpop.eup %9330 }
 0xc45   : > { %v6058_v47 = vpop.permute.xlu1 %6057  ;;  %v5764_v14 = vmul.f32 %v9331_v60, %v12753_v0 }
 0xc46   : > { %v5782_v46 = vpack.c.bf16 %v5761_v36, %v5760_v34 }
 0xc48   : > { %8352 = vmatprep.mubr.msk.bf16.mxu1 %vm1752_vm2, %v5782_v46 }
 0xc49   : > { %v6056_v42 = vpop.permute.xlu1 %6055  ;;  %8353 = vmatmul.mubr.msk.bf16.gmra.mxu1 %vm1752_vm2, %v5783_v4 }
 0xc4b   : > { %v9333_v29 = vpop.eup %9332 }
 0xc4c   : > { %v5765_v63 = vmul.f32 %v9333_v29, %v12767_v43  ;;  %v13900_v43 = vld [vmem:[#allocation71_spill] sm:$0xff]  ;;  %v9335_v6 = vpop.eup %9334  ;;  %v13904_v29 = vld [vmem:[#allocation73_spill] sm:$0xff] }
 0xc4d   : > { %v12914_v40 = vpop.permute.xlu1 %8532  ;;  %v9337_v16 = vpop.eup %9336 }
 0xc4e   : > { %v5784_v15 = vpack.c.bf16 %v5765_v63, %v5764_v14  ;;  %v5766_v55 = vmul.f32 %v9337_v16, %v12745_v45 }
 0xc50   : > { %8364 = vmatprep.mubr.msk.bf16.mxu0 %vm1752_vm2, %v5784_v15 }
 0xc51   : > { %v12919_v5 = vpop.permute.xlu1 %8542 }
 0xc55   : > { %v12921_v27 = vpop.permute.xlu1 %8552 }
 0xc59   : > { %v12923_v58 = vpop.permute.xlu1 %8562 }
 0xc5d   : > { %v8573_v1 = vpop.permute.xlu1 %8572 }
 0xc5e   : > { %v8575_v49 = vunpack.i.h.bf16 %v8573_v1  ;;  %v8574_v54 = vunpack.i.l.bf16 %v8573_v1 }
 0xc60   : > { %v6539_v0 = vsel %vm1295_vm1, %v13899_v20, %v8575_v49  ;;  %v6538_v37 = vsel %vm1295_vm1, %v13900_v43, %v8574_v54  ;;  %v13906_v20 = vld [vmem:[#allocation77_spill] sm:$0xff] }
 0xc61   : > { %v8583_v52 = vpop.permute.xlu1 %8582 }
 0xc62   : > { %v8585_v50 = vunpack.i.h.bf16 %v8583_v52  ;;  %v8584_v56 = vunpack.i.l.bf16 %v8583_v52 }
 0xc64   : > { %v12930_v19 = vsel %vm6560_vm3, %v6538_v37, %v8584_v56  ;;  %v12933_v62 = vsel %vm6560_vm3, %v6539_v0, %v8585_v50  ;;  %v13905_v50 = vld [vmem:[#allocation79_spill] sm:$0xff] }
 0xc65   : > { %v8593_v25 = vpop.permute.xlu1 %8592 }
 0xc66   : > { %v8595_v7 = vunpack.i.h.bf16 %v8593_v25  ;;  %v8594_v10 = vunpack.i.l.bf16 %v8593_v25  ;;  %v8768_v25 = vld [vmem:[%s13409_s7 + $0x8] sm:$0xff]  }
 0xc67   : > { %8372 = vmatprep.subr.bf16.mxu1 %v8768_v25 }
 0xc68   : > { %v6543_v38 = vsel %vm1295_vm1, %v13901_v44, %v8595_v7  ;;  %v6542_v61 = vsel %vm1295_vm1, %v13902_v48, %v8594_v10  ;;  %8373 = vmatpush3.bf16.msra.mxu1 %v8768_v25  ;;  %v8769_v7 = vld [vmem:[%s13409_s7] sm:$0xff]  }
 0xc69   : > { %v8603_v22 = vpop.permute.xlu1 %8602  ;;  %8374 = vmatprep.subr.bf16.mxu1 %v8769_v7 }
 0xc6a   : > { %v8605_v35 = vunpack.i.h.bf16 %v8603_v22  ;;  %v8604_v28 = vunpack.i.l.bf16 %v8603_v22 }
 0xc6c   : > { %v12940_v59 = vsel %vm6560_vm3, %v6542_v61, %v8604_v28  ;;  %v12943_v31 = vsel %vm6560_vm3, %v6543_v38, %v8605_v35  ;;  %8375 = vmatpush3.bf16.msra.mxu1 %v8769_v7 }
 0xc6e   : > { %v5707_v3 = vpop.xlane.xlu0 %5706 }
 0xc72   : > { %v5701_v8 = vpop.xlane.xlu0 %5700 }
 0xc73   : > { %9338 = vrcp.f32 %v5701_v8  ;;  %v13908_v8 = vld [vmem:[#allocation36_spill] sm:$0xff] }
 0xc74   : > { %9340 = vrcp.f32 %v5698_v26  ;;  %v5767_v26 = vmul.f32 %v9335_v6, %v12759_v21 }
 0xc75   : > { %9342 = vrcp.f32 %v5707_v3  ;;  %v13907_v3 = vld [vmem:[#allocation41_spill] sm:$0xff] }
 0xc76   : > { %v6062_v41 = vpop.permute.xlu0 %6061  ;;  %9344 = vrcp.f32 %v12897_v30 }
 0xc77   : > { %8356 = vmatprep.subr.bf16.mxu0 %v6062_v41 }
 0xc78   : > { %8357 = vmatpush3.bf16.msra.mxu0 %v6062_v41  ;;  %v13909_v41 = vpack.i.bf16 %v13907_v3, %v13908_v8  ;;  %v13931_v3 = vld [vmem:[#allocation118_spill] sm:$0xff]  ;;  %v13932_v8 = vld [vmem:[#allocation35_spill] sm:$0xff] }
 0xc79   : > { %8358 = vmatprep.subr.bf16.mxu0 %v6060_v2 }
 0xc7a   : > { %v12947_v9 = vpop.permute.xlu0 %8527 }
 0xc7c   : > { %8359 = vmatpush3.bf16.msra.mxu0 %v6060_v2  ;;  %v5785_v2 = vpack.c.bf16 %v5767_v26, %v5766_v55 }
 0xc7d   : > { %8360 = vmatprep.subr.bf16.mxu0 %v6058_v47 }
 0xc7e   : > { %v12950_v39 = vpop.permute.xlu0 %8537 }
 0xc80   : > { %v9339_v13 = vpop.eup %9338  ;;  %8361 = vmatpush3.bf16.msra.mxu0 %v6058_v47 }
 0xc81   : > { %v9341_v57 = vpop.eup %9340  ;;  %8362 = vmatprep.subr.bf16.mxu0 %v6056_v42  ;;  %v5769_v53 = vmul.f32 %v9339_v13, %v12813_v11  ;;  %v13910_v13 = vld [vmem:[#allocation48_spill] sm:$0xff] }
 0xc82   : > { %v12953_v33 = vpop.permute.xlu0 %8547  ;;  %v5768_v30 = vmul.f32 %v9341_v57, %v12769_v18  ;;  %v9343_v23 = vpop.eup %9342  ;;  %v13911_v57 = vld [vmem:[#allocation50_spill] sm:$0xff] }
 0xc83   : > { %v9345_v47 = vpop.eup %9344  ;;  %v5771_v21 = vmul.f32 %v9343_v23, %v12805_v32  ;;  %v13912_v26 = vpack.i.bf16 %v13910_v13, %v13911_v57  ;;  %v13934_v13 = vld [vmem:[#allocation37_spill] sm:$0xff]  ;;  %v13935_v57 = vld [vmem:[#allocation39_spill] sm:$0xff] }
 0xc84   : > { %8363 = vmatpush3.bf16.msra.mxu0 %v6056_v42  ;;  %v5786_v17 = vpack.c.bf16 %v5769_v53, %v5768_v30  ;;  %v5770_v11 = vmul.f32 %v9345_v47, %v12761_v51  ;;  %v13903_v42 = vld [vmem:[#allocation75_spill] sm:$0xff]  ;;  %v13913_v30 = vld [vmem:[#allocation106_spill] sm:$0xff]  ;;  %v13917_v47 = vld [vmem:[#allocation105_spill] sm:$0xff] }
 0xc86   : > { %v12958_v24 = vpop.permute.xlu0 %8557  ;;  %v5787_v12 = vpack.c.bf16 %v5771_v21, %v5770_v11 }
 0xc87   : > { %8365 = vmatmul.mubr.msk.bf16.vlgmr.msra.gmra.mxu0 %vm1752_vm2, %v5785_v2  ;;  %v13914_v2 = vld [vmem:[#allocation104_spill] sm:$0xff] }
 0xc88   : > { %8368 = vmatprep.mubr.msk.bf16.mxu0 %vm1752_vm2, %v5786_v17  ;;  %v13915_v23 = vpack.i.bf16 %v13913_v30, %v13914_v2  ;;  %v13916_v17 = vld [vmem:[#allocation108_spill] sm:$0xff]  ;;  %v13937_v30 = vld [vmem:[#allocation114_spill] sm:$0xff] }
 0xc89   : > { %v13918_v21 = vpack.i.bf16 %v13916_v17, %v13917_v47  ;;  %v13938_v2 = vld [vmem:[#allocation112_spill] sm:$0xff]  ;;  %v13940_v17 = vld [vmem:[#allocation115_spill] sm:$0xff]  ;;  %v13941_v47 = vld [vmem:[#allocation113_spill] sm:$0xff] }
 0xc8a   : > { %v8568_v34 = vpop.permute.xlu0 %8567 }
 0xc8b   : > { %v8570_v36 = vunpack.i.h.bf16 %v8568_v34  ;;  %v8569_v45 = vunpack.i.l.bf16 %v8568_v34 }
 0xc8d   : > { %v6537_v60 = vsel %vm1295_vm1, %v13903_v42, %v8570_v36  ;;  %v6536_v14 = vsel %vm1295_vm1, %v13904_v29, %v8569_v45  ;;  %v13919_v42 = vld [vmem:[#allocation54_spill] sm:$0xff] }
 0xc8e   : > { %v8578_v46 = vpop.permute.xlu0 %8577 }
 0xc8f   : > { %v8580_v18 = vunpack.i.h.bf16 %v8578_v46  ;;  %v8579_v4 = vunpack.i.l.bf16 %v8578_v46  ;;  %8369 = vmatmul.mubr.msk.bf16.gmra.mxu0 %vm1752_vm2, %v5787_v12 }
 0xc91   : > { %v12970_v63 = vsel %vm6560_vm3, %v6536_v14, %v8579_v4  ;;  %v12973_v32 = vsel %vm6560_vm3, %v6537_v60, %v8580_v18  ;;  %v13920_v60 = vld [vmem:[#allocation44_spill] sm:$0xff] }
 0xc92   : > { %v8588_v51 = vpop.permute.xlu0 %8587  ;;  %v13921_v29 = vpack.i.bf16 %v13919_v42, %v13920_v60  ;;  %v13943_v42 = vld [vmem:[#allocation68_spill] sm:$0xff] }
 0xc93   : > { %v8590_v15 = vunpack.i.h.bf16 %v8588_v51  ;;  %v8589_v1 = vunpack.i.l.bf16 %v8588_v51 }
 0xc95   : > { %v6541_v56 = vsel %vm1295_vm1, %v13905_v50, %v8590_v15  ;;  %v6540_v0 = vsel %vm1295_vm1, %v13906_v20, %v8589_v1  ;;  %v13922_v15 = vld [vmem:[#allocation55_spill] sm:$0xff]  ;;  %v13923_v1 = vld [vmem:[#allocation52_spill] sm:$0xff]  ;;  %v13925_v20 = vld [vmem:[#allocation110_spill] sm:$0xff] }
 0xc96   : > { %v8598_v49 = vpop.permute.xlu0 %8597 }
 0xc97   : > { %v8600_v54 = vunpack.i.h.bf16 %v8598_v49  ;;  %v8599_v52 = vunpack.i.l.bf16 %v8598_v49  ;;  %v13924_v49 = vpack.i.bf16 %v13922_v15, %v13923_v1  ;;  %v13944_v15 = vld [vmem:[#allocation58_spill] sm:$0xff] }
 0xc99   : > { %v12980_v43 = vsel %vm6560_vm3, %v6540_v0, %v8599_v52  ;;  %v12983_v37 = vsel %vm6560_vm3, %v6541_v56, %v8600_v54  ;;  %v13926_v0 = vld [vmem:[#allocation107_spill] sm:$0xff] }
 0xc9a   : > { %v13927_v25 = vpack.i.bf16 %v13925_v20, %v13926_v0 }
 0xcbd   : > { %v8318_v10 = vpop.f32.mrf.mxu1 }
 0xcbf   : > { %v5846_v22 = vpop.f32.mrf.mxu1 }
 0xcc1   : > { %v8319_v35 = vpop.f32.mrf.mxu1 }
 0xcc2   : > { %v8616_v28 = vpack.i.bf16 %v8319_v35, %v8318_v10  ;;  %v13928_v10 = vld [vmem:[#allocation111_spill] sm:$0xff] }
 0xcc3   : > { %v5849_v44 = vpop.f32.mrf.mxu1 }
 0xcc4   : > { %v8621_v38 = vpack.i.bf16 %v5849_v44, %v5846_v22  ;;  %8617 = vrot.lane.b32.xlu1 %v8616_v28, %s9399_s10  ;;  %v13929_v22 = vld [vmem:[#allocation109_spill] sm:$0xff] }
 0xcc5   : > { %v8322_v48 = vpop.f32.mrf.mxu1  ;;  %v13930_v35 = vpack.i.bf16 %v13928_v10, %v13929_v22 }
 0xcc6   : > { %8622 = vrot.lane.b32.xlu0 %v8621_v38, %s9399_s10 }
 0xcc7   : > { %v5862_v61 = vpop.f32.mrf.mxu1 }
 0xcc8   : > { %8632 = vrot.lane.b32.xlu1 %v13909_v41, %s9398_s26  ;;  %v13933_v41 = vpack.i.bf16 %v13931_v3, %v13932_v8  ;;  %v8564_v3 = vunpack.i.l.bf16 %v12923_v58 }
 0xcc9   : > { %v8323_v6 = vpop.f32.mrf.mxu1 }
 0xcca   : > { %v8636_v16 = vpack.i.bf16 %v8323_v6, %v8322_v48  ;;  %8627 = vrot.lane.b32.xlu0 %v13912_v26, %s9398_s26  ;;  %v13936_v26 = vpack.i.bf16 %v13934_v13, %v13935_v57  ;;  %v8560_v57 = vunpack.i.h.bf16 %v12958_v24 }
 0xccb   : > { %v5865_v53 = vpop.f32.mrf.mxu1 }
 0xccc   : > { %v8641_v55 = vpack.i.bf16 %v5865_v53, %v5862_v61  ;;  %8637 = vrot.lane.b32.xlu1 %v8636_v16, %s9399_s10 }
 0xcce   : > { %8642 = vrot.lane.b32.xlu0 %v8641_v55, %s9399_s10 }
 0xcd0   : > { %8652 = vrot.lane.b32.xlu1 %v13915_v23, %s9397_s28  ;;  %v13939_v23 = vpack.i.bf16 %v13937_v30, %v13938_v2  ;;  %v13948_v30 = vld [vmem:[#allocation57_spill] sm:$0xff] }
 0xcd2   : > { %8647 = vrot.lane.b32.xlu0 %v13918_v21, %s9397_s28  ;;  %v13942_v21 = vpack.i.bf16 %v13940_v17, %v13941_v47 }
 0xcf1   : > { %v8334_v34 = vpop.f32.mrf.mxu0 }
 0xcf3   : > { %v5935_v11 = vpop.f32.mrf.mxu0 }
 0xcf5   : > { %v8335_v36 = vpop.f32.mrf.mxu0 }
 0xcf6   : > { %v8656_v45 = vpack.i.bf16 %v8335_v36, %v8334_v34  ;;  %v8535_v34 = vunpack.i.h.bf16 %v12914_v40  ;;  %v8534_v36 = vunpack.i.l.bf16 %v12914_v40 }
 0xcf7   : > { %v5938_v12 = vpop.f32.mrf.mxu0 }
 0xcf8   : > { %v8661_v46 = vpack.i.bf16 %v5938_v12, %v5935_v11  ;;  %8657 = vrot.lane.b32.xlu1 %v8656_v45, %s9399_s10  ;;  %v13052_v11 = vpop.permute.xlu1 %8612  ;;  %v8545_v45 = vunpack.i.h.bf16 %v12919_v5  ;;  %v8544_v12 = vunpack.i.l.bf16 %v12919_v5  ;;  %v6531_v60 = vsel %vm1295_vm1, %v13943_v42, %v8535_v34  ;;  %v13950_v34 = vld [vmem:[#allocation64_spill] sm:$0xff] }
 0xcf9   : > { %v8338_v18 = vpop.f32.mrf.mxu0  ;;  %v6530_v40 = vsel %vm1295_vm1, %v13944_v15, %v8534_v36 }
 0xcfa   : > { %8662 = vrot.lane.b32.xlu0 %v8661_v46, %s9399_s10  ;;  %v13057_v46 = vpop.permute.xlu0 %8607 }
 0xcfb   : > { %v5951_v4 = vpop.f32.mrf.mxu0 }
 0xcfc   : > { %8672 = vrot.lane.b32.xlu1 %v13921_v29, %s9398_s26  ;;  %v8540_v29 = vunpack.i.h.bf16 %v12950_v39 }
 0xcfd   : > { %v8339_v14 = vpop.f32.mrf.mxu0 }
 0xcfe   : > { %v8676_v51 = vpack.i.bf16 %v8339_v14, %v8338_v18  ;;  %8667 = vrot.lane.b32.xlu0 %v13924_v49, %s9398_s26  ;;  %v8530_v18 = vunpack.i.h.bf16 %v12947_v9  ;;  %v8539_v14 = vunpack.i.l.bf16 %v12950_v39  ;;  %v6563_v49 = vsel %vm6560_vm3, %v6530_v40, %v8544_v12 }
 0xcff   : > { %v5954_v54 = vpop.f32.mrf.mxu0 }
 0xd00   : > { %v8681_v52 = vpack.i.bf16 %v5954_v54, %v5951_v4  ;;  %8677 = vrot.lane.b32.xlu1 %v8676_v51, %s9399_s10  ;;  %v8529_v4 = vunpack.i.l.bf16 %v12947_v9  ;;  %v6564_v54 = vsel %vm6560_vm3, %v6531_v60, %v8545_v45  ;;  %v13945_v9 = vld [vmem:[#allocation63_spill] sm:$0xff] }
 0xd01   : > { %v8350_v50 = vpop.f32.mrf.mxu1 }
 0xd02   : > { %8682 = vrot.lane.b32.xlu0 %v8681_v52, %s9399_s10 }
 0xd03   : > { %v6024_v56 = vpop.f32.mrf.mxu1 }
 0xd04   : > { %8692 = vrot.lane.b32.xlu1 %v13927_v25, %s9397_s28 }
 0xd05   : > { %v8351_v7 = vpop.f32.mrf.mxu1 }
 0xd06   : > { %8687 = vrot.lane.b32.xlu0 %v13930_v35, %s9397_s28  ;;  %v8696_v28 = vpack.i.bf16 %v8351_v7, %v8350_v50  ;;  %v6529_v50 = vsel %vm1295_vm1, %v13945_v9, %v8530_v18 }
 0xd07   : > { %v6027_v44 = vpop.f32.mrf.mxu1  ;;  %v6562_v7 = vsel %vm6560_vm3, %v6529_v50, %v8540_v29 }
 0xd08   : > { %v8701_v38 = vpack.i.bf16 %v6027_v44, %v6024_v56  ;;  %8697 = vrot.lane.b32.xlu1 %v8696_v28, %s9399_s10  ;;  %v13946_v56 = vld [vmem:[#allocation60_spill] sm:$0xff]  ;;  %v8555_v28 = vunpack.i.h.bf16 %v12921_v27  ;;  %v8554_v44 = vunpack.i.l.bf16 %v12921_v27  ;;  %v8559_v27 = vunpack.i.l.bf16 %v12958_v24 }
 0xd09   : > { %v8354_v48 = vpop.f32.mrf.mxu1  ;;  %v6528_v20 = vsel %vm1295_vm1, %v13946_v56, %v8529_v4  ;;  %v13951_v56 = vld [vmem:[#allocation117_spill] sm:$0xff] }
 0xd0a   : > { %8702 = vrot.lane.b32.xlu0 %v8701_v38, %s9399_s10  ;;  %v6561_v25 = vsel %vm6560_vm3, %v6528_v20, %v8539_v14  ;;  %v13952_v20 = vld [vmem:[#allocation116_spill] sm:$0xff] }
 0xd0b   : > { %v6040_v61 = vpop.f32.mrf.mxu1 }
 0xd0c   : > { %8712 = vrot.lane.b32.xlu1 %v13933_v41, %s9398_s26 }
 0xd0d   : > { %v8355_v6 = vpop.f32.mrf.mxu1 }
 0xd0e   : > { %v8716_v16 = vpack.i.bf16 %v8355_v6, %v8354_v48  ;;  %8707 = vrot.lane.b32.xlu0 %v13936_v26, %s9398_s26  ;;  %v8550_v6 = vunpack.i.h.bf16 %v12953_v33 }
 0xd0f   : > { %v6043_v53 = vpop.f32.mrf.mxu1 }
 0xd10   : > { %v8721_v55 = vpack.i.bf16 %v6043_v53, %v6040_v61  ;;  %8717 = vrot.lane.b32.xlu1 %v8716_v16, %s9399_s10  ;;  %v8565_v61 = vunpack.i.h.bf16 %v12923_v58  ;;  %v8549_v16 = vunpack.i.l.bf16 %v12953_v33  ;;  %v13947_v53 = vld [vmem:[#allocation69_spill] sm:$0xff]  ;;  %v6534_v58 = vsel %vm1295_vm1, %v13948_v30, %v8554_v44 }
 0xd11   : > { %v6567_v33 = vsel %vm6560_vm3, %v6534_v58, %v8564_v3 }
 0xd12   : > { %8722 = vrot.lane.b32.xlu0 %v8721_v55, %s9399_s10  ;;  %v6535_v55 = vsel %vm1295_vm1, %v13947_v53, %v8555_v28  ;;  %v6532_v36 = vsel %vm1295_vm1, %v13950_v34, %v8549_v16 }
 0xd13   : > { %v6568_v17 = vsel %vm6560_vm3, %v6535_v55, %v8565_v61  ;;  %v6565_v18 = vsel %vm6560_vm3, %v6532_v36, %v8559_v27 }
 0xd14   : > { %8732 = vrot.lane.b32.xlu1 %v13939_v23, %s9397_s28 }
 0xd16   : > { %8727 = vrot.lane.b32.xlu0 %v13942_v21, %s9397_s28  ;;  %v13949_v21 = vld [vmem:[#allocation70_spill] sm:$0xff] }
 0xd17   : > { %v6533_v24 = vsel %vm1295_vm1, %v13949_v21, %v8550_v6 }
 0xd18   : > { %v6566_v4 = vsel %vm6560_vm3, %v6533_v24, %v8560_v57 }
 0xd36   : > { %v8618_v51 = vpop.permute.xlu1 %8617 }
 0xd37   : > { %v8620_v1 = vunpack.i.h.bf16 %v8618_v51  ;;  %v8619_v5 = vunpack.i.l.bf16 %v8618_v51 }
 0xd38   : > { %v8623_v52 = vpop.permute.xlu0 %8622 }
 0xd39   : > { %v8625_v0 = vunpack.i.h.bf16 %v8623_v52  ;;  %v8624_v39 = vunpack.i.l.bf16 %v8623_v52  ;;  %v6597_v10 = vsel %vm6593_vm4, %v6564_v54, %v8620_v1  ;;  %v6596_v22 = vsel %vm6593_vm4, %v6563_v49, %v8619_v5 }
 0xd3a   : > { %v13077_v35 = vpop.permute.xlu1 %8632  ;;  %v6627_v13 = vpack.c.bf16 %v6597_v10, %v6596_v22  ;;  %v13955_v10 = vld [vmem:[#allocation40_spill] sm:$0xff] }
 0xd3b   : > { %v6594_v38 = vsel %vm6593_vm4, %v6561_v25, %v8624_v39  ;;  %v6595_v48 = vsel %vm6593_vm4, %v6562_v7, %v8625_v0  ;;  %v13953_v0 = vpack.i.bf16 %v13951_v56, %v13952_v20  ;;  %v13954_v7 = vld [vmem:[#allocation47_spill] sm:$0xff] }
 0xd3c   : > { %v6626_v8 = vpack.c.bf16 %v6595_v48, %v6594_v38  ;;  %v13085_v41 = vpop.permute.xlu0 %8627  ;;  %v13956_v22 = vpack.i.bf16 %v13954_v7, %v13955_v10 }
 0xd3e   : > { %v8638_v26 = vpop.permute.xlu1 %8637  ;;  %8376 = vmatprep.mubr.msk.bf16.mxu1 %vm467_vm0, %v6626_v8 }
 0xd3f   : > { %v8640_v2 = vunpack.i.h.bf16 %v8638_v26  ;;  %v8639_v23 = vunpack.i.l.bf16 %v8638_v26  ;;  %8377 = vmatmul.mubr.msk.bf16.vlgmr.msra.gmra.mxu1 %vm467_vm0, %v6627_v13 }
 0xd40   : > { %v8643_v47 = vpop.permute.xlu0 %8642 }
 0xd41   : > { %v8645_v45 = vunpack.i.h.bf16 %v8643_v47  ;;  %v8644_v12 = vunpack.i.l.bf16 %v8643_v47  ;;  %v6601_v42 = vsel %vm6593_vm4, %v6568_v17, %v8640_v2  ;;  %v6600_v60 = vsel %vm6593_vm4, %v6567_v33, %v8639_v23 }
 0xd42   : > { %v6629_v15 = vpack.c.bf16 %v6601_v42, %v6600_v60  ;;  %v13123_v38 = vpop.permute.xlu1 %8652  ;;  %v8635_v42 = vunpack.i.h.bf16 %v13077_v35  ;;  %v8634_v60 = vunpack.i.l.bf16 %v13077_v35 }
 0xd43   : > { %v6598_v29 = vsel %vm6593_vm4, %v6565_v18, %v8644_v12  ;;  %v6599_v14 = vsel %vm6593_vm4, %v6566_v4, %v8645_v45  ;;  %v8615_v18 = vunpack.i.h.bf16 %v13052_v11  ;;  %v8609_v4 = vunpack.i.l.bf16 %v13057_v46 }
 0xd44   : > { %v6628_v51 = vpack.c.bf16 %v6599_v14, %v6598_v29  ;;  %v13125_v48 = vpop.permute.xlu0 %8647  ;;  %v8655_v7 = vunpack.i.h.bf16 %v13123_v38 }
 0xd46   : > { %8380 = vmatprep.mubr.msk.bf16.mxu1 %vm467_vm0, %v6628_v51 }
 0xd47   : > { %8381 = vmatmul.mubr.msk.bf16.gmra.mxu1 %vm467_vm0, %v6629_v15  ;;  %v8366_v40 = vpop.f32.mrf.mxu0 }
 0xd49   : > { %v6113_v1 = vpop.f32.mrf.mxu0 }
 0xd4b   : > { %v8367_v5 = vpop.f32.mrf.mxu0 }
 0xd4c   : > { %v8736_v49 = vpack.i.bf16 %v8367_v5, %v8366_v40  ;;  %v13958_v40 = vld [vmem:[#allocation59_spill] sm:$0xff]  ;;  %v13960_v5 = vld [vmem:[#allocation56_spill] sm:$0xff] }
 0xd4d   : > { %v6116_v54 = vpop.f32.mrf.mxu0 }
 0xd4e   : > { %v8741_v52 = vpack.i.bf16 %v6116_v54, %v6113_v1  ;;  %8737 = vrot.lane.b32.xlu1 %v8736_v49, %s9399_s10  ;;  %v13959_v1 = vld [vmem:[#allocation65_spill] sm:$0xff]  ;;  %v6544_v49 = vsel %vm1295_vm1, %v13960_v5, %v8609_v4  ;;  %v13965_v5 = vld [vmem:[#allocation82_spill] sm:$0xff] }
 0xd4f   : > { %v8370_v9 = vpop.f32.mrf.mxu0 }
 0xd50   : > { %8742 = vrot.lane.b32.xlu0 %v8741_v52, %s9399_s10 }
 0xd51   : > { %v6129_v50 = vpop.f32.mrf.mxu0 }
 0xd52   : > { %8752 = vrot.lane.b32.xlu1 %v13953_v0, %s9398_s26 }
 0xd53   : > { %v8371_v39 = vpop.f32.mrf.mxu0 }
 0xd54   : > { %v8761_v25 = vpack.i.bf16 %v8371_v39, %v8370_v9  ;;  %8747 = vrot.lane.b32.xlu0 %v13956_v22, %s9398_s26 }
 0xd55   : > { %v6132_v28 = vpop.f32.mrf.mxu0 }
 0xd56   : > { %v8756_v44 = vpack.i.bf16 %v6132_v28, %v6129_v50  ;;  %8762 = vrot.lane.b32.xlu1 %v8761_v25, %s9399_s10  ;;  %v8654_v28 = vunpack.i.l.bf16 %v13123_v38 }
 0xd58   : > { %8757 = vrot.lane.b32.xlu0 %v8756_v44, %s9399_s10  ;;  %v8650_v44 = vunpack.i.h.bf16 %v13125_v48 }
 0xd6a   : > { %v8658_v61 = vpop.permute.xlu1 %8657 }
 0xd6b   : > { %v8660_v3 = vunpack.i.h.bf16 %v8658_v61  ;;  %v8659_v8 = vunpack.i.l.bf16 %v8658_v61  ;;  %v8649_v61 = vunpack.i.l.bf16 %v13125_v48 }
 0xd6c   : > { %v8663_v6 = vpop.permute.xlu0 %8662 }
 0xd6d   : > { %v6605_v16 = vsel %vm6593_vm4, %v12933_v62, %v8660_v3  ;;  %v6604_v13 = vsel %vm6593_vm4, %v12930_v19, %v8659_v8  ;;  %v8665_v57 = vunpack.i.h.bf16 %v8663_v6  ;;  %v8664_v27 = vunpack.i.l.bf16 %v8663_v6 }
 0xd6e   : > { %v6631_v26 = vpack.c.bf16 %v6605_v16, %v6604_v13  ;;  %v13131_v53 = vpop.permute.xlu1 %8672 }
 0xd6f   : > { %v6602_v55 = vsel %vm6593_vm4, %v12970_v63, %v8664_v27  ;;  %v6603_v30 = vsel %vm6593_vm4, %v12973_v32, %v8665_v57  ;;  %v8675_v6 = vunpack.i.h.bf16 %v13131_v53  ;;  %v8674_v16 = vunpack.i.l.bf16 %v13131_v53 }
 0xd70   : > { %v6630_v58 = vpack.c.bf16 %v6603_v30, %v6602_v55  ;;  %v13137_v2 = vpop.permute.xlu0 %8667  ;;  %v13961_v30 = vld [vmem:[#allocation67_spill] sm:$0xff] }
 0xd71   : > { %v8670_v57 = vunpack.i.h.bf16 %v13137_v2  ;;  %v8669_v27 = vunpack.i.l.bf16 %v13137_v2  ;;  %v6551_v48 = vsel %vm1295_vm1, %v13961_v30, %v8655_v7 }
 0xd72   : > { %v8678_v23 = vpop.permute.xlu1 %8677  ;;  %8384 = vmatprep.mubr.msk.bf16.mxu1 %vm467_vm0, %v6630_v58  ;;  %v13962_v58 = vld [vmem:[#allocation62_spill] sm:$0xff] }
 0xd73   : > { %v8680_v62 = vunpack.i.h.bf16 %v8678_v23  ;;  %v8679_v33 = vunpack.i.l.bf16 %v8678_v23  ;;  %8385 = vmatmul.mubr.msk.bf16.gmra.mxu1 %vm467_vm0, %v6631_v26  ;;  %v6550_v23 = vsel %vm1295_vm1, %v13962_v58, %v8654_v28 }
 0xd74   : > { %v8683_v19 = vpop.permute.xlu0 %8682 }
 0xd75   : > { %v6609_v17 = vsel %vm6593_vm4, %v12943_v31, %v8680_v62  ;;  %v6608_v63 = vsel %vm6593_vm4, %v12940_v59, %v8679_v33  ;;  %v8685_v47 = vunpack.i.h.bf16 %v8683_v19  ;;  %v8684_v21 = vunpack.i.l.bf16 %v8683_v19  ;;  %v13963_v62 = vld [vmem:[#allocation72_spill] sm:$0xff]  ;;  %v13964_v33 = vld [vmem:[#allocation66_spill] sm:$0xff] }
 0xd76   : > { %v6633_v32 = vpack.c.bf16 %v6609_v17, %v6608_v63  ;;  %v13145_v24 = vpop.permute.xlu1 %8692  ;;  %v8614_v31 = vunpack.i.l.bf16 %v13052_v11  ;;  %v8610_v59 = vunpack.i.h.bf16 %v13057_v46  ;;  %v13957_v11 = vld [vmem:[#allocation61_spill] sm:$0xff]  ;;  %v6549_v53 = vsel %vm1295_vm1, %v13963_v62, %v8650_v44  ;;  %v13969_v62 = vld [vmem:[#allocation86_spill] sm:$0xff] }
 0xd77   : > { %v6606_v34 = vsel %vm6593_vm4, %v12980_v43, %v8684_v21  ;;  %v6607_v36 = vsel %vm6593_vm4, %v12983_v37, %v8685_v47  ;;  %v8630_v43 = vunpack.i.h.bf16 %v13085_v41  ;;  %v8629_v37 = vunpack.i.l.bf16 %v13085_v41 }
 0xd78   : > { %v6632_v45 = vpack.c.bf16 %v6607_v36, %v6606_v34  ;;  %v13151_v12 = vpop.permute.xlu0 %8687  ;;  %v6547_v15 = vsel %vm1295_vm1, %v13957_v11, %v8615_v18  ;;  %v6546_v46 = vsel %vm1295_vm1, %v13958_v40, %v8614_v31  ;;  %v6545_v35 = vsel %vm1295_vm1, %v13959_v1, %v8610_v59 }
 0xd79   : > { %v6580_v41 = vsel %vm6560_vm3, %v6547_v15, %v8635_v42  ;;  %v6579_v52 = vsel %vm6560_vm3, %v6546_v46, %v8634_v60  ;;  %v6577_v56 = vsel %vm6560_vm3, %v6544_v49, %v8629_v37  ;;  %v6578_v20 = vsel %vm6560_vm3, %v6545_v35, %v8630_v43 }
 0xd7a   : > { %8388 = vmatprep.mubr.msk.bf16.mxu1 %vm467_vm0, %v6632_v45  ;;  %v8698_v29 = vpop.permute.xlu1 %8697  ;;  %v6548_v19 = vsel %vm1295_vm1, %v13964_v33, %v8649_v61  ;;  %v6583_v17 = vsel %vm6560_vm3, %v6550_v23, %v8674_v16  ;;  %v6584_v63 = vsel %vm6560_vm3, %v6551_v48, %v8675_v6  ;;  %v6582_v34 = vsel %vm6560_vm3, %v6549_v53, %v8670_v57  ;;  %v13970_v33 = vld [vmem:[#allocation84_spill] sm:$0xff] }
 0xd7b   : > { %8389 = vmatmul.mubr.msk.bf16.gmra.mxu1 %vm467_vm0, %v6633_v32  ;;  %v8700_v14 = vunpack.i.h.bf16 %v8698_v29  ;;  %v8699_v51 = vunpack.i.l.bf16 %v8698_v29  ;;  %v6581_v32 = vsel %vm6560_vm3, %v6548_v19, %v8669_v27  ;;  %v8695_v60 = vunpack.i.h.bf16 %v13145_v24 }
 0xd7c   : > { %v8703_v54 = vpop.permute.xlu0 %8702  ;;  %v8694_v43 = vunpack.i.l.bf16 %v13145_v24  ;;  %v8690_v37 = vunpack.i.h.bf16 %v13151_v12  ;;  %v8689_v29 = vunpack.i.l.bf16 %v13151_v12 }
 0xd7d   : > { %v8705_v9 = vunpack.i.h.bf16 %v8703_v54  ;;  %v8704_v50 = vunpack.i.l.bf16 %v8703_v54  ;;  %v6613_v0 = vsel %vm6593_vm4, %v6580_v41, %v8700_v14  ;;  %v6612_v39 = vsel %vm6593_vm4, %v6579_v52, %v8699_v51  ;;  %v13966_v54 = vld [vmem:[#allocation80_spill] sm:$0xff]  ;;  %v13967_v52 = vld [vmem:[#allocation83_spill] sm:$0xff] }
 0xd7e   : > { %v8713_v25 = vpop.permute.xlu1 %8712  ;;  %v6635_v13 = vpack.c.bf16 %v6613_v0, %v6612_v39  ;;  %v6555_v49 = vsel %vm1295_vm1, %v13965_v5, %v8695_v60  ;;  %v6554_v41 = vsel %vm1295_vm1, %v13966_v54, %v8694_v43  ;;  %v6553_v24 = vsel %vm1295_vm1, %v13967_v52, %v8690_v37  ;;  %v13974_v5 = vld [vmem:[#allocation2_spill] sm:$0xff] }
 0xd7f   : > { %v6610_v10 = vsel %vm6593_vm4, %v6577_v56, %v8704_v50  ;;  %v6611_v22 = vsel %vm6593_vm4, %v6578_v20, %v8705_v9  ;;  %v8715_v51 = vunpack.i.h.bf16 %v8713_v25  ;;  %v8714_v11 = vunpack.i.l.bf16 %v8713_v25  ;;  %v13968_v9 = vld [vmem:[#allocation81_spill] sm:$0xff] }
 0xd80   : > { %v6634_v3 = vpack.c.bf16 %v6611_v22, %v6610_v10  ;;  %v8708_v8 = vpop.permute.xlu0 %8707  ;;  %v6552_v12 = vsel %vm1295_vm1, %v13968_v9, %v8689_v29  ;;  %v13250_v29 = vld [vmem:[%s13410_s8] ss:$0 sm:$0xff] }
 0xd81   : > { %v8710_v15 = vunpack.i.h.bf16 %v8708_v8  ;;  %v8709_v40 = vunpack.i.l.bf16 %v8708_v8  ;;  %v6588_v56 = vsel %vm6560_vm3, %v6555_v49, %v8715_v51  ;;  %v6587_v20 = vsel %vm6560_vm3, %v6554_v41, %v8714_v11 }
 0xd82   : > { %v8718_v26 = vpop.permute.xlu1 %8717  ;;  %8392 = vmatprep.mubr.msk.bf16.mxu1 %vm467_vm0, %v6634_v3 }
 0xd83   : > { %v8720_v55 = vunpack.i.h.bf16 %v8718_v26  ;;  %v8719_v38 = vunpack.i.l.bf16 %v8718_v26  ;;  %8393 = vmatmul.mubr.msk.bf16.gmra.mxu1 %vm467_vm0, %v6635_v13  ;;  %v6585_v25 = vsel %vm6560_vm3, %v6552_v12, %v8709_v40  ;;  %v6586_v7 = vsel %vm6560_vm3, %v6553_v24, %v8710_v15  ;;  %v13973_v15 = vld [vmem:[#allocation3_spill] sm:$0xff]  ;;  %v13975_v24 = vld [vmem:[#allocation5_spill] sm:$0xff] }
 0xd84   : > { %v8723_v2 = vpop.permute.xlu0 %8722 }
 0xd85   : > { %v8725_v47 = vunpack.i.h.bf16 %v8723_v2  ;;  %v8724_v21 = vunpack.i.l.bf16 %v8723_v2  ;;  %v6617_v36 = vsel %vm6593_vm4, %v6584_v63, %v8720_v55  ;;  %v6616_v45 = vsel %vm6593_vm4, %v6583_v17, %v8719_v38  ;;  %v13971_v2 = vld [vmem:[#allocation87_spill] sm:$0xff]  ;;  %v13972_v63 = vld [vmem:[#allocation85_spill] sm:$0xff] }
 0xd86   : > { %v6637_v4 = vpack.c.bf16 %v6617_v36, %v6616_v45  ;;  %v8733_v42 = vpop.permute.xlu1 %8732 }
 0xd87   : > { %v6614_v18 = vsel %vm6593_vm4, %v6581_v32, %v8724_v21  ;;  %v6615_v31 = vsel %vm6593_vm4, %v6582_v34, %v8725_v47  ;;  %v8735_v44 = vunpack.i.h.bf16 %v8733_v42  ;;  %v8734_v8 = vunpack.i.l.bf16 %v8733_v42 }
 0xd88   : > { %v6636_v59 = vpack.c.bf16 %v6615_v31, %v6614_v18  ;;  %v8728_v14 = vpop.permute.xlu0 %8727 }
 0xd89   : > { %v8730_v6 = vunpack.i.h.bf16 %v8728_v14  ;;  %v8729_v16 = vunpack.i.l.bf16 %v8728_v14  ;;  %v6559_v53 = vsel %vm1295_vm1, %v13969_v62, %v8735_v44  ;;  %v6558_v19 = vsel %vm1295_vm1, %v13970_v33, %v8734_v8 }
 0xd8a   : > { %8396 = vmatprep.mubr.msk.bf16.mxu1 %vm467_vm0, %v6636_v59 }
 0xd8b   : > { %8397 = vmatmul.mubr.msk.bf16.gmra.mxu1 %vm467_vm0, %v6637_v4  ;;  %v6557_v17 = vsel %vm1295_vm1, %v13971_v2, %v8730_v6  ;;  %v6556_v47 = vsel %vm1295_vm1, %v13972_v63, %v8729_v16  ;;  %v13982_v63 = vld [vmem:[#allocation10_spill] sm:$0xff] }
 0xdc0   : > { %v8738_v46 = vpop.permute.xlu1 %8737 }
 0xdc1   : > { %v8740_v1 = vunpack.i.h.bf16 %v8738_v46  ;;  %v8739_v35 = vunpack.i.l.bf16 %v8738_v46 }
 0xdc2   : > { %v8743_v50 = vpop.permute.xlu0 %8742 }
 0xdc3   : > { %v8745_v0 = vunpack.i.h.bf16 %v8743_v50  ;;  %v8744_v39 = vunpack.i.l.bf16 %v8743_v50  ;;  %v6621_v10 = vsel %vm6593_vm4, %v6588_v56, %v8740_v1  ;;  %v6620_v22 = vsel %vm6593_vm4, %v6587_v20, %v8739_v35  ;;  %v13976_v20 = vld [vmem:[#allocation4_spill] sm:$0xff] }
 0xdc4   : > { %v8753_v28 = vpop.permute.xlu1 %8752  ;;  %v6639_v27 = vpack.c.bf16 %v6621_v10, %v6620_v22  ;;  %v13977_v10 = vld [vmem:[#allocation8_spill] sm:$0xff] }
 0xdc5   : > { %v6618_v61 = vsel %vm6593_vm4, %v6585_v25, %v8744_v39  ;;  %v6619_v3 = vsel %vm6593_vm4, %v6586_v7, %v8745_v0  ;;  %v8755_v26 = vunpack.i.h.bf16 %v8753_v28  ;;  %v8754_v55 = vunpack.i.l.bf16 %v8753_v28 }
 0xdc6   : > { %v6638_v13 = vpack.c.bf16 %v6619_v3, %v6618_v61  ;;  %v8748_v57 = vpop.permute.xlu0 %8747  ;;  %v13978_v3 = vld [vmem:[#allocation6_spill] sm:$0xff] }
 0xdc7   : > { %v8750_v38 = vunpack.i.h.bf16 %v8748_v57  ;;  %v8749_v30 = vunpack.i.l.bf16 %v8748_v57  ;;  %v6592_v32 = vsel %vm6560_vm3, %v6559_v53, %v8755_v26  ;;  %v6591_v34 = vsel %vm6560_vm3, %v6558_v19, %v8754_v55  ;;  %v13979_v57 = vld [vmem:[#allocation9_spill] sm:$0xff]  ;;  %v13981_v53 = vld [vmem:[#allocation12_spill] sm:$0xff] }
 0xdc8   : > { %v8763_v48 = vpop.permute.xlu1 %8762  ;;  %8400 = vmatprep.mubr.msk.bf16.mxu1 %vm467_vm0, %v6638_v13 }
 0xdc9   : > { %v8765_v58 = vunpack.i.h.bf16 %v8763_v48  ;;  %v8764_v23 = vunpack.i.l.bf16 %v8763_v48  ;;  %8401 = vmatmul.mubr.msk.bf16.gmra.mxu1 %vm467_vm0, %v6639_v27  ;;  %v6589_v18 = vsel %vm6560_vm3, %v6556_v47, %v8749_v30  ;;  %v6590_v31 = vsel %vm6560_vm3, %v6557_v17, %v8750_v38  ;;  %v13980_v38 = vld [vmem:[#allocation7_spill] sm:$0xff] }
 0xdca   : > { %v8758_v21 = vpop.permute.xlu0 %8757 }
 0xdcb   : > { %v8760_v36 = vunpack.i.h.bf16 %v8758_v21  ;;  %v8759_v45 = vunpack.i.l.bf16 %v8758_v21  ;;  %v6625_v59 = vsel %vm6593_vm4, %v6592_v32, %v8765_v58  ;;  %v6624_v4 = vsel %vm6593_vm4, %v6591_v34, %v8764_v23 }
 0xdcc   : > { %v6641_v37 = vpack.c.bf16 %v6625_v59, %v6624_v4  ;;  %v13984_v4 = vld [vmem:[#allocation11_spill] sm:$0xff] }
 0xdcd   : > { %v6622_v42 = vsel %vm6593_vm4, %v6589_v18, %v8759_v45  ;;  %v6623_v60 = vsel %vm6593_vm4, %v6590_v31, %v8760_v36  ;;  %v13983_v36 = vld [vmem:[#allocation13_spill] sm:$0xff] }
 0xdce   : > { %v6640_v43 = vpack.c.bf16 %v6623_v60, %v6622_v42 }
 0xdd0   : > { %8404 = vmatprep.mubr.msk.bf16.mxu1 %vm467_vm0, %v6640_v43 }
 0xdd1   : > { %8405 = vmatmul.mubr.msk.bf16.gmra.mxu1 %vm467_vm0, %v6641_v37 }
 0xdff   : > { %v8378_v14 = vpop.f32.mrf.mxu1 }
 0xe00   : > { %v6756_v51 = vadd.f32 %v8378_v14, %v13250_v29  ;;  %v13985_v14 = vld [vmem:[#allocation16_spill] sm:$0xff] }
 0xe01   : > { %v6747_v11 = vpop.f32.mrf.mxu1 }
 0xe02   : > { %v6876_v40 = vadd.f32 %v13973_v15, %v6756_v51  ;;  %v6748_v46 = vadd.f32 %v13250_v29, %v6747_v11 }
 0xe03   : > { %v8379_v1 = vpop.f32.mrf.mxu1 }
 0xe04   : > { %v7423_v35 = vpack.c.bf16 %v6876_v40, %v6876_v40  ;;  %v6874_v49 = vadd.f32 %v13974_v5, %v6748_v46  ;;  %v6759_v54 = vadd.f32 %v8379_v1, %v13250_v29  ;;  %v13986_v46 = vld [vmem:[#allocation14_spill] sm:$0xff] }
 0xe05   : > { %v6750_v41 = vpop.f32.mrf.mxu1 }
 0xe06   : > { %7037 = vst.msk [vmem:[%s13260_s24 + $0x8] sm:$0xf] %vm7034_vm5, %v7423_v35  ;;  %v7421_v52 = vpack.c.bf16 %v6874_v49, %v6874_v49  ;;  %v6877_v9 = vadd.f32 %v13975_v24, %v6759_v54  ;;  %v6751_v12 = vadd.f32 %v13250_v29, %v6750_v41  ;;  %v13987_v54 = vld [vmem:[#allocation17_spill] sm:$0xff] }
 0xe07   : > { %v8382_v50 = vpop.f32.mrf.mxu1 }
 0xe08   : > { %7035 = vst.msk [vmem:[%s13260_s24] sm:$0xf] %vm7034_vm5, %v7421_v52  ;;  %v7424_v56 = vpack.c.bf16 %v6877_v9, %v6877_v9  ;;  %v6875_v0 = vadd.f32 %v13976_v20, %v6751_v12  ;;  %v6772_v39 = vadd.f32 %v8382_v50, %v13250_v29  ;;  %v13988_v9 = vld [vmem:[#allocation15_spill] sm:$0xff] }
 0xe09   : > { %v6763_v25 = vpop.f32.mrf.mxu1 }
 0xe0a   : > { %7038 = vst.msk [vmem:[%s13260_s24 + $0xc] sm:$0xf] %vm7034_vm5, %v7424_v56  ;;  %v7422_v7 = vpack.c.bf16 %v6875_v0, %v6875_v0  ;;  %v6880_v22 = vadd.f32 %v13977_v10, %v6772_v39  ;;  %v6764_v28 = vadd.f32 %v13250_v29, %v6763_v25  ;;  %v13989_v39 = vld [vmem:[#allocation20_spill] sm:$0xff] }
 0xe0b   : > { %v8383_v44 = vpop.f32.mrf.mxu1 }
 0xe0c   : > { %7036 = vst.msk [vmem:[%s13260_s24 + $0x4] sm:$0xf] %vm7034_vm5, %v7422_v7  ;;  %v7427_v61 = vpack.c.bf16 %v6880_v22, %v6880_v22  ;;  %v6878_v8 = vadd.f32 %v13978_v3, %v6764_v28  ;;  %v6775_v6 = vadd.f32 %v8383_v44, %v13250_v29  ;;  %v13990_v28 = vld [vmem:[#allocation18_spill] sm:$0xff] }
 0xe0d   : > { %v6766_v16 = vpop.f32.mrf.mxu1 }
 0xe0e   : > { %7041 = vst.msk [vmem:[%s13260_s24 + $0x18] sm:$0xf] %vm7034_vm5, %v7427_v61  ;;  %v7425_v13 = vpack.c.bf16 %v6878_v8, %v6878_v8  ;;  %v6881_v27 = vadd.f32 %v13979_v57, %v6775_v6  ;;  %v6767_v26 = vadd.f32 %v13250_v29, %v6766_v16  ;;  %v13991_v6 = vld [vmem:[#allocation21_spill] sm:$0xff] }
 0xe10   : > { %7039 = vst.msk [vmem:[%s13260_s24 + $0x10] sm:$0xf] %vm7034_vm5, %v7425_v13  ;;  %v7428_v55 = vpack.c.bf16 %v6881_v27, %v6881_v27  ;;  %v6879_v30 = vadd.f32 %v13980_v38, %v6767_v26  ;;  %v13992_v26 = vld [vmem:[#allocation19_spill] sm:$0xff] }
 0xe12   : > { %7042 = vst.msk [vmem:[%s13260_s24 + $0x1c] sm:$0xf] %vm7034_vm5, %v7428_v55  ;;  %v7426_v48 = vpack.c.bf16 %v6879_v30, %v6879_v30 }
 0xe14   : > { %7040 = vst.msk [vmem:[%s13260_s24 + $0x14] sm:$0xf] %vm7034_vm5, %v7426_v48 }
 0xe33   : > { %v8386_v58 = vpop.f32.mrf.mxu1 }
 0xe34   : > { %v6788_v23 = vadd.f32 %v8386_v58, %v13250_v29  ;;  %v13993_v58 = vld [vmem:[#allocation24_spill] sm:$0xff] }
 0xe35   : > { %v6779_v62 = vpop.f32.mrf.mxu1 }
 0xe36   : > { %v6884_v33 = vadd.f32 %v13981_v53, %v6788_v23  ;;  %v6780_v19 = vadd.f32 %v13250_v29, %v6779_v62 }
 0xe37   : > { %v8387_v2 = vpop.f32.mrf.mxu1 }
 0xe38   : > { %v7431_v17 = vpack.c.bf16 %v6884_v33, %v6884_v33  ;;  %v6882_v47 = vadd.f32 %v13982_v63, %v6780_v19  ;;  %v6791_v21 = vadd.f32 %v8387_v2, %v13250_v29  ;;  %v13994_v19 = vld [vmem:[#allocation22_spill] sm:$0xff] }
 0xe39   : > { %v6782_v32 = vpop.f32.mrf.mxu1 }
 0xe3a   : > { %7045 = vst.msk [vmem:[%s13260_s24 + $0x28] sm:$0xf] %vm7034_vm5, %v7431_v17  ;;  %v7429_v34 = vpack.c.bf16 %v6882_v47, %v6882_v47  ;;  %v6885_v45 = vadd.f32 %v13983_v36, %v6791_v21  ;;  %v6783_v18 = vadd.f32 %v13250_v29, %v6782_v32  ;;  %v13995_v21 = vld [vmem:[#allocation25_spill] sm:$0xff] }
 0xe3b   : > { %v8390_v31 = vpop.f32.mrf.mxu1 }
 0xe3c   : > { %7043 = vst.msk [vmem:[%s13260_s24 + $0x20] sm:$0xf] %vm7034_vm5, %v7429_v34  ;;  %v7432_v59 = vpack.c.bf16 %v6885_v45, %v6885_v45  ;;  %v6883_v42 = vadd.f32 %v13984_v4, %v6783_v18  ;;  %v6804_v60 = vadd.f32 %v8390_v31, %v13250_v29  ;;  %v13996_v45 = vld [vmem:[#allocation23_spill] sm:$0xff] }
 0xe3d   : > { %v6795_v43 = vpop.f32.mrf.mxu1 }
 0xe3e   : > { %7046 = vst.msk [vmem:[%s13260_s24 + $0x2c] sm:$0xf] %vm7034_vm5, %v7432_v59  ;;  %v7430_v37 = vpack.c.bf16 %v6883_v42, %v6883_v42  ;;  %v6888_v51 = vadd.f32 %v13985_v14, %v6804_v60  ;;  %v6796_v11 = vadd.f32 %v13250_v29, %v6795_v43  ;;  %v13997_v60 = vld [vmem:[#allocation28_spill] sm:$0xff] }
 0xe3f   : > { %v8391_v15 = vpop.f32.mrf.mxu1 }
 0xe40   : > { %7044 = vst.msk [vmem:[%s13260_s24 + $0x24] sm:$0xf] %vm7034_vm5, %v7430_v37  ;;  %v7435_v40 = vpack.c.bf16 %v6888_v51, %v6888_v51  ;;  %v6886_v1 = vadd.f32 %v13986_v46, %v6796_v11  ;;  %v6807_v35 = vadd.f32 %v8391_v15, %v13250_v29  ;;  %v13998_v11 = vld [vmem:[#allocation26_spill] sm:$0xff] }
 0xe41   : > { %v6798_v5 = vpop.f32.mrf.mxu1 }
 0xe42   : > { %7049 = vst.msk [vmem:[%s13260_s24 + $0x38] sm:$0xf] %vm7034_vm5, %v7435_v40  ;;  %v7433_v49 = vpack.c.bf16 %v6886_v1, %v6886_v1  ;;  %v6889_v41 = vadd.f32 %v13987_v54, %v6807_v35  ;;  %v6799_v52 = vadd.f32 %v13250_v29, %v6798_v5  ;;  %v13999_v35 = vld [vmem:[#allocation29_spill] sm:$0xff] }
 0xe43   : > { %v8394_v50 = vpop.f32.mrf.mxu1 }
 0xe44   : > { %7047 = vst.msk [vmem:[%s13260_s24 + $0x30] sm:$0xf] %vm7034_vm5, %v7433_v49  ;;  %v7436_v24 = vpack.c.bf16 %v6889_v41, %v6889_v41  ;;  %v6887_v12 = vadd.f32 %v13988_v9, %v6799_v52  ;;  %v6820_v56 = vadd.f32 %v8394_v50, %v13250_v29  ;;  %v14000_v52 = vld [vmem:[#allocation27_spill] sm:$0xff] }
 0xe45   : > { %v6811_v0 = vpop.f32.mrf.mxu1 }
 0xe46   : > { %7050 = vst.msk [vmem:[%s13260_s24 + $0x3c] sm:$0xf] %vm7034_vm5, %v7436_v24  ;;  %v7434_v20 = vpack.c.bf16 %v6887_v12, %v6887_v12  ;;  %v6892_v25 = vadd.f32 %v13989_v39, %v6820_v56  ;;  %v6812_v7 = vadd.f32 %v13250_v29, %v6811_v0  ;;  %v14001_v56 = vld [vmem:[#allocation32_spill] sm:$0xff] }
 0xe47   : > { %v8395_v10 = vpop.f32.mrf.mxu1 }
 0xe48   : > { %7048 = vst.msk [vmem:[%s13260_s24 + $0x34] sm:$0xf] %vm7034_vm5, %v7434_v20  ;;  %v7439_v22 = vpack.c.bf16 %v6892_v25, %v6892_v25  ;;  %v6890_v44 = vadd.f32 %v13990_v28, %v6812_v7  ;;  %v6823_v61 = vadd.f32 %v8395_v10, %v13250_v29  ;;  %v14002_v7 = vld [vmem:[#allocation30_spill] sm:$0xff] }
 0xe49   : > { %v6814_v3 = vpop.f32.mrf.mxu1 }
 0xe4a   : > { %7053 = vst.msk [vmem:[%s13260_s24 + $0x48] sm:$0xf] %vm7034_vm5, %v7439_v22  ;;  %v7437_v8 = vpack.c.bf16 %v6890_v44, %v6890_v44  ;;  %v6893_v16 = vadd.f32 %v13991_v6, %v6823_v61  ;;  %v6815_v13 = vadd.f32 %v13250_v29, %v6814_v3  ;;  %v14003_v61 = vld [vmem:[#allocation33_spill] sm:$0xff] }
 0xe4b   : > { %v8398_v57 = vpop.f32.mrf.mxu1 }
 0xe4c   : > { %7051 = vst.msk [vmem:[%s13260_s24 + $0x40] sm:$0xf] %vm7034_vm5, %v7437_v8  ;;  %v7440_v27 = vpack.c.bf16 %v6893_v16, %v6893_v16  ;;  %v6891_v55 = vadd.f32 %v13992_v26, %v6815_v13  ;;  %v6836_v38 = vadd.f32 %v8398_v57, %v13250_v29  ;;  %v14004_v16 = vld [vmem:[#allocation31_spill] sm:$0xff] }
 0xe4d   : > { %v6827_v30 = vpop.f32.mrf.mxu1 }
 0xe4e   : > { %7054 = vst.msk [vmem:[%s13260_s24 + $0x4c] sm:$0xf] %vm7034_vm5, %v7440_v27  ;;  %v7438_v48 = vpack.c.bf16 %v6891_v55, %v6891_v55  ;;  %v6896_v23 = vadd.f32 %v13993_v58, %v6836_v38  ;;  %v6828_v62 = vadd.f32 %v13250_v29, %v6827_v30 }
 0xe4f   : > { %v8399_v53 = vpop.f32.mrf.mxu1 }
 0xe50   : > { %7052 = vst.msk [vmem:[%s13260_s24 + $0x44] sm:$0xf] %vm7034_vm5, %v7438_v48  ;;  %v7443_v33 = vpack.c.bf16 %v6896_v23, %v6896_v23  ;;  %v6894_v2 = vadd.f32 %v13994_v19, %v6828_v62  ;;  %v6839_v17 = vadd.f32 %v8399_v53, %v13250_v29 }
 0xe51   : > { %v6830_v63 = vpop.f32.mrf.mxu1 }
 0xe52   : > { %7057 = vst.msk [vmem:[%s13260_s24 + $0x58] sm:$0xf] %vm7034_vm5, %v7443_v33  ;;  %v7441_v47 = vpack.c.bf16 %v6894_v2, %v6894_v2  ;;  %v6897_v32 = vadd.f32 %v13995_v21, %v6839_v17  ;;  %v6831_v34 = vadd.f32 %v13250_v29, %v6830_v63 }
 0xe54   : > { %7055 = vst.msk [vmem:[%s13260_s24 + $0x50] sm:$0xf] %vm7034_vm5, %v7441_v47  ;;  %v7444_v36 = vpack.c.bf16 %v6897_v32, %v6897_v32  ;;  %v6895_v18 = vadd.f32 %v13996_v45, %v6831_v34 }
 0xe56   : > { %7058 = vst.msk [vmem:[%s13260_s24 + $0x5c] sm:$0xf] %vm7034_vm5, %v7444_v36  ;;  %v7442_v31 = vpack.c.bf16 %v6895_v18, %v6895_v18 }
 0xe58   : > { %7056 = vst.msk [vmem:[%s13260_s24 + $0x54] sm:$0xf] %vm7034_vm5, %v7442_v31 }
 0xe89   : > { %v8402_v59 = vpop.f32.mrf.mxu1 }
 0xe8a   : > { %v6852_v4 = vadd.f32 %v8402_v59, %v13250_v29 }
 0xe8b   : > { %v6843_v42 = vpop.f32.mrf.mxu1 }
 0xe8c   : > { %v6900_v43 = vadd.f32 %v13997_v60, %v6852_v4  ;;  %v6844_v37 = vadd.f32 %v13250_v29, %v6843_v42 }
 0xe8d   : > { %v8403_v14 = vpop.f32.mrf.mxu1 }
 0xe8e   : > { %v7447_v51 = vpack.c.bf16 %v6900_v43, %v6900_v43  ;;  %v6898_v15 = vadd.f32 %v13998_v11, %v6844_v37  ;;  %v6855_v40 = vadd.f32 %v8403_v14, %v13250_v29 }
 0xe8f   : > { %v6846_v46 = vpop.f32.mrf.mxu1 }
 0xe90   : > { %7061 = vst.msk [vmem:[%s13260_s24 + $0x68] sm:$0xf] %vm7034_vm5, %v7447_v51  ;;  %v7445_v1 = vpack.c.bf16 %v6898_v15, %v6898_v15  ;;  %v6901_v5 = vadd.f32 %v13999_v35, %v6855_v40  ;;  %v6847_v49 = vadd.f32 %v13250_v29, %v6846_v46 }
 0xe91   : > { %v8406_v54 = vpop.f32.mrf.mxu1 }
 0xe92   : > { %7059 = vst.msk [vmem:[%s13260_s24 + $0x60] sm:$0xf] %vm7034_vm5, %v7445_v1  ;;  %v7448_v41 = vpack.c.bf16 %v6901_v5, %v6901_v5  ;;  %v6899_v24 = vadd.f32 %v14000_v52, %v6847_v49  ;;  %v6868_v9 = vadd.f32 %v8406_v54, %v13250_v29 }
 0xe93   : > { %v6859_v12 = vpop.f32.mrf.mxu1 }
 0xe94   : > { %7062 = vst.msk [vmem:[%s13260_s24 + $0x6c] sm:$0xf] %vm7034_vm5, %v7448_v41  ;;  %v7446_v50 = vpack.c.bf16 %v6899_v24, %v6899_v24  ;;  %v6904_v20 = vadd.f32 %v14001_v56, %v6868_v9  ;;  %v6860_v0 = vadd.f32 %v13250_v29, %v6859_v12 }
 0xe95   : > { %v8407_v39 = vpop.f32.mrf.mxu1 }
 0xe96   : > { %7060 = vst.msk [vmem:[%s13260_s24 + $0x64] sm:$0xf] %vm7034_vm5, %v7446_v50  ;;  %v7451_v25 = vpack.c.bf16 %v6904_v20, %v6904_v20  ;;  %v6902_v10 = vadd.f32 %v14002_v7, %v6860_v0  ;;  %v6871_v22 = vadd.f32 %v8407_v39, %v13250_v29 }
 0xe97   : > { %v6862_v28 = vpop.f32.mrf.mxu1 }
 0xe98   : > { %7065 = vst.msk [vmem:[%s13260_s24 + $0x78] sm:$0xf] %vm7034_vm5, %v7451_v25  ;;  %v7449_v44 = vpack.c.bf16 %v6902_v10, %v6902_v10  ;;  %v6905_v3 = vadd.f32 %v14003_v61, %v6871_v22  ;;  %v6863_v8 = vadd.f32 %v13250_v29, %v6862_v28 }
 0xe9a   : > { %7063 = vst.msk [vmem:[%s13260_s24 + $0x70] sm:$0xf] %vm7034_vm5, %v7449_v44  ;;  %v7452_v6 = vpack.c.bf16 %v6905_v3, %v6905_v3  ;;  %v6903_v13 = vadd.f32 %v14004_v16, %v6863_v8 }
 0xe9c   : > { %7066 = vst.msk [vmem:[%s13260_s24 + $0x7c] sm:$0xf] %vm7034_vm5, %v7452_v6  ;;  %v7450_v57 = vpack.c.bf16 %v6903_v13, %v6903_v13 }
 0xe9e   : > { %7064 = vst.msk [vmem:[%s13260_s24 + $0x74] sm:$0xf] %vm7034_vm5, %v7450_v57 }
 0xe9f PF: > { %s19_s13 = sadd.s32 1, %s9384_s13   ;;  %s14005_s30 = smov %s9376_s11 }
 0xea0   : > { %p16_p7 = scmp.ge.s32.totalorder %s19_s13, 6   ;;  %s14006_s10 = smov %s9380_s12 }
 0xea1   : > { %s14007_s11 = smov %s14010_s14  ;;  %s14008_s12 = smov %s14014_s15 }
 0xea2   :  { %18 = sbr.rel (!%p16_p7) target bundleno = 3 (0x3), region = 92 }

</bundles_post_ra>
